<compile_context>
chip_gen: v5e
topology: v5e:2x2
jax: 0.10.0
libtpu: 0.0.40
codegen_flags: <defaults>
</compile_context>

<pallas_src>
import functools

import jax
import jax.numpy as jnp
from jax.experimental import pallas as pl
from jax.experimental.pallas import tpu as pltpu


# ------------------------------ Pallas kernel -------------------------------

def _pacnet_kernel(x_ref, w1_ref, b1_ref, w2_ref, b2_ref, w3_ref, b3_ref,
                   w4_ref, b4_ref, o_ref, a1p_ref, a2_ref, *,
                   n, oh1, ow1, oh2, ow2, c1, c2):
    """Fused PacNet forward; all operands VMEM-resident, single grid step."""
    f32 = jnp.float32
    m1 = n * oh1 * ow1                      # rows of the conv GEMMs (n*8*8)

    # ---- conv1 (k=3, stride 1, VALID) + bias + ReLU -------------------------
    # out[(n,oh,ow), co] = sum_{ki,kj} x[n, oh+ki, ow+kj, :] @ W1[ki*3+kj]
    acc1 = jnp.zeros((m1, c1), f32)
    for ki in range(3):
        for kj in range(3):
            patch = x_ref[:, ki:ki + oh1, kj:kj + ow1, :].reshape(m1, -1)
            acc1 = acc1 + jnp.dot(patch, w1_ref[ki * 3 + kj],
                                  preferred_element_type=f32)
    a1 = jnp.maximum(acc1 + b1_ref[...], 0.0)                     # (m1, c1)

    # Zero-padded conv1 activation so conv2's shifted windows stay in bounds
    # while keeping the sublane-aligned oh1 x ow1 grid.
    a1p_ref[...] = jnp.zeros_like(a1p_ref)
    a1p_ref[:, 0:oh1, 0:ow1, :] = a1.reshape(n, oh1, ow1, c1)

    # ---- conv2 (k=2) + bias + ReLU ------------------------------------------
    # Computed on the padded oh1 x ow1 grid; only rows with (h<oh2, w<ow2) are
    # real conv2 outputs and fc3 below only ever reads those.
    acc2 = jnp.zeros((m1, c2), f32)
    for ki in range(2):
        for kj in range(2):
            patch = a1p_ref[:, ki:ki + oh1, kj:kj + ow1, :].reshape(m1, c1)
            acc2 = acc2 + jnp.dot(patch, w2_ref[ki * 2 + kj],
                                  preferred_element_type=f32)
    a2_ref[...] = jnp.maximum(acc2 + b2_ref[...],
                              0.0).reshape(n, oh1 * ow1, c2)

    # ---- fc3 + ReLU ----------------------------------------------------------
    # PyTorch flattens conv2's output NCHW; that permutation is folded into
    # w3's row order in prepare_params(), so fc3 is a plain accumulation over
    # the oh2*ow2 valid spatial positions.  w3 is bf16; accumulate in f32.
    acc3 = jnp.zeros((n, b3_ref.shape[-1]), f32)
    for h in range(oh2):
        for w in range(ow2):
            lhs = a2_ref[:, h * ow1 + w, :].astype(w3_ref.dtype)   # (n, c2)
            rhs = w3_ref[pl.ds((h * ow2 + w) * c2, c2), :]         # (c2, fc)
            acc3 = acc3 + jnp.dot(lhs, rhs, preferred_element_type=f32)
    a3 = jnp.maximum(acc3 + b3_ref[...], 0.0)                      # (n, fc)

    # ---- fc4 (Q-values) ------------------------------------------------------
    o_ref[...] = (jnp.dot(a3, w4_ref[...], preferred_element_type=f32)
                  + b4_ref[...]).astype(o_ref.dtype)


# ------------------------------- forward wrapper -----------------------------

def pacnet_forward(x_nchw, prep):
    """Matches PacNet.forward: conv1+ReLU, conv2+ReLU, fc3+ReLU, fc4."""
    n, cin, rows, cols = x_nchw.shape
    oh1, ow1 = rows - 2, cols - 2            # conv1: kernel 3
    oh2, ow2 = rows - 3, cols - 3            # conv2: kernel 2
    c1 = prep["w1"].shape[-1]
    c2 = prep["w2"].shape[-1]
    fc = prep["w3"].shape[-1]
    moves = prep["w4"].shape[-1]

    x_nhwc = jnp.transpose(x_nchw, (0, 2, 3, 1))   # tiny (3 KB) layout glue

    kernel = functools.partial(_pacnet_kernel, n=n, oh1=oh1, ow1=ow1,
                               oh2=oh2, ow2=ow2, c1=c1, c2=c2)
    return pl.pallas_call(
        kernel,
        out_shape=jax.ShapeDtypeStruct((n, moves), jnp.float32),
        grid=(1,),
        # Every block equals the full array, so the (8,128) rule is satisfied
        # and each operand is DMA'd to VMEM exactly once.
        in_specs=[
            pl.BlockSpec((n, rows, cols, cin), lambda i: (0, 0, 0, 0)),  # x
            pl.BlockSpec((9, cin, c1), lambda i: (0, 0, 0)),             # w1
            pl.BlockSpec((1, c1), lambda i: (0, 0)),                     # b1
            pl.BlockSpec((4, c1, c2), lambda i: (0, 0, 0)),              # w2
            pl.BlockSpec((1, c2), lambda i: (0, 0)),                     # b2
            pl.BlockSpec((oh2 * ow2 * c2, fc), lambda i: (0, 0)),        # w3 bf16
            pl.BlockSpec((1, fc), lambda i: (0, 0)),                     # b3
            pl.BlockSpec((fc, moves), lambda i: (0, 0)),                 # w4
            pl.BlockSpec((1, moves), lambda i: (0, 0)),                  # b4
        ],
        out_specs=pl.BlockSpec((n, moves), lambda i: (0, 0)),
        scratch_shapes=[
            pltpu.VMEM((n, oh1 + 1, ow1 + 1, c1), jnp.float32),  # padded conv1 act
            pltpu.VMEM((n, oh1 * ow1, c2), jnp.float32),         # conv2 act (NHWC)
        ],
        compiler_params=pltpu.CompilerParams(
            dimension_semantics=("arbitrary",),
            vmem_limit_bytes=12 * 1024 * 1024),
    )(x_nhwc, prep["w1"], prep["b1"], prep["w2"], prep["b2"],
      prep["w3"], prep["b3"], prep["w4"], prep["b4"])


# --------------------- one-time weight layout preparation --------------------

def prepare_params(p, rows, cols):
    """Fold ALL layout plumbing into the stored weights, once, off the hot path."""
    cout1, cin, kh1, kw1 = p["w1"].shape
    cout2, _, kh2, kw2 = p["w2"].shape
    fc = p["w3"].shape[0]
    oh2, ow2 = rows - 3, cols - 3
    # conv weights -> per-offset (Cin, Cout) GEMM matrices, index k = ki*KW+kj
    w1 = jnp.transpose(p["w1"], (2, 3, 1, 0)).reshape(kh1 * kw1, cin, cout1)
    w2 = jnp.transpose(p["w2"], (2, 3, 1, 0)).reshape(kh2 * kw2, cout1, cout2)
    # fc3: fold torch's NCHW flatten (c*HW + h*W + w) into NHWC-major row order
    # ((h*W + w)*C + c) and store bf16 (MXU-native, half the HBM DMA).
    w3 = (jnp.transpose(p["w3"].reshape(fc, cout2, oh2, ow2), (2, 3, 1, 0))
          .reshape(oh2 * ow2 * cout2, fc).astype(jnp.bfloat16))
    w4 = jnp.transpose(p["w4"], (1, 0))
    return dict(
        w1=w1, b1=p["b1"].reshape(1, -1),
        w2=w2, b2=p["b2"].reshape(1, -1),
        w3=w3, b3=p["b3"].reshape(1, -1),
        w4=w4, b4=p["b4"].reshape(1, -1),
    )


# ------------------------ deterministic parameter init -----------------------

def init_params(key, rows, cols, entities, moves):
    conv1_out, conv2_out, fc_out = 32, 64, 512
    linear_input = (cols - 3) * (rows - 3) * conv2_out   # conv2d_size_out x3
    ks = jax.random.split(key, 8)
    s = 0.05
    # self.head (nn.Linear(linear_input, moves)) exists in __init__ but is
    # never used in forward(); it is intentionally omitted here.
    return dict(
        w1=jax.random.normal(ks[0], (conv1_out, entities, 3, 3), jnp.float32) * s,
        b1=jax.random.normal(ks[1], (conv1_out,), jnp.float32) * s,
        w2=jax.random.normal(ks[2], (conv2_out, conv1_out, 2, 2), jnp.float32) * s,
        b2=jax.random.normal(ks[3], (conv2_out,), jnp.float32) * s,
        w3=jax.random.normal(ks[4], (fc_out, linear_input), jnp.float32) * s,
        b3=jax.random.normal(ks[5], (fc_out,), jnp.float32) * s,
        w4=jax.random.normal(ks[6], (moves, fc_out), jnp.float32) * s,
        b4=jax.random.normal(ks[7], (moves,), jnp.float32) * s,
    )


# ------------------------------ pure-JAX reference ---------------------------

def reference_forward(x_nchw, p):
    dn = ("NCHW", "OIHW", "NCHW")
    hp = jax.lax.Precision.HIGHEST
    # Kernel stores w3 in bf16; mirror that quantization in the reference.
    w3 = p["w3"].astype(jnp.bfloat16).astype(jnp.float32)
    h = jax.lax.conv_general_dilated(x_nchw, p["w1"], (1, 1), "VALID",
                                     dimension_numbers=dn, precision=hp)
    h = jax.nn.relu(h + p["b1"][None, :, None, None])
    h = jax.lax.conv_general_dilated(h, p["w2"], (1, 1), "VALID",
                                     dimension_numbers=dn, precision=hp)
    h = jax.nn.relu(h + p["b2"][None, :, None, None])
    h = h.reshape(h.shape[0], -1)                       # NCHW flatten
    h = jax.nn.relu(jnp.dot(h, w3.T, precision=hp) + p["b3"])
    return jnp.dot(h, p["w4"].T, precision=hp) + p["b4"]


# ----------------------------------- main ------------------------------------

if __name__ == "__main__":
    # Maze config: 10x10 maze, 4 entity channels, 4 moves, batch of 2 mazes.
    rows = cols = 10
    entities, moves, batch = 4, 4, 2

    key = jax.random.PRNGKey(0)
    k_par, k_x = jax.random.split(key)
    params = init_params(k_par, rows, cols, entities, moves)
    x = jax.random.normal(k_x, (batch, entities, rows, cols), jnp.float32)

    prep = prepare_params(params, rows, cols)   # once, outside the hot path
    fwd = jax.jit(pacnet_forward)

    out = jax.block_until_ready(fwd(x, prep))
    ref = jax.block_until_ready(reference_forward(x, params))

    assert out.shape == (batch, moves), out.shape
    # fc3 runs bf16 x bf16 on the MXU with f32 accumulation (documented
    # precision choice); tolerance is set accordingly.
    assert jnp.allclose(out, ref, rtol=1e-2, atol=2e-2), (out, ref)
    print("KERNEL_OK")
</pallas_src>

<mosaic_0001>
module attributes {stable_mosaic.version = 11 : i64} {
  func.func @_pacnet_kernel(%arg0: i32, %arg1: memref<2x10x10x4xf32, #tpu.memory_space<vmem>>, %arg2: memref<9x4x32xf32, #tpu.memory_space<vmem>>, %arg3: memref<1x32xf32, #tpu.memory_space<vmem>>, %arg4: memref<4x32x64xf32, #tpu.memory_space<vmem>>, %arg5: memref<1x64xf32, #tpu.memory_space<vmem>>, %arg6: memref<3136x512xbf16, #tpu.memory_space<vmem>>, %arg7: memref<1x512xf32, #tpu.memory_space<vmem>>, %arg8: memref<512x4xf32, #tpu.memory_space<vmem>>, %arg9: memref<1x4xf32, #tpu.memory_space<vmem>>, %arg10: memref<2x4xf32, #tpu.memory_space<vmem>>, %arg11: memref<2x9x9x32xf32, #tpu.memory_space<vmem>>, %arg12: memref<2x64x64xf32, #tpu.memory_space<vmem>>) attributes {dimension_semantics = [#tpu.dimension_semantics<arbitrary>], iteration_bounds = array<i64: 1>, scalar_prefetch = 0 : i64, scratch_operands = 2 : i64, tpu.core_type = #tpu.core_type<tc>, window_params = [{pipeline_mode = #tpu.pipeline_mode<synchronous>, transform_indices = @transform_0, window_bounds = array<i64: 2, 10, 10, 4>}, {pipeline_mode = #tpu.pipeline_mode<synchronous>, transform_indices = @transform_1, window_bounds = array<i64: 9, 4, 32>}, {pipeline_mode = #tpu.pipeline_mode<synchronous>, transform_indices = @transform_2, window_bounds = array<i64: 1, 32>}, {pipeline_mode = #tpu.pipeline_mode<synchronous>, transform_indices = @transform_3, window_bounds = array<i64: 4, 32, 64>}, {pipeline_mode = #tpu.pipeline_mode<synchronous>, transform_indices = @transform_4, window_bounds = array<i64: 1, 64>}, {pipeline_mode = #tpu.pipeline_mode<synchronous>, transform_indices = @transform_5, window_bounds = array<i64: 3136, 512>}, {pipeline_mode = #tpu.pipeline_mode<synchronous>, transform_indices = @transform_6, window_bounds = array<i64: 1, 512>}, {pipeline_mode = #tpu.pipeline_mode<synchronous>, transform_indices = @transform_7, window_bounds = array<i64: 512, 4>}, {pipeline_mode = #tpu.pipeline_mode<synchronous>, transform_indices = @transform_8, window_bounds = array<i64: 1, 4>}, {pipeline_mode = #tpu.pipeline_mode<synchronous>, transform_indices = @transform_9, window_bounds = array<i64: 2, 4>}]} {
    %cst = arith.constant 0.000000e+00 : f32
    %0 = vector.broadcast %cst : f32 to vector<128x32xf32>
    %c0 = arith.constant 0 : index
    %c0_0 = arith.constant 0 : index
    %c0_1 = arith.constant 0 : index
    %c0_2 = arith.constant 0 : index
    %1 = vector.load %arg1[%c0, %c0_0, %c0_1, %c0_2] : memref<2x10x10x4xf32, #tpu.memory_space<vmem>>, vector<2x8x8x4xf32>
    %2 = vector.shape_cast %1 : vector<2x8x8x4xf32> to vector<128x4xf32>
    %c0_3 = arith.constant 0 : index
    %c0_4 = arith.constant 0 : index
    %c0_5 = arith.constant 0 : index
    %3 = vector.load %arg2[%c0_3, %c0_4, %c0_5] : memref<9x4x32xf32, #tpu.memory_space<vmem>>, vector<1x4x32xf32>
    %4 = vector.shape_cast %3 : vector<1x4x32xf32> to vector<4x32xf32>
    %cst_6 = arith.constant dense<0.000000e+00> : vector<128x32xf32>
    %5 = tpu.matmul %2, %4, %cst_6 {dimension_numbers = #tpu.dot_dimension_numbers<[1], [0], [0], [1], [0, 0, 1, 1], [], []>} : vector<128x4xf32>, vector<4x32xf32>, vector<128x32xf32> -> vector<128x32xf32>
    %6 = arith.addf %0, %5 : vector<128x32xf32>
    %c0_7 = arith.constant 0 : index
    %c0_8 = arith.constant 0 : index
    %c1 = arith.constant 1 : index
    %c0_9 = arith.constant 0 : index
    %7 = vector.load %arg1[%c0_7, %c0_8, %c1, %c0_9] : memref<2x10x10x4xf32, #tpu.memory_space<vmem>>, vector<2x8x8x4xf32>
    %8 = vector.shape_cast %7 : vector<2x8x8x4xf32> to vector<128x4xf32>
    %c1_10 = arith.constant 1 : index
    %c0_11 = arith.constant 0 : index
    %c0_12 = arith.constant 0 : index
    %9 = vector.load %arg2[%c1_10, %c0_11, %c0_12] : memref<9x4x32xf32, #tpu.memory_space<vmem>>, vector<1x4x32xf32>
    %10 = vector.shape_cast %9 : vector<1x4x32xf32> to vector<4x32xf32>
    %cst_13 = arith.constant dense<0.000000e+00> : vector<128x32xf32>
    %11 = tpu.matmul %8, %10, %cst_13 {dimension_numbers = #tpu.dot_dimension_numbers<[1], [0], [0], [1], [0, 0, 1, 1], [], []>} : vector<128x4xf32>, vector<4x32xf32>, vector<128x32xf32> -> vector<128x32xf32>
    %12 = arith.addf %6, %11 : vector<128x32xf32>
    %c0_14 = arith.constant 0 : index
    %c0_15 = arith.constant 0 : index
    %c2 = arith.constant 2 : index
    %c0_16 = arith.constant 0 : index
    %13 = vector.load %arg1[%c0_14, %c0_15, %c2, %c0_16] : memref<2x10x10x4xf32, #tpu.memory_space<vmem>>, vector<2x8x8x4xf32>
    %14 = vector.shape_cast %13 : vector<2x8x8x4xf32> to vector<128x4xf32>
    %c2_17 = arith.constant 2 : index
    %c0_18 = arith.constant 0 : index
    %c0_19 = arith.constant 0 : index
    %15 = vector.load %arg2[%c2_17, %c0_18, %c0_19] : memref<9x4x32xf32, #tpu.memory_space<vmem>>, vector<1x4x32xf32>
    %16 = vector.shape_cast %15 : vector<1x4x32xf32> to vector<4x32xf32>
    %cst_20 = arith.constant dense<0.000000e+00> : vector<128x32xf32>
    %17 = tpu.matmul %14, %16, %cst_20 {dimension_numbers = #tpu.dot_dimension_numbers<[1], [0], [0], [1], [0, 0, 1, 1], [], []>} : vector<128x4xf32>, vector<4x32xf32>, vector<128x32xf32> -> vector<128x32xf32>
    %18 = arith.addf %12, %17 : vector<128x32xf32>
    %c0_21 = arith.constant 0 : index
    %c1_22 = arith.constant 1 : index
    %c0_23 = arith.constant 0 : index
    %c0_24 = arith.constant 0 : index
    %19 = vector.load %arg1[%c0_21, %c1_22, %c0_23, %c0_24] : memref<2x10x10x4xf32, #tpu.memory_space<vmem>>, vector<2x8x8x4xf32>
    %20 = vector.shape_cast %19 : vector<2x8x8x4xf32> to vector<128x4xf32>
    %c3 = arith.constant 3 : index
    %c0_25 = arith.constant 0 : index
    %c0_26 = arith.constant 0 : index
    %21 = vector.load %arg2[%c3, %c0_25, %c0_26] : memref<9x4x32xf32, #tpu.memory_space<vmem>>, vector<1x4x32xf32>
    %22 = vector.shape_cast %21 : vector<1x4x32xf32> to vector<4x32xf32>
    %cst_27 = arith.constant dense<0.000000e+00> : vector<128x32xf32>
    %23 = tpu.matmul %20, %22, %cst_27 {dimension_numbers = #tpu.dot_dimension_numbers<[1], [0], [0], [1], [0, 0, 1, 1], [], []>} : vector<128x4xf32>, vector<4x32xf32>, vector<128x32xf32> -> vector<128x32xf32>
    %24 = arith.addf %18, %23 : vector<128x32xf32>
    %c0_28 = arith.constant 0 : index
    %c1_29 = arith.constant 1 : index
    %c1_30 = arith.constant 1 : index
    %c0_31 = arith.constant 0 : index
    %25 = vector.load %arg1[%c0_28, %c1_29, %c1_30, %c0_31] : memref<2x10x10x4xf32, #tpu.memory_space<vmem>>, vector<2x8x8x4xf32>
    %26 = vector.shape_cast %25 : vector<2x8x8x4xf32> to vector<128x4xf32>
    %c4 = arith.constant 4 : index
    %c0_32 = arith.constant 0 : index
    %c0_33 = arith.constant 0 : index
    %27 = vector.load %arg2[%c4, %c0_32, %c0_33] : memref<9x4x32xf32, #tpu.memory_space<vmem>>, vector<1x4x32xf32>
    %28 = vector.shape_cast %27 : vector<1x4x32xf32> to vector<4x32xf32>
    %cst_34 = arith.constant dense<0.000000e+00> : vector<128x32xf32>
    %29 = tpu.matmul %26, %28, %cst_34 {dimension_numbers = #tpu.dot_dimension_numbers<[1], [0], [0], [1], [0, 0, 1, 1], [], []>} : vector<128x4xf32>, vector<4x32xf32>, vector<128x32xf32> -> vector<128x32xf32>
    %30 = arith.addf %24, %29 : vector<128x32xf32>
    %c0_35 = arith.constant 0 : index
    %c1_36 = arith.constant 1 : index
    %c2_37 = arith.constant 2 : index
    %c0_38 = arith.constant 0 : index
    %31 = vector.load %arg1[%c0_35, %c1_36, %c2_37, %c0_38] : memref<2x10x10x4xf32, #tpu.memory_space<vmem>>, vector<2x8x8x4xf32>
    %32 = vector.shape_cast %31 : vector<2x8x8x4xf32> to vector<128x4xf32>
    %c5 = arith.constant 5 : index
    %c0_39 = arith.constant 0 : index
    %c0_40 = arith.constant 0 : index
    %33 = vector.load %arg2[%c5, %c0_39, %c0_40] : memref<9x4x32xf32, #tpu.memory_space<vmem>>, vector<1x4x32xf32>
    %34 = vector.shape_cast %33 : vector<1x4x32xf32> to vector<4x32xf32>
    %cst_41 = arith.constant dense<0.000000e+00> : vector<128x32xf32>
    %35 = tpu.matmul %32, %34, %cst_41 {dimension_numbers = #tpu.dot_dimension_numbers<[1], [0], [0], [1], [0, 0, 1, 1], [], []>} : vector<128x4xf32>, vector<4x32xf32>, vector<128x32xf32> -> vector<128x32xf32>
    %36 = arith.addf %30, %35 : vector<128x32xf32>
    %c0_42 = arith.constant 0 : index
    %c2_43 = arith.constant 2 : index
    %c0_44 = arith.constant 0 : index
    %c0_45 = arith.constant 0 : index
    %37 = vector.load %arg1[%c0_42, %c2_43, %c0_44, %c0_45] : memref<2x10x10x4xf32, #tpu.memory_space<vmem>>, vector<2x8x8x4xf32>
    %38 = vector.shape_cast %37 : vector<2x8x8x4xf32> to vector<128x4xf32>
    %c6 = arith.constant 6 : index
    %c0_46 = arith.constant 0 : index
    %c0_47 = arith.constant 0 : index
    %39 = vector.load %arg2[%c6, %c0_46, %c0_47] : memref<9x4x32xf32, #tpu.memory_space<vmem>>, vector<1x4x32xf32>
    %40 = vector.shape_cast %39 : vector<1x4x32xf32> to vector<4x32xf32>
    %cst_48 = arith.constant dense<0.000000e+00> : vector<128x32xf32>
    %41 = tpu.matmul %38, %40, %cst_48 {dimension_numbers = #tpu.dot_dimension_numbers<[1], [0], [0], [1], [0, 0, 1, 1], [], []>} : vector<128x4xf32>, vector<4x32xf32>, vector<128x32xf32> -> vector<128x32xf32>
    %42 = arith.addf %36, %41 : vector<128x32xf32>
    %c0_49 = arith.constant 0 : index
    %c2_50 = arith.constant 2 : index
    %c1_51 = arith.constant 1 : index
    %c0_52 = arith.constant 0 : index
    %43 = vector.load %arg1[%c0_49, %c2_50, %c1_51, %c0_52] : memref<2x10x10x4xf32, #tpu.memory_space<vmem>>, vector<2x8x8x4xf32>
    %44 = vector.shape_cast %43 : vector<2x8x8x4xf32> to vector<128x4xf32>
    %c7 = arith.constant 7 : index
    %c0_53 = arith.constant 0 : index
    %c0_54 = arith.constant 0 : index
    %45 = vector.load %arg2[%c7, %c0_53, %c0_54] : memref<9x4x32xf32, #tpu.memory_space<vmem>>, vector<1x4x32xf32>
    %46 = vector.shape_cast %45 : vector<1x4x32xf32> to vector<4x32xf32>
    %cst_55 = arith.constant dense<0.000000e+00> : vector<128x32xf32>
    %47 = tpu.matmul %44, %46, %cst_55 {dimension_numbers = #tpu.dot_dimension_numbers<[1], [0], [0], [1], [0, 0, 1, 1], [], []>} : vector<128x4xf32>, vector<4x32xf32>, vector<128x32xf32> -> vector<128x32xf32>
    %48 = arith.addf %42, %47 : vector<128x32xf32>
    %c0_56 = arith.constant 0 : index
    %c2_57 = arith.constant 2 : index
    %c2_58 = arith.constant 2 : index
    %c0_59 = arith.constant 0 : index
    %49 = vector.load %arg1[%c0_56, %c2_57, %c2_58, %c0_59] : memref<2x10x10x4xf32, #tpu.memory_space<vmem>>, vector<2x8x8x4xf32>
    %50 = vector.shape_cast %49 : vector<2x8x8x4xf32> to vector<128x4xf32>
    %c8 = arith.constant 8 : index
    %c0_60 = arith.constant 0 : index
    %c0_61 = arith.constant 0 : index
    %51 = vector.load %arg2[%c8, %c0_60, %c0_61] : memref<9x4x32xf32, #tpu.memory_space<vmem>>, vector<1x4x32xf32>
    %52 = vector.shape_cast %51 : vector<1x4x32xf32> to vector<4x32xf32>
    %cst_62 = arith.constant dense<0.000000e+00> : vector<128x32xf32>
    %53 = tpu.matmul %50, %52, %cst_62 {dimension_numbers = #tpu.dot_dimension_numbers<[1], [0], [0], [1], [0, 0, 1, 1], [], []>} : vector<128x4xf32>, vector<4x32xf32>, vector<128x32xf32> -> vector<128x32xf32>
    %54 = arith.addf %48, %53 : vector<128x32xf32>
    %c0_63 = arith.constant 0 : index
    %c0_64 = arith.constant 0 : index
    %55 = vector.load %arg3[%c0_63, %c0_64] : memref<1x32xf32, #tpu.memory_space<vmem>>, vector<1x32xf32>
    %56 = vector.broadcast %55 : vector<1x32xf32> to vector<128x32xf32>
    %57 = arith.addf %54, %56 : vector<128x32xf32>
    %cst_65 = arith.constant 0.000000e+00 : f32
    %58 = vector.broadcast %cst_65 : f32 to vector<128x32xf32>
    %59 = arith.maximumf %57, %58 : vector<128x32xf32>
    %cst_66 = arith.constant 0.000000e+00 : f32
    %60 = vector.broadcast %cst_66 : f32 to vector<2x9x9x32xf32>
    %c0_67 = arith.constant 0 : index
    %c0_68 = arith.constant 0 : index
    %c0_69 = arith.constant 0 : index
    %c0_70 = arith.constant 0 : index
    %61 = vector.load %arg11[%c0_67, %c0_68, %c0_69, %c0_70] : memref<2x9x9x32xf32, #tpu.memory_space<vmem>>, vector<2x9x9x32xf32>
    tpu.vector_store %arg11[%c0_67, %c0_68, %c0_69, %c0_70], %60 {strides = array<i32>} : memref<2x9x9x32xf32, #tpu.memory_space<vmem>>, vector<2x9x9x32xf32>,
    %62 = vector.shape_cast %59 : vector<128x32xf32> to vector<2x8x8x32xf32>
    %c0_71 = arith.constant 0 : index
    %c0_72 = arith.constant 0 : index
    %c0_73 = arith.constant 0 : index
    %c0_74 = arith.constant 0 : index
    %63 = vector.load %arg11[%c0_71, %c0_72, %c0_73, %c0_74] : memref<2x9x9x32xf32, #tpu.memory_space<vmem>>, vector<2x8x8x32xf32>
    tpu.vector_store %arg11[%c0_71, %c0_72, %c0_73, %c0_74], %62 {strides = array<i32>} : memref<2x9x9x32xf32, #tpu.memory_space<vmem>>, vector<2x8x8x32xf32>,
    %cst_75 = arith.constant 0.000000e+00 : f32
    %64 = vector.broadcast %cst_75 : f32 to vector<128x64xf32>
    %c0_76 = arith.constant 0 : index
    %c0_77 = arith.constant 0 : index
    %c0_78 = arith.constant 0 : index
    %c0_79 = arith.constant 0 : index
    %65 = vector.load %arg11[%c0_76, %c0_77, %c0_78, %c0_79] : memref<2x9x9x32xf32, #tpu.memory_space<vmem>>, vector<2x8x8x32xf32>
    %66 = vector.shape_cast %65 : vector<2x8x8x32xf32> to vector<128x32xf32>
    %c0_80 = arith.constant 0 : index
    %c0_81 = arith.constant 0 : index
    %c0_82 = arith.constant 0 : index
    %67 = vector.load %arg4[%c0_80, %c0_81, %c0_82] : memref<4x32x64xf32, #tpu.memory_space<vmem>>, vector<1x32x64xf32>
    %68 = vector.shape_cast %67 : vector<1x32x64xf32> to vector<32x64xf32>
    %cst_83 = arith.constant dense<0.000000e+00> : vector<128x64xf32>
    %69 = tpu.matmul %66, %68, %cst_83 {dimension_numbers = #tpu.dot_dimension_numbers<[1], [0], [0], [1], [0, 0, 1, 1], [], []>} : vector<128x32xf32>, vector<32x64xf32>, vector<128x64xf32> -> vector<128x64xf32>
    %70 = arith.addf %64, %69 : vector<128x64xf32>
    %c0_84 = arith.constant 0 : index
    %c0_85 = arith.constant 0 : index
    %c1_86 = arith.constant 1 : index
    %c0_87 = arith.constant 0 : index
    %71 = vector.load %arg11[%c0_84, %c0_85, %c1_86, %c0_87] : memref<2x9x9x32xf32, #tpu.memory_space<vmem>>, vector<2x8x8x32xf32>
    %72 = vector.shape_cast %71 : vector<2x8x8x32xf32> to vector<128x32xf32>
    %c1_88 = arith.constant 1 : index
    %c0_89 = arith.constant 0 : index
    %c0_90 = arith.constant 0 : index
    %73 = vector.load %arg4[%c1_88, %c0_89, %c0_90] : memref<4x32x64xf32, #tpu.memory_space<vmem>>, vector<1x32x64xf32>
    %74 = vector.shape_cast %73 : vector<1x32x64xf32> to vector<32x64xf32>
    %cst_91 = arith.constant dense<0.000000e+00> : vector<128x64xf32>
    %75 = tpu.matmul %72, %74, %cst_91 {dimension_numbers = #tpu.dot_dimension_numbers<[1], [0], [0], [1], [0, 0, 1, 1], [], []>} : vector<128x32xf32>, vector<32x64xf32>, vector<128x64xf32> -> vector<128x64xf32>
    %76 = arith.addf %70, %75 : vector<128x64xf32>
    %c0_92 = arith.constant 0 : index
    %c1_93 = arith.constant 1 : index
    %c0_94 = arith.constant 0 : index
    %c0_95 = arith.constant 0 : index
    %77 = vector.load %arg11[%c0_92, %c1_93, %c0_94, %c0_95] : memref<2x9x9x32xf32, #tpu.memory_space<vmem>>, vector<2x8x8x32xf32>
    %78 = vector.shape_cast %77 : vector<2x8x8x32xf32> to vector<128x32xf32>
    %c2_96 = arith.constant 2 : index
    %c0_97 = arith.constant 0 : index
    %c0_98 = arith.constant 0 : index
    %79 = vector.load %arg4[%c2_96, %c0_97, %c0_98] : memref<4x32x64xf32, #tpu.memory_space<vmem>>, vector<1x32x64xf32>
    %80 = vector.shape_cast %79 : vector<1x32x64xf32> to vector<32x64xf32>
    %cst_99 = arith.constant dense<0.000000e+00> : vector<128x64xf32>
    %81 = tpu.matmul %78, %80, %cst_99 {dimension_numbers = #tpu.dot_dimension_numbers<[1], [0], [0], [1], [0, 0, 1, 1], [], []>} : vector<128x32xf32>, vector<32x64xf32>, vector<128x64xf32> -> vector<128x64xf32>
    %82 = arith.addf %76, %81 : vector<128x64xf32>
    %c0_100 = arith.constant 0 : index
    %c1_101 = arith.constant 1 : index
    %c1_102 = arith.constant 1 : index
    %c0_103 = arith.constant 0 : index
    %83 = vector.load %arg11[%c0_100, %c1_101, %c1_102, %c0_103] : memref<2x9x9x32xf32, #tpu.memory_space<vmem>>, vector<2x8x8x32xf32>
    %84 = vector.shape_cast %83 : vector<2x8x8x32xf32> to vector<128x32xf32>
    %c3_104 = arith.constant 3 : index
    %c0_105 = arith.constant 0 : index
    %c0_106 = arith.constant 0 : index
    %85 = vector.load %arg4[%c3_104, %c0_105, %c0_106] : memref<4x32x64xf32, #tpu.memory_space<vmem>>, vector<1x32x64xf32>
    %86 = vector.shape_cast %85 : vector<1x32x64xf32> to vector<32x64xf32>
    %cst_107 = arith.constant dense<0.000000e+00> : vector<128x64xf32>
    %87 = tpu.matmul %84, %86, %cst_107 {dimension_numbers = #tpu.dot_dimension_numbers<[1], [0], [0], [1], [0, 0, 1, 1], [], []>} : vector<128x32xf32>, vector<32x64xf32>, vector<128x64xf32> -> vector<128x64xf32>
    %88 = arith.addf %82, %87 : vector<128x64xf32>
    %c0_108 = arith.constant 0 : index
    %c0_109 = arith.constant 0 : index
    %89 = vector.load %arg5[%c0_108, %c0_109] : memref<1x64xf32, #tpu.memory_space<vmem>>, vector<1x64xf32>
    %90 = vector.broadcast %89 : vector<1x64xf32> to vector<128x64xf32>
    %91 = arith.addf %88, %90 : vector<128x64xf32>
    %cst_110 = arith.constant 0.000000e+00 : f32
    %92 = vector.broadcast %cst_110 : f32 to vector<128x64xf32>
    %93 = arith.maximumf %91, %92 : vector<128x64xf32>
    %94 = vector.shape_cast %93 : vector<128x64xf32> to vector<2x64x64xf32>
    %c0_111 = arith.constant 0 : index
    %c0_112 = arith.constant 0 : index
    %c0_113 = arith.constant 0 : index
    %95 = vector.load %arg12[%c0_111, %c0_112, %c0_113] : memref<2x64x64xf32, #tpu.memory_space<vmem>>, vector<2x64x64xf32>
    tpu.vector_store %arg12[%c0_111, %c0_112, %c0_113], %94 {strides = array<i32>} : memref<2x64x64xf32, #tpu.memory_space<vmem>>, vector<2x64x64xf32>,
    %cst_114 = arith.constant 0.000000e+00 : f32
    %96 = vector.broadcast %cst_114 : f32 to vector<2x512xf32>
    %c0_115 = arith.constant 0 : index
    %c0_116 = arith.constant 0 : index
    %c0_117 = arith.constant 0 : index
    %97 = vector.load %arg12[%c0_115, %c0_116, %c0_117] : memref<2x64x64xf32, #tpu.memory_space<vmem>>, vector<2x1x64xf32>
    %98 = vector.shape_cast %97 : vector<2x1x64xf32> to vector<2x64xf32>
    %99 = arith.truncf %98 : vector<2x64xf32> to vector<2x64xbf16>
    %c0_118 = arith.constant 0 : index
    %c0_119 = arith.constant 0 : index
    %100 = vector.load %arg6[%c0_118, %c0_119] : memref<3136x512xbf16, #tpu.memory_space<vmem>>, vector<64x512xbf16>
    %cst_120 = arith.constant dense<0.000000e+00> : vector<2x512xf32>
    %101 = tpu.matmul %99, %100, %cst_120 {dimension_numbers = #tpu.dot_dimension_numbers<[1], [0], [0], [1], [0, 0, 1, 1], [], []>} : vector<2x64xbf16>, vector<64x512xbf16>, vector<2x512xf32> -> vector<2x512xf32>
    %102 = arith.addf %96, %101 : vector<2x512xf32>
    %c0_121 = arith.constant 0 : index
    %c1_122 = arith.constant 1 : index
    %c0_123 = arith.constant 0 : index
    %103 = vector.load %arg12[%c0_121, %c1_122, %c0_123] : memref<2x64x64xf32, #tpu.memory_space<vmem>>, vector<2x1x64xf32>
    %104 = vector.shape_cast %103 : vector<2x1x64xf32> to vector<2x64xf32>
    %105 = arith.truncf %104 : vector<2x64xf32> to vector<2x64xbf16>
    %c64 = arith.constant 64 : index
    %c0_124 = arith.constant 0 : index
    %106 = vector.load %arg6[%c64, %c0_124] : memref<3136x512xbf16, #tpu.memory_space<vmem>>, vector<64x512xbf16>
    %cst_125 = arith.constant dense<0.000000e+00> : vector<2x512xf32>
    %107 = tpu.matmul %105, %106, %cst_125 {dimension_numbers = #tpu.dot_dimension_numbers<[1], [0], [0], [1], [0, 0, 1, 1], [], []>} : vector<2x64xbf16>, vector<64x512xbf16>, vector<2x512xf32> -> vector<2x512xf32>
    %108 = arith.addf %102, %107 : vector<2x512xf32>
    %c0_126 = arith.constant 0 : index
    %c2_127 = arith.constant 2 : index
    %c0_128 = arith.constant 0 : index
    %109 = vector.load %arg12[%c0_126, %c2_127, %c0_128] : memref<2x64x64xf32, #tpu.memory_space<vmem>>, vector<2x1x64xf32>
    %110 = vector.shape_cast %109 : vector<2x1x64xf32> to vector<2x64xf32>
    %111 = arith.truncf %110 : vector<2x64xf32> to vector<2x64xbf16>
    %c128 = arith.constant 128 : index
    %c0_129 = arith.constant 0 : index
    %112 = vector.load %arg6[%c128, %c0_129] : memref<3136x512xbf16, #tpu.memory_space<vmem>>, vector<64x512xbf16>
    %cst_130 = arith.constant dense<0.000000e+00> : vector<2x512xf32>
    %113 = tpu.matmul %111, %112, %cst_130 {dimension_numbers = #tpu.dot_dimension_numbers<[1], [0], [0], [1], [0, 0, 1, 1], [], []>} : vector<2x64xbf16>, vector<64x512xbf16>, vector<2x512xf32> -> vector<2x512xf32>
    %114 = arith.addf %108, %113 : vector<2x512xf32>
    %c0_131 = arith.constant 0 : index
    %c3_132 = arith.constant 3 : index
    %c0_133 = arith.constant 0 : index
    %115 = vector.load %arg12[%c0_131, %c3_132, %c0_133] : memref<2x64x64xf32, #tpu.memory_space<vmem>>, vector<2x1x64xf32>
    %116 = vector.shape_cast %115 : vector<2x1x64xf32> to vector<2x64xf32>
    %117 = arith.truncf %116 : vector<2x64xf32> to vector<2x64xbf16>
    %c192 = arith.constant 192 : index
    %c0_134 = arith.constant 0 : index
    %118 = vector.load %arg6[%c192, %c0_134] : memref<3136x512xbf16, #tpu.memory_space<vmem>>, vector<64x512xbf16>
    %cst_135 = arith.constant dense<0.000000e+00> : vector<2x512xf32>
    %119 = tpu.matmul %117, %118, %cst_135 {dimension_numbers = #tpu.dot_dimension_numbers<[1], [0], [0], [1], [0, 0, 1, 1], [], []>} : vector<2x64xbf16>, vector<64x512xbf16>, vector<2x512xf32> -> vector<2x512xf32>
    %120 = arith.addf %114, %119 : vector<2x512xf32>
    %c0_136 = arith.constant 0 : index
    %c4_137 = arith.constant 4 : index
    %c0_138 = arith.constant 0 : index
    %121 = vector.load %arg12[%c0_136, %c4_137, %c0_138] : memref<2x64x64xf32, #tpu.memory_space<vmem>>, vector<2x1x64xf32>
    %122 = vector.shape_cast %121 : vector<2x1x64xf32> to vector<2x64xf32>
    %123 = arith.truncf %122 : vector<2x64xf32> to vector<2x64xbf16>
    %c256 = arith.constant 256 : index
    %c0_139 = arith.constant 0 : index
    %124 = vector.load %arg6[%c256, %c0_139] : memref<3136x512xbf16, #tpu.memory_space<vmem>>, vector<64x512xbf16>
    %cst_140 = arith.constant dense<0.000000e+00> : vector<2x512xf32>
    %125 = tpu.matmul %123, %124, %cst_140 {dimension_numbers = #tpu.dot_dimension_numbers<[1], [0], [0], [1], [0, 0, 1, 1], [], []>} : vector<2x64xbf16>, vector<64x512xbf16>, vector<2x512xf32> -> vector<2x512xf32>
    %126 = arith.addf %120, %125 : vector<2x512xf32>
    %c0_141 = arith.constant 0 : index
    %c5_142 = arith.constant 5 : index
    %c0_143 = arith.constant 0 : index
    %127 = vector.load %arg12[%c0_141, %c5_142, %c0_143] : memref<2x64x64xf32, #tpu.memory_space<vmem>>, vector<2x1x64xf32>
    %128 = vector.shape_cast %127 : vector<2x1x64xf32> to vector<2x64xf32>
    %129 = arith.truncf %128 : vector<2x64xf32> to vector<2x64xbf16>
    %c320 = arith.constant 320 : index
    %c0_144 = arith.constant 0 : index
    %130 = vector.load %arg6[%c320, %c0_144] : memref<3136x512xbf16, #tpu.memory_space<vmem>>, vector<64x512xbf16>
    %cst_145 = arith.constant dense<0.000000e+00> : vector<2x512xf32>
    %131 = tpu.matmul %129, %130, %cst_145 {dimension_numbers = #tpu.dot_dimension_numbers<[1], [0], [0], [1], [0, 0, 1, 1], [], []>} : vector<2x64xbf16>, vector<64x512xbf16>, vector<2x512xf32> -> vector<2x512xf32>
    %132 = arith.addf %126, %131 : vector<2x512xf32>
    %c0_146 = arith.constant 0 : index
    %c6_147 = arith.constant 6 : index
    %c0_148 = arith.constant 0 : index
    %133 = vector.load %arg12[%c0_146, %c6_147, %c0_148] : memref<2x64x64xf32, #tpu.memory_space<vmem>>, vector<2x1x64xf32>
    %134 = vector.shape_cast %133 : vector<2x1x64xf32> to vector<2x64xf32>
    %135 = arith.truncf %134 : vector<2x64xf32> to vector<2x64xbf16>
    %c384 = arith.constant 384 : index
    %c0_149 = arith.constant 0 : index
    %136 = vector.load %arg6[%c384, %c0_149] : memref<3136x512xbf16, #tpu.memory_space<vmem>>, vector<64x512xbf16>
    %cst_150 = arith.constant dense<0.000000e+00> : vector<2x512xf32>
    %137 = tpu.matmul %135, %136, %cst_150 {dimension_numbers = #tpu.dot_dimension_numbers<[1], [0], [0], [1], [0, 0, 1, 1], [], []>} : vector<2x64xbf16>, vector<64x512xbf16>, vector<2x512xf32> -> vector<2x512xf32>
    %138 = arith.addf %132, %137 : vector<2x512xf32>
    %c0_151 = arith.constant 0 : index
    %c8_152 = arith.constant 8 : index
    %c0_153 = arith.constant 0 : index
    %139 = vector.load %arg12[%c0_151, %c8_152, %c0_153] : memref<2x64x64xf32, #tpu.memory_space<vmem>>, vector<2x1x64xf32>
    %140 = vector.shape_cast %139 : vector<2x1x64xf32> to vector<2x64xf32>
    %141 = arith.truncf %140 : vector<2x64xf32> to vector<2x64xbf16>
    %c448 = arith.constant 448 : index
    %c0_154 = arith.constant 0 : index
    %142 = vector.load %arg6[%c448, %c0_154] : memref<3136x512xbf16, #tpu.memory_space<vmem>>, vector<64x512xbf16>
    %cst_155 = arith.constant dense<0.000000e+00> : vector<2x512xf32>
    %143 = tpu.matmul %141, %142, %cst_155 {dimension_numbers = #tpu.dot_dimension_numbers<[1], [0], [0], [1], [0, 0, 1, 1], [], []>} : vector<2x64xbf16>, vector<64x512xbf16>, vector<2x512xf32> -> vector<2x512xf32>
    %144 = arith.addf %138, %143 : vector<2x512xf32>
    %c0_156 = arith.constant 0 : index
    %c9 = arith.constant 9 : index
    %c0_157 = arith.constant 0 : index
    %145 = vector.load %arg12[%c0_156, %c9, %c0_157] : memref<2x64x64xf32, #tpu.memory_space<vmem>>, vector<2x1x64xf32>
    %146 = vector.shape_cast %145 : vector<2x1x64xf32> to vector<2x64xf32>
    %147 = arith.truncf %146 : vector<2x64xf32> to vector<2x64xbf16>
    %c512 = arith.constant 512 : index
    %c0_158 = arith.constant 0 : index
    %148 = vector.load %arg6[%c512, %c0_158] : memref<3136x512xbf16, #tpu.memory_space<vmem>>, vector<64x512xbf16>
    %cst_159 = arith.constant dense<0.000000e+00> : vector<2x512xf32>
    %149 = tpu.matmul %147, %148, %cst_159 {dimension_numbers = #tpu.dot_dimension_numbers<[1], [0], [0], [1], [0, 0, 1, 1], [], []>} : vector<2x64xbf16>, vector<64x512xbf16>, vector<2x512xf32> -> vector<2x512xf32>
    %150 = arith.addf %144, %149 : vector<2x512xf32>
    %c0_160 = arith.constant 0 : index
    %c10 = arith.constant 10 : index
    %c0_161 = arith.constant 0 : index
    %151 = vector.load %arg12[%c0_160, %c10, %c0_161] : memref<2x64x64xf32, #tpu.memory_space<vmem>>, vector<2x1x64xf32>
    %152 = vector.shape_cast %151 : vector<2x1x64xf32> to vector<2x64xf32>
    %153 = arith.truncf %152 : vector<2x64xf32> to vector<2x64xbf16>
    %c576 = arith.constant 576 : index
    %c0_162 = arith.constant 0 : index
    %154 = vector.load %arg6[%c576, %c0_162] : memref<3136x512xbf16, #tpu.memory_space<vmem>>, vector<64x512xbf16>
    %cst_163 = arith.constant dense<0.000000e+00> : vector<2x512xf32>
    %155 = tpu.matmul %153, %154, %cst_163 {dimension_numbers = #tpu.dot_dimension_numbers<[1], [0], [0], [1], [0, 0, 1, 1], [], []>} : vector<2x64xbf16>, vector<64x512xbf16>, vector<2x512xf32> -> vector<2x512xf32>
    %156 = arith.addf %150, %155 : vector<2x512xf32>
    %c0_164 = arith.constant 0 : index
    %c11 = arith.constant 11 : index
    %c0_165 = arith.constant 0 : index
    %157 = vector.load %arg12[%c0_164, %c11, %c0_165] : memref<2x64x64xf32, #tpu.memory_space<vmem>>, vector<2x1x64xf32>
    %158 = vector.shape_cast %157 : vector<2x1x64xf32> to vector<2x64xf32>
    %159 = arith.truncf %158 : vector<2x64xf32> to vector<2x64xbf16>
    %c640 = arith.constant 640 : index
    %c0_166 = arith.constant 0 : index
    %160 = vector.load %arg6[%c640, %c0_166] : memref<3136x512xbf16, #tpu.memory_space<vmem>>, vector<64x512xbf16>
    %cst_167 = arith.constant dense<0.000000e+00> : vector<2x512xf32>
    %161 = tpu.matmul %159, %160, %cst_167 {dimension_numbers = #tpu.dot_dimension_numbers<[1], [0], [0], [1], [0, 0, 1, 1], [], []>} : vector<2x64xbf16>, vector<64x512xbf16>, vector<2x512xf32> -> vector<2x512xf32>
    %162 = arith.addf %156, %161 : vector<2x512xf32>
    %c0_168 = arith.constant 0 : index
    %c12 = arith.constant 12 : index
    %c0_169 = arith.constant 0 : index
    %163 = vector.load %arg12[%c0_168, %c12, %c0_169] : memref<2x64x64xf32, #tpu.memory_space<vmem>>, vector<2x1x64xf32>
    %164 = vector.shape_cast %163 : vector<2x1x64xf32> to vector<2x64xf32>
    %165 = arith.truncf %164 : vector<2x64xf32> to vector<2x64xbf16>
    %c704 = arith.constant 704 : index
    %c0_170 = arith.constant 0 : index
    %166 = vector.load %arg6[%c704, %c0_170] : memref<3136x512xbf16, #tpu.memory_space<vmem>>, vector<64x512xbf16>
    %cst_171 = arith.constant dense<0.000000e+00> : vector<2x512xf32>
    %167 = tpu.matmul %165, %166, %cst_171 {dimension_numbers = #tpu.dot_dimension_numbers<[1], [0], [0], [1], [0, 0, 1, 1], [], []>} : vector<2x64xbf16>, vector<64x512xbf16>, vector<2x512xf32> -> vector<2x512xf32>
    %168 = arith.addf %162, %167 : vector<2x512xf32>
    %c0_172 = arith.constant 0 : index
    %c13 = arith.constant 13 : index
    %c0_173 = arith.constant 0 : index
    %169 = vector.load %arg12[%c0_172, %c13, %c0_173] : memref<2x64x64xf32, #tpu.memory_space<vmem>>, vector<2x1x64xf32>
    %170 = vector.shape_cast %169 : vector<2x1x64xf32> to vector<2x64xf32>
    %171 = arith.truncf %170 : vector<2x64xf32> to vector<2x64xbf16>
    %c768 = arith.constant 768 : index
    %c0_174 = arith.constant 0 : index
    %172 = vector.load %arg6[%c768, %c0_174] : memref<3136x512xbf16, #tpu.memory_space<vmem>>, vector<64x512xbf16>
    %cst_175 = arith.constant dense<0.000000e+00> : vector<2x512xf32>
    %173 = tpu.matmul %171, %172, %cst_175 {dimension_numbers = #tpu.dot_dimension_numbers<[1], [0], [0], [1], [0, 0, 1, 1], [], []>} : vector<2x64xbf16>, vector<64x512xbf16>, vector<2x512xf32> -> vector<2x512xf32>
    %174 = arith.addf %168, %173 : vector<2x512xf32>
    %c0_176 = arith.constant 0 : index
    %c14 = arith.constant 14 : index
    %c0_177 = arith.constant 0 : index
    %175 = vector.load %arg12[%c0_176, %c14, %c0_177] : memref<2x64x64xf32, #tpu.memory_space<vmem>>, vector<2x1x64xf32>
    %176 = vector.shape_cast %175 : vector<2x1x64xf32> to vector<2x64xf32>
    %177 = arith.truncf %176 : vector<2x64xf32> to vector<2x64xbf16>
    %c832 = arith.constant 832 : index
    %c0_178 = arith.constant 0 : index
    %178 = vector.load %arg6[%c832, %c0_178] : memref<3136x512xbf16, #tpu.memory_space<vmem>>, vector<64x512xbf16>
    %cst_179 = arith.constant dense<0.000000e+00> : vector<2x512xf32>
    %179 = tpu.matmul %177, %178, %cst_179 {dimension_numbers = #tpu.dot_dimension_numbers<[1], [0], [0], [1], [0, 0, 1, 1], [], []>} : vector<2x64xbf16>, vector<64x512xbf16>, vector<2x512xf32> -> vector<2x512xf32>
    %180 = arith.addf %174, %179 : vector<2x512xf32>
    %c0_180 = arith.constant 0 : index
    %c16 = arith.constant 16 : index
    %c0_181 = arith.constant 0 : index
    %181 = vector.load %arg12[%c0_180, %c16, %c0_181] : memref<2x64x64xf32, #tpu.memory_space<vmem>>, vector<2x1x64xf32>
    %182 = vector.shape_cast %181 : vector<2x1x64xf32> to vector<2x64xf32>
    %183 = arith.truncf %182 : vector<2x64xf32> to vector<2x64xbf16>
    %c896 = arith.constant 896 : index
    %c0_182 = arith.constant 0 : index
    %184 = vector.load %arg6[%c896, %c0_182] : memref<3136x512xbf16, #tpu.memory_space<vmem>>, vector<64x512xbf16>
    %cst_183 = arith.constant dense<0.000000e+00> : vector<2x512xf32>
    %185 = tpu.matmul %183, %184, %cst_183 {dimension_numbers = #tpu.dot_dimension_numbers<[1], [0], [0], [1], [0, 0, 1, 1], [], []>} : vector<2x64xbf16>, vector<64x512xbf16>, vector<2x512xf32> -> vector<2x512xf32>
    %186 = arith.addf %180, %185 : vector<2x512xf32>
    %c0_184 = arith.constant 0 : index
    %c17 = arith.constant 17 : index
    %c0_185 = arith.constant 0 : index
    %187 = vector.load %arg12[%c0_184, %c17, %c0_185] : memref<2x64x64xf32, #tpu.memory_space<vmem>>, vector<2x1x64xf32>
    %188 = vector.shape_cast %187 : vector<2x1x64xf32> to vector<2x64xf32>
    %189 = arith.truncf %188 : vector<2x64xf32> to vector<2x64xbf16>
    %c960 = arith.constant 960 : index
    %c0_186 = arith.constant 0 : index
    %190 = vector.load %arg6[%c960, %c0_186] : memref<3136x512xbf16, #tpu.memory_space<vmem>>, vector<64x512xbf16>
    %cst_187 = arith.constant dense<0.000000e+00> : vector<2x512xf32>
    %191 = tpu.matmul %189, %190, %cst_187 {dimension_numbers = #tpu.dot_dimension_numbers<[1], [0], [0], [1], [0, 0, 1, 1], [], []>} : vector<2x64xbf16>, vector<64x512xbf16>, vector<2x512xf32> -> vector<2x512xf32>
    %192 = arith.addf %186, %191 : vector<2x512xf32>
    %c0_188 = arith.constant 0 : index
    %c18 = arith.constant 18 : index
    %c0_189 = arith.constant 0 : index
    %193 = vector.load %arg12[%c0_188, %c18, %c0_189] : memref<2x64x64xf32, #tpu.memory_space<vmem>>, vector<2x1x64xf32>
    %194 = vector.shape_cast %193 : vector<2x1x64xf32> to vector<2x64xf32>
    %195 = arith.truncf %194 : vector<2x64xf32> to vector<2x64xbf16>
    %c1024 = arith.constant 1024 : index
    %c0_190 = arith.constant 0 : index
    %196 = vector.load %arg6[%c1024, %c0_190] : memref<3136x512xbf16, #tpu.memory_space<vmem>>, vector<64x512xbf16>
    %cst_191 = arith.constant dense<0.000000e+00> : vector<2x512xf32>
    %197 = tpu.matmul %195, %196, %cst_191 {dimension_numbers = #tpu.dot_dimension_numbers<[1], [0], [0], [1], [0, 0, 1, 1], [], []>} : vector<2x64xbf16>, vector<64x512xbf16>, vector<2x512xf32> -> vector<2x512xf32>
    %198 = arith.addf %192, %197 : vector<2x512xf32>
    %c0_192 = arith.constant 0 : index
    %c19 = arith.constant 19 : index
    %c0_193 = arith.constant 0 : index
    %199 = vector.load %arg12[%c0_192, %c19, %c0_193] : memref<2x64x64xf32, #tpu.memory_space<vmem>>, vector<2x1x64xf32>
    %200 = vector.shape_cast %199 : vector<2x1x64xf32> to vector<2x64xf32>
    %201 = arith.truncf %200 : vector<2x64xf32> to vector<2x64xbf16>
    %c1088 = arith.constant 1088 : index
    %c0_194 = arith.constant 0 : index
    %202 = vector.load %arg6[%c1088, %c0_194] : memref<3136x512xbf16, #tpu.memory_space<vmem>>, vector<64x512xbf16>
    %cst_195 = arith.constant dense<0.000000e+00> : vector<2x512xf32>
    %203 = tpu.matmul %201, %202, %cst_195 {dimension_numbers = #tpu.dot_dimension_numbers<[1], [0], [0], [1], [0, 0, 1, 1], [], []>} : vector<2x64xbf16>, vector<64x512xbf16>, vector<2x512xf32> -> vector<2x512xf32>
    %204 = arith.addf %198, %203 : vector<2x512xf32>
    %c0_196 = arith.constant 0 : index
    %c20 = arith.constant 20 : index
    %c0_197 = arith.constant 0 : index
    %205 = vector.load %arg12[%c0_196, %c20, %c0_197] : memref<2x64x64xf32, #tpu.memory_space<vmem>>, vector<2x1x64xf32>
    %206 = vector.shape_cast %205 : vector<2x1x64xf32> to vector<2x64xf32>
    %207 = arith.truncf %206 : vector<2x64xf32> to vector<2x64xbf16>
    %c1152 = arith.constant 1152 : index
    %c0_198 = arith.constant 0 : index
    %208 = vector.load %arg6[%c1152, %c0_198] : memref<3136x512xbf16, #tpu.memory_space<vmem>>, vector<64x512xbf16>
    %cst_199 = arith.constant dense<0.000000e+00> : vector<2x512xf32>
    %209 = tpu.matmul %207, %208, %cst_199 {dimension_numbers = #tpu.dot_dimension_numbers<[1], [0], [0], [1], [0, 0, 1, 1], [], []>} : vector<2x64xbf16>, vector<64x512xbf16>, vector<2x512xf32> -> vector<2x512xf32>
    %210 = arith.addf %204, %209 : vector<2x512xf32>
    %c0_200 = arith.constant 0 : index
    %c21 = arith.constant 21 : index
    %c0_201 = arith.constant 0 : index
    %211 = vector.load %arg12[%c0_200, %c21, %c0_201] : memref<2x64x64xf32, #tpu.memory_space<vmem>>, vector<2x1x64xf32>
    %212 = vector.shape_cast %211 : vector<2x1x64xf32> to vector<2x64xf32>
    %213 = arith.truncf %212 : vector<2x64xf32> to vector<2x64xbf16>
    %c1216 = arith.constant 1216 : index
    %c0_202 = arith.constant 0 : index
    %214 = vector.load %arg6[%c1216, %c0_202] : memref<3136x512xbf16, #tpu.memory_space<vmem>>, vector<64x512xbf16>
    %cst_203 = arith.constant dense<0.000000e+00> : vector<2x512xf32>
    %215 = tpu.matmul %213, %214, %cst_203 {dimension_numbers = #tpu.dot_dimension_numbers<[1], [0], [0], [1], [0, 0, 1, 1], [], []>} : vector<2x64xbf16>, vector<64x512xbf16>, vector<2x512xf32> -> vector<2x512xf32>
    %216 = arith.addf %210, %215 : vector<2x512xf32>
    %c0_204 = arith.constant 0 : index
    %c22 = arith.constant 22 : index
    %c0_205 = arith.constant 0 : index
    %217 = vector.load %arg12[%c0_204, %c22, %c0_205] : memref<2x64x64xf32, #tpu.memory_space<vmem>>, vector<2x1x64xf32>
    %218 = vector.shape_cast %217 : vector<2x1x64xf32> to vector<2x64xf32>
    %219 = arith.truncf %218 : vector<2x64xf32> to vector<2x64xbf16>
    %c1280 = arith.constant 1280 : index
    %c0_206 = arith.constant 0 : index
    %220 = vector.load %arg6[%c1280, %c0_206] : memref<3136x512xbf16, #tpu.memory_space<vmem>>, vector<64x512xbf16>
    %cst_207 = arith.constant dense<0.000000e+00> : vector<2x512xf32>
    %221 = tpu.matmul %219, %220, %cst_207 {dimension_numbers = #tpu.dot_dimension_numbers<[1], [0], [0], [1], [0, 0, 1, 1], [], []>} : vector<2x64xbf16>, vector<64x512xbf16>, vector<2x512xf32> -> vector<2x512xf32>
    %222 = arith.addf %216, %221 : vector<2x512xf32>
    %c0_208 = arith.constant 0 : index
    %c24 = arith.constant 24 : index
    %c0_209 = arith.constant 0 : index
    %223 = vector.load %arg12[%c0_208, %c24, %c0_209] : memref<2x64x64xf32, #tpu.memory_space<vmem>>, vector<2x1x64xf32>
    %224 = vector.shape_cast %223 : vector<2x1x64xf32> to vector<2x64xf32>
    %225 = arith.truncf %224 : vector<2x64xf32> to vector<2x64xbf16>
    %c1344 = arith.constant 1344 : index
    %c0_210 = arith.constant 0 : index
    %226 = vector.load %arg6[%c1344, %c0_210] : memref<3136x512xbf16, #tpu.memory_space<vmem>>, vector<64x512xbf16>
    %cst_211 = arith.constant dense<0.000000e+00> : vector<2x512xf32>
    %227 = tpu.matmul %225, %226, %cst_211 {dimension_numbers = #tpu.dot_dimension_numbers<[1], [0], [0], [1], [0, 0, 1, 1], [], []>} : vector<2x64xbf16>, vector<64x512xbf16>, vector<2x512xf32> -> vector<2x512xf32>
    %228 = arith.addf %222, %227 : vector<2x512xf32>
    %c0_212 = arith.constant 0 : index
    %c25 = arith.constant 25 : index
    %c0_213 = arith.constant 0 : index
    %229 = vector.load %arg12[%c0_212, %c25, %c0_213] : memref<2x64x64xf32, #tpu.memory_space<vmem>>, vector<2x1x64xf32>
    %230 = vector.shape_cast %229 : vector<2x1x64xf32> to vector<2x64xf32>
    %231 = arith.truncf %230 : vector<2x64xf32> to vector<2x64xbf16>
    %c1408 = arith.constant 1408 : index
    %c0_214 = arith.constant 0 : index
    %232 = vector.load %arg6[%c1408, %c0_214] : memref<3136x512xbf16, #tpu.memory_space<vmem>>, vector<64x512xbf16>
    %cst_215 = arith.constant dense<0.000000e+00> : vector<2x512xf32>
    %233 = tpu.matmul %231, %232, %cst_215 {dimension_numbers = #tpu.dot_dimension_numbers<[1], [0], [0], [1], [0, 0, 1, 1], [], []>} : vector<2x64xbf16>, vector<64x512xbf16>, vector<2x512xf32> -> vector<2x512xf32>
    %234 = arith.addf %228, %233 : vector<2x512xf32>
    %c0_216 = arith.constant 0 : index
    %c26 = arith.constant 26 : index
    %c0_217 = arith.constant 0 : index
    %235 = vector.load %arg12[%c0_216, %c26, %c0_217] : memref<2x64x64xf32, #tpu.memory_space<vmem>>, vector<2x1x64xf32>
    %236 = vector.shape_cast %235 : vector<2x1x64xf32> to vector<2x64xf32>
    %237 = arith.truncf %236 : vector<2x64xf32> to vector<2x64xbf16>
    %c1472 = arith.constant 1472 : index
    %c0_218 = arith.constant 0 : index
    %238 = vector.load %arg6[%c1472, %c0_218] : memref<3136x512xbf16, #tpu.memory_space<vmem>>, vector<64x512xbf16>
    %cst_219 = arith.constant dense<0.000000e+00> : vector<2x512xf32>
    %239 = tpu.matmul %237, %238, %cst_219 {dimension_numbers = #tpu.dot_dimension_numbers<[1], [0], [0], [1], [0, 0, 1, 1], [], []>} : vector<2x64xbf16>, vector<64x512xbf16>, vector<2x512xf32> -> vector<2x512xf32>
    %240 = arith.addf %234, %239 : vector<2x512xf32>
    %c0_220 = arith.constant 0 : index
    %c27 = arith.constant 27 : index
    %c0_221 = arith.constant 0 : index
    %241 = vector.load %arg12[%c0_220, %c27, %c0_221] : memref<2x64x64xf32, #tpu.memory_space<vmem>>, vector<2x1x64xf32>
    %242 = vector.shape_cast %241 : vector<2x1x64xf32> to vector<2x64xf32>
    %243 = arith.truncf %242 : vector<2x64xf32> to vector<2x64xbf16>
    %c1536 = arith.constant 1536 : index
    %c0_222 = arith.constant 0 : index
    %244 = vector.load %arg6[%c1536, %c0_222] : memref<3136x512xbf16, #tpu.memory_space<vmem>>, vector<64x512xbf16>
    %cst_223 = arith.constant dense<0.000000e+00> : vector<2x512xf32>
    %245 = tpu.matmul %243, %244, %cst_223 {dimension_numbers = #tpu.dot_dimension_numbers<[1], [0], [0], [1], [0, 0, 1, 1], [], []>} : vector<2x64xbf16>, vector<64x512xbf16>, vector<2x512xf32> -> vector<2x512xf32>
    %246 = arith.addf %240, %245 : vector<2x512xf32>
    %c0_224 = arith.constant 0 : index
    %c28 = arith.constant 28 : index
    %c0_225 = arith.constant 0 : index
    %247 = vector.load %arg12[%c0_224, %c28, %c0_225] : memref<2x64x64xf32, #tpu.memory_space<vmem>>, vector<2x1x64xf32>
    %248 = vector.shape_cast %247 : vector<2x1x64xf32> to vector<2x64xf32>
    %249 = arith.truncf %248 : vector<2x64xf32> to vector<2x64xbf16>
    %c1600 = arith.constant 1600 : index
    %c0_226 = arith.constant 0 : index
    %250 = vector.load %arg6[%c1600, %c0_226] : memref<3136x512xbf16, #tpu.memory_space<vmem>>, vector<64x512xbf16>
    %cst_227 = arith.constant dense<0.000000e+00> : vector<2x512xf32>
    %251 = tpu.matmul %249, %250, %cst_227 {dimension_numbers = #tpu.dot_dimension_numbers<[1], [0], [0], [1], [0, 0, 1, 1], [], []>} : vector<2x64xbf16>, vector<64x512xbf16>, vector<2x512xf32> -> vector<2x512xf32>
    %252 = arith.addf %246, %251 : vector<2x512xf32>
    %c0_228 = arith.constant 0 : index
    %c29 = arith.constant 29 : index
    %c0_229 = arith.constant 0 : index
    %253 = vector.load %arg12[%c0_228, %c29, %c0_229] : memref<2x64x64xf32, #tpu.memory_space<vmem>>, vector<2x1x64xf32>
    %254 = vector.shape_cast %253 : vector<2x1x64xf32> to vector<2x64xf32>
    %255 = arith.truncf %254 : vector<2x64xf32> to vector<2x64xbf16>
    %c1664 = arith.constant 1664 : index
    %c0_230 = arith.constant 0 : index
    %256 = vector.load %arg6[%c1664, %c0_230] : memref<3136x512xbf16, #tpu.memory_space<vmem>>, vector<64x512xbf16>
    %cst_231 = arith.constant dense<0.000000e+00> : vector<2x512xf32>
    %257 = tpu.matmul %255, %256, %cst_231 {dimension_numbers = #tpu.dot_dimension_numbers<[1], [0], [0], [1], [0, 0, 1, 1], [], []>} : vector<2x64xbf16>, vector<64x512xbf16>, vector<2x512xf32> -> vector<2x512xf32>
    %258 = arith.addf %252, %257 : vector<2x512xf32>
    %c0_232 = arith.constant 0 : index
    %c30 = arith.constant 30 : index
    %c0_233 = arith.constant 0 : index
    %259 = vector.load %arg12[%c0_232, %c30, %c0_233] : memref<2x64x64xf32, #tpu.memory_space<vmem>>, vector<2x1x64xf32>
    %260 = vector.shape_cast %259 : vector<2x1x64xf32> to vector<2x64xf32>
    %261 = arith.truncf %260 : vector<2x64xf32> to vector<2x64xbf16>
    %c1728 = arith.constant 1728 : index
    %c0_234 = arith.constant 0 : index
    %262 = vector.load %arg6[%c1728, %c0_234] : memref<3136x512xbf16, #tpu.memory_space<vmem>>, vector<64x512xbf16>
    %cst_235 = arith.constant dense<0.000000e+00> : vector<2x512xf32>
    %263 = tpu.matmul %261, %262, %cst_235 {dimension_numbers = #tpu.dot_dimension_numbers<[1], [0], [0], [1], [0, 0, 1, 1], [], []>} : vector<2x64xbf16>, vector<64x512xbf16>, vector<2x512xf32> -> vector<2x512xf32>
    %264 = arith.addf %258, %263 : vector<2x512xf32>
    %c0_236 = arith.constant 0 : index
    %c32 = arith.constant 32 : index
    %c0_237 = arith.constant 0 : index
    %265 = vector.load %arg12[%c0_236, %c32, %c0_237] : memref<2x64x64xf32, #tpu.memory_space<vmem>>, vector<2x1x64xf32>
    %266 = vector.shape_cast %265 : vector<2x1x64xf32> to vector<2x64xf32>
    %267 = arith.truncf %266 : vector<2x64xf32> to vector<2x64xbf16>
    %c1792 = arith.constant 1792 : index
    %c0_238 = arith.constant 0 : index
    %268 = vector.load %arg6[%c1792, %c0_238] : memref<3136x512xbf16, #tpu.memory_space<vmem>>, vector<64x512xbf16>
    %cst_239 = arith.constant dense<0.000000e+00> : vector<2x512xf32>
    %269 = tpu.matmul %267, %268, %cst_239 {dimension_numbers = #tpu.dot_dimension_numbers<[1], [0], [0], [1], [0, 0, 1, 1], [], []>} : vector<2x64xbf16>, vector<64x512xbf16>, vector<2x512xf32> -> vector<2x512xf32>
    %270 = arith.addf %264, %269 : vector<2x512xf32>
    %c0_240 = arith.constant 0 : index
    %c33 = arith.constant 33 : index
    %c0_241 = arith.constant 0 : index
    %271 = vector.load %arg12[%c0_240, %c33, %c0_241] : memref<2x64x64xf32, #tpu.memory_space<vmem>>, vector<2x1x64xf32>
    %272 = vector.shape_cast %271 : vector<2x1x64xf32> to vector<2x64xf32>
    %273 = arith.truncf %272 : vector<2x64xf32> to vector<2x64xbf16>
    %c1856 = arith.constant 1856 : index
    %c0_242 = arith.constant 0 : index
    %274 = vector.load %arg6[%c1856, %c0_242] : memref<3136x512xbf16, #tpu.memory_space<vmem>>, vector<64x512xbf16>
    %cst_243 = arith.constant dense<0.000000e+00> : vector<2x512xf32>
    %275 = tpu.matmul %273, %274, %cst_243 {dimension_numbers = #tpu.dot_dimension_numbers<[1], [0], [0], [1], [0, 0, 1, 1], [], []>} : vector<2x64xbf16>, vector<64x512xbf16>, vector<2x512xf32> -> vector<2x512xf32>
    %276 = arith.addf %270, %275 : vector<2x512xf32>
    %c0_244 = arith.constant 0 : index
    %c34 = arith.constant 34 : index
    %c0_245 = arith.constant 0 : index
    %277 = vector.load %arg12[%c0_244, %c34, %c0_245] : memref<2x64x64xf32, #tpu.memory_space<vmem>>, vector<2x1x64xf32>
    %278 = vector.shape_cast %277 : vector<2x1x64xf32> to vector<2x64xf32>
    %279 = arith.truncf %278 : vector<2x64xf32> to vector<2x64xbf16>
    %c1920 = arith.constant 1920 : index
    %c0_246 = arith.constant 0 : index
    %280 = vector.load %arg6[%c1920, %c0_246] : memref<3136x512xbf16, #tpu.memory_space<vmem>>, vector<64x512xbf16>
    %cst_247 = arith.constant dense<0.000000e+00> : vector<2x512xf32>
    %281 = tpu.matmul %279, %280, %cst_247 {dimension_numbers = #tpu.dot_dimension_numbers<[1], [0], [0], [1], [0, 0, 1, 1], [], []>} : vector<2x64xbf16>, vector<64x512xbf16>, vector<2x512xf32> -> vector<2x512xf32>
    %282 = arith.addf %276, %281 : vector<2x512xf32>
    %c0_248 = arith.constant 0 : index
    %c35 = arith.constant 35 : index
    %c0_249 = arith.constant 0 : index
    %283 = vector.load %arg12[%c0_248, %c35, %c0_249] : memref<2x64x64xf32, #tpu.memory_space<vmem>>, vector<2x1x64xf32>
    %284 = vector.shape_cast %283 : vector<2x1x64xf32> to vector<2x64xf32>
    %285 = arith.truncf %284 : vector<2x64xf32> to vector<2x64xbf16>
    %c1984 = arith.constant 1984 : index
    %c0_250 = arith.constant 0 : index
    %286 = vector.load %arg6[%c1984, %c0_250] : memref<3136x512xbf16, #tpu.memory_space<vmem>>, vector<64x512xbf16>
    %cst_251 = arith.constant dense<0.000000e+00> : vector<2x512xf32>
    %287 = tpu.matmul %285, %286, %cst_251 {dimension_numbers = #tpu.dot_dimension_numbers<[1], [0], [0], [1], [0, 0, 1, 1], [], []>} : vector<2x64xbf16>, vector<64x512xbf16>, vector<2x512xf32> -> vector<2x512xf32>
    %288 = arith.addf %282, %287 : vector<2x512xf32>
    %c0_252 = arith.constant 0 : index
    %c36 = arith.constant 36 : index
    %c0_253 = arith.constant 0 : index
    %289 = vector.load %arg12[%c0_252, %c36, %c0_253] : memref<2x64x64xf32, #tpu.memory_space<vmem>>, vector<2x1x64xf32>
    %290 = vector.shape_cast %289 : vector<2x1x64xf32> to vector<2x64xf32>
    %291 = arith.truncf %290 : vector<2x64xf32> to vector<2x64xbf16>
    %c2048 = arith.constant 2048 : index
    %c0_254 = arith.constant 0 : index
    %292 = vector.load %arg6[%c2048, %c0_254] : memref<3136x512xbf16, #tpu.memory_space<vmem>>, vector<64x512xbf16>
    %cst_255 = arith.constant dense<0.000000e+00> : vector<2x512xf32>
    %293 = tpu.matmul %291, %292, %cst_255 {dimension_numbers = #tpu.dot_dimension_numbers<[1], [0], [0], [1], [0, 0, 1, 1], [], []>} : vector<2x64xbf16>, vector<64x512xbf16>, vector<2x512xf32> -> vector<2x512xf32>
    %294 = arith.addf %288, %293 : vector<2x512xf32>
    %c0_256 = arith.constant 0 : index
    %c37 = arith.constant 37 : index
    %c0_257 = arith.constant 0 : index
    %295 = vector.load %arg12[%c0_256, %c37, %c0_257] : memref<2x64x64xf32, #tpu.memory_space<vmem>>, vector<2x1x64xf32>
    %296 = vector.shape_cast %295 : vector<2x1x64xf32> to vector<2x64xf32>
    %297 = arith.truncf %296 : vector<2x64xf32> to vector<2x64xbf16>
    %c2112 = arith.constant 2112 : index
    %c0_258 = arith.constant 0 : index
    %298 = vector.load %arg6[%c2112, %c0_258] : memref<3136x512xbf16, #tpu.memory_space<vmem>>, vector<64x512xbf16>
    %cst_259 = arith.constant dense<0.000000e+00> : vector<2x512xf32>
    %299 = tpu.matmul %297, %298, %cst_259 {dimension_numbers = #tpu.dot_dimension_numbers<[1], [0], [0], [1], [0, 0, 1, 1], [], []>} : vector<2x64xbf16>, vector<64x512xbf16>, vector<2x512xf32> -> vector<2x512xf32>
    %300 = arith.addf %294, %299 : vector<2x512xf32>
    %c0_260 = arith.constant 0 : index
    %c38 = arith.constant 38 : index
    %c0_261 = arith.constant 0 : index
    %301 = vector.load %arg12[%c0_260, %c38, %c0_261] : memref<2x64x64xf32, #tpu.memory_space<vmem>>, vector<2x1x64xf32>
    %302 = vector.shape_cast %301 : vector<2x1x64xf32> to vector<2x64xf32>
    %303 = arith.truncf %302 : vector<2x64xf32> to vector<2x64xbf16>
    %c2176 = arith.constant 2176 : index
    %c0_262 = arith.constant 0 : index
    %304 = vector.load %arg6[%c2176, %c0_262] : memref<3136x512xbf16, #tpu.memory_space<vmem>>, vector<64x512xbf16>
    %cst_263 = arith.constant dense<0.000000e+00> : vector<2x512xf32>
    %305 = tpu.matmul %303, %304, %cst_263 {dimension_numbers = #tpu.dot_dimension_numbers<[1], [0], [0], [1], [0, 0, 1, 1], [], []>} : vector<2x64xbf16>, vector<64x512xbf16>, vector<2x512xf32> -> vector<2x512xf32>
    %306 = arith.addf %300, %305 : vector<2x512xf32>
    %c0_264 = arith.constant 0 : index
    %c40 = arith.constant 40 : index
    %c0_265 = arith.constant 0 : index
    %307 = vector.load %arg12[%c0_264, %c40, %c0_265] : memref<2x64x64xf32, #tpu.memory_space<vmem>>, vector<2x1x64xf32>
    %308 = vector.shape_cast %307 : vector<2x1x64xf32> to vector<2x64xf32>
    %309 = arith.truncf %308 : vector<2x64xf32> to vector<2x64xbf16>
    %c2240 = arith.constant 2240 : index
    %c0_266 = arith.constant 0 : index
    %310 = vector.load %arg6[%c2240, %c0_266] : memref<3136x512xbf16, #tpu.memory_space<vmem>>, vector<64x512xbf16>
    %cst_267 = arith.constant dense<0.000000e+00> : vector<2x512xf32>
    %311 = tpu.matmul %309, %310, %cst_267 {dimension_numbers = #tpu.dot_dimension_numbers<[1], [0], [0], [1], [0, 0, 1, 1], [], []>} : vector<2x64xbf16>, vector<64x512xbf16>, vector<2x512xf32> -> vector<2x512xf32>
    %312 = arith.addf %306, %311 : vector<2x512xf32>
    %c0_268 = arith.constant 0 : index
    %c41 = arith.constant 41 : index
    %c0_269 = arith.constant 0 : index
    %313 = vector.load %arg12[%c0_268, %c41, %c0_269] : memref<2x64x64xf32, #tpu.memory_space<vmem>>, vector<2x1x64xf32>
    %314 = vector.shape_cast %313 : vector<2x1x64xf32> to vector<2x64xf32>
    %315 = arith.truncf %314 : vector<2x64xf32> to vector<2x64xbf16>
    %c2304 = arith.constant 2304 : index
    %c0_270 = arith.constant 0 : index
    %316 = vector.load %arg6[%c2304, %c0_270] : memref<3136x512xbf16, #tpu.memory_space<vmem>>, vector<64x512xbf16>
    %cst_271 = arith.constant dense<0.000000e+00> : vector<2x512xf32>
    %317 = tpu.matmul %315, %316, %cst_271 {dimension_numbers = #tpu.dot_dimension_numbers<[1], [0], [0], [1], [0, 0, 1, 1], [], []>} : vector<2x64xbf16>, vector<64x512xbf16>, vector<2x512xf32> -> vector<2x512xf32>
    %318 = arith.addf %312, %317 : vector<2x512xf32>
    %c0_272 = arith.constant 0 : index
    %c42 = arith.constant 42 : index
    %c0_273 = arith.constant 0 : index
    %319 = vector.load %arg12[%c0_272, %c42, %c0_273] : memref<2x64x64xf32, #tpu.memory_space<vmem>>, vector<2x1x64xf32>
    %320 = vector.shape_cast %319 : vector<2x1x64xf32> to vector<2x64xf32>
    %321 = arith.truncf %320 : vector<2x64xf32> to vector<2x64xbf16>
    %c2368 = arith.constant 2368 : index
    %c0_274 = arith.constant 0 : index
    %322 = vector.load %arg6[%c2368, %c0_274] : memref<3136x512xbf16, #tpu.memory_space<vmem>>, vector<64x512xbf16>
    %cst_275 = arith.constant dense<0.000000e+00> : vector<2x512xf32>
    %323 = tpu.matmul %321, %322, %cst_275 {dimension_numbers = #tpu.dot_dimension_numbers<[1], [0], [0], [1], [0, 0, 1, 1], [], []>} : vector<2x64xbf16>, vector<64x512xbf16>, vector<2x512xf32> -> vector<2x512xf32>
    %324 = arith.addf %318, %323 : vector<2x512xf32>
    %c0_276 = arith.constant 0 : index
    %c43 = arith.constant 43 : index
    %c0_277 = arith.constant 0 : index
    %325 = vector.load %arg12[%c0_276, %c43, %c0_277] : memref<2x64x64xf32, #tpu.memory_space<vmem>>, vector<2x1x64xf32>
    %326 = vector.shape_cast %325 : vector<2x1x64xf32> to vector<2x64xf32>
    %327 = arith.truncf %326 : vector<2x64xf32> to vector<2x64xbf16>
    %c2432 = arith.constant 2432 : index
    %c0_278 = arith.constant 0 : index
    %328 = vector.load %arg6[%c2432, %c0_278] : memref<3136x512xbf16, #tpu.memory_space<vmem>>, vector<64x512xbf16>
    %cst_279 = arith.constant dense<0.000000e+00> : vector<2x512xf32>
    %329 = tpu.matmul %327, %328, %cst_279 {dimension_numbers = #tpu.dot_dimension_numbers<[1], [0], [0], [1], [0, 0, 1, 1], [], []>} : vector<2x64xbf16>, vector<64x512xbf16>, vector<2x512xf32> -> vector<2x512xf32>
    %330 = arith.addf %324, %329 : vector<2x512xf32>
    %c0_280 = arith.constant 0 : index
    %c44 = arith.constant 44 : index
    %c0_281 = arith.constant 0 : index
    %331 = vector.load %arg12[%c0_280, %c44, %c0_281] : memref<2x64x64xf32, #tpu.memory_space<vmem>>, vector<2x1x64xf32>
    %332 = vector.shape_cast %331 : vector<2x1x64xf32> to vector<2x64xf32>
    %333 = arith.truncf %332 : vector<2x64xf32> to vector<2x64xbf16>
    %c2496 = arith.constant 2496 : index
    %c0_282 = arith.constant 0 : index
    %334 = vector.load %arg6[%c2496, %c0_282] : memref<3136x512xbf16, #tpu.memory_space<vmem>>, vector<64x512xbf16>
    %cst_283 = arith.constant dense<0.000000e+00> : vector<2x512xf32>
    %335 = tpu.matmul %333, %334, %cst_283 {dimension_numbers = #tpu.dot_dimension_numbers<[1], [0], [0], [1], [0, 0, 1, 1], [], []>} : vector<2x64xbf16>, vector<64x512xbf16>, vector<2x512xf32> -> vector<2x512xf32>
    %336 = arith.addf %330, %335 : vector<2x512xf32>
    %c0_284 = arith.constant 0 : index
    %c45 = arith.constant 45 : index
    %c0_285 = arith.constant 0 : index
    %337 = vector.load %arg12[%c0_284, %c45, %c0_285] : memref<2x64x64xf32, #tpu.memory_space<vmem>>, vector<2x1x64xf32>
    %338 = vector.shape_cast %337 : vector<2x1x64xf32> to vector<2x64xf32>
    %339 = arith.truncf %338 : vector<2x64xf32> to vector<2x64xbf16>
    %c2560 = arith.constant 2560 : index
    %c0_286 = arith.constant 0 : index
    %340 = vector.load %arg6[%c2560, %c0_286] : memref<3136x512xbf16, #tpu.memory_space<vmem>>, vector<64x512xbf16>
    %cst_287 = arith.constant dense<0.000000e+00> : vector<2x512xf32>
    %341 = tpu.matmul %339, %340, %cst_287 {dimension_numbers = #tpu.dot_dimension_numbers<[1], [0], [0], [1], [0, 0, 1, 1], [], []>} : vector<2x64xbf16>, vector<64x512xbf16>, vector<2x512xf32> -> vector<2x512xf32>
    %342 = arith.addf %336, %341 : vector<2x512xf32>
    %c0_288 = arith.constant 0 : index
    %c46 = arith.constant 46 : index
    %c0_289 = arith.constant 0 : index
    %343 = vector.load %arg12[%c0_288, %c46, %c0_289] : memref<2x64x64xf32, #tpu.memory_space<vmem>>, vector<2x1x64xf32>
    %344 = vector.shape_cast %343 : vector<2x1x64xf32> to vector<2x64xf32>
    %345 = arith.truncf %344 : vector<2x64xf32> to vector<2x64xbf16>
    %c2624 = arith.constant 2624 : index
    %c0_290 = arith.constant 0 : index
    %346 = vector.load %arg6[%c2624, %c0_290] : memref<3136x512xbf16, #tpu.memory_space<vmem>>, vector<64x512xbf16>
    %cst_291 = arith.constant dense<0.000000e+00> : vector<2x512xf32>
    %347 = tpu.matmul %345, %346, %cst_291 {dimension_numbers = #tpu.dot_dimension_numbers<[1], [0], [0], [1], [0, 0, 1, 1], [], []>} : vector<2x64xbf16>, vector<64x512xbf16>, vector<2x512xf32> -> vector<2x512xf32>
    %348 = arith.addf %342, %347 : vector<2x512xf32>
    %c0_292 = arith.constant 0 : index
    %c48 = arith.constant 48 : index
    %c0_293 = arith.constant 0 : index
    %349 = vector.load %arg12[%c0_292, %c48, %c0_293] : memref<2x64x64xf32, #tpu.memory_space<vmem>>, vector<2x1x64xf32>
    %350 = vector.shape_cast %349 : vector<2x1x64xf32> to vector<2x64xf32>
    %351 = arith.truncf %350 : vector<2x64xf32> to vector<2x64xbf16>
    %c2688 = arith.constant 2688 : index
    %c0_294 = arith.constant 0 : index
    %352 = vector.load %arg6[%c2688, %c0_294] : memref<3136x512xbf16, #tpu.memory_space<vmem>>, vector<64x512xbf16>
    %cst_295 = arith.constant dense<0.000000e+00> : vector<2x512xf32>
    %353 = tpu.matmul %351, %352, %cst_295 {dimension_numbers = #tpu.dot_dimension_numbers<[1], [0], [0], [1], [0, 0, 1, 1], [], []>} : vector<2x64xbf16>, vector<64x512xbf16>, vector<2x512xf32> -> vector<2x512xf32>
    %354 = arith.addf %348, %353 : vector<2x512xf32>
    %c0_296 = arith.constant 0 : index
    %c49 = arith.constant 49 : index
    %c0_297 = arith.constant 0 : index
    %355 = vector.load %arg12[%c0_296, %c49, %c0_297] : memref<2x64x64xf32, #tpu.memory_space<vmem>>, vector<2x1x64xf32>
    %356 = vector.shape_cast %355 : vector<2x1x64xf32> to vector<2x64xf32>
    %357 = arith.truncf %356 : vector<2x64xf32> to vector<2x64xbf16>
    %c2752 = arith.constant 2752 : index
    %c0_298 = arith.constant 0 : index
    %358 = vector.load %arg6[%c2752, %c0_298] : memref<3136x512xbf16, #tpu.memory_space<vmem>>, vector<64x512xbf16>
    %cst_299 = arith.constant dense<0.000000e+00> : vector<2x512xf32>
    %359 = tpu.matmul %357, %358, %cst_299 {dimension_numbers = #tpu.dot_dimension_numbers<[1], [0], [0], [1], [0, 0, 1, 1], [], []>} : vector<2x64xbf16>, vector<64x512xbf16>, vector<2x512xf32> -> vector<2x512xf32>
    %360 = arith.addf %354, %359 : vector<2x512xf32>
    %c0_300 = arith.constant 0 : index
    %c50 = arith.constant 50 : index
    %c0_301 = arith.constant 0 : index
    %361 = vector.load %arg12[%c0_300, %c50, %c0_301] : memref<2x64x64xf32, #tpu.memory_space<vmem>>, vector<2x1x64xf32>
    %362 = vector.shape_cast %361 : vector<2x1x64xf32> to vector<2x64xf32>
    %363 = arith.truncf %362 : vector<2x64xf32> to vector<2x64xbf16>
    %c2816 = arith.constant 2816 : index
    %c0_302 = arith.constant 0 : index
    %364 = vector.load %arg6[%c2816, %c0_302] : memref<3136x512xbf16, #tpu.memory_space<vmem>>, vector<64x512xbf16>
    %cst_303 = arith.constant dense<0.000000e+00> : vector<2x512xf32>
    %365 = tpu.matmul %363, %364, %cst_303 {dimension_numbers = #tpu.dot_dimension_numbers<[1], [0], [0], [1], [0, 0, 1, 1], [], []>} : vector<2x64xbf16>, vector<64x512xbf16>, vector<2x512xf32> -> vector<2x512xf32>
    %366 = arith.addf %360, %365 : vector<2x512xf32>
    %c0_304 = arith.constant 0 : index
    %c51 = arith.constant 51 : index
    %c0_305 = arith.constant 0 : index
    %367 = vector.load %arg12[%c0_304, %c51, %c0_305] : memref<2x64x64xf32, #tpu.memory_space<vmem>>, vector<2x1x64xf32>
    %368 = vector.shape_cast %367 : vector<2x1x64xf32> to vector<2x64xf32>
    %369 = arith.truncf %368 : vector<2x64xf32> to vector<2x64xbf16>
    %c2880 = arith.constant 2880 : index
    %c0_306 = arith.constant 0 : index
    %370 = vector.load %arg6[%c2880, %c0_306] : memref<3136x512xbf16, #tpu.memory_space<vmem>>, vector<64x512xbf16>
    %cst_307 = arith.constant dense<0.000000e+00> : vector<2x512xf32>
    %371 = tpu.matmul %369, %370, %cst_307 {dimension_numbers = #tpu.dot_dimension_numbers<[1], [0], [0], [1], [0, 0, 1, 1], [], []>} : vector<2x64xbf16>, vector<64x512xbf16>, vector<2x512xf32> -> vector<2x512xf32>
    %372 = arith.addf %366, %371 : vector<2x512xf32>
    %c0_308 = arith.constant 0 : index
    %c52 = arith.constant 52 : index
    %c0_309 = arith.constant 0 : index
    %373 = vector.load %arg12[%c0_308, %c52, %c0_309] : memref<2x64x64xf32, #tpu.memory_space<vmem>>, vector<2x1x64xf32>
    %374 = vector.shape_cast %373 : vector<2x1x64xf32> to vector<2x64xf32>
    %375 = arith.truncf %374 : vector<2x64xf32> to vector<2x64xbf16>
    %c2944 = arith.constant 2944 : index
    %c0_310 = arith.constant 0 : index
    %376 = vector.load %arg6[%c2944, %c0_310] : memref<3136x512xbf16, #tpu.memory_space<vmem>>, vector<64x512xbf16>
    %cst_311 = arith.constant dense<0.000000e+00> : vector<2x512xf32>
    %377 = tpu.matmul %375, %376, %cst_311 {dimension_numbers = #tpu.dot_dimension_numbers<[1], [0], [0], [1], [0, 0, 1, 1], [], []>} : vector<2x64xbf16>, vector<64x512xbf16>, vector<2x512xf32> -> vector<2x512xf32>
    %378 = arith.addf %372, %377 : vector<2x512xf32>
    %c0_312 = arith.constant 0 : index
    %c53 = arith.constant 53 : index
    %c0_313 = arith.constant 0 : index
    %379 = vector.load %arg12[%c0_312, %c53, %c0_313] : memref<2x64x64xf32, #tpu.memory_space<vmem>>, vector<2x1x64xf32>
    %380 = vector.shape_cast %379 : vector<2x1x64xf32> to vector<2x64xf32>
    %381 = arith.truncf %380 : vector<2x64xf32> to vector<2x64xbf16>
    %c3008 = arith.constant 3008 : index
    %c0_314 = arith.constant 0 : index
    %382 = vector.load %arg6[%c3008, %c0_314] : memref<3136x512xbf16, #tpu.memory_space<vmem>>, vector<64x512xbf16>
    %cst_315 = arith.constant dense<0.000000e+00> : vector<2x512xf32>
    %383 = tpu.matmul %381, %382, %cst_315 {dimension_numbers = #tpu.dot_dimension_numbers<[1], [0], [0], [1], [0, 0, 1, 1], [], []>} : vector<2x64xbf16>, vector<64x512xbf16>, vector<2x512xf32> -> vector<2x512xf32>
    %384 = arith.addf %378, %383 : vector<2x512xf32>
    %c0_316 = arith.constant 0 : index
    %c54 = arith.constant 54 : index
    %c0_317 = arith.constant 0 : index
    %385 = vector.load %arg12[%c0_316, %c54, %c0_317] : memref<2x64x64xf32, #tpu.memory_space<vmem>>, vector<2x1x64xf32>
    %386 = vector.shape_cast %385 : vector<2x1x64xf32> to vector<2x64xf32>
    %387 = arith.truncf %386 : vector<2x64xf32> to vector<2x64xbf16>
    %c3072 = arith.constant 3072 : index
    %c0_318 = arith.constant 0 : index
    %388 = vector.load %arg6[%c3072, %c0_318] : memref<3136x512xbf16, #tpu.memory_space<vmem>>, vector<64x512xbf16>
    %cst_319 = arith.constant dense<0.000000e+00> : vector<2x512xf32>
    %389 = tpu.matmul %387, %388, %cst_319 {dimension_numbers = #tpu.dot_dimension_numbers<[1], [0], [0], [1], [0, 0, 1, 1], [], []>} : vector<2x64xbf16>, vector<64x512xbf16>, vector<2x512xf32> -> vector<2x512xf32>
    %390 = arith.addf %384, %389 : vector<2x512xf32>
    %c0_320 = arith.constant 0 : index
    %c0_321 = arith.constant 0 : index
    %391 = vector.load %arg7[%c0_320, %c0_321] : memref<1x512xf32, #tpu.memory_space<vmem>>, vector<1x512xf32>
    %392 = vector.broadcast %391 : vector<1x512xf32> to vector<2x512xf32>
    %393 = arith.addf %390, %392 : vector<2x512xf32>
    %cst_322 = arith.constant 0.000000e+00 : f32
    %394 = vector.broadcast %cst_322 : f32 to vector<2x512xf32>
    %395 = arith.maximumf %393, %394 : vector<2x512xf32>
    %c0_323 = arith.constant 0 : index
    %c0_324 = arith.constant 0 : index
    %396 = vector.load %arg8[%c0_323, %c0_324] : memref<512x4xf32, #tpu.memory_space<vmem>>, vector<512x4xf32>
    %cst_325 = arith.constant dense<0.000000e+00> : vector<2x4xf32>
    %397 = tpu.matmul %395, %396, %cst_325 {dimension_numbers = #tpu.dot_dimension_numbers<[1], [0], [0], [1], [0, 0, 1, 1], [], []>} : vector<2x512xf32>, vector<512x4xf32>, vector<2x4xf32> -> vector<2x4xf32>
    %c0_326 = arith.constant 0 : index
    %c0_327 = arith.constant 0 : index
    %398 = vector.load %arg9[%c0_326, %c0_327] : memref<1x4xf32, #tpu.memory_space<vmem>>, vector<1x4xf32>
    %399 = vector.broadcast %398 : vector<1x4xf32> to vector<2x4xf32>
    %400 = arith.addf %397, %399 : vector<2x4xf32>
    %c0_328 = arith.constant 0 : index
    %c0_329 = arith.constant 0 : index
    %401 = vector.load %arg10[%c0_328, %c0_329] : memref<2x4xf32, #tpu.memory_space<vmem>>, vector<2x4xf32>
    tpu.vector_store %arg10[%c0_328, %c0_329], %400 {strides = array<i32>} : memref<2x4xf32, #tpu.memory_space<vmem>>, vector<2x4xf32>,
    return
  }
  func.func @transform_0(%arg0: i32) -> (i32, i32, i32, i32) {
    %c0_i32 = arith.constant 0 : i32
    %c0_i32_0 = arith.constant 0 : i32
    %c0_i32_1 = arith.constant 0 : i32
    %c0_i32_2 = arith.constant 0 : i32
    %c0_i32_3 = arith.constant 0 : i32
    return %c0_i32, %c0_i32_0, %c0_i32_1, %c0_i32_2 : i32, i32, i32, i32
  }
  func.func @transform_1(%arg0: i32) -> (i32, i32, i32) {
    %c0_i32 = arith.constant 0 : i32
    %c0_i32_0 = arith.constant 0 : i32
    %c0_i32_1 = arith.constant 0 : i32
    %c0_i32_2 = arith.constant 0 : i32
    return %c0_i32, %c0_i32_0, %c0_i32_1 : i32, i32, i32
  }
  func.func @transform_2(%arg0: i32) -> (i32, i32) {
    %c0_i32 = arith.constant 0 : i32
    %c0_i32_0 = arith.constant 0 : i32
    %c0_i32_1 = arith.constant 0 : i32
    return %c0_i32, %c0_i32_0 : i32, i32
  }
  func.func @transform_3(%arg0: i32) -> (i32, i32, i32) {
    %c0_i32 = arith.constant 0 : i32
    %c0_i32_0 = arith.constant 0 : i32
    %c0_i32_1 = arith.constant 0 : i32
    %c0_i32_2 = arith.constant 0 : i32
    return %c0_i32, %c0_i32_0, %c0_i32_1 : i32, i32, i32
  }
  func.func @transform_4(%arg0: i32) -> (i32, i32) {
    %c0_i32 = arith.constant 0 : i32
    %c0_i32_0 = arith.constant 0 : i32
    %c0_i32_1 = arith.constant 0 : i32
    return %c0_i32, %c0_i32_0 : i32, i32
  }
  func.func @transform_5(%arg0: i32) -> (i32, i32) {
    %c0_i32 = arith.constant 0 : i32
    %c0_i32_0 = arith.constant 0 : i32
    %c0_i32_1 = arith.constant 0 : i32
    return %c0_i32, %c0_i32_0 : i32, i32
  }
  func.func @transform_6(%arg0: i32) -> (i32, i32) {
    %c0_i32 = arith.constant 0 : i32
    %c0_i32_0 = arith.constant 0 : i32
    %c0_i32_1 = arith.constant 0 : i32
    return %c0_i32, %c0_i32_0 : i32, i32
  }
  func.func @transform_7(%arg0: i32) -> (i32, i32) {
    %c0_i32 = arith.constant 0 : i32
    %c0_i32_0 = arith.constant 0 : i32
    %c0_i32_1 = arith.constant 0 : i32
    return %c0_i32, %c0_i32_0 : i32, i32
  }
  func.func @transform_8(%arg0: i32) -> (i32, i32) {
    %c0_i32 = arith.constant 0 : i32
    %c0_i32_0 = arith.constant 0 : i32
    %c0_i32_1 = arith.constant 0 : i32
    return %c0_i32, %c0_i32_0 : i32, i32
  }
  func.func @transform_9(%arg0: i32) -> (i32, i32) {
    %c0_i32 = arith.constant 0 : i32
    %c0_i32_0 = arith.constant 0 : i32
    %c0_i32_1 = arith.constant 0 : i32
    return %c0_i32, %c0_i32_0 : i32, i32
  }
}

</mosaic_0001>

<bundles_post_ra>
// kernel: pacnet_forward.1
= control target key start
LH: loop header
LB: loop body
LE: loop exit
PB: predicated region body
PF: predicated region fallthrough
CT: control target
= control target key end

     0   :  { %14 = vsyncpa [#allocation5], 0  ;;  %s17383_s0 = inlined_call_operand.vmem [shape: f32[2,10,10,4], index: 0, kind: input, shape index: {}]   ;;  %s17384_s1 = inlined_call_operand.hbm [shape: f32[9,4,32], index: 1, kind: input, shape index: {}]   ;;  %s17385_s2 = inlined_call_operand.hbm [shape: f32[1,32], index: 2, kind: input, shape index: {}]   ;;  %s17386_s3 = inlined_call_operand.hbm [shape: f32[4,32,64], index: 3, kind: input, shape index: {}]   ;;  %s17387_s4 = inlined_call_operand.hbm [shape: f32[1,64], index: 4, kind: input, shape index: {}]   ;;  %s17388_s5 = inlined_call_operand.hbm [shape: bf16[3136,512], index: 5, kind: input, shape index: {}]   ;;  %s17389_s6 = inlined_call_operand.hbm [shape: f32[1,512], index: 6, kind: input, shape index: {}]   ;;  %s17390_s7 = inlined_call_operand.vmem [shape: f32[512,4], index: 7, kind: input, shape index: {}]   ;;  %s17391_s8 = inlined_call_operand.hbm [shape: f32[1,4], index: 8, kind: input, shape index: {}]   ;;  %s17392_s9 = inlined_call_operand.hbm [shape: f32[2,4], index: 9, kind: output, shape index: {}]  }
   0x1   :  { %15 = vsyncpa [#allocation8], 0 }
   0x2   :  { %16 = vsyncpa [#allocation11], 0 }
   0x3   :  { %17 = vsyncpa [#allocation14], 0  ;;  %s39_s11 = sshll.u32 %s17385_s2, 4  ;;  %s40_s11 = int_to_ptr.hbm [resolvable:$true] %s39_s11 }
   0x4   :  { %18 = vsyncpa [#allocation6], 0  ;;  %s15131_s12 = smov [#allocation7]   ;;  %s63_s16 = sshll.u32 %s17387_s4, 4  ;;  %s64_s16 = int_to_ptr.hbm [resolvable:$true] %s63_s16 }
   0x5   :  { %s41_s13 = sshll.u32 %s15131_s12, 4  ;;  %s15132_s17 = smov [#allocation10]   ;;  %s42_s13 = int_to_ptr.vmem [resolvable:$true] %s41_s13 }
   0x6   :  { %44 = dma.hbm_to_vmem [thread:$0]  %s40_s11, 16, %s42_s13, [#allocation8]  }
   0x7   :  { %s65_s18 = sshll.u32 %s15132_s17, 4  ;;  %s87_s21 = sshll.u32 %s17389_s6, 4  ;;  %s66_s18 = int_to_ptr.vmem [resolvable:$true] %s65_s18  ;;  %s88_s21 = int_to_ptr.hbm [resolvable:$true] %s87_s21 }
   0x8   :  { %68 = dma.hbm_to_vmem [thread:$0]  %s64_s16, 16, %s66_s18, [#allocation11]  }
   0x9   :  { %s25_s23 = sshll.u32 %s17384_s1, 4  ;;  %s15133_s24 = smov [#allocation13]   ;;  %s26_s23 = int_to_ptr.hbm [resolvable:$true] %s25_s23 }
   0xa   :  { %s89_s25 = sshll.u32 %s15133_s24, 4  ;;  %s15134_s4 = smov [#allocation4]   ;;  %s90_s25 = int_to_ptr.vmem [resolvable:$true] %s89_s25 }
   0xb   :  { %92 = dma.hbm_to_vmem [thread:$0]  %s88_s21, 64, %s90_s25, [#allocation14]  }
   0xc   :  { %s27_s26 = sshll.u32 %s15134_s4, 4  ;;  %s15135_s27 = smov 64   ;;  %s28_s26 = int_to_ptr.vmem [resolvable:$true] %s27_s26 }
   0xd   :  { %s15136_s28 = smov 4   ;;  %s49_s30 = sshll.u32 %s17386_s3, 4  ;;  %s50_s30 = int_to_ptr.hbm [resolvable:$true] %s49_s30 }
   0xe   :  { %33 = dma.hbm_to_vmem [thread:$0]  %s26_s23, 576, %s28_s26, [#allocation5], %s15135_s27, %s15135_s27, %s15136_s28  }
   0xf   :  { %s15137_s10 = smov [#allocation9]   ;;  %s73_s13 = sshll.u32 %s17388_s5, 4  ;;  %s74_s13 = int_to_ptr.hbm [resolvable:$true] %s73_s13 }
  0x10   :  { %s51_s11 = sshll.u32 %s15137_s10, 4  ;;  %s15138_s14 = smov 128   ;;  %s52_s11 = int_to_ptr.vmem [resolvable:$true] %s51_s11 }
  0x11   :  { %s15139_s15 = smov 8   ;;  %s15140_s16 = smov [#allocation12]  }
  0x12   :  { %57 = dma.hbm_to_vmem [thread:$0]  %s50_s30, 2048, %s52_s11, [#allocation8], %s15138_s14, %s15138_s14, %s15139_s15  }
  0x13   :  { %s75_s17 = sshll.u32 %s15140_s16, 4  ;;  %s15141_s18 = smov 256   ;;  %s76_s17 = int_to_ptr.vmem [resolvable:$true] %s75_s17 }
  0x14   :  { %s15142_s19 = smov 16   ;;  %s100_s21 = sshll.u32 %s17391_s8, 4  ;;  %s101_s21 = int_to_ptr.hbm [resolvable:$true] %s100_s21 }
  0x15   :  { %81 = dma.hbm_to_vmem [thread:$0]  %s74_s13, 100352, %s76_s17, [#allocation11], %s15141_s18, %s15141_s18, %s15142_s19  }
  0x16   :  { %s15143_s2 = smov [#allocation15]  }
  0x17   :  { %s102_s22 = sshll.u32 %s15143_s2, 4  ;;  %s103_s22 = int_to_ptr.vmem [resolvable:$true] %s102_s22 }
  0x18   :  { %105 = dma.hbm_to_vmem [thread:$0]  %s101_s21, 16, %s103_s22, [#allocation14]  }
  0x19   :  { %15121 = dma.done.wait [#allocation5], 576  }
  0x1a   :  { %15122 = vsyncadd [#allocation5], 4294966720 }
  0x1b   :  { %15123 = dma.done.wait [#allocation8], 2064  }
  0x1c   :  { %15124 = vsyncadd [#allocation8], 4294965232 }
  0x1d   :  { %15125 = dma.done.wait [#allocation11], 100368  }
  0x1e   :  { %15126 = vsyncadd [#allocation11], 4294866928 }
  0x1f   :  { %15127 = dma.done.wait [#allocation14], 80  }
  0x20   :  { %15128 = vsyncadd [#allocation14], 4294967216  ;;  %vm219_vm0 = vcmask 1043456   ;;  %vm170_vm1 = vcmask 31744   ;;  %v169_v0 = vld [vmem:[#allocation4 + $0x4] sm:$0xf] }
  0x21   :  { %v151_v1 = vld [vmem:[#allocation4] sm:$0xf]  ;;  %v421_v2 = vld [vmem:[#allocation4 + $0x8] sm:$0xf]  ;;  %10482 = vmatpush.msk.msra.mxu0 %vm219_vm0, %v169_v0  ;;  %v722_v6 = vld [vmem:[#allocation4 + $0x10] sm:$0xf] }
  0x22   :  { %10499 = vmatpush.msk.msra.mxu1 %vm219_vm0, %v151_v1  ;;  %v152_v3 = vld [vmem:[%s17383_s0 + $0x1] sm:$0xff]  ;;  %10516 = vmatpush.msk.msra.mxu2 %vm219_vm0, %v421_v2  ;;  %v572_v7 = vld [vmem:[#allocation4 + $0xc] sm:$0xf]  ;;  %v10533_v8 = vld [vmem:[%s17383_s0 + $0x10] sm:$0xff]  ;;  %vm1492_vm2 = vcmask 261120   ;;  %vm1494_vm3 = vcmask 253952  }
  0x23   :  { %v135_v4 = vld [vmem:[%s17383_s0] sm:$0xff]  ;;  %10483 = vmatmul.msk.f32.vlgmr.msra.gmra.mxu0 %vm170_vm1, %v152_v3  ;;  %10549 = vmatpush.msk.msra.mxu3 %vm219_vm0, %v572_v7  ;;  %v15241_v9 = vld [vmem:[%s17383_s0 + $0x11] sm:$0xff]  ;;  %v1173_v44 = vld [vmem:[#allocation4 + $0x1c] sm:$0xf]  ;;  %vm2150_vm4 = vcmask 523264   ;;  %vm2212_vm5 = vcmask 1041409  }
  0x24   :  { %v404_v5 = vld [vmem:[%s17383_s0 + $0x2] sm:$0xff]  ;;  %10500 = vmatmul.msk.f32.vlgmr.msra.gmra.mxu1 %vm170_vm1, %v135_v4  ;;  %10582 = vmatpush.msk.msrb.mxu0 %vm219_vm0, %v722_v6  ;;  %v15246_v10 = vld [vmem:[%s17383_s0 + $0x12] sm:$0xff]  ;;  %s10469_s19 = sshll.u32 %s17392_s9, 4  ;;  %vm10460_vm6 = vcmask 25600   ;;  %s10470_s19 = int_to_ptr.hbm [resolvable:$true] %s10469_s19 }
  0x25   :  { %10517 = vmatmul.msk.f32.vlgmr.msra.gmra.mxu2 %vm170_vm1, %v404_v5  ;;  %10550 = vmatmul.msk.f32.vlgmr.msra.gmra.mxu3 %vm170_vm1, %v10533_v8  ;;  %v15253_v11 = vld [vmem:[%s17383_s0 + $0x20] sm:$0xff]  ;;  %v15275_v14 = vld [vmem:[%s17383_s0 + $0x30] sm:$0xff]  ;;  %v1023_v40 = vld [vmem:[#allocation4 + $0x18] sm:$0xf] }
  0x26   :  { %v15263_v12 = vld [vmem:[%s17383_s0 + $0x21] sm:$0xff]  ;;  %v15286_v15 = vld [vmem:[%s17383_s0 + $0x31] sm:$0xff]  ;;  %10648 = vmatpush.msk.msrb.mxu2 %vm219_vm0, %v1023_v40  ;;  %10681 = vmatpush.msk.msrb.mxu3 %vm219_vm0, %v1173_v44 }
  0x27   :  { %v15268_v13 = vld [vmem:[%s17383_s0 + $0x22] sm:$0xff]  ;;  %v15291_v16 = vld [vmem:[%s17383_s0 + $0x32] sm:$0xff] }
  0x28   :  { %v15298_v17 = vld [vmem:[%s17383_s0 + $0x40] sm:$0xff]  ;;  %v15321_v20 = vld [vmem:[%s17383_s0 + $0x50] sm:$0xff] }
  0x29   :  { %v15309_v18 = vld [vmem:[%s17383_s0 + $0x41] sm:$0xff]  ;;  %v15332_v21 = vld [vmem:[%s17383_s0 + $0x51] sm:$0xff] }
  0x2a   :  { %v15314_v19 = vld [vmem:[%s17383_s0 + $0x42] sm:$0xff]  ;;  %v15337_v22 = vld [vmem:[%s17383_s0 + $0x52] sm:$0xff] }
  0x2b   :  { %10484 = vmatmul.msk.f32.gmra.mxu0 %vm170_vm1, %v15241_v9  ;;  %v15344_v23 = vld [vmem:[%s17383_s0 + $0x60] sm:$0xff]  ;;  %v15367_v26 = vld [vmem:[%s17383_s0 + $0x70] sm:$0xff] }
  0x2c   :  { %10501 = vmatmul.msk.f32.gmra.mxu1 %vm170_vm1, %v10533_v8  ;;  %v15355_v24 = vld [vmem:[%s17383_s0 + $0x61] sm:$0xff]  ;;  %v15378_v27 = vld [vmem:[%s17383_s0 + $0x71] sm:$0xff] }
  0x2d   :  { %10518 = vmatmul.msk.f32.gmra.mxu2 %vm170_vm1, %v15246_v10  ;;  %10551 = vmatmul.msk.f32.gmra.mxu3 %vm170_vm1, %v15253_v11  ;;  %v15360_v25 = vld [vmem:[%s17383_s0 + $0x62] sm:$0xff]  ;;  %v15383_v28 = vld [vmem:[%s17383_s0 + $0x72] sm:$0xff] }
  0x2e   :  { %v15390_v29 = vld [vmem:[%s17383_s0 + $0x80] sm:$0xff]  ;;  %v10541_v33 = vld [vmem:[%s17383_s0 + $0xb0] sm:$0xff] }
  0x2f   :  { %v160_v30 = vld [vmem:[%s17383_s0 + $0xa1] sm:$0xff]  ;;  %v15417_v34 = vld [vmem:[%s17383_s0 + $0xb1] sm:$0xff] }
  0x30   :  { %v143_v31 = vld [vmem:[%s17383_s0 + $0xa0] sm:$0xff]  ;;  %v15422_v35 = vld [vmem:[%s17383_s0 + $0xb2] sm:$0xff] }
  0x31   :  { %v412_v32 = vld [vmem:[%s17383_s0 + $0xa2] sm:$0xff]  ;;  %v15451_v39 = vld [vmem:[%s17383_s0 + $0xd0] sm:$0xff] }
  0x32   :  { %v15429_v36 = vld [vmem:[%s17383_s0 + $0xc0] sm:$0xff]  ;;  %v15463_v41 = vld [vmem:[%s17383_s0 + $0xd1] sm:$0xff] }
  0x33   :  { %10485 = vmatmul.msk.f32.gmra.mxu0 %vm170_vm1, %v15263_v12  ;;  %v15439_v37 = vld [vmem:[%s17383_s0 + $0xc1] sm:$0xff]  ;;  %v15468_v42 = vld [vmem:[%s17383_s0 + $0xd2] sm:$0xff] }
  0x34   :  { %10502 = vmatmul.msk.f32.gmra.mxu1 %vm170_vm1, %v15253_v11  ;;  %v15444_v38 = vld [vmem:[%s17383_s0 + $0xc2] sm:$0xff]  ;;  %v872_v45 = vld [vmem:[#allocation4 + $0x14] sm:$0xf] }
  0x35   :  { %10519 = vmatmul.msk.f32.gmra.mxu2 %vm170_vm1, %v15268_v13  ;;  %10552 = vmatmul.msk.f32.gmra.mxu3 %vm170_vm1, %v15275_v14  ;;  %v15475_v43 = vld [vmem:[%s17383_s0 + $0xe0] sm:$0xff]  ;;  %v15500_v48 = vld [vmem:[%s17383_s0 + $0xf0] sm:$0xff] }
  0x36   :  { %10615 = vmatpush.msk.msrb.mxu1 %vm219_vm0, %v872_v45  ;;  %v15488_v46 = vld [vmem:[%s17383_s0 + $0xe1] sm:$0xff]  ;;  %v15512_v50 = vld [vmem:[%s17383_s0 + $0xf1] sm:$0xff] }
  0x37   :  { %v15493_v47 = vld [vmem:[%s17383_s0 + $0xe2] sm:$0xff]  ;;  %v15517_v51 = vld [vmem:[%s17383_s0 + $0xf2] sm:$0xff] }
  0x38   :  { %v1323_v49 = vld [vmem:[#allocation4 + $0x20] sm:$0xf]  ;;  %v15547_v55 = vld [vmem:[%s17383_s0 + $0x110] sm:$0xff] }
  0x39   :  { %10714 = vmatpush.msk.msra.mxu0 %vm219_vm0, %v1323_v49  ;;  %v15524_v52 = vld [vmem:[%s17383_s0 + $0x100] sm:$0xff]  ;;  %v15558_v56 = vld [vmem:[%s17383_s0 + $0x111] sm:$0xff] }
  0x3a   :  { %v15535_v53 = vld [vmem:[%s17383_s0 + $0x101] sm:$0xff]  ;;  %v15563_v57 = vld [vmem:[%s17383_s0 + $0x112] sm:$0xff] }
  0x3b   :  { %10486 = vmatmul.msk.f32.gmra.mxu0 %vm170_vm1, %v15286_v15  ;;  %v15540_v54 = vld [vmem:[%s17383_s0 + $0x102] sm:$0xff] }
  0x3c   :  { %10503 = vmatmul.msk.f32.gmra.mxu1 %vm170_vm1, %v15275_v14  ;;  %v15570_v58 = vld [vmem:[%s17383_s0 + $0x120] sm:$0xff] }
  0x3d   :  { %10520 = vmatmul.msk.f32.gmra.mxu2 %vm170_vm1, %v15291_v16  ;;  %10553 = vmatmul.msk.f32.gmra.mxu3 %vm170_vm1, %v15298_v17 }
  0x43   :  { %10487 = vmatmul.msk.f32.gmra.mxu0 %vm170_vm1, %v15309_v18 }
  0x44   :  { %10504 = vmatmul.msk.f32.gmra.mxu1 %vm170_vm1, %v15298_v17 }
  0x45   :  { %10521 = vmatmul.msk.f32.gmra.mxu2 %vm170_vm1, %v15314_v19  ;;  %10554 = vmatmul.msk.f32.gmra.mxu3 %vm170_vm1, %v15321_v20 }
  0x4b   :  { %10488 = vmatmul.msk.f32.gmra.mxu0 %vm170_vm1, %v15332_v21 }
  0x4c   :  { %10505 = vmatmul.msk.f32.gmra.mxu1 %vm170_vm1, %v15321_v20 }
  0x4d   :  { %10522 = vmatmul.msk.f32.gmra.mxu2 %vm170_vm1, %v15337_v22  ;;  %10555 = vmatmul.msk.f32.gmra.mxu3 %vm170_vm1, %v15344_v23 }
  0x53   :  { %10489 = vmatmul.msk.f32.gmra.mxu0 %vm170_vm1, %v15355_v24 }
  0x54   :  { %10506 = vmatmul.msk.f32.gmra.mxu1 %vm170_vm1, %v15344_v23 }
  0x55   :  { %10523 = vmatmul.msk.f32.gmra.mxu2 %vm170_vm1, %v15360_v25  ;;  %10556 = vmatmul.msk.f32.gmra.mxu3 %vm170_vm1, %v15367_v26 }
  0x5b   :  { %10490 = vmatmul.msk.f32.gmra.mxu0 %vm170_vm1, %v15378_v27 }
  0x5c   :  { %10507 = vmatmul.msk.f32.gmra.mxu1 %vm170_vm1, %v15367_v26 }
  0x5d   :  { %10524 = vmatmul.msk.f32.gmra.mxu2 %vm170_vm1, %v15383_v28  ;;  %10557 = vmatmul.msk.f32.gmra.mxu3 %vm170_vm1, %v15390_v29 }
  0x63   :  { %10491 = vmatmul.msk.f32.gmra.mxu0 %vm170_vm1, %v160_v30 }
  0x64   :  { %10508 = vmatmul.msk.f32.gmra.mxu1 %vm170_vm1, %v143_v31 }
  0x65   :  { %10525 = vmatmul.msk.f32.gmra.mxu2 %vm170_vm1, %v412_v32  ;;  %10558 = vmatmul.msk.f32.gmra.mxu3 %vm170_vm1, %v10541_v33 }
  0x6b   :  { %10492 = vmatmul.msk.f32.gmra.mxu0 %vm170_vm1, %v15417_v34 }
  0x6c   :  { %10509 = vmatmul.msk.f32.gmra.mxu1 %vm170_vm1, %v10541_v33 }
  0x6d   :  { %10526 = vmatmul.msk.f32.gmra.mxu2 %vm170_vm1, %v15422_v35  ;;  %10559 = vmatmul.msk.f32.gmra.mxu3 %vm170_vm1, %v15429_v36 }
  0x73   :  { %10493 = vmatmul.msk.f32.gmra.mxu0 %vm170_vm1, %v15439_v37 }
  0x74   :  { %10510 = vmatmul.msk.f32.gmra.mxu1 %vm170_vm1, %v15429_v36 }
  0x75   :  { %10527 = vmatmul.msk.f32.gmra.mxu2 %vm170_vm1, %v15444_v38  ;;  %10560 = vmatmul.msk.f32.gmra.mxu3 %vm170_vm1, %v15451_v39 }
  0x7b   :  { %10494 = vmatmul.msk.f32.gmra.mxu0 %vm170_vm1, %v15463_v41 }
  0x7c   :  { %10511 = vmatmul.msk.f32.gmra.mxu1 %vm170_vm1, %v15451_v39 }
  0x7d   :  { %10528 = vmatmul.msk.f32.gmra.mxu2 %vm170_vm1, %v15468_v42  ;;  %10561 = vmatmul.msk.f32.gmra.mxu3 %vm170_vm1, %v15475_v43 }
  0x83   :  { %10495 = vmatmul.msk.f32.gmra.mxu0 %vm170_vm1, %v15488_v46 }
  0x84   :  { %10512 = vmatmul.msk.f32.gmra.mxu1 %vm170_vm1, %v15475_v43 }
  0x85   :  { %10529 = vmatmul.msk.f32.gmra.mxu2 %vm170_vm1, %v15493_v47  ;;  %10562 = vmatmul.msk.f32.gmra.mxu3 %vm170_vm1, %v15500_v48 }
  0x8b   :  { %10496 = vmatmul.msk.f32.gmra.mxu0 %vm170_vm1, %v15512_v50 }
  0x8c   :  { %10513 = vmatmul.msk.f32.gmra.mxu1 %vm170_vm1, %v15500_v48 }
  0x8d   :  { %10530 = vmatmul.msk.f32.gmra.mxu2 %vm170_vm1, %v15517_v51  ;;  %10563 = vmatmul.msk.f32.gmra.mxu3 %vm170_vm1, %v15524_v52 }
  0x93   :  { %10497 = vmatmul.msk.f32.gmra.mxu0 %vm170_vm1, %v15535_v53 }
  0x94   :  { %10514 = vmatmul.msk.f32.gmra.mxu1 %vm170_vm1, %v15524_v52 }
  0x95   :  { %10531 = vmatmul.msk.f32.gmra.mxu2 %vm170_vm1, %v15540_v54  ;;  %10564 = vmatmul.msk.f32.gmra.mxu3 %vm170_vm1, %v15547_v55 }
  0x9b   :  { %10498 = vmatmul.msk.f32.gmra.mxu0 %vm170_vm1, %v15558_v56 }
  0x9c   :  { %10515 = vmatmul.msk.f32.gmra.mxu1 %vm170_vm1, %v15547_v55 }
  0x9d   :  { %10532 = vmatmul.msk.f32.gmra.mxu2 %vm170_vm1, %v15563_v57  ;;  %10565 = vmatmul.msk.f32.gmra.mxu3 %vm170_vm1, %v15570_v58 }
  0xa0   :  { %v240_v59 = vpop.f32.mrf.mxu0 }
  0xa1   :  { %v356_v60 = vpop.f32.mrf.mxu1 }
  0xa2   :  { %v357_v61 = vadd.f32 %v356_v60, %v240_v59 }
  0xa3   :  { %10583 = vmatmul.msk.f32.vlgmr.msrb.gmra.mxu0 %vm170_vm1, %v15241_v9 }
  0xa4   :  { %10616 = vmatmul.msk.f32.vlgmr.msrb.gmra.mxu1 %vm170_vm1, %v15246_v10 }
  0xa5   :  { %10649 = vmatmul.msk.f32.vlgmr.msrb.gmra.mxu2 %vm170_vm1, %v15253_v11  ;;  %10682 = vmatmul.msk.f32.vlgmr.msrb.gmra.mxu3 %vm170_vm1, %v15263_v12 }
  0xa8   :  { %v490_v62 = vpop.f32.mrf.mxu2  ;;  %v243_v0 = vpop.f32.mrf.mxu0 }
  0xa9   :  { %v538_v63 = vadd.f32 %v490_v62, %v357_v61  ;;  %v359_v1 = vpop.f32.mrf.mxu1  ;;  %v641_v2 = vpop.f32.mrf.mxu3 }
  0xaa   :  { %v360_v4 = vadd.f32 %v359_v1, %v243_v0 }
  0xab   :  { %v15586_v3 = vadd.f32 %v641_v2, %v538_v63  ;;  %10584 = vmatmul.msk.f32.gmra.mxu0 %vm170_vm1, %v15263_v12 }
  0xac   :  { %10617 = vmatmul.msk.f32.gmra.mxu1 %vm170_vm1, %v15268_v13 }
  0xad   :  { %10650 = vmatmul.msk.f32.gmra.mxu2 %vm170_vm1, %v15275_v14  ;;  %10683 = vmatmul.msk.f32.gmra.mxu3 %vm170_vm1, %v15286_v15 }
  0xb0   :  { %v493_v5 = vpop.f32.mrf.mxu2  ;;  %v246_v7 = vpop.f32.mrf.mxu0 }
  0xb1   :  { %v539_v6 = vadd.f32 %v493_v5, %v360_v4  ;;  %v362_v8 = vpop.f32.mrf.mxu1  ;;  %v644_v9 = vpop.f32.mrf.mxu3 }
  0xb2   :  { %v363_v11 = vadd.f32 %v362_v8, %v246_v7 }
  0xb3   :  { %v15596_v10 = vadd.f32 %v644_v9, %v539_v6  ;;  %10585 = vmatmul.msk.f32.gmra.mxu0 %vm170_vm1, %v15286_v15 }
  0xb4   :  { %10618 = vmatmul.msk.f32.gmra.mxu1 %vm170_vm1, %v15291_v16 }
  0xb5   :  { %10651 = vmatmul.msk.f32.gmra.mxu2 %vm170_vm1, %v15298_v17  ;;  %10684 = vmatmul.msk.f32.gmra.mxu3 %vm170_vm1, %v15309_v18 }
  0xb8   :  { %v496_v12 = vpop.f32.mrf.mxu2  ;;  %v249_v30 = vpop.f32.mrf.mxu0 }
  0xb9   :  { %v540_v14 = vadd.f32 %v496_v12, %v363_v11  ;;  %v365_v31 = vpop.f32.mrf.mxu1  ;;  %v647_v32 = vpop.f32.mrf.mxu3  ;;  %v15654_v12 = vld [vmem:[%s17383_s0 + $0x82] sm:$0xff] }
  0xba   :  { %v366_v15 = vadd.f32 %v365_v31, %v249_v30  ;;  %v10672_v30 = vld [vmem:[%s17383_s0 + $0x91] sm:$0xff] }
  0xbb   :  { %v15606_v33 = vadd.f32 %v647_v32, %v540_v14  ;;  %10586 = vmatmul.msk.f32.gmra.mxu0 %vm170_vm1, %v15309_v18 }
  0xbc   :  { %10619 = vmatmul.msk.f32.gmra.mxu1 %vm170_vm1, %v15314_v19 }
  0xbd   :  { %10652 = vmatmul.msk.f32.gmra.mxu2 %vm170_vm1, %v15321_v20  ;;  %10685 = vmatmul.msk.f32.gmra.mxu3 %vm170_vm1, %v15332_v21 }
  0xc0   :  { %v499_v17 = vpop.f32.mrf.mxu2  ;;  %v252_v44 = vpop.f32.mrf.mxu0 }
  0xc1   :  { %v541_v40 = vadd.f32 %v499_v17, %v366_v15  ;;  %v368_v45 = vpop.f32.mrf.mxu1  ;;  %v650_v49 = vpop.f32.mrf.mxu3 }
  0xc2   :  { %v369_v18 = vadd.f32 %v368_v45, %v252_v44 }
  0xc3   :  { %v15616_v59 = vadd.f32 %v650_v49, %v541_v40  ;;  %10587 = vmatmul.msk.f32.gmra.mxu0 %vm170_vm1, %v15332_v21 }
  0xc4   :  { %10620 = vmatmul.msk.f32.gmra.mxu1 %vm170_vm1, %v15337_v22 }
  0xc5   :  { %10653 = vmatmul.msk.f32.gmra.mxu2 %vm170_vm1, %v15344_v23  ;;  %10686 = vmatmul.msk.f32.gmra.mxu3 %vm170_vm1, %v15355_v24 }
  0xc8   :  { %v502_v20 = vpop.f32.mrf.mxu2  ;;  %v255_v61 = vpop.f32.mrf.mxu0 }
  0xc9   :  { %v542_v60 = vadd.f32 %v502_v20, %v369_v18  ;;  %v371_v62 = vpop.f32.mrf.mxu1  ;;  %v653_v63 = vpop.f32.mrf.mxu3 }
  0xca   :  { %v372_v21 = vadd.f32 %v371_v62, %v255_v61 }
  0xcb   :  { %v15626_v0 = vadd.f32 %v653_v63, %v542_v60  ;;  %10588 = vmatmul.msk.f32.gmra.mxu0 %vm170_vm1, %v15355_v24  ;;  %v10671_v24 = vld [vmem:[%s17383_s0 + $0x81] sm:$0xff]  ;;  %v1564_v63 = vld [vmem:[#allocation9 + $0x10] sm:$0xff] }
  0xcc   :  { %10621 = vmatmul.msk.f32.gmra.mxu1 %vm170_vm1, %v15360_v25 }
  0xcd   :  { %10654 = vmatmul.msk.f32.gmra.mxu2 %vm170_vm1, %v15367_v26  ;;  %10687 = vmatmul.msk.f32.gmra.mxu3 %vm170_vm1, %v15378_v27 }
  0xd0   :  { %v505_v23 = vpop.f32.mrf.mxu2  ;;  %v258_v2 = vpop.f32.mrf.mxu0 }
  0xd1   :  { %v543_v1 = vadd.f32 %v505_v23, %v372_v21  ;;  %v374_v4 = vpop.f32.mrf.mxu1  ;;  %v656_v5 = vpop.f32.mrf.mxu3 }
  0xd2   :  { %v375_v26 = vadd.f32 %v374_v4, %v258_v2 }
  0xd3   :  { %v15636_v6 = vadd.f32 %v656_v5, %v543_v1  ;;  %10589 = vmatmul.msk.f32.gmra.mxu0 %vm170_vm1, %v15378_v27  ;;  %v10639_v27 = vld [vmem:[%s17383_s0 + $0x90] sm:$0xff] }
  0xd4   :  { %10622 = vmatmul.msk.f32.gmra.mxu1 %vm170_vm1, %v15383_v28  ;;  %v1833_v1 = vld [vmem:[#allocation9 + $0x50] sm:$0xff] }
  0xd5   :  { %10655 = vmatmul.msk.f32.gmra.mxu2 %vm170_vm1, %v15390_v29  ;;  %10688 = vmatmul.msk.f32.gmra.mxu3 %vm170_vm1, %v10671_v24  ;;  %v1983_v5 = vld [vmem:[#allocation9 + $0x70] sm:$0xff] }
  0xd8   :  { %v508_v7 = vpop.f32.mrf.mxu2  ;;  %v261_v9 = vpop.f32.mrf.mxu0 }
  0xd9   :  { %v544_v8 = vadd.f32 %v508_v7, %v375_v26  ;;  %v659_v11 = vpop.f32.mrf.mxu3  ;;  %v377_v14 = vpop.f32.mrf.mxu1 }
  0xda   :  { %v378_v31 = vadd.f32 %v377_v14, %v261_v9 }
  0xdb   :  { %v15656_v29 = vadd.f32 %v659_v11, %v544_v8  ;;  %10590 = vmatmul.msk.f32.gmra.mxu0 %vm170_vm1, %v10671_v24 }
  0xdc   :  { %10623 = vmatmul.msk.f32.gmra.mxu1 %vm170_vm1, %v15654_v12 }
  0xdd   :  { %10656 = vmatmul.msk.f32.gmra.mxu2 %vm170_vm1, %v10639_v27  ;;  %10689 = vmatmul.msk.f32.gmra.mxu3 %vm170_vm1, %v10672_v30 }
  0xe0   :  { %v511_v32 = vpop.f32.mrf.mxu2  ;;  %v15666_v17 = vpop.f32.mrf.mxu0 }
  0xe1   :  { %v545_v15 = vadd.f32 %v511_v32, %v378_v31  ;;  %v662_v40 = vpop.f32.mrf.mxu3  ;;  %v15764_v18 = vpop.f32.mrf.mxu1  ;;  %v1832_v31 = vld [vmem:[#allocation9 + $0x48] sm:$0xff] }
  0xe3   :  { %v15668_v44 = vadd.f32 %v662_v40, %v545_v15  ;;  %10591 = vmatmul.msk.f32.gmra.mxu0 %vm170_vm1, %v15417_v34  ;;  %v1584_v15 = vld [vmem:[#allocation9 + $0x28] sm:$0xff] }
  0xe4   :  { %10624 = vmatmul.msk.f32.gmra.mxu1 %vm170_vm1, %v15422_v35 }
  0xe5   :  { %10657 = vmatmul.msk.f32.gmra.mxu2 %vm170_vm1, %v15429_v36  ;;  %10690 = vmatmul.msk.f32.gmra.mxu3 %vm170_vm1, %v15439_v37 }
  0xe8   :  { %v15678_v45 = vpop.f32.mrf.mxu0  ;;  %v15766_v20 = vpop.f32.mrf.mxu2 }
  0xe9   :  { %v15770_v60 = vpop.f32.mrf.mxu3  ;;  %v15774_v62 = vpop.f32.mrf.mxu1 }
  0xeb   :  { %10592 = vmatmul.msk.f32.gmra.mxu0 %vm170_vm1, %v15439_v37 }
  0xec   :  { %10625 = vmatmul.msk.f32.gmra.mxu1 %vm170_vm1, %v15444_v38 }
  0xed   :  { %10658 = vmatmul.msk.f32.gmra.mxu2 %vm170_vm1, %v15451_v39  ;;  %10691 = vmatmul.msk.f32.gmra.mxu3 %vm170_vm1, %v15463_v41 }
  0xf0   :  { %v15688_v34 = vpop.f32.mrf.mxu0 }
  0xf1   :  { %v15780_v21 = vpop.f32.mrf.mxu3  ;;  %v15786_v2 = vpop.f32.mrf.mxu1 }
  0xf3   :  { %10593 = vmatmul.msk.f32.gmra.mxu0 %vm170_vm1, %v15463_v41  ;;  %v10679_v41 = vld [vmem:[%s17383_s0 + $0x121] sm:$0xff] }
  0xf4   :  { %10626 = vmatmul.msk.f32.gmra.mxu1 %vm170_vm1, %v15468_v42 }
  0xf5   :  { %10659 = vmatmul.msk.f32.gmra.mxu2 %vm170_vm1, %v15475_v43  ;;  %10692 = vmatmul.msk.f32.gmra.mxu3 %vm170_vm1, %v15488_v46  ;;  %v1565_v43 = vld [vmem:[#allocation9 + $0x18] sm:$0xff] }
  0xf6   :  { %1760 = vmatpush.msra.mxu2 %v1565_v43  ;;  %v1982_v43 = vld [vmem:[#allocation9 + $0x68] sm:$0xff] }
  0xf8   :  { %v15698_v35 = vpop.f32.mrf.mxu0  ;;  %1761 = vmatpush.msra.mxu2 %v1564_v63 }
  0xf9   :  { %v15792_v24 = vpop.f32.mrf.mxu3  ;;  %v15796_v26 = vpop.f32.mrf.mxu1 }
  0xfb   :  { %10594 = vmatmul.msk.f32.gmra.mxu0 %vm170_vm1, %v15488_v46 }
  0xfc   :  { %10627 = vmatmul.msk.f32.gmra.mxu1 %vm170_vm1, %v15493_v47 }
  0xfd   :  { %10660 = vmatmul.msk.f32.gmra.mxu2 %vm170_vm1, %v15500_v48  ;;  %10693 = vmatmul.msk.f32.gmra.mxu3 %vm170_vm1, %v15512_v50  ;;  %v1834_v48 = vld [vmem:[#allocation9 + $0x58] sm:$0xff] }
  0xfe   :  { %1895 = vmatpush.msra.mxu3 %v1834_v48 }
 0x100   :  { %v15708_v36 = vpop.f32.mrf.mxu0  ;;  %1896 = vmatpush.msra.mxu3 %v1833_v1 }
 0x101   :  { %v15804_v8 = vpop.f32.mrf.mxu3  ;;  %v15808_v11 = vpop.f32.mrf.mxu1 }
 0x102   :  { %1897 = vmatpush.msra.mxu3 %v1832_v31 }
 0x103   :  { %10595 = vmatmul.msk.f32.gmra.mxu0 %vm170_vm1, %v15512_v50  ;;  %v10647_v50 = vld [vmem:[%s17383_s0 + $0x130] sm:$0xff] }
 0x104   :  { %10628 = vmatmul.msk.f32.gmra.mxu1 %vm170_vm1, %v15517_v51 }
 0x105   :  { %10661 = vmatmul.msk.f32.gmra.mxu2 %vm170_vm1, %v15524_v52  ;;  %10694 = vmatmul.msk.f32.gmra.mxu3 %vm170_vm1, %v15535_v53  ;;  %v15748_v52 = vld [vmem:[%s17383_s0 + $0x122] sm:$0xff] }
 0x108   :  { %v15718_v37 = vpop.f32.mrf.mxu0 }
 0x109   :  { %v15814_v14 = vpop.f32.mrf.mxu3  ;;  %v15821_v32 = vpop.f32.mrf.mxu1 }
 0x10b   :  { %10596 = vmatmul.msk.f32.gmra.mxu0 %vm170_vm1, %v15535_v53  ;;  %v10680_v53 = vld [vmem:[%s17383_s0 + $0x131] sm:$0xff] }
 0x10c   :  { %10629 = vmatmul.msk.f32.gmra.mxu1 %vm170_vm1, %v15540_v54 }
 0x10d   :  { %10662 = vmatmul.msk.f32.gmra.mxu2 %vm170_vm1, %v15547_v55  ;;  %10695 = vmatmul.msk.f32.gmra.mxu3 %vm170_vm1, %v15558_v56  ;;  %v1586_v55 = vld [vmem:[#allocation9 + $0x38] sm:$0xff] }
 0x10e   :  { %1647 = vmatpush.msra.mxu1 %v1586_v55 }
 0x110   :  { %v15728_v39 = vpop.f32.mrf.mxu0 }
 0x111   :  { %17393 = vst [vmem:[#allocation22_spill] sm:$0xff] %v15728_v39  ;;  %v15832_v48 = vpop.f32.mrf.mxu1 }
 0x112   :  { %17395 = vst [vmem:[#allocation24_spill] sm:$0xff] %v15832_v48 }
 0x113   :  { %10597 = vmatmul.msk.f32.gmra.mxu0 %vm170_vm1, %v15558_v56 }
 0x114   :  { %10630 = vmatmul.msk.f32.gmra.mxu1 %vm170_vm1, %v15563_v57 }
 0x115   :  { %10663 = vmatmul.msk.f32.gmra.mxu2 %vm170_vm1, %v15570_v58  ;;  %10696 = vmatmul.msk.f32.gmra.mxu3 %vm170_vm1, %v10679_v41  ;;  %v1984_v58 = vld [vmem:[#allocation9 + $0x78] sm:$0xff] }
 0x116   :  { %2045 = vmatpush.msrb.mxu0 %v1984_v58 }
 0x118   :  { %v15740_v46 = vpop.f32.mrf.mxu0  ;;  %2046 = vmatpush.msrb.mxu0 %v1983_v5 }
 0x119   :  { %17394 = vst [vmem:[#allocation23_spill] sm:$0xff] %v15740_v46  ;;  %v15842_v58 = vpop.f32.mrf.mxu1 }
 0x11a   :  { %2047 = vmatpush.msrb.mxu0 %v1982_v43  ;;  %17398 = vst [vmem:[#allocation27_spill] sm:$0xff] %v15842_v58 }
 0x11b   :  { %10598 = vmatmul.msk.f32.gmra.mxu0 %vm170_vm1, %v10679_v41 }
 0x11c   :  { %10631 = vmatmul.msk.f32.gmra.mxu1 %vm170_vm1, %v15748_v52 }
 0x11d   :  { %10664 = vmatmul.msk.f32.gmra.mxu2 %vm170_vm1, %v10647_v50  ;;  %10697 = vmatmul.msk.f32.gmra.mxu3 %vm170_vm1, %v10680_v53 }
 0x120   :  { %v15758_v56 = vpop.f32.mrf.mxu0 }
 0x121   :  { %v941_v5 = vpop.f32.mrf.mxu1 }
 0x123   :  { %10715 = vmatmul.msk.f32.vlgmr.msra.gmra.mxu0 %vm170_vm1, %v15268_v13  ;;  %v15778_v13 = vpop.f32.mrf.mxu2 }
 0x128   :  { %v15762_v49 = vpop.f32.mrf.mxu0 }
 0x12b   :  { %10716 = vmatmul.msk.f32.gmra.mxu0 %vm170_vm1, %v15291_v16  ;;  %v1585_v16 = vld [vmem:[#allocation9 + $0x30] sm:$0xff]  ;;  %v15788_v4 = vpop.f32.mrf.mxu2 }
 0x12c   :  { %1648 = vmatpush.msra.mxu1 %v1585_v16 }
 0x12e   :  { %1649 = vmatpush.msra.mxu1 %v1584_v15 }
 0x130   :  { %v15772_v61 = vpop.f32.mrf.mxu0 }
 0x133   :  { %10717 = vmatmul.msk.f32.gmra.mxu0 %vm170_vm1, %v15314_v19  ;;  %v15798_v7 = vpop.f32.mrf.mxu2 }
 0x138   :  { %v15782_v23 = vpop.f32.mrf.mxu0 }
 0x13b   :  { %10718 = vmatmul.msk.f32.gmra.mxu0 %vm170_vm1, %v15337_v22  ;;  %v15810_v27 = vpop.f32.mrf.mxu2 }
 0x140   :  { %v15790_v19 = vpop.f32.mrf.mxu0 }
 0x143   :  { %10719 = vmatmul.msk.f32.gmra.mxu0 %vm170_vm1, %v15360_v25  ;;  %v1563_v25 = vld [vmem:[#allocation9 + $0x8] sm:$0xff]  ;;  %v15824_v40 = vpop.f32.mrf.mxu2 }
 0x144   :  { %1762 = vmatpush.msra.mxu2 %v1563_v25 }
 0x148   :  { %v15800_v22 = vpop.f32.mrf.mxu0 }
 0x14b   :  { %10720 = vmatmul.msk.f32.gmra.mxu0 %vm170_vm1, %v15383_v28  ;;  %v10705_v28 = vld [vmem:[%s17383_s0 + $0x92] sm:$0xff]  ;;  %v15834_v50 = vpop.f32.mrf.mxu2 }
 0x14c   :  { %17396 = vst [vmem:[#allocation25_spill] sm:$0xff] %v15834_v50  ;;  %v840_v50 = vadd.f32 %v15762_v49, %v15596_v10 }
 0x150   :  { %v15806_v9 = vpop.f32.mrf.mxu0 }
 0x153   :  { %10721 = vmatmul.msk.f32.gmra.mxu0 %vm170_vm1, %v15654_v12  ;;  %v15826_v12 = vpop.f32.mrf.mxu3  ;;  %v15844_v63 = vpop.f32.mrf.mxu2 }
 0x154   :  { %17399 = vst [vmem:[#allocation28_spill] sm:$0xff] %v15844_v63  ;;  %v1981_v63 = vld [vmem:[#allocation9 + $0x60] sm:$0xff] }
 0x155   :  { %2048 = vmatpush.msrb.mxu0 %v1981_v63 }
 0x158   :  { %v15816_v30 = vpop.f32.mrf.mxu0 }
 0x15b   :  { %10722 = vmatmul.msk.f32.gmra.mxu0 %vm170_vm1, %v10705_v28  ;;  %v15838_v55 = vpop.f32.mrf.mxu3  ;;  %v1831_v28 = vld [vmem:[#allocation9 + $0x40] sm:$0xff]  ;;  %v1092_v31 = vpop.f32.mrf.mxu2 }
 0x15c   :  { %17397 = vst [vmem:[#allocation26_spill] sm:$0xff] %v15838_v55  ;;  %1898 = vmatpush.msra.mxu3 %v1831_v28  ;;  %v10713_v55 = vld [vmem:[%s17383_s0 + $0x132] sm:$0xff] }
 0x160   :  { %v15828_v41 = vpop.f32.mrf.mxu0 }
 0x163   :  { %10723 = vmatmul.msk.f32.gmra.mxu0 %vm170_vm1, %v15444_v38  ;;  %v1562_v38 = vld [vmem:[#allocation9] sm:$0xff]  ;;  %v15850_v16 = vpop.f32.mrf.mxu3 }
 0x164   :  { %17400 = vst [vmem:[#allocation29_spill] sm:$0xff] %v15850_v16  ;;  %1763 = vmatpush.msra.mxu2 %v1562_v38  ;;  %v1095_v38 = vpop.f32.mrf.mxu2  ;;  %v15144_v16 = vmov 0.0  }
 0x165   :  { %1493 = vst.msk [vmem:[#allocation2] sm:$0xff] %vm1492_vm2, %v15144_v16 }
 0x166   :  { %1496 = vst.msk [vmem:[#allocation2 + $0x10] sm:$0xff] %vm1492_vm2, %v15144_v16 }
 0x167   :  { %1498 = vst.msk [vmem:[#allocation2 + $0x20] sm:$0xff] %vm1492_vm2, %v15144_v16 }
 0x168   :  { %v15836_v53 = vpop.f32.mrf.mxu0  ;;  %1500 = vst.msk [vmem:[#allocation2 + $0x30] sm:$0xff] %vm1492_vm2, %v15144_v16 }
 0x169   :  { %1502 = vst.msk [vmem:[#allocation2 + $0x40] sm:$0xff] %vm1492_vm2, %v15144_v16 }
 0x16a   :  { %1504 = vst.msk [vmem:[#allocation2 + $0x50] sm:$0xff] %vm1492_vm2, %v15144_v16 }
 0x16b   :  { %10724 = vmatmul.msk.f32.gmra.mxu0 %vm170_vm1, %v15468_v42  ;;  %v1583_v42 = vld [vmem:[#allocation9 + $0x20] sm:$0xff]  ;;  %v1242_v15 = vpop.f32.mrf.mxu3  ;;  %1506 = vst.msk [vmem:[#allocation2 + $0x60] sm:$0xff] %vm1492_vm2, %v15144_v16 }
 0x16c   :  { %1650 = vmatpush.msra.mxu1 %v1583_v42  ;;  %1508 = vst.msk [vmem:[#allocation2 + $0x70] sm:$0xff] %vm1492_vm2, %v15144_v16  ;;  %v1098_v63 = vpop.f32.mrf.mxu2 }
 0x16d   :  { %1510 = vst.msk [vmem:[#allocation2 + $0x80] sm:$0xff] %vm1492_vm2, %v15144_v16 }
 0x16e   :  { %1512 = vst.msk [vmem:[#allocation2 + $0x90] sm:$0xff] %vm1492_vm2, %v15144_v16 }
 0x16f   :  { %1514 = vst.msk [vmem:[#allocation2 + $0xa0] sm:$0xff] %vm1492_vm2, %v15144_v16 }
 0x170   :  { %v15846_v1 = vpop.f32.mrf.mxu0  ;;  %1516 = vst.msk [vmem:[#allocation2 + $0xb0] sm:$0xff] %vm1492_vm2, %v15144_v16 }
 0x171   :  { %1518 = vst.msk [vmem:[#allocation2 + $0xc0] sm:$0xff] %vm1492_vm2, %v15144_v16 }
 0x172   :  { %1520 = vst.msk [vmem:[#allocation2 + $0xd0] sm:$0xff] %vm1492_vm2, %v15144_v16 }
 0x173   :  { %10725 = vmatmul.msk.f32.gmra.mxu0 %vm170_vm1, %v15493_v47  ;;  %v944_v47 = vpop.f32.mrf.mxu1  ;;  %1522 = vst.msk [vmem:[#allocation2 + $0xe0] sm:$0xff] %vm1492_vm2, %v15144_v16 }
 0x174   :  { %1524 = vst.msk [vmem:[#allocation2 + $0xf0] sm:$0xff] %vm1492_vm2, %v15144_v16 }
 0x175   :  { %1526 = vst.msk [vmem:[#allocation2 + $0x100] sm:$0xff] %vm1492_vm2, %v15144_v16 }
 0x176   :  { %1528 = vst.msk [vmem:[#allocation2 + $0x110] sm:$0xff] %vm1492_vm2, %v15144_v16 }
 0x177   :  { %1495 = vst.msk [vmem:[#allocation2 + $0x8] sm:$0x1] %vm1494_vm3, %v15144_v16 }
 0x178   :  { %v15852_v25 = vpop.f32.mrf.mxu0  ;;  %1497 = vst.msk [vmem:[#allocation2 + $0x18] sm:$0x1] %vm1494_vm3, %v15144_v16 }
 0x179   :  { %1499 = vst.msk [vmem:[#allocation2 + $0x28] sm:$0x1] %vm1494_vm3, %v15144_v16 }
 0x17a   :  { %1501 = vst.msk [vmem:[#allocation2 + $0x38] sm:$0x1] %vm1494_vm3, %v15144_v16 }
 0x17b   :  { %10726 = vmatmul.msk.f32.gmra.mxu0 %vm170_vm1, %v15517_v51  ;;  %v1245_v51 = vpop.f32.mrf.mxu3  ;;  %1503 = vst.msk [vmem:[#allocation2 + $0x48] sm:$0x1] %vm1494_vm3, %v15144_v16 }
 0x17c   :  { %1505 = vst.msk [vmem:[#allocation2 + $0x58] sm:$0x1] %vm1494_vm3, %v15144_v16 }
 0x17d   :  { %1507 = vst.msk [vmem:[#allocation2 + $0x68] sm:$0x1] %vm1494_vm3, %v15144_v16 }
 0x17e   :  { %1509 = vst.msk [vmem:[#allocation2 + $0x78] sm:$0x1] %vm1494_vm3, %v15144_v16 }
 0x17f   :  { %1511 = vst.msk [vmem:[#allocation2 + $0x88] sm:$0x1] %vm1494_vm3, %v15144_v16 }
 0x180   :  { %v15856_v43 = vpop.f32.mrf.mxu0  ;;  %1513 = vst.msk [vmem:[#allocation2 + $0x98] sm:$0x1] %vm1494_vm3, %v15144_v16 }
 0x181   :  { %1515 = vst.msk [vmem:[#allocation2 + $0xa8] sm:$0x1] %vm1494_vm3, %v15144_v16 }
 0x182   :  { %1517 = vst.msk [vmem:[#allocation2 + $0xb8] sm:$0x1] %vm1494_vm3, %v15144_v16 }
 0x183   :  { %10727 = vmatmul.msk.f32.gmra.mxu0 %vm170_vm1, %v15540_v54  ;;  %v947_v54 = vpop.f32.mrf.mxu1  ;;  %1519 = vst.msk [vmem:[#allocation2 + $0xc8] sm:$0x1] %vm1494_vm3, %v15144_v16 }
 0x184   :  { %1521 = vst.msk [vmem:[#allocation2 + $0xd8] sm:$0x1] %vm1494_vm3, %v15144_v16 }
 0x185   :  { %1523 = vst.msk [vmem:[#allocation2 + $0xe8] sm:$0x1] %vm1494_vm3, %v15144_v16 }
 0x186   :  { %1525 = vst.msk [vmem:[#allocation2 + $0xf8] sm:$0x1] %vm1494_vm3, %v15144_v16 }
 0x187   :  { %1527 = vst.msk [vmem:[#allocation2 + $0x108] sm:$0x1] %vm1494_vm3, %v15144_v16 }
 0x188   :  { %v15864_v28 = vpop.f32.mrf.mxu0  ;;  %1529 = vst.msk [vmem:[#allocation2 + $0x118] sm:$0x1] %vm1494_vm3, %v15144_v16 }
 0x189   :  { %17401 = vst [vmem:[#allocation30_spill] sm:$0xff] %v15864_v28 }
 0x18b   :  { %10728 = vmatmul.msk.f32.gmra.mxu0 %vm170_vm1, %v15563_v57  ;;  %v1248_v57 = vpop.f32.mrf.mxu3  ;;  %v950_v58 = vpop.f32.mrf.mxu1 }
 0x190   :  { %v15884_v42 = vpop.f32.mrf.mxu0 }
 0x191   :  { %17402 = vst [vmem:[#allocation31_spill] sm:$0xff] %v15884_v42  ;;  %v839_v42 = vadd.f32 %v15758_v56, %v15586_v3 }
 0x193   :  { %10729 = vmatmul.msk.f32.gmra.mxu0 %vm170_vm1, %v15748_v52  ;;  %v1101_v52 = vpop.f32.mrf.mxu2  ;;  %v989_v3 = vadd.f32 %v941_v5, %v839_v42 }
 0x195   :  { %v1140_v56 = vadd.f32 %v1092_v31, %v989_v3  ;;  %v15928_v31 = vld [vmem:[#allocation7] ss:$0 sm:$0xff]  ;;  %v990_v3 = vadd.f32 %v944_v47, %v840_v50  ;;  %v841_v50 = vadd.f32 %v15772_v61, %v15606_v33 }
 0x197   :  { %v1290_v5 = vadd.f32 %v1242_v15, %v1140_v56  ;;  %v1141_v49 = vadd.f32 %v1095_v38, %v990_v3 }
 0x198   :  { %v15906_v46 = vpop.f32.mrf.mxu0 }
 0x199   :  { %17403 = vst [vmem:[#allocation32_spill] sm:$0xff] %v15906_v46  ;;  %v1251_v46 = vpop.f32.mrf.mxu3  ;;  %v1291_v38 = vadd.f32 %v1245_v51, %v1141_v49  ;;  %v842_v51 = vadd.f32 %v15782_v23, %v15616_v59  ;;  %v843_v59 = vadd.f32 %v15790_v19, %v15626_v0 }
 0x19b   :  { %10730 = vmatmul.msk.f32.gmra.mxu0 %vm170_vm1, %v10713_v55  ;;  %v953_v55 = vpop.f32.mrf.mxu1  ;;  %v1104_v10 = vpop.f32.mrf.mxu2  ;;  %v992_v16 = vadd.f32 %v950_v58, %v842_v51 }
 0x1a0   :  { %v1392_v42 = vpop.f32.mrf.mxu0 }
 0x1a1   :  { %v1440_v28 = vadd.f32 %v1392_v42, %v1290_v5  ;;  %v1254_v56 = vpop.f32.mrf.mxu3  ;;  %v991_v5 = vadd.f32 %v947_v54, %v841_v50 }
 0x1a3   :  { %v1460_v15 = vadd.f32 %v15928_v31, %v1440_v28  ;;  %v956_v33 = vpop.f32.mrf.mxu1  ;;  %v1142_v61 = vadd.f32 %v1098_v63, %v991_v5 }
 0x1a5   :  { %v1476_v47 = vmax.f32 %v1460_v15, 0.0  ;;  %v1107_v15 = vpop.f32.mrf.mxu2  ;;  %v1292_v39 = vadd.f32 %v1248_v57, %v1142_v61 }
 0x1a7   :  { %1530 = vst.msk [vmem:[#allocation2] sm:$0xff] %vm1492_vm2, %v1476_v47 }
 0x1a8   :  { %v1395_v28 = vpop.f32.mrf.mxu0 }
 0x1a9   :  { %v1441_v42 = vadd.f32 %v1395_v28, %v1291_v38  ;;  %v1257_v54 = vpop.f32.mrf.mxu3  ;;  %v1143_v38 = vadd.f32 %v1101_v52, %v992_v16 }
 0x1ab   :  { %v1461_v3 = vadd.f32 %v15928_v31, %v1441_v42  ;;  %v959_v5 = vpop.f32.mrf.mxu1 }
 0x1ad   :  { %v1477_v49 = vmax.f32 %v1461_v3, 0.0  ;;  %v1110_v42 = vpop.f32.mrf.mxu2  ;;  %v1293_v3 = vadd.f32 %v1251_v46, %v1143_v38  ;;  %v844_v46 = vadd.f32 %v15800_v22, %v15636_v6 }
 0x1ae   :  { %v1566_v47 = vld [vmem:[#allocation2 + $0x1] sm:$0xff] }
 0x1af   :  { %v1546_v48 = vld [vmem:[#allocation2] sm:$0xff]  ;;  %1531 = vst.msk [vmem:[#allocation2 + $0x10] sm:$0xff] %vm1492_vm2, %v1477_v49  ;;  %10731 = vmatmul.msk.f32.vlgmr.msra.gmra.mxu1 %vm1492_vm2, %v1566_v47 }
 0x1b0   :  { %10747 = vmatmul.msk.f32.vlgmr.msra.gmra.mxu2 %vm1492_vm2, %v1546_v48  ;;  %v1398_v50 = vpop.f32.mrf.mxu0  ;;  %v993_v48 = vadd.f32 %v953_v55, %v843_v59 }
 0x1b1   :  { %v1442_v63 = vadd.f32 %v1398_v50, %v1292_v39  ;;  %v1260_v52 = vpop.f32.mrf.mxu3 }
 0x1b2   :  { %v1144_v0 = vadd.f32 %v1104_v10, %v993_v48 }
 0x1b3   :  { %v1462_v28 = vadd.f32 %v15928_v31, %v1442_v63  ;;  %v962_v49 = vpop.f32.mrf.mxu1  ;;  %v994_v63 = vadd.f32 %v956_v33, %v844_v46 }
 0x1b4   :  { %v1294_v16 = vadd.f32 %v1254_v56, %v1144_v0  ;;  %v845_v56 = vadd.f32 %v15806_v9, %v15656_v29 }
 0x1b5   :  { %v1478_v23 = vmax.f32 %v1462_v28, 0.0  ;;  %v1113_v55 = vpop.f32.mrf.mxu2  ;;  %v1145_v6 = vadd.f32 %v1107_v15, %v994_v63 }
 0x1b6   :  { %v1567_v57 = vld [vmem:[#allocation2 + $0x11] sm:$0xff]  ;;  %v995_v15 = vadd.f32 %v959_v5, %v845_v56 }
 0x1b7   :  { %v1547_v61 = vld [vmem:[#allocation2 + $0x10] sm:$0xff]  ;;  %1532 = vst.msk [vmem:[#allocation2 + $0x20] sm:$0xff] %vm1492_vm2, %v1478_v23  ;;  %10732 = vmatmul.msk.f32.gmra.mxu1 %vm1492_vm2, %v1567_v57  ;;  %10779 = vmatmul.msk.f32.vlgmr.msrb.gmra.mxu0 %vm1492_vm2, %v1567_v57 }
 0x1b8   :  { %10748 = vmatmul.msk.f32.gmra.mxu2 %vm1492_vm2, %v1547_v61  ;;  %10763 = vmatmul.msk.f32.vlgmr.msra.gmra.mxu3 %vm1492_vm2, %v1547_v61  ;;  %v1401_v39 = vpop.f32.mrf.mxu0  ;;  %v1295_v61 = vadd.f32 %v1257_v54, %v1145_v6  ;;  %v1146_v29 = vadd.f32 %v1110_v42, %v995_v15  ;;  %v381_v54 = vadd.f32 %v15764_v18, %v15666_v17 }
 0x1b9   :  { %v1443_v58 = vadd.f32 %v1401_v39, %v1293_v3  ;;  %v1263_v28 = vpop.f32.mrf.mxu3 }
 0x1bb   :  { %v1463_v19 = vadd.f32 %v15928_v31, %v1443_v58  ;;  %v965_v3 = vpop.f32.mrf.mxu1  ;;  %v846_v58 = vadd.f32 %v15816_v30, %v15668_v44 }
 0x1bd   :  { %v1479_v51 = vmax.f32 %v1463_v19, 0.0  ;;  %v1116_v48 = vpop.f32.mrf.mxu2  ;;  %v996_v18 = vadd.f32 %v962_v49, %v846_v58 }
 0x1be   :  { %v1568_v47 = vld [vmem:[#allocation2 + $0x21] sm:$0xff] }
 0x1bf   :  { %v1548_v50 = vld [vmem:[#allocation2 + $0x20] sm:$0xff]  ;;  %1533 = vst.msk [vmem:[#allocation2 + $0x30] sm:$0xff] %vm1492_vm2, %v1479_v51  ;;  %10733 = vmatmul.msk.f32.gmra.mxu1 %vm1492_vm2, %v1568_v47  ;;  %10780 = vmatmul.msk.f32.gmra.mxu0 %vm1492_vm2, %v1568_v47  ;;  %v546_v47 = vadd.f32 %v15766_v20, %v381_v54  ;;  %v1147_v42 = vadd.f32 %v1113_v55, %v996_v18 }
 0x1c0   :  { %10749 = vmatmul.msk.f32.gmra.mxu2 %vm1492_vm2, %v1548_v50  ;;  %10764 = vmatmul.msk.f32.gmra.mxu3 %vm1492_vm2, %v1548_v50  ;;  %v1404_v10 = vpop.f32.mrf.mxu0  ;;  %v1296_v50 = vadd.f32 %v1260_v52, %v1146_v29 }
 0x1c1   :  { %v1444_v38 = vadd.f32 %v1404_v10, %v1294_v16  ;;  %v1266_v19 = vpop.f32.mrf.mxu3  ;;  %v697_v5 = vadd.f32 %v15770_v60, %v546_v47  ;;  %v384_v16 = vadd.f32 %v15774_v62, %v15678_v45  ;;  %v1297_v56 = vadd.f32 %v1263_v28, %v1147_v42  ;;  %v1821_v42 = vld [vmem:[#allocation2 + $0x80] sm:$0xff] }
 0x1c3   :  { %v1464_v22 = vadd.f32 %v15928_v31, %v1444_v38  ;;  %v968_v30 = vpop.f32.mrf.mxu1  ;;  %v847_v10 = vadd.f32 %v15828_v41, %v697_v5 }
 0x1c5   :  { %v1480_v59 = vmax.f32 %v1464_v22, 0.0  ;;  %v1119_v52 = vpop.f32.mrf.mxu2  ;;  %v547_v22 = vadd.f32 %v15778_v13, %v384_v16  ;;  %v997_v62 = vadd.f32 %v965_v3, %v847_v10 }
 0x1c6   :  { %v1569_v23 = vld [vmem:[#allocation2 + $0x31] sm:$0xff] }
 0x1c7   :  { %v1549_v57 = vld [vmem:[#allocation2 + $0x30] sm:$0xff]  ;;  %1534 = vst.msk [vmem:[#allocation2 + $0x40] sm:$0xff] %vm1492_vm2, %v1480_v59  ;;  %10734 = vmatmul.msk.f32.gmra.mxu1 %vm1492_vm2, %v1569_v23  ;;  %10781 = vmatmul.msk.f32.gmra.mxu0 %vm1492_vm2, %v1569_v23  ;;  %v698_v49 = vadd.f32 %v15780_v21, %v547_v22  ;;  %v1148_v55 = vadd.f32 %v1116_v48, %v997_v62 }
 0x1c8   :  { %10750 = vmatmul.msk.f32.gmra.mxu2 %vm1492_vm2, %v1549_v57  ;;  %10765 = vmatmul.msk.f32.gmra.mxu3 %vm1492_vm2, %v1549_v57  ;;  %v1407_v33 = vpop.f32.mrf.mxu0  ;;  %v387_v59 = vadd.f32 %v15786_v2, %v15688_v34 }
 0x1c9   :  { %v1445_v39 = vadd.f32 %v1407_v33, %v1295_v61  ;;  %v1269_v60 = vpop.f32.mrf.mxu3  ;;  %v848_v23 = vadd.f32 %v15836_v53, %v698_v49  ;;  %v1298_v29 = vadd.f32 %v1266_v19, %v1148_v55 }
 0x1cb   :  { %v1465_v9 = vadd.f32 %v15928_v31, %v1445_v39  ;;  %v971_v28 = vpop.f32.mrf.mxu1  ;;  %v548_v39 = vadd.f32 %v15788_v4, %v387_v59  ;;  %v998_v21 = vadd.f32 %v968_v30, %v848_v23  ;;  %v14158_v59 = vld [vmem:[#allocation12 + $0xf4] sm:$0xf0] }
 0x1cd   :  { %v1481_v0 = vmax.f32 %v1465_v9, 0.0  ;;  %v1122_v61 = vpop.f32.mrf.mxu2  ;;  %v699_v3 = vadd.f32 %v15792_v24, %v548_v39  ;;  %v1149_v48 = vadd.f32 %v1119_v52, %v998_v21  ;;  %v390_v9 = vadd.f32 %v15796_v26, %v15698_v35  ;;  %v17405_v21 = vld [vmem:[#allocation24_spill] sm:$0xff] }
 0x1ce   :  { %v1570_v46 = vld [vmem:[#allocation2 + $0x41] sm:$0xff] }
 0x1cf   :  { %v1550_v51 = vld [vmem:[#allocation2 + $0x40] sm:$0xff]  ;;  %1535 = vst.msk [vmem:[#allocation2 + $0x50] sm:$0xff] %vm1492_vm2, %v1481_v0  ;;  %10735 = vmatmul.msk.f32.gmra.mxu1 %vm1492_vm2, %v1570_v46  ;;  %10782 = vmatmul.msk.f32.gmra.mxu0 %vm1492_vm2, %v1570_v46  ;;  %v849_v54 = vadd.f32 %v15846_v1, %v699_v3  ;;  %v1299_v47 = vadd.f32 %v1269_v60, %v1149_v48 }
 0x1d0   :  { %10751 = vmatmul.msk.f32.gmra.mxu2 %vm1492_vm2, %v1550_v51  ;;  %10766 = vmatmul.msk.f32.gmra.mxu3 %vm1492_vm2, %v1550_v51  ;;  %v1410_v17 = vpop.f32.mrf.mxu0  ;;  %v549_v51 = vadd.f32 %v15798_v7, %v390_v9 }
 0x1d1   :  { %v1446_v44 = vadd.f32 %v1410_v17, %v1296_v50  ;;  %v1272_v53 = vpop.f32.mrf.mxu3  ;;  %v999_v26 = vadd.f32 %v971_v28, %v849_v54  ;;  %v10847_v28 = vld [vmem:[#allocation12 + $0xf0] sm:$0xf0]  ;;  %v17407_v54 = vld [vmem:[#allocation25_spill] sm:$0xff] }
 0x1d2   :  { %v700_v50 = vadd.f32 %v15804_v8, %v549_v51 }
 0x1d3   :  { %v1466_v20 = vadd.f32 %v15928_v31, %v1446_v44  ;;  %v974_v0 = vpop.f32.mrf.mxu1  ;;  %v1150_v17 = vadd.f32 %v1122_v61, %v999_v26  ;;  %v393_v44 = vadd.f32 %v15808_v11, %v15708_v36  ;;  %v17408_v26 = vld [vmem:[#allocation26_spill] sm:$0xff] }
 0x1d4   :  { %v850_v30 = vadd.f32 %v15852_v25, %v700_v50 }
 0x1d5   :  { %v1482_v63 = vmax.f32 %v1466_v20, 0.0  ;;  %v1125_v24 = vpop.f32.mrf.mxu2  ;;  %v1971_v20 = vld [vmem:[#allocation2 + $0x81] sm:$0xff]  ;;  %v550_v10 = vadd.f32 %v15810_v27, %v393_v44  ;;  %v17410_v44 = vld [vmem:[#allocation27_spill] sm:$0xff] }
 0x1d6   :  { %v1571_v38 = vld [vmem:[#allocation2 + $0x51] sm:$0xff]  ;;  %v1000_v11 = vadd.f32 %v974_v0, %v850_v30 }
 0x1d7   :  { %v1551_v6 = vld [vmem:[#allocation2 + $0x50] sm:$0xff]  ;;  %1536 = vst.msk [vmem:[#allocation2 + $0x60] sm:$0xff] %vm1492_vm2, %v1482_v63  ;;  %10736 = vmatmul.msk.f32.gmra.mxu1 %vm1492_vm2, %v1571_v38  ;;  %10783 = vmatmul.msk.f32.gmra.mxu0 %vm1492_vm2, %v1571_v38  ;;  %v1300_v63 = vadd.f32 %v1272_v53, %v1150_v17 }
 0x1d8   :  { %10752 = vmatmul.msk.f32.gmra.mxu2 %vm1492_vm2, %v1551_v6  ;;  %10767 = vmatmul.msk.f32.gmra.mxu3 %vm1492_vm2, %v1551_v6  ;;  %v1413_v45 = vpop.f32.mrf.mxu0  ;;  %v701_v6 = vadd.f32 %v15814_v14, %v550_v10  ;;  %v1151_v22 = vadd.f32 %v1125_v24, %v1000_v11  ;;  %v14155_v14 = vld [vmem:[#allocation12 + $0xe4] sm:$0xf]  ;;  %v17406_v53 = vld [vmem:[#allocation30_spill] sm:$0xff] }
 0x1d9   :  { %v1447_v41 = vadd.f32 %v1413_v45, %v1297_v56  ;;  %v1275_v18 = vpop.f32.mrf.mxu3  ;;  %v396_v56 = vadd.f32 %v15821_v32, %v15718_v37  ;;  %v10850_v32 = vor.u32 %v14155_v14, %v10847_v28 }
 0x1da   :  { %v851_v60 = vadd.f32 %v15856_v43, %v701_v6  ;;  %v10853_v43 = vld [vmem:[#allocation12 + $0xe8] sm:$0xf] }
 0x1db   :  { %v1467_v13 = vadd.f32 %v15928_v31, %v1447_v41  ;;  %v977_v8 = vpop.f32.mrf.mxu1  ;;  %v551_v55 = vadd.f32 %v15824_v40, %v396_v56  ;;  %v10854_v40 = vor.u32 %v14158_v59, %v10853_v43  ;;  %2315 = vmatpush.bf16.msrb.mxu2 %v10850_v32 }
 0x1dc   :  { %v1001_v23 = vadd.f32 %v977_v8, %v851_v60 }
 0x1dd   :  { %v1483_v57 = vmax.f32 %v1467_v13, 0.0  ;;  %v1128_v38 = vpop.f32.mrf.mxu2  ;;  %v1301_v13 = vadd.f32 %v1275_v18, %v1151_v22  ;;  %2328 = vmatpush.bf16.msrb.mxu3 %v10854_v40  ;;  %v17409_v18 = vld [vmem:[#allocation23_spill] sm:$0xff]  ;;  %v17413_v22 = vld [vmem:[#allocation29_spill] sm:$0xff] }
 0x1de   :  { %v1572_v33 = vld [vmem:[#allocation2 + $0x61] sm:$0xff]  ;;  %v402_v30 = vadd.f32 %v17410_v44, %v17409_v18 }
 0x1df   :  { %v1552_v15 = vld [vmem:[#allocation2 + $0x60] sm:$0xff]  ;;  %1537 = vst.msk [vmem:[#allocation2 + $0x70] sm:$0xff] %vm1492_vm2, %v1483_v57  ;;  %10737 = vmatmul.msk.f32.gmra.mxu1 %vm1492_vm2, %v1572_v33  ;;  %10784 = vmatmul.msk.f32.gmra.mxu0 %vm1492_vm2, %v1572_v33  ;;  %v702_v33 = vadd.f32 %v15826_v12, %v551_v55  ;;  %v10845_v12 = vld [vmem:[#allocation12 + $0xe0] sm:$0xf] }
 0x1e0   :  { %10753 = vmatmul.msk.f32.gmra.mxu2 %vm1492_vm2, %v1552_v15  ;;  %10768 = vmatmul.msk.f32.gmra.mxu3 %vm1492_vm2, %v1552_v15  ;;  %v1416_v34 = vpop.f32.mrf.mxu0  ;;  %v1152_v15 = vadd.f32 %v1128_v38, %v1001_v23  ;;  %v16100_v18 = vld [vmem:[#allocation10] ss:$0 sm:$0xff] }
 0x1e1   :  { %v1448_v2 = vadd.f32 %v1416_v34, %v1298_v29  ;;  %v1278_v62 = vpop.f32.mrf.mxu3  ;;  %v17404_v34 = vld [vmem:[#allocation22_spill] sm:$0xff]  ;;  %v852_v3 = vadd.f32 %v17406_v53, %v702_v33  ;;  %v10831_v33 = vld [vmem:[#allocation12 + $0xd0] sm:$0xf0] }
 0x1e2   :  { %v1302_v0 = vadd.f32 %v1278_v62, %v1152_v15 }
 0x1e3   :  { %v1468_v4 = vadd.f32 %v15928_v31, %v1448_v2  ;;  %v980_v61 = vpop.f32.mrf.mxu1  ;;  %v399_v2 = vadd.f32 %v17405_v21, %v17404_v34  ;;  %v10837_v34 = vld [vmem:[#allocation12 + $0xc8] sm:$0xf] }
 0x1e4   :  { %v1002_v24 = vadd.f32 %v980_v61, %v852_v3  ;;  %v14151_v61 = vld [vmem:[#allocation12 + $0xc4] sm:$0xf] }
 0x1e5   :  { %v1484_v58 = vmax.f32 %v1468_v4, 0.0  ;;  %v1131_v29 = vpop.f32.mrf.mxu2 }
 0x1e6   :  { %v1573_v19 = vld [vmem:[#allocation2 + $0x71] sm:$0xff]  ;;  %v1153_v50 = vadd.f32 %v1131_v29, %v1002_v24  ;;  %v10834_v29 = vor.u32 %v14151_v61, %v10831_v33 }
 0x1e7   :  { %v1553_v46 = vld [vmem:[#allocation2 + $0x70] sm:$0xff]  ;;  %1538 = vst.msk [vmem:[#allocation2 + $0x90] sm:$0xff] %vm1492_vm2, %v1484_v58  ;;  %10738 = vmatmul.msk.f32.gmra.mxu1 %vm1492_vm2, %v1573_v19  ;;  %10785 = vmatmul.msk.f32.gmra.mxu0 %vm1492_vm2, %v1573_v19  ;;  %v552_v58 = vadd.f32 %v17407_v54, %v399_v2  ;;  %v14157_v19 = vld [vmem:[#allocation12 + $0xec] sm:$0xf0]  ;;  %v14154_v2 = vld [vmem:[#allocation12 + $0xd4] sm:$0xf0] }
 0x1e8   :  { %10754 = vmatmul.msk.f32.gmra.mxu2 %vm1492_vm2, %v1553_v46  ;;  %10769 = vmatmul.msk.f32.gmra.mxu3 %vm1492_vm2, %v1553_v46  ;;  %v1419_v35 = vpop.f32.mrf.mxu0  ;;  %v10838_v3 = vor.u32 %v14154_v2, %v10837_v34  ;;  %v1979_v24 = vld [vmem:[#allocation2 + $0x111] sm:$0xff] }
 0x1e9   :  { %v1449_v1 = vadd.f32 %v1419_v35, %v1299_v47  ;;  %v1281_v46 = vpop.f32.mrf.mxu3  ;;  %v10846_v47 = vor.u32 %v14157_v19, %v10845_v12  ;;  %2316 = vmatpush.bf16.msrb.mxu2 %v10834_v29  ;;  %v14153_v12 = vld [vmem:[#allocation12 + $0xcc] sm:$0xf0] }
 0x1ea   :  { %2329 = vmatpush.bf16.msrb.mxu3 %v10838_v3 }
 0x1eb   :  { %v1469_v7 = vadd.f32 %v15928_v31, %v1449_v1  ;;  %2302 = vmatpush.bf16.msrb.mxu1 %v10846_v47  ;;  %v703_v1 = vadd.f32 %v17408_v26, %v552_v58  ;;  %v1829_v47 = vld [vmem:[#allocation2 + $0x110] sm:$0xff] }
 0x1ed   :  { %v1485_v5 = vmax.f32 %v1469_v7, 0.0  ;;  %v983_v7 = vpop.f32.mrf.mxu1 }
 0x1ee   :  { %v1574_v52 = vld [vmem:[#allocation2 + $0x91] sm:$0xff] }
 0x1ef   :  { %v1554_v16 = vld [vmem:[#allocation2 + $0x90] sm:$0xff]  ;;  %1539 = vst.msk [vmem:[#allocation2 + $0xa0] sm:$0xff] %vm1492_vm2, %v1485_v5  ;;  %10739 = vmatmul.msk.f32.gmra.mxu1 %vm1492_vm2, %v1574_v52  ;;  %10786 = vmatmul.msk.f32.gmra.mxu0 %vm1492_vm2, %v1971_v20  ;;  %v17411_v5 = vld [vmem:[#allocation31_spill] sm:$0xff]  ;;  %v1134_v52 = vpop.f32.mrf.mxu2 }
 0x1f0   :  { %10755 = vmatmul.msk.f32.gmra.mxu2 %vm1492_vm2, %v1554_v16  ;;  %10770 = vmatmul.msk.f32.gmra.mxu3 %vm1492_vm2, %v1821_v42  ;;  %v1422_v36 = vpop.f32.mrf.mxu0  ;;  %v853_v42 = vadd.f32 %v17411_v5, %v703_v1  ;;  %v14147_v5 = vld [vmem:[#allocation12 + $0xa4] sm:$0xf] }
 0x1f1   :  { %v1450_v25 = vadd.f32 %v1422_v36, %v1300_v63  ;;  %v17412_v63 = vld [vmem:[#allocation28_spill] sm:$0xff]  ;;  %v1303_v36 = vadd.f32 %v1281_v46, %v1153_v50  ;;  %v1284_v6 = vpop.f32.mrf.mxu3 }
 0x1f2   :  { %v553_v8 = vadd.f32 %v17412_v63, %v402_v30 }
 0x1f3   :  { %v1470_v27 = vadd.f32 %v15928_v31, %v1450_v25  ;;  %v1003_v25 = vadd.f32 %v983_v7, %v853_v42  ;;  %v10815_v42 = vld [vmem:[#allocation12 + $0xb0] sm:$0xf0] }
 0x1f5   :  { %v1486_v45 = vmax.f32 %v1470_v27, 0.0  ;;  %v704_v27 = vadd.f32 %v17413_v22, %v553_v8  ;;  %v1154_v56 = vadd.f32 %v1134_v52, %v1003_v25 }
 0x1f6   :  { %v1575_v41 = vld [vmem:[#allocation2 + $0xa1] sm:$0xff] }
 0x1f7   :  { %v1555_v49 = vld [vmem:[#allocation2 + $0xa0] sm:$0xff]  ;;  %1540 = vst.msk [vmem:[#allocation2 + $0xb0] sm:$0xff] %vm1492_vm2, %v1486_v45  ;;  %10740 = vmatmul.msk.f32.gmra.mxu1 %vm1492_vm2, %v1575_v41  ;;  %10787 = vmatmul.msk.f32.gmra.mxu0 %vm1492_vm2, %v1575_v41  ;;  %v1304_v14 = vadd.f32 %v1284_v6, %v1154_v56  ;;  %v1137_v28 = vpop.f32.mrf.mxu2  ;;  %v10813_v56 = vld [vmem:[#allocation12 + $0xa0] sm:$0xf] }
 0x1f8   :  { %10756 = vmatmul.msk.f32.gmra.mxu2 %vm1492_vm2, %v1555_v49  ;;  %10771 = vmatmul.msk.f32.gmra.mxu3 %vm1492_vm2, %v1555_v49  ;;  %v1425_v37 = vpop.f32.mrf.mxu0  ;;  %v17414_v45 = vld [vmem:[#allocation32_spill] sm:$0xff]  ;;  %v986_v49 = vpop.f32.mrf.mxu1 }
 0x1f9   :  { %v1451_v57 = vadd.f32 %v1425_v37, %v1301_v13  ;;  %v854_v62 = vadd.f32 %v17414_v45, %v704_v27 }
 0x1fb   :  { %v1471_v39 = vadd.f32 %v15928_v31, %v1451_v57  ;;  %v1004_v32 = vadd.f32 %v986_v49, %v854_v62  ;;  %v1287_v57 = vpop.f32.mrf.mxu3 }
 0x1fd   :  { %v1487_v48 = vmax.f32 %v1471_v39, 0.0  ;;  %v1155_v59 = vadd.f32 %v1137_v28, %v1004_v32 }
 0x1fe   :  { %v1576_v4 = vld [vmem:[#allocation2 + $0xb1] sm:$0xff] }
 0x1ff   :  { %v1556_v9 = vld [vmem:[#allocation2 + $0xb0] sm:$0xff]  ;;  %1541 = vst.msk [vmem:[#allocation2 + $0xc0] sm:$0xff] %vm1492_vm2, %v1487_v48  ;;  %10741 = vmatmul.msk.f32.gmra.mxu1 %vm1492_vm2, %v1576_v4  ;;  %10788 = vmatmul.msk.f32.gmra.mxu0 %vm1492_vm2, %v1576_v4  ;;  %v1305_v21 = vadd.f32 %v1287_v57, %v1155_v59 }
 0x200   :  { %10757 = vmatmul.msk.f32.gmra.mxu2 %vm1492_vm2, %v1556_v9  ;;  %10772 = vmatmul.msk.f32.gmra.mxu3 %vm1492_vm2, %v1556_v9  ;;  %v1428_v51 = vpop.f32.mrf.mxu0 }
 0x201   :  { %v1452_v35 = vadd.f32 %v1428_v51, %v1302_v0  ;;  %v10829_v0 = vld [vmem:[#allocation12 + $0xc0] sm:$0xf] }
 0x202   :  { %v10830_v19 = vor.u32 %v14153_v12, %v10829_v0 }
 0x203   :  { %v1472_v17 = vadd.f32 %v15928_v31, %v1452_v35 }
 0x204   :  { %2303 = vmatpush.bf16.msrb.mxu1 %v10830_v19  ;;  %v10805_v19 = vld [vmem:[#allocation12 + $0x88] sm:$0xf] }
 0x205   :  { %v1488_v20 = vmax.f32 %v1472_v17, 0.0 }
 0x206   :  { %v1577_v16 = vld [vmem:[#allocation2 + $0xc1] sm:$0xff] }
 0x207   :  { %v1557_v10 = vld [vmem:[#allocation2 + $0xc0] sm:$0xff]  ;;  %1542 = vst.msk [vmem:[#allocation2 + $0xd0] sm:$0xff] %vm1492_vm2, %v1488_v20  ;;  %10742 = vmatmul.msk.f32.gmra.mxu1 %vm1492_vm2, %v1577_v16  ;;  %10789 = vmatmul.msk.f32.gmra.mxu0 %vm1492_vm2, %v1577_v16  ;;  %v10821_v20 = vld [vmem:[#allocation12 + $0xa8] sm:$0xf]  ;;  %v10818_v16 = vor.u32 %v14147_v5, %v10815_v42  ;;  %v14145_v5 = vld [vmem:[#allocation12 + $0x8c] sm:$0xf0] }
 0x208   :  { %10758 = vmatmul.msk.f32.gmra.mxu2 %vm1492_vm2, %v1557_v10  ;;  %10773 = vmatmul.msk.f32.gmra.mxu3 %vm1492_vm2, %v1557_v10  ;;  %v1431_v11 = vpop.f32.mrf.mxu0  ;;  %v14150_v10 = vld [vmem:[#allocation12 + $0xb4] sm:$0xf0] }
 0x209   :  { %v1453_v38 = vadd.f32 %v1431_v11, %v1303_v36  ;;  %v10822_v8 = vor.u32 %v14150_v10, %v10821_v20  ;;  %2317 = vmatpush.bf16.msrb.mxu2 %v10818_v16  ;;  %v11237_v10 = vld [vmem:[#allocation12 + $0x340] sm:$0xf] }
 0x20b   :  { %v1473_v60 = vadd.f32 %v15928_v31, %v1453_v38  ;;  %2330 = vmatpush.bf16.msrb.mxu3 %v10822_v8 }
 0x20d   :  { %v1489_v41 = vmax.f32 %v1473_v60, 0.0  ;;  %v14149_v60 = vld [vmem:[#allocation12 + $0xac] sm:$0xf0] }
 0x20e   :  { %v1578_v55 = vld [vmem:[#allocation2 + $0xd1] sm:$0xff]  ;;  %v10814_v62 = vor.u32 %v14149_v60, %v10813_v56 }
 0x20f   :  { %v1558_v13 = vld [vmem:[#allocation2 + $0xd0] sm:$0xff]  ;;  %1543 = vst.msk [vmem:[#allocation2 + $0xe0] sm:$0xff] %vm1492_vm2, %v1489_v41  ;;  %10743 = vmatmul.msk.f32.gmra.mxu1 %vm1492_vm2, %v1578_v55  ;;  %10790 = vmatmul.msk.f32.gmra.mxu0 %vm1492_vm2, %v1578_v55 }
 0x210   :  { %10759 = vmatmul.msk.f32.gmra.mxu2 %vm1492_vm2, %v1558_v13  ;;  %10774 = vmatmul.msk.f32.gmra.mxu3 %vm1492_vm2, %v1558_v13  ;;  %v1434_v37 = vpop.f32.mrf.mxu0 }
 0x211   :  { %v1454_v43 = vadd.f32 %v1434_v37, %v1304_v14  ;;  %2304 = vmatpush.bf16.msrb.mxu1 %v10814_v62 }
 0x213   :  { %v1474_v23 = vadd.f32 %v15928_v31, %v1454_v43 }
 0x215   :  { %v1490_v40 = vmax.f32 %v1474_v23, 0.0 }
 0x216   :  { %v1579_v15 = vld [vmem:[#allocation2 + $0xe1] sm:$0xff] }
 0x217   :  { %v1559_v39 = vld [vmem:[#allocation2 + $0xe0] sm:$0xff]  ;;  %1544 = vst.msk [vmem:[#allocation2 + $0xf0] sm:$0xff] %vm1492_vm2, %v1490_v40  ;;  %10744 = vmatmul.msk.f32.gmra.mxu1 %vm1492_vm2, %v1579_v15  ;;  %10791 = vmatmul.msk.f32.gmra.mxu0 %vm1492_vm2, %v1579_v15 }
 0x218   :  { %10760 = vmatmul.msk.f32.gmra.mxu2 %vm1492_vm2, %v1559_v39  ;;  %10775 = vmatmul.msk.f32.gmra.mxu3 %vm1492_vm2, %v1559_v39  ;;  %v1437_v53 = vpop.f32.mrf.mxu0 }
 0x219   :  { %v1455_v48 = vadd.f32 %v1437_v53, %v1305_v21 }
 0x21b   :  { %v1475_v4 = vadd.f32 %v15928_v31, %v1455_v48 }
 0x21d   :  { %v1491_v9 = vmax.f32 %v1475_v4, 0.0 }
 0x21e   :  { %v1580_v54 = vld [vmem:[#allocation2 + $0xf1] sm:$0xff] }
 0x21f   :  { %v1560_v58 = vld [vmem:[#allocation2 + $0xf0] sm:$0xff]  ;;  %1545 = vst.msk [vmem:[#allocation2 + $0x100] sm:$0xff] %vm1492_vm2, %v1491_v9  ;;  %10745 = vmatmul.msk.f32.gmra.mxu1 %vm1492_vm2, %v1580_v54  ;;  %10792 = vmatmul.msk.f32.gmra.mxu0 %vm1492_vm2, %v1580_v54  ;;  %v14143_v54 = vld [vmem:[#allocation12 + $0x84] sm:$0xf] }
 0x220   :  { %10761 = vmatmul.msk.f32.gmra.mxu2 %vm1492_vm2, %v1560_v58  ;;  %10776 = vmatmul.msk.f32.gmra.mxu3 %vm1492_vm2, %v1560_v58  ;;  %v10799_v58 = vld [vmem:[#allocation12 + $0x90] sm:$0xf0] }
 0x221   :  { %v10802_v12 = vor.u32 %v14143_v54, %v10799_v58  ;;  %v10839_v54 = vld [vmem:[#allocation12 + $0xd8] sm:$0xf0]  ;;  %v14135_v58 = vld [vmem:[#allocation12 + $0x44] sm:$0xf] }
 0x223   :  { %2318 = vmatpush.bf16.msrb.mxu2 %v10802_v12 }
 0x226   :  { %v1581_v46 = vld [vmem:[#allocation2 + $0x101] sm:$0xff] }
 0x227   :  { %v1561_v51 = vld [vmem:[#allocation2 + $0x100] sm:$0xff]  ;;  %10746 = vmatmul.msk.f32.gmra.mxu1 %vm1492_vm2, %v1581_v46  ;;  %10793 = vmatmul.msk.f32.gmra.mxu0 %vm1492_vm2, %v1581_v46 }
 0x228   :  { %10762 = vmatmul.msk.f32.gmra.mxu2 %vm1492_vm2, %v1561_v51  ;;  %10777 = vmatmul.msk.f32.gmra.mxu3 %vm1492_vm2, %v1561_v51  ;;  %v14146_v46 = vld [vmem:[#allocation12 + $0x94] sm:$0xf0] }
 0x22c   :  { %v1652_v31 = vpop.f32.mrf.mxu1 }
 0x22f   :  { %10794 = vmatmul.msk.f32.gmra.mxu0 %vm1492_vm2, %v1979_v24 }
 0x230   :  { %10778 = vmatmul.msk.f32.gmra.mxu3 %vm1492_vm2, %v1829_v47 }
 0x233   :  { %v1765_v35 = vpop.f32.mrf.mxu2 }
 0x234   :  { %v1655_v26 = vpop.f32.mrf.mxu1  ;;  %v2050_v1 = vpop.f32.mrf.mxu0  ;;  %v1766_v50 = vadd.f32 %v1765_v35, %v1652_v31  ;;  %v10806_v31 = vor.u32 %v14146_v46, %v10805_v19 }
 0x236   :  { %2331 = vmatpush.bf16.msrb.mxu3 %v10806_v31  ;;  %v11305_v31 = vld [vmem:[#allocation12 + $0x3c0] sm:$0xf] }
 0x23b   :  { %v1768_v17 = vpop.f32.mrf.mxu2  ;;  %v1900_v7 = vpop.f32.mrf.mxu3 }
 0x23c   :  { %v1948_v44 = vadd.f32 %v1900_v7, %v1766_v50  ;;  %v1658_v30 = vpop.f32.mrf.mxu1  ;;  %v2053_v52 = vpop.f32.mrf.mxu0  ;;  %v1769_v11 = vadd.f32 %v1768_v17, %v1655_v26  ;;  %v11253_v50 = vld [vmem:[#allocation12 + $0x360] sm:$0xf]  ;;  %v14237_v17 = vld [vmem:[#allocation12 + $0x36c] sm:$0xf0] }
 0x23d   :  { %v11254_v42 = vor.u32 %v14237_v17, %v11253_v50  ;;  %v14133_v50 = vld [vmem:[#allocation12 + $0x2c] sm:$0xf0] }
 0x23e   :  { %v2098_v63 = vadd.f32 %v2050_v1, %v1948_v44 }
 0x23f   :  { %3270 = vmatpush.bf16.msra.mxu0 %v11254_v42 }
 0x240   :  { %v2118_v36 = vadd.f32 %v16100_v18, %v2098_v63  ;;  %v14233_v63 = vld [vmem:[#allocation12 + $0x34c] sm:$0xf0] }
 0x242   :  { %v2134_v25 = vmax.f32 %v2118_v36, 0.0  ;;  %v11238_v36 = vor.u32 %v14233_v63, %v11237_v10  ;;  %v14245_v10 = vld [vmem:[#allocation12 + $0x3ac] sm:$0xf0] }
 0x243   :  { %v1771_v38 = vpop.f32.mrf.mxu2  ;;  %v1903_v6 = vpop.f32.mrf.mxu3 }
 0x244   :  { %2151 = vst.msk [vmem:[#allocation3] sm:$0xff] %vm2150_vm4, %v2134_v25  ;;  %v1949_v22 = vadd.f32 %v1903_v6, %v1769_v11  ;;  %v1661_v27 = vpop.f32.mrf.mxu1  ;;  %v2056_v45 = vpop.f32.mrf.mxu0  ;;  %v1772_v55 = vadd.f32 %v1771_v38, %v1658_v30  ;;  %v10797_v30 = vld [vmem:[#allocation12 + $0x80] sm:$0xf]  ;;  %3271 = vmatpush.bf16.msra.mxu0 %v11238_v36 }
 0x246   :  { %v2099_v41 = vadd.f32 %v2053_v52, %v1949_v22  ;;  %v10798_v52 = vor.u32 %v14145_v5, %v10797_v30  ;;  %v11221_v22 = vld [vmem:[#allocation12 + $0x320] sm:$0xf]  ;;  %v10823_v30 = vld [vmem:[#allocation12 + $0xb8] sm:$0xf0]  ;;  %v14131_v5 = vld [vmem:[#allocation12 + $0x24] sm:$0xf] }
 0x248   :  { %v2119_v49 = vadd.f32 %v16100_v18, %v2099_v41  ;;  %2305 = vmatpush.bf16.msrb.mxu1 %v10798_v52  ;;  %v10883_v52 = vld [vmem:[#allocation12 + $0x30] sm:$0xf0] }
 0x24a   :  { %v2135_v13 = vmax.f32 %v2119_v49, 0.0  ;;  %v11205_v49 = vld [vmem:[#allocation12 + $0x300] sm:$0xf] }
 0x24b   :  { %v1774_v14 = vpop.f32.mrf.mxu2  ;;  %v1906_v28 = vpop.f32.mrf.mxu3 }
 0x24c   :  { %2152 = vst.msk [vmem:[#allocation3 + $0x8] sm:$0xff] %vm2150_vm4, %v2135_v13  ;;  %v1950_v37 = vadd.f32 %v1906_v28, %v1772_v55  ;;  %v1664_v32 = vpop.f32.mrf.mxu1  ;;  %v2059_v43 = vpop.f32.mrf.mxu0  ;;  %v1775_v57 = vadd.f32 %v1774_v14, %v1661_v27  ;;  %v14229_v27 = vld [vmem:[#allocation12 + $0x32c] sm:$0xf0] }
 0x24d   :  { %v14225_v55 = vld [vmem:[#allocation12 + $0x30c] sm:$0xf0] }
 0x24e   :  { %v2100_v59 = vadd.f32 %v2056_v45, %v1950_v37  ;;  %v11222_v45 = vor.u32 %v14229_v27, %v11221_v22  ;;  %v11206_v14 = vor.u32 %v14225_v55, %v11205_v49  ;;  %v10807_v27 = vld [vmem:[#allocation12 + $0x98] sm:$0xf0] }
 0x250   :  { %v2120_v23 = vadd.f32 %v16100_v18, %v2100_v59  ;;  %3272 = vmatpush.bf16.msra.mxu0 %v11222_v45  ;;  %v14141_v59 = vld [vmem:[#allocation12 + $0x6c] sm:$0xf0] }
 0x252   :  { %v2136_v40 = vmax.f32 %v2120_v23, 0.0 }
 0x253   :  { %v1777_v61 = vpop.f32.mrf.mxu2  ;;  %v1909_v33 = vpop.f32.mrf.mxu3 }
 0x254   :  { %2153 = vst.msk [vmem:[#allocation3 + $0x10] sm:$0xff] %vm2150_vm4, %v2136_v40  ;;  %v1951_v15 = vadd.f32 %v1909_v33, %v1775_v57  ;;  %v1667_v39 = vpop.f32.mrf.mxu1  ;;  %v2062_v29 = vpop.f32.mrf.mxu0  ;;  %v1778_v2 = vadd.f32 %v1777_v61, %v1664_v32  ;;  %3273 = vmatpush.bf16.msra.mxu0 %v11206_v14  ;;  %v14156_v61 = vld [vmem:[#allocation12 + $0xec] sm:$0xf]  ;;  %v10855_v33 = vld [vmem:[#allocation12 + $0xf8] sm:$0xf0] }
 0x255   :  { %v14241_v14 = vld [vmem:[#allocation12 + $0x38c] sm:$0xf0] }
 0x256   :  { %v2101_v34 = vadd.f32 %v2059_v43, %v1951_v15  ;;  %v10913_v43 = vld [vmem:[#allocation12 + $0x60] sm:$0xf]  ;;  %v14139_v15 = vld [vmem:[#allocation12 + $0x64] sm:$0xf] }
 0x257   :  { %v10914_v40 = vor.u32 %v14141_v59, %v10913_v43 }
 0x258   :  { %v2121_v21 = vadd.f32 %v16100_v18, %v2101_v34  ;;  %v11321_v34 = vld [vmem:[#allocation12 + $0x3e0] sm:$0xf] }
 0x259   :  { %2444 = vmatpush.bf16.msra.mxu2 %v10914_v40 }
 0x25a   :  { %v2137_v53 = vmax.f32 %v2121_v21, 0.0  ;;  %v14253_v21 = vld [vmem:[#allocation12 + $0x3ec] sm:$0xf0] }
 0x25b   :  { %v1780_v3 = vpop.f32.mrf.mxu2  ;;  %v1912_v48 = vpop.f32.mrf.mxu3 }
 0x25c   :  { %2154 = vst.msk [vmem:[#allocation3 + $0x18] sm:$0xff] %vm2150_vm4, %v2137_v53  ;;  %v1952_v4 = vadd.f32 %v1912_v48, %v1778_v2  ;;  %v1670_v9 = vpop.f32.mrf.mxu1  ;;  %v2065_v0 = vpop.f32.mrf.mxu0  ;;  %v1781_v24 = vadd.f32 %v1780_v3, %v1667_v39  ;;  %v10858_v39 = vor.u32 %v14156_v61, %v10855_v33  ;;  %v11322_v53 = vor.u32 %v14253_v21, %v11321_v34  ;;  %v10897_v3 = vld [vmem:[#allocation12 + $0x40] sm:$0xf]  ;;  %v14137_v48 = vld [vmem:[#allocation12 + $0x4c] sm:$0xf0] }
 0x25d   :  { %v3156_v61 = vld [vmem:[#allocation3 + $0x6] sm:$0x1] }
 0x25e   :  { %v2102_v51 = vadd.f32 %v2062_v29, %v1952_v4  ;;  %v10915_v29 = vld [vmem:[#allocation12 + $0x70] sm:$0xf0]  ;;  %2341 = vmatpush.bf16.msra.mxu1 %v10858_v39  ;;  %v14152_v4 = vld [vmem:[#allocation12 + $0xcc] sm:$0xf]  ;;  %3436 = vmatpush.bf16.msrb.mxu0 %v11322_v53 }
 0x25f   :  { %v10918_v2 = vor.u32 %v14139_v15, %v10915_v29  ;;  %v10842_v46 = vor.u32 %v14152_v4, %v10839_v54 }
 0x260   :  { %v2122_v47 = vadd.f32 %v16100_v18, %v2102_v51 }
 0x261   :  { %2457 = vmatpush.bf16.msra.mxu3 %v10918_v2 }
 0x262   :  { %v2138_v35 = vmax.f32 %v2122_v47, 0.0  ;;  %v14249_v47 = vld [vmem:[#allocation12 + $0x3cc] sm:$0xf0]  ;;  %2342 = vmatpush.bf16.msra.mxu1 %v10842_v46 }
 0x263   :  { %v1783_v26 = vpop.f32.mrf.mxu2  ;;  %v1915_v1 = vpop.f32.mrf.mxu3 }
 0x264   :  { %2155 = vst.msk [vmem:[#allocation3 + $0x20] sm:$0xff] %vm2150_vm4, %v2138_v35  ;;  %v1953_v7 = vadd.f32 %v1915_v1, %v1781_v24  ;;  %v1673_v44 = vpop.f32.mrf.mxu1  ;;  %v2068_v20 = vpop.f32.mrf.mxu0  ;;  %v1784_v11 = vadd.f32 %v1783_v26, %v1670_v9  ;;  %v10898_v9 = vor.u32 %v14137_v48, %v10897_v3  ;;  %v11306_v35 = vor.u32 %v14249_v47, %v11305_v31  ;;  %v10881_v1 = vld [vmem:[#allocation12 + $0x20] sm:$0xf]  ;;  %v10921_v31 = vld [vmem:[#allocation12 + $0x68] sm:$0xf] }
 0x265   :  { %v14148_v44 = vld [vmem:[#allocation12 + $0xac] sm:$0xf]  ;;  %v3158_v48 = vpack.c.bf16 %v3156_v61, %v3156_v61 }
 0x266   :  { %v2103_v16 = vadd.f32 %v2065_v0, %v1953_v7  ;;  %v10899_v0 = vld [vmem:[#allocation12 + $0x50] sm:$0xf0]  ;;  %2445 = vmatpush.bf16.msra.mxu2 %v10898_v9  ;;  %3437 = vmatpush.bf16.msrb.mxu0 %v11306_v35  ;;  %v10882_v7 = vor.u32 %v14133_v50, %v10881_v1  ;;  %v14142_v1 = vld [vmem:[#allocation12 + $0x74] sm:$0xf0]  ;;  %v10981_v50 = vld [vmem:[#allocation12 + $0x160] sm:$0xf] }
 0x267   :  { %v10902_v51 = vor.u32 %v14135_v58, %v10899_v0  ;;  %v3178_v35 = vunpack.c.l.b16 %v3158_v48  ;;  %v14132_v61 = vld [vmem:[#allocation12 + $0x2c] sm:$0xf]  ;;  %v11357_v48 = vld [vmem:[#allocation12 + $0x420] sm:$0xf] }
 0x268   :  { %v2123_v8 = vadd.f32 %v16100_v18, %v2103_v16  ;;  %v11289_v16 = vld [vmem:[#allocation12 + $0x3a0] sm:$0xf] }
 0x269   :  { %2458 = vmatpush.bf16.msra.mxu3 %v10902_v51  ;;  %v11290_v36 = vor.u32 %v14245_v10, %v11289_v16  ;;  %v10923_v51 = vld [vmem:[#allocation12 + $0x78] sm:$0xf0]  ;;  %v16126_v16 = vld [vmem:[#allocation3] sm:$0x1] }
 0x26a   :  { %v2139_v25 = vmax.f32 %v2123_v8, 0.0  ;;  %2446 = vmatpush.bf16.msra.mxu2 %v10882_v7  ;;  %v10886_v8 = vor.u32 %v14131_v5, %v10883_v52  ;;  %v14173_v7 = vld [vmem:[#allocation12 + $0x16c] sm:$0xf0] }
 0x26b   :  { %v1786_v38 = vpop.f32.mrf.mxu2  ;;  %v1918_v6 = vpop.f32.mrf.mxu3  ;;  %3438 = vmatpush.bf16.msrb.mxu0 %v11290_v36 }
 0x26c   :  { %2156 = vst.msk [vmem:[#allocation3 + $0x28] sm:$0xff] %vm2150_vm4, %v2139_v25  ;;  %v1954_v56 = vadd.f32 %v1918_v6, %v1784_v11  ;;  %v1676_v60 = vpop.f32.mrf.mxu1  ;;  %v2071_v62 = vpop.f32.mrf.mxu0  ;;  %v10865_v25 = vld [vmem:[#allocation12] sm:$0xf]  ;;  %v14129_v38 = vld [vmem:[#allocation12 + $0xc] sm:$0xf0] }
 0x26d   :  { %v14144_v6 = vld [vmem:[#allocation12 + $0x8c] sm:$0xf]  ;;  %2459 = vmatpush.bf16.msra.mxu3 %v10886_v8  ;;  %v10866_v22 = vor.u32 %v14129_v38, %v10865_v25 }
 0x26e   :  { %v2104_v41 = vadd.f32 %v2068_v20, %v1954_v56  ;;  %v10826_v20 = vor.u32 %v14148_v44, %v10823_v30  ;;  %v14127_v56 = vld [vmem:[#allocation12 + $0x4] sm:$0xf]  ;;  %v10810_v49 = vor.u32 %v14144_v6, %v10807_v27  ;;  %v11389_v44 = vld [vmem:[#allocation12 + $0x460] sm:$0xf]  ;;  %v14269_v30 = vld [vmem:[#allocation12 + $0x46c] sm:$0xf0] }
 0x26f   :  { %2447 = vmatpush.bf16.msra.mxu2 %v10866_v22  ;;  %v10922_v22 = vor.u32 %v14142_v1, %v10921_v31  ;;  %v10907_v27 = vld [vmem:[#allocation12 + $0x58] sm:$0xf0] }
 0x270   :  { %v2124_v13 = vadd.f32 %v16100_v18, %v2104_v41  ;;  %2343 = vmatpush.bf16.msra.mxu1 %v10826_v20 }
 0x272   :  { %v2140_v28 = vmax.f32 %v2124_v13, 0.0  ;;  %v11273_v13 = vld [vmem:[#allocation12 + $0x380] sm:$0xf] }
 0x273   :  { %v1789_v37 = vpop.f32.mrf.mxu2  ;;  %v1921_v32 = vpop.f32.mrf.mxu3 }
 0x274   :  { %2157 = vst.msk [vmem:[#allocation3 + $0x30] sm:$0xff] %vm2150_vm4, %v2140_v28  ;;  %v16116_v23 = vpop.f32.mrf.mxu1  ;;  %v2074_v57 = vpop.f32.mrf.mxu0  ;;  %v1790_v12 = vadd.f32 %v1789_v37, %v1676_v60  ;;  %v10867_v60 = vld [vmem:[#allocation12 + $0x10] sm:$0xf0]  ;;  %v11274_v37 = vor.u32 %v14241_v14, %v11273_v13  ;;  %2344 = vmatpush.bf16.msra.mxu1 %v10810_v49  ;;  %v14138_v49 = vld [vmem:[#allocation12 + $0x54] sm:$0xf0] }
 0x275   :  { %v10870_v55 = vor.u32 %v14127_v56, %v10867_v60  ;;  %v10905_v56 = vld [vmem:[#allocation12 + $0x48] sm:$0xf]  ;;  %v14169_v13 = vld [vmem:[#allocation12 + $0x14c] sm:$0xf0]  ;;  %v11373_v14 = vld [vmem:[#allocation12 + $0x440] sm:$0xf] }
 0x276   :  { %3439 = vmatpush.bf16.msrb.mxu0 %v11274_v37 }
 0x277   :  { %2460 = vmatpush.bf16.msra.mxu3 %v10870_v55  ;;  %v10965_v55 = vld [vmem:[#allocation12 + $0x140] sm:$0xf] }
 0x27b   :  { %v1792_v19 = vpop.f32.mrf.mxu2  ;;  %v1924_v24 = vpop.f32.mrf.mxu3 }
 0x27c   :  { %v1956_v26 = vadd.f32 %v1924_v24, %v1790_v12  ;;  %v2077_v17 = vpop.f32.mrf.mxu0  ;;  %v1682_v63 = vpop.f32.mrf.mxu1  ;;  %v1793_v45 = vadd.f32 %v1792_v19, %v16116_v23  ;;  %v2187_v23 = vld [vmem:[#allocation3 + $0x1] sm:$0x1]  ;;  %v14140_v12 = vld [vmem:[#allocation12 + $0x6c] sm:$0xf] }
 0x27d   :  { %v2189_v21 = vpack.c.bf16 %v2187_v23, %v2187_v23  ;;  %v10926_v38 = vor.u32 %v14140_v12, %v10923_v51  ;;  %v14128_v12 = vld [vmem:[#allocation12 + $0xc] sm:$0xf] }
 0x27e   :  { %v2106_v42 = vadd.f32 %v2074_v57, %v1956_v26 }
 0x27f   :  { %v2209_v19 = vunpack.c.l.b16 %v2189_v21 }
 0x280   :  { %v2126_v11 = vadd.f32 %v16100_v18, %v2106_v42 }
 0x282   :  { %v2142_v62 = vmax.f32 %v2126_v11, 0.0 }
 0x283   :  { %v1795_v41 = vpop.f32.mrf.mxu2  ;;  %v1927_v28 = vpop.f32.mrf.mxu3 }
 0x284   :  { %2159 = vst.msk [vmem:[#allocation3 + $0x40] sm:$0xff] %vm2150_vm4, %v2142_v62  ;;  %v1957_v32 = vadd.f32 %v1927_v28, %v1793_v45  ;;  %v2080_v43 = vpop.f32.mrf.mxu0  ;;  %v1685_v40 = vpop.f32.mrf.mxu1  ;;  %v1796_v33 = vadd.f32 %v1795_v41, %v1682_v63  ;;  %v14136_v63 = vld [vmem:[#allocation12 + $0x4c] sm:$0xf]  ;;  %v10982_v62 = vor.u32 %v14173_v7, %v10981_v50  ;;  %v11390_v41 = vor.u32 %v14269_v30, %v11389_v44  ;;  %v14265_v28 = vld [vmem:[#allocation12 + $0x44c] sm:$0xf0] }
 0x285   :  { %v10910_v23 = vor.u32 %v14136_v63, %v10907_v27  ;;  %v11374_v21 = vor.u32 %v14265_v28, %v11373_v14  ;;  %v10933_v44 = vld [vmem:[#allocation12 + $0x100] sm:$0xf]  ;;  %v14161_v30 = vld [vmem:[#allocation12 + $0x10c] sm:$0xf0]  ;;  %v10991_v14 = vld [vmem:[#allocation12 + $0x178] sm:$0xf0] }
 0x286   :  { %v2107_v59 = vadd.f32 %v2077_v17, %v1957_v32  ;;  %v11457_v28 = vld [vmem:[#allocation12 + $0x4e0] sm:$0xf] }
 0x288   :  { %v2127_v57 = vadd.f32 %v16100_v18, %v2107_v59 }
 0x28a   :  { %v2143_v15 = vmax.f32 %v2127_v57, 0.0  ;;  %v2169_v57 = vpack.c.bf16 %v16126_v16, %v16126_v16 }
 0x28b   :  { %v1798_v39 = vpop.f32.mrf.mxu2  ;;  %v1930_v29 = vpop.f32.mrf.mxu3  ;;  %v2188_v34 = vld [vmem:[#allocation3 + $0x41] sm:$0x1]  ;;  %v3157_v2 = vld [vmem:[#allocation3 + $0x46] sm:$0x1]  ;;  %v2168_v46 = vld [vmem:[#allocation3 + $0x40] sm:$0x1] }
 0x28c   :  { %2160 = vst.msk [vmem:[#allocation3 + $0x48] sm:$0xff] %vm2150_vm4, %v2143_v15  ;;  %v1958_v53 = vadd.f32 %v1930_v29, %v1796_v33  ;;  %v2190_v3 = vpack.c.bf16 %v2188_v34, %v2188_v34  ;;  %v3159_v4 = vpack.c.bf16 %v3157_v2, %v3157_v2  ;;  %v2083_v9 = vpop.f32.mrf.mxu0  ;;  %v1799_v17 = vadd.f32 %v1798_v39, %v1685_v40  ;;  %v1688_v8 = vpop.f32.mrf.mxu1  ;;  %v10891_v33 = vld [vmem:[#allocation12 + $0x38] sm:$0xf0]  ;;  %v10889_v15 = vld [vmem:[#allocation12 + $0x28] sm:$0xf] }
 0x28d   :  { %v2170_v10 = vpack.c.bf16 %v2168_v46, %v2168_v46  ;;  %v10906_v40 = vor.u32 %v14138_v49, %v10905_v56  ;;  %v10966_v34 = vor.u32 %v14169_v13, %v10965_v55  ;;  %v14134_v2 = vld [vmem:[#allocation12 + $0x34] sm:$0xf0]  ;;  %v10894_v51 = vor.u32 %v14132_v61, %v10891_v33  ;;  %v14172_v49 = vld [vmem:[#allocation12 + $0x16c] sm:$0xf] }
 0x28e   :  { %v2108_v54 = vadd.f32 %v2080_v43, %v1958_v53  ;;  %v2210_v58 = vunpack.c.l.b16 %v2190_v3  ;;  %v3179_v0 = vunpack.c.l.b16 %v3159_v4  ;;  %v3322_v43 = vld [vmem:[#allocation3 + $0x8] sm:$0x1]  ;;  %v14165_v3 = vld [vmem:[#allocation12 + $0x12c] sm:$0xf0]  ;;  %v10890_v31 = vor.u32 %v14134_v2, %v10889_v15  ;;  %v2493_v63 = vld [vmem:[#allocation3 + $0x42] sm:$0x1] }
 0x28f   :  { %v2353_v32 = vunpack.c.l.b16 %v2170_v10  ;;  %v10949_v53 = vld [vmem:[#allocation12 + $0x120] sm:$0xf]  ;;  %v14261_v4 = vld [vmem:[#allocation12 + $0x42c] sm:$0xf0]  ;;  %v2352_v50 = vunpack.c.l.b16 %v2169_v57  ;;  %v2495_v13 = vpack.c.bf16 %v2493_v63, %v2493_v63  ;;  %v2492_v57 = vld [vmem:[#allocation3 + $0x2] sm:$0x1]  ;;  %v10994_v2 = vor.u32 %v14172_v49, %v10991_v14 }
 0x290   :  { %v2128_v47 = vadd.f32 %v16100_v18, %v2108_v54  ;;  %v2211_v24 = vrot.slane %v2210_v58, 7  ;;  %v3180_v26 = vrot.slane %v3179_v0, 7  ;;  %v3324_v0 = vpack.c.bf16 %v3322_v43, %v3322_v43  ;;  %v10935_v49 = vld [vmem:[#allocation12 + $0x110] sm:$0xf0]  ;;  %v10943_v14 = vld [vmem:[#allocation12 + $0x118] sm:$0xf0] }
 0x291   :  { %v2354_v58 = vrot.slane %v2353_v32, 7  ;;  %v11358_v7 = vor.u32 %v14261_v4, %v11357_v48  ;;  %v14168_v48 = vld [vmem:[#allocation12 + $0x14c] sm:$0xf] }
 0x292   :  { %v2144_v5 = vmax.f32 %v2128_v47, 0.0  ;;  %v2213_v20 = vsel %vm2212_vm5, %v2211_v24, %v2209_v19  ;;  %v3181_v52 = vsel %vm2212_vm5, %v3180_v26, %v3178_v35  ;;  %v10950_v47 = vor.u32 %v14165_v3, %v10949_v53  ;;  %v10875_v24 = vld [vmem:[#allocation12 + $0x18] sm:$0xf0]  ;;  %v10873_v35 = vld [vmem:[#allocation12 + $0x8] sm:$0xf] }
 0x293   :  { %v1801_v42 = vpop.f32.mrf.mxu2  ;;  %v1933_v36 = vpop.f32.mrf.mxu3  ;;  %v16128_v11 = vpack.c.b16 %v2213_v20, %v2213_v20  ;;  %v16130_v25 = vpack.c.b16 %v3181_v52, %v3181_v52  ;;  %v3323_v6 = vld [vmem:[#allocation3 + $0x48] sm:$0x1]  ;;  %v14130_v26 = vld [vmem:[#allocation12 + $0x14] sm:$0xf0]  ;;  %v14257_v20 = vld [vmem:[#allocation12 + $0x40c] sm:$0xf0]  ;;  %v2355_v16 = vsel %vm2212_vm5, %v2354_v58, %v2352_v50  ;;  %v3344_v10 = vunpack.c.l.b16 %v3324_v0 }
 0x294   :  { %2161 = vst.msk [vmem:[#allocation3 + $0x50] sm:$0xff] %vm2150_vm4, %v2144_v5  ;;  %v1959_v60 = vadd.f32 %v1933_v36, %v1799_v17  ;;  %v3325_v45 = vpack.c.bf16 %v3323_v6, %v3323_v6  ;;  %v2086_v59 = vpop.f32.mrf.mxu0  ;;  %v1691_v5 = vpop.f32.mrf.mxu1  ;;  %v10874_v36 = vor.u32 %v14130_v26, %v10873_v35  ;;  %v10989_v6 = vld [vmem:[#allocation12 + $0x168] sm:$0xf]  ;;  %v3489_v27 = vld [vmem:[#allocation3 + $0x49] sm:$0x1] }
 0x295   :  { %10859 = vmatmul.msk.bf16.vlgmr.msrb.gmra.mxu1 %vm2150_vm4, %v16128_v11  ;;  %10860 = vmatmul.msk.bf16.vlgmr.msrb.gmra.mxu2 %vm2150_vm4, %v16128_v11  ;;  %v10967_v3 = vld [vmem:[#allocation12 + $0x150] sm:$0xf0]  ;;  %v14281_v58 = vld [vmem:[#allocation12 + $0x4cc] sm:$0xf0]  ;;  %v14166_v35 = vld [vmem:[#allocation12 + $0x134] sm:$0xf0] }
 0x296   :  { %v2109_v37 = vadd.f32 %v2083_v9, %v1959_v60  ;;  %10861 = vmatmul.msk.bf16.vlgmr.msrb.gmra.mxu3 %vm2150_vm4, %v16128_v11  ;;  %11267 = vmatmul.msk.bf16.vlgmr.msra.gmra.mxu0 %vm2150_vm4, %v16130_v25  ;;  %v3345_v29 = vunpack.c.l.b16 %v3325_v45  ;;  %v1802_v9 = vadd.f32 %v1801_v42, %v1688_v8  ;;  %v11341_v42 = vld [vmem:[#allocation12 + $0x400] sm:$0xf]  ;;  %v10878_v8 = vor.u32 %v14128_v12, %v10875_v24  ;;  %v10957_v24 = vld [vmem:[#allocation12 + $0x128] sm:$0xf] }
 0x297   :  { %2483 = vmatpush.bf16.msrb.mxu2 %v10926_v38  ;;  %2470 = vmatpush.bf16.msrb.mxu1 %v10922_v22  ;;  %v10934_v38 = vor.u32 %v14161_v30, %v10933_v44  ;;  %v14174_v22 = vld [vmem:[#allocation12 + $0x174] sm:$0xf0]  ;;  %v11342_v45 = vor.u32 %v14257_v20, %v11341_v42  ;;  %v2515_v12 = vunpack.c.l.b16 %v2495_v13  ;;  %v14164_v44 = vld [vmem:[#allocation12 + $0x12c] sm:$0xf]  ;;  %v11425_v42 = vld [vmem:[#allocation12 + $0x4a0] sm:$0xf] }
 0x298   :  { %v2129_v39 = vadd.f32 %v16100_v18, %v2109_v37  ;;  %2606 = vmatpush.bf16.msrb.mxu3 %v10982_v62  ;;  %3602 = vmatpush.bf16.msra.mxu0 %v11390_v41  ;;  %v3346_v17 = vrot.slane %v3345_v29, 7  ;;  %v14171_v62 = vld [vmem:[#allocation12 + $0x164] sm:$0xf]  ;;  %v10983_v41 = vld [vmem:[#allocation12 + $0x170] sm:$0xf0]  ;;  %v10990_v33 = vor.u32 %v14174_v22, %v10989_v6  ;;  %v10958_v6 = vor.u32 %v14166_v35, %v10957_v24 }
 0x299   :  { %v14285_v37 = vld [vmem:[#allocation12 + $0x4ec] sm:$0xf0]  ;;  %v10986_v15 = vor.u32 %v14171_v62, %v10983_v41  ;;  %v14170_v29 = vld [vmem:[#allocation12 + $0x154] sm:$0xf0]  ;;  %v11035_v24 = vld [vmem:[#allocation12 + $0x1d0] sm:$0xf0] }
 0x29a   :  { %v2145_v54 = vmax.f32 %v2129_v39, 0.0  ;;  %v3347_v60 = vsel %vm2212_vm5, %v3346_v17, %v3344_v10  ;;  %v10973_v39 = vld [vmem:[#allocation12 + $0x148] sm:$0xf]  ;;  %v11458_v53 = vor.u32 %v14285_v37, %v11457_v28  ;;  %v14163_v17 = vld [vmem:[#allocation12 + $0x124] sm:$0xf]  ;;  %v2516_v10 = vrot.slane %v2515_v12, 7 }
 0x29b   :  { %v1804_v19 = vpop.f32.mrf.mxu2  ;;  %v1936_v46 = vpop.f32.mrf.mxu3  ;;  %2484 = vmatpush.bf16.msrb.mxu2 %v10910_v23  ;;  %2471 = vmatpush.bf16.msrb.mxu1 %v10906_v40  ;;  %v3491_v23 = vpack.c.bf16 %v3489_v27, %v3489_v27  ;;  %v16150_v61 = vpack.c.b16 %v3347_v60, %v3347_v60  ;;  %v14277_v20 = vld [vmem:[#allocation12 + $0x4ac] sm:$0xf0]  ;;  %v10941_v27 = vld [vmem:[#allocation12 + $0x108] sm:$0xf]  ;;  %v14159_v60 = vld [vmem:[#allocation12 + $0x104] sm:$0xf] }
 0x29c   :  { %2162 = vst.msk [vmem:[#allocation3 + $0x58] sm:$0xff] %vm2150_vm4, %v2145_v54  ;;  %v1960_v1 = vadd.f32 %v1936_v46, %v1802_v9  ;;  %2607 = vmatpush.bf16.msrb.mxu3 %v10966_v34  ;;  %3603 = vmatpush.bf16.msra.mxu0 %v11374_v21  ;;  %v2089_v55 = vpop.f32.mrf.mxu0  ;;  %v1805_v32 = vadd.f32 %v1804_v19, %v1691_v5  ;;  %v14167_v34 = vld [vmem:[#allocation12 + $0x144] sm:$0xf]  ;;  %v10975_v9 = vld [vmem:[#allocation12 + $0x158] sm:$0xf0] }
 0x29d   :  { %v11441_v54 = vld [vmem:[#allocation12 + $0x4c0] sm:$0xf]  ;;  %v3511_v46 = vunpack.c.l.b16 %v3491_v23  ;;  %v10959_v5 = vld [vmem:[#allocation12 + $0x138] sm:$0xf0]  ;;  %v11426_v41 = vor.u32 %v14277_v20, %v11425_v42  ;;  %v14273_v37 = vld [vmem:[#allocation12 + $0x48c] sm:$0xf0] }
 0x29e   :  { %v2110_v52 = vadd.f32 %v2086_v59, %v1960_v1  ;;  %v16148_v59 = vpack.c.b16 %v2355_v16, %v2355_v16  ;;  %v3488_v19 = vld [vmem:[#allocation3 + $0x9] sm:$0x1]  ;;  %v10978_v1 = vor.u32 %v14168_v48, %v10975_v9  ;;  %v11442_v50 = vor.u32 %v14281_v58, %v11441_v54  ;;  %v11057_v48 = vld [vmem:[#allocation12 + $0x1e8] sm:$0xf]  ;;  %v14190_v9 = vld [vmem:[#allocation12 + $0x1f4] sm:$0xf0] }
 0x29f   :  { %2485 = vmatpush.bf16.msrb.mxu2 %v10894_v51  ;;  %2472 = vmatpush.bf16.msrb.mxu1 %v10890_v31  ;;  %v1694_v51 = vpop.f32.mrf.mxu1  ;;  %v2494_v31 = vpack.c.bf16 %v2492_v57, %v2492_v57  ;;  %v3490_v30 = vpack.c.bf16 %v3488_v19, %v3488_v19  ;;  %v3512_v63 = vrot.slane %v3511_v46, 7  ;;  %v10962_v62 = vor.u32 %v14164_v44, %v10959_v5  ;;  %v11409_v28 = vld [vmem:[#allocation12 + $0x480] sm:$0xf]  ;;  %v14301_v58 = vld [vmem:[#allocation12 + $0x56c] sm:$0xf0] }
 0x2a0   :  { %v2130_v56 = vadd.f32 %v16100_v18, %v2110_v52  ;;  %2608 = vmatpush.bf16.msrb.mxu3 %v10950_v47  ;;  %3604 = vmatpush.bf16.msra.mxu0 %v11358_v7  ;;  %v10970_v47 = vor.u32 %v14167_v34, %v10967_v3  ;;  %v10951_v7 = vld [vmem:[#allocation12 + $0x130] sm:$0xf0]  ;;  %v14189_v3 = vld [vmem:[#allocation12 + $0x1ec] sm:$0xf0]  ;;  %v11525_v54 = vld [vmem:[#allocation12 + $0x560] sm:$0xf] }
 0x2a1   :  { %v10954_v22 = vor.u32 %v14163_v17, %v10951_v7  ;;  %v3510_v13 = vunpack.c.l.b16 %v3490_v30  ;;  %v11033_v35 = vld [vmem:[#allocation12 + $0x1c0] sm:$0xf]  ;;  %v11041_v17 = vld [vmem:[#allocation12 + $0x1c8] sm:$0xf]  ;;  %v14186_v7 = vld [vmem:[#allocation12 + $0x1d4] sm:$0xf0] }
 0x2a2   :  { %v2146_v43 = vmax.f32 %v2130_v56, 0.0  ;;  %v14162_v56 = vld [vmem:[#allocation12 + $0x114] sm:$0xf0]  ;;  %v11509_v44 = vld [vmem:[#allocation12 + $0x540] sm:$0xf] }
 0x2a3   :  { %v1939_v40 = vpop.f32.mrf.mxu3  ;;  %2486 = vmatpush.bf16.msrb.mxu2 %v10878_v8  ;;  %2473 = vmatpush.bf16.msrb.mxu1 %v10874_v36  ;;  %v1807_v4 = vpop.f32.mrf.mxu2  ;;  %v3513_v23 = vsel %vm2212_vm5, %v3512_v63, %v3510_v13  ;;  %v14297_v30 = vld [vmem:[#allocation12 + $0x54c] sm:$0xf0]  ;;  %v3654_v5 = vld [vmem:[#allocation3 + $0xa] sm:$0x1] }
 0x2a4   :  { %2163 = vst.msk [vmem:[#allocation3 + $0x60] sm:$0xff] %vm2150_vm4, %v2146_v43  ;;  %v1961_v21 = vadd.f32 %v1939_v40, %v1805_v32  ;;  %2609 = vmatpush.bf16.msrb.mxu3 %v10934_v38  ;;  %3605 = vmatpush.bf16.msra.mxu0 %v11342_v45  ;;  %v1808_v52 = vadd.f32 %v1807_v4, %v1694_v51  ;;  %v2092_v8 = vpop.f32.mrf.mxu0  ;;  %v2514_v38 = vunpack.c.l.b16 %v2494_v31 }
 0x2a5   :  { %10862 = vmatmul.msk.bf16.vlgmr.msra.gmra.mxu1 %vm2150_vm4, %v16128_v11  ;;  %10927 = vmatmul.msk.bf16.vlgmr.msra.gmra.mxu2 %vm2150_vm4, %v16148_v59  ;;  %v10974_v11 = vor.u32 %v14170_v29, %v10973_v39  ;;  %v10942_v40 = vor.u32 %v14162_v56, %v10941_v27  ;;  %v11051_v39 = vld [vmem:[#allocation12 + $0x1f0] sm:$0xf0]  ;;  %v3655_v29 = vld [vmem:[#allocation3 + $0x4a] sm:$0x1]  ;;  %v16168_v31 = vpack.c.b16 %v3513_v23, %v3513_v23  ;;  %v14293_v27 = vld [vmem:[#allocation12 + $0x52c] sm:$0xf0] }
 0x2a6   :  { %v2111_v0 = vadd.f32 %v2089_v55, %v1961_v21  ;;  %10928 = vmatmul.msk.bf16.vlgmr.msra.gmra.mxu3 %vm2150_vm4, %v16148_v59  ;;  %11335 = vmatmul.msk.bf16.vlgmr.msrb.gmra.mxu0 %vm2150_vm4, %v16150_v61  ;;  %v14160_v55 = vld [vmem:[#allocation12 + $0x10c] sm:$0xf]  ;;  %v2517_v43 = vsel %vm2212_vm5, %v2516_v10, %v2514_v38  ;;  %v3657_v19 = vpack.c.bf16 %v3655_v29, %v3655_v29  ;;  %v11025_v38 = vld [vmem:[#allocation12 + $0x1a8] sm:$0xf]  ;;  %v2659_v23 = vld [vmem:[#allocation3 + $0x43] sm:$0x1] }
 0x2a7   :  { %2632 = vmatpush.bf16.msra.mxu2 %v10990_v33  ;;  %2619 = vmatpush.bf16.msra.mxu1 %v10986_v15  ;;  %v10938_v33 = vor.u32 %v14159_v60, %v10935_v49  ;;  %v14187_v15 = vld [vmem:[#allocation12 + $0x1e4] sm:$0xf]  ;;  %v10946_v21 = vor.u32 %v14160_v55, %v10943_v14  ;;  %v1697_v4 = vpop.f32.mrf.mxu1  ;;  %v16166_v12 = vpack.c.b16 %v2517_v43, %v2517_v43  ;;  %v11001_v49 = vld [vmem:[#allocation12 + $0x180] sm:$0xf]  ;;  %v14205_v29 = vld [vmem:[#allocation12 + $0x26c] sm:$0xf0] }
 0x2a8   :  { %v2131_v26 = vadd.f32 %v16100_v18, %v2111_v0  ;;  %2645 = vmatpush.bf16.msra.mxu3 %v10994_v2  ;;  %3768 = vmatpush.bf16.msrb.mxu0 %v11458_v53  ;;  %v11410_v2 = vor.u32 %v14273_v37, %v11409_v28  ;;  %v11049_v53 = vld [vmem:[#allocation12 + $0x1e0] sm:$0xf]  ;;  %v3677_v10 = vunpack.c.l.b16 %v3657_v19  ;;  %v11510_v63 = vor.u32 %v14297_v30, %v11509_v44  ;;  %v14177_v28 = vld [vmem:[#allocation12 + $0x18c] sm:$0xf0]  ;;  %v11009_v37 = vld [vmem:[#allocation12 + $0x188] sm:$0xf] }
 0x2a9   :  { %v3656_v56 = vpack.c.bf16 %v3654_v5, %v3654_v5  ;;  %v11477_v43 = vld [vmem:[#allocation12 + $0x500] sm:$0xf]  ;;  %v14313_v44 = vld [vmem:[#allocation12 + $0x5cc] sm:$0xf0]  ;;  %v2658_v30 = vld [vmem:[#allocation3 + $0x3] sm:$0x1] }
 0x2aa   :  { %v2147_v16 = vmax.f32 %v2131_v26, 0.0  ;;  %v11058_v26 = vor.u32 %v14190_v9, %v11057_v48  ;;  %v3678_v55 = vrot.slane %v3677_v10, 7  ;;  %v14203_v48 = vld [vmem:[#allocation12 + $0x264] sm:$0xf]  ;;  %v11119_v9 = vld [vmem:[#allocation12 + $0x270] sm:$0xf0] }
 0x2ab   :  { %v1942_v36 = vpop.f32.mrf.mxu3  ;;  %2633 = vmatpush.bf16.msra.mxu2 %v10974_v11  ;;  %2620 = vmatpush.bf16.msra.mxu1 %v10970_v47  ;;  %v1810_v57 = vpop.f32.mrf.mxu2  ;;  %v11050_v11 = vor.u32 %v14189_v3, %v11049_v53  ;;  %v14183_v47 = vld [vmem:[#allocation12 + $0x1c4] sm:$0xf]  ;;  %v14188_v53 = vld [vmem:[#allocation12 + $0x1ec] sm:$0xf]  ;;  %v11059_v3 = vld [vmem:[#allocation12 + $0x1f8] sm:$0xf0] }
 0x2ac   :  { %2164 = vst.msk [vmem:[#allocation3 + $0x68] sm:$0xff] %vm2150_vm4, %v2147_v16  ;;  %v1962_v45 = vadd.f32 %v1942_v36, %v1808_v52  ;;  %2646 = vmatpush.bf16.msra.mxu3 %v10978_v1  ;;  %3769 = vmatpush.bf16.msrb.mxu0 %v11442_v50  ;;  %v2095_v51 = vpop.f32.mrf.mxu0  ;;  %v11526_v1 = vor.u32 %v14301_v58, %v11525_v54  ;;  %v14185_v50 = vld [vmem:[#allocation12 + $0x1cc] sm:$0xf0]  ;;  %v14179_v52 = vld [vmem:[#allocation12 + $0x1a4] sm:$0xf] }
 0x2ad   :  { %v11038_v42 = vor.u32 %v14183_v47, %v11035_v24  ;;  %v11034_v20 = vor.u32 %v14185_v50, %v11033_v35  ;;  %v11019_v16 = vld [vmem:[#allocation12 + $0x1b0] sm:$0xf0]  ;;  %v14181_v36 = vld [vmem:[#allocation12 + $0x1ac] sm:$0xf0]  ;;  %v11593_v54 = vld [vmem:[#allocation12 + $0x5e0] sm:$0xf]  ;;  %v11062_v51 = vor.u32 %v14188_v53, %v11059_v3  ;;  %v11122_v24 = vor.u32 %v14203_v48, %v11119_v9 }
 0x2ae   :  { %v2112_v32 = vadd.f32 %v2092_v8, %v1962_v45  ;;  %v11017_v8 = vld [vmem:[#allocation12 + $0x1a0] sm:$0xf]  ;;  %v11022_v60 = vor.u32 %v14179_v52, %v11019_v16  ;;  %v14289_v57 = vld [vmem:[#allocation12 + $0x50c] sm:$0xf0]  ;;  %v14199_v50 = vld [vmem:[#allocation12 + $0x244] sm:$0xf] }
 0x2af   :  { %2634 = vmatpush.bf16.msra.mxu2 %v10958_v6  ;;  %2621 = vmatpush.bf16.msra.mxu1 %v10954_v22  ;;  %v14182_v6 = vld [vmem:[#allocation12 + $0x1b4] sm:$0xf0]  ;;  %v11493_v22 = vld [vmem:[#allocation12 + $0x520] sm:$0xf]  ;;  %v11018_v45 = vor.u32 %v14181_v36, %v11017_v8  ;;  %v14317_v58 = vld [vmem:[#allocation12 + $0x5ec] sm:$0xf0] }
 0x2b0   :  { %v2132_v34 = vadd.f32 %v16100_v18, %v2112_v32  ;;  %2647 = vmatpush.bf16.msra.mxu3 %v10962_v62  ;;  %3770 = vmatpush.bf16.msrb.mxu0 %v11426_v41  ;;  %v11054_v18 = vor.u32 %v14187_v15, %v11051_v39  ;;  %v14175_v62 = vld [vmem:[#allocation12 + $0x184] sm:$0xf]  ;;  %v11003_v41 = vld [vmem:[#allocation12 + $0x190] sm:$0xf0]  ;;  %v11026_v13 = vor.u32 %v14182_v6, %v11025_v38  ;;  %v14178_v32 = vld [vmem:[#allocation12 + $0x194] sm:$0xf0] }
 0x2b1   :  { %v11494_v14 = vor.u32 %v14293_v27, %v11493_v22  ;;  %v11002_v15 = vor.u32 %v14177_v28, %v11001_v49  ;;  %v11117_v39 = vld [vmem:[#allocation12 + $0x260] sm:$0xf]  ;;  %v11594_v35 = vor.u32 %v14317_v58, %v11593_v54  ;;  %v14180_v36 = vld [vmem:[#allocation12 + $0x1ac] sm:$0xf]  ;;  %v11027_v38 = vld [vmem:[#allocation12 + $0x1b8] sm:$0xf0]  ;;  %v2660_v6 = vpack.c.bf16 %v2658_v30, %v2658_v30 }
 0x2b2   :  { %v2148_v0 = vmax.f32 %v2132_v34, 0.0  ;;  %v3821_v34 = vld [vmem:[#allocation3 + $0x4b] sm:$0x1]  ;;  %v11118_v19 = vor.u32 %v14205_v29, %v11117_v39  ;;  %v11087_v22 = vld [vmem:[#allocation12 + $0x230] sm:$0xf0]  ;;  %v11030_v49 = vor.u32 %v14180_v36, %v11027_v38 }
 0x2b3   :  { %v1945_v46 = vpop.f32.mrf.mxu3  ;;  %2635 = vmatpush.bf16.msra.mxu2 %v10942_v40  ;;  %2622 = vmatpush.bf16.msra.mxu1 %v10938_v33  ;;  %v3676_v40 = vunpack.c.l.b16 %v3656_v56  ;;  %v11006_v33 = vor.u32 %v14175_v62, %v11003_v41  ;;  %v11085_v10 = vld [vmem:[#allocation12 + $0x220] sm:$0xf]  ;;  %v14309_v56 = vld [vmem:[#allocation12 + $0x5ac] sm:$0xf0]  ;;  %v11127_v53 = vld [vmem:[#allocation12 + $0x278] sm:$0xf0] }
 0x2b4   :  { %2165 = vst.msk [vmem:[#allocation3 + $0x70] sm:$0xff] %vm2150_vm4, %v2148_v0  ;;  %2648 = vmatpush.bf16.msra.mxu3 %v10946_v21  ;;  %3771 = vmatpush.bf16.msrb.mxu0 %v11410_v2  ;;  %v11010_v21 = vor.u32 %v14178_v32, %v11009_v37  ;;  %v11478_v2 = vor.u32 %v14289_v57, %v11477_v43  ;;  %v11561_v27 = vld [vmem:[#allocation12 + $0x5a0] sm:$0xf]  ;;  %v14176_v37 = vld [vmem:[#allocation12 + $0x18c] sm:$0xf]  ;;  %v2680_v57 = vunpack.c.l.b16 %v2660_v6 }
 0x2b5   :  { %10929 = vmatmul.msk.bf16.vlgmr.msrb.gmra.mxu1 %vm2150_vm4, %v16148_v59  ;;  %10930 = vmatmul.msk.bf16.vlgmr.msrb.gmra.mxu2 %vm2150_vm4, %v16148_v59  ;;  %v11042_v59 = vor.u32 %v14186_v7, %v11041_v17  ;;  %v3679_v4 = vsel %vm2212_vm5, %v3678_v55, %v3676_v40  ;;  %v2661_v0 = vpack.c.bf16 %v2659_v23, %v2659_v23  ;;  %v11103_v17 = vld [vmem:[#allocation12 + $0x250] sm:$0xf0]  ;;  %v11577_v7 = vld [vmem:[#allocation12 + $0x5c0] sm:$0xf]  ;;  %v11011_v32 = vld [vmem:[#allocation12 + $0x198] sm:$0xf0] }
 0x2b6   :  { %10995 = vmatmul.msk.bf16.vlgmr.msrb.gmra.mxu3 %vm2150_vm4, %v16166_v12  ;;  %11403 = vmatmul.msk.bf16.vlgmr.msra.gmra.mxu0 %vm2150_vm4, %v16168_v31  ;;  %v3823_v46 = vpack.c.bf16 %v3821_v34, %v3821_v34  ;;  %v16180_v47 = vpack.c.b16 %v3679_v4, %v3679_v4  ;;  %v11578_v8 = vor.u32 %v14313_v44, %v11577_v7  ;;  %v11069_v55 = vld [vmem:[#allocation12 + $0x200] sm:$0xf]  ;;  %v14191_v43 = vld [vmem:[#allocation12 + $0x204] sm:$0xf]  ;;  %v11071_v23 = vld [vmem:[#allocation12 + $0x210] sm:$0xf0] }
 0x2b7   :  { %2785 = vmatpush.bf16.msrb.mxu2 %v11054_v18  ;;  %2772 = vmatpush.bf16.msrb.mxu1 %v11050_v11  ;;  %v11101_v18 = vld [vmem:[#allocation12 + $0x240] sm:$0xf]  ;;  %v14201_v11 = vld [vmem:[#allocation12 + $0x24c] sm:$0xf0]  ;;  %v2681_v5 = vunpack.c.l.b16 %v2661_v0  ;;  %v11562_v28 = vor.u32 %v14309_v56, %v11561_v27  ;;  %v3987_v3 = vld [vmem:[#allocation3 + $0x4c] sm:$0x1]  ;;  %v11074_v48 = vor.u32 %v14191_v43, %v11071_v23 }
 0x2b8   :  { %2798 = vmatpush.bf16.msrb.mxu3 %v11058_v26  ;;  %3934 = vmatpush.bf16.msra.mxu0 %v11526_v1  ;;  %v14184_v26 = vld [vmem:[#allocation12 + $0x1cc] sm:$0xf]  ;;  %v11043_v1 = vld [vmem:[#allocation12 + $0x1d8] sm:$0xf0]  ;;  %v11102_v52 = vor.u32 %v14201_v11, %v11101_v18  ;;  %v11545_v40 = vld [vmem:[#allocation12 + $0x580] sm:$0xf] }
 0x2b9   :  { %v11046_v16 = vor.u32 %v14184_v26, %v11043_v1  ;;  %v11125_v9 = vld [vmem:[#allocation12 + $0x268] sm:$0xf]  ;;  %v14206_v54 = vld [vmem:[#allocation12 + $0x274] sm:$0xf0]  ;;  %v11185_v58 = vld [vmem:[#allocation12 + $0x2e0] sm:$0xf] }
 0x2ba   :  { %v11126_v26 = vor.u32 %v14206_v54, %v11125_v9  ;;  %v14200_v1 = vld [vmem:[#allocation12 + $0x24c] sm:$0xf]  ;;  %v11109_v30 = vld [vmem:[#allocation12 + $0x248] sm:$0xf]  ;;  %v11095_v6 = vld [vmem:[#allocation12 + $0x238] sm:$0xf0] }
 0x2bb   :  { %2786 = vmatpush.bf16.msrb.mxu2 %v11038_v42  ;;  %2773 = vmatpush.bf16.msrb.mxu1 %v11034_v20  ;;  %v3820_v42 = vld [vmem:[#allocation3 + $0xb] sm:$0x1]  ;;  %v3843_v20 = vunpack.c.l.b16 %v3823_v46  ;;  %v11093_v56 = vld [vmem:[#allocation12 + $0x228] sm:$0xf]  ;;  %v14192_v43 = vld [vmem:[#allocation12 + $0x20c] sm:$0xf] }
 0x2bc   :  { %2799 = vmatpush.bf16.msrb.mxu3 %v11042_v59  ;;  %3935 = vmatpush.bf16.msra.mxu0 %v11510_v63  ;;  %v14197_v59 = vld [vmem:[#allocation12 + $0x22c] sm:$0xf0]  ;;  %v11106_v63 = vor.u32 %v14199_v50, %v11103_v17  ;;  %v11661_v46 = vld [vmem:[#allocation12 + $0x660] sm:$0xf]  ;;  %v11111_v50 = vld [vmem:[#allocation12 + $0x258] sm:$0xf0] }
 0x2bd   :  { %v3844_v62 = vrot.slane %v3843_v20, 7  ;;  %v11086_v41 = vor.u32 %v14197_v59, %v11085_v10  ;;  %v14217_v20 = vld [vmem:[#allocation12 + $0x2cc] sm:$0xf0]  ;;  %v2824_v10 = vld [vmem:[#allocation3 + $0x4] sm:$0x1]  ;;  %v11114_v36 = vor.u32 %v14200_v1, %v11111_v50 }
 0x2be   :  { %v11193_v54 = vld [vmem:[#allocation12 + $0x2e8] sm:$0xf]  ;;  %v11729_v1 = vld [vmem:[#allocation12 + $0x6e0] sm:$0xf]  ;;  %v14349_v50 = vld [vmem:[#allocation12 + $0x6ec] sm:$0xf0] }
 0x2bf   :  { %2787 = vmatpush.bf16.msrb.mxu2 %v11022_v60  ;;  %2774 = vmatpush.bf16.msrb.mxu1 %v11018_v45  ;;  %v3822_v60 = vpack.c.bf16 %v3820_v42, %v3820_v42  ;;  %v2682_v45 = vrot.slane %v2681_v5, 7  ;;  %v14202_v5 = vld [vmem:[#allocation12 + $0x254] sm:$0xf0]  ;;  %v11169_v42 = vld [vmem:[#allocation12 + $0x2c0] sm:$0xf] }
 0x2c0   :  { %2800 = vmatpush.bf16.msrb.mxu3 %v11026_v13  ;;  %3936 = vmatpush.bf16.msra.mxu0 %v11494_v14  ;;  %v14193_v13 = vld [vmem:[#allocation12 + $0x20c] sm:$0xf0]  ;;  %v11110_v38 = vor.u32 %v14202_v5, %v11109_v30 }
 0x2c1   :  { %v2683_v39 = vsel %vm2212_vm5, %v2682_v45, %v2680_v57  ;;  %v3842_v29 = vunpack.c.l.b16 %v3822_v60  ;;  %v11070_v34 = vor.u32 %v14193_v13, %v11069_v55  ;;  %v14198_v60 = vld [vmem:[#allocation12 + $0x234] sm:$0xf0]  ;;  %v11153_v45 = vld [vmem:[#allocation12 + $0x2a0] sm:$0xf]  ;;  %v14325_v55 = vld [vmem:[#allocation12 + $0x62c] sm:$0xf0] }
 0x2c2   :  { %v16192_v18 = vpack.c.b16 %v2683_v39, %v2683_v39  ;;  %v11079_v57 = vld [vmem:[#allocation12 + $0x218] sm:$0xf0]  ;;  %v11137_v39 = vld [vmem:[#allocation12 + $0x280] sm:$0xf] }
 0x2c3   :  { %2788 = vmatpush.bf16.msrb.mxu2 %v11006_v33  ;;  %2775 = vmatpush.bf16.msrb.mxu1 %v11002_v15  ;;  %v14305_v33 = vld [vmem:[#allocation12 + $0x58c] sm:$0xf0]  ;;  %v2825_v15 = vld [vmem:[#allocation3 + $0x44] sm:$0x1]  ;;  %v3845_v0 = vsel %vm2212_vm5, %v3844_v62, %v3842_v29  ;;  %v2826_v62 = vpack.c.bf16 %v2824_v10, %v2824_v10 }
 0x2c4   :  { %2801 = vmatpush.bf16.msrb.mxu3 %v11010_v21  ;;  %3937 = vmatpush.bf16.msra.mxu0 %v11478_v2  ;;  %v11014_v21 = vor.u32 %v14176_v37, %v11011_v32  ;;  %v14204_v2 = vld [vmem:[#allocation12 + $0x26c] sm:$0xf]  ;;  %v11546_v4 = vor.u32 %v14305_v33, %v11545_v40  ;;  %v2827_v11 = vpack.c.bf16 %v2825_v15, %v2825_v15  ;;  %v11077_v33 = vld [vmem:[#allocation12 + $0x208] sm:$0xf]  ;;  %v14194_v15 = vld [vmem:[#allocation12 + $0x214] sm:$0xf0] }
 0x2c5   :  { %10996 = vmatmul.msk.bf16.vlgmr.msra.gmra.mxu1 %vm2150_vm4, %v16166_v12  ;;  %10997 = vmatmul.msk.bf16.vlgmr.msra.gmra.mxu2 %vm2150_vm4, %v16166_v12  ;;  %v16194_v17 = vpack.c.b16 %v3845_v0, %v3845_v0  ;;  %v11094_v32 = vor.u32 %v14198_v60, %v11093_v56  ;;  %v2846_v29 = vunpack.c.l.b16 %v2826_v62  ;;  %v11078_v9 = vor.u32 %v14194_v15, %v11077_v33  ;;  %v4153_v0 = vld [vmem:[#allocation3 + $0x4d] sm:$0x1]  ;;  %v11161_v62 = vld [vmem:[#allocation12 + $0x2a8] sm:$0xf] }
 0x2c6   :  { %10998 = vmatmul.msk.bf16.vlgmr.msra.gmra.mxu3 %vm2150_vm4, %v16166_v12  ;;  %11471 = vmatmul.msk.bf16.vlgmr.msrb.gmra.mxu0 %vm2150_vm4, %v16180_v47  ;;  %v14195_v12 = vld [vmem:[#allocation12 + $0x224] sm:$0xf]  ;;  %v2847_v59 = vunpack.c.l.b16 %v2827_v11  ;;  %v11187_v11 = vld [vmem:[#allocation12 + $0x2f0] sm:$0xf0]  ;;  %v4155_v5 = vpack.c.bf16 %v4153_v0, %v4153_v0 }
 0x2c7   :  { %2938 = vmatpush.bf16.msra.mxu2 %v11118_v19  ;;  %2811 = vmatpush.bf16.msra.mxu1 %v11062_v51  ;;  %v11090_v14 = vor.u32 %v14195_v12, %v11087_v22  ;;  %v14221_v19 = vld [vmem:[#allocation12 + $0x2ec] sm:$0xf0]  ;;  %v14196_v12 = vld [vmem:[#allocation12 + $0x22c] sm:$0xf]  ;;  %v11170_v22 = vor.u32 %v14217_v20, %v11169_v42  ;;  %v11177_v20 = vld [vmem:[#allocation12 + $0x2c8] sm:$0xf] }
 0x2c8   :  { %2951 = vmatpush.bf16.msra.mxu3 %v11122_v24  ;;  %4100 = vmatpush.bf16.msrb.mxu0 %v11594_v35  ;;  %v14333_v51 = vld [vmem:[#allocation12 + $0x66c] sm:$0xf0]  ;;  %v11130_v24 = vor.u32 %v14204_v2, %v11127_v53  ;;  %v3989_v35 = vpack.c.bf16 %v3987_v3, %v3987_v3  ;;  %v11186_v7 = vor.u32 %v14221_v19, %v11185_v58  ;;  %v2991_v53 = vld [vmem:[#allocation3 + $0x45] sm:$0x1]  ;;  %v14222_v58 = vld [vmem:[#allocation12 + $0x2f4] sm:$0xf0]  ;;  %v4175_v60 = vunpack.c.l.b16 %v4155_v5 }
 0x2c9   :  { %v11662_v44 = vor.u32 %v14333_v51, %v11661_v46  ;;  %v11098_v37 = vor.u32 %v14196_v12, %v11095_v6  ;;  %v14321_v2 = vld [vmem:[#allocation12 + $0x60c] sm:$0xf0]  ;;  %v14219_v51 = vld [vmem:[#allocation12 + $0x2e4] sm:$0xf]  ;;  %v11194_v30 = vor.u32 %v14222_v58, %v11193_v54  ;;  %v11713_v12 = vld [vmem:[#allocation12 + $0x6c0] sm:$0xf] }
 0x2ca   :  { %v11190_v42 = vor.u32 %v14219_v51, %v11187_v11  ;;  %v14345_v6 = vld [vmem:[#allocation12 + $0x6cc] sm:$0xf0]  ;;  %v4152_v56 = vld [vmem:[#allocation3 + $0xd] sm:$0x1]  ;;  %v4176_v33 = vrot.slane %v4175_v60, 7 }
 0x2cb   :  { %2939 = vmatpush.bf16.msra.mxu2 %v11102_v52  ;;  %2812 = vmatpush.bf16.msra.mxu1 %v11046_v16  ;;  %v11645_v52 = vld [vmem:[#allocation12 + $0x640] sm:$0xf]  ;;  %v14329_v16 = vld [vmem:[#allocation12 + $0x64c] sm:$0xf0]  ;;  %v11261_v51 = vld [vmem:[#allocation12 + $0x368] sm:$0xf] }
 0x2cc   :  { %2952 = vmatpush.bf16.msra.mxu3 %v11106_v63  ;;  %4101 = vmatpush.bf16.msrb.mxu0 %v11578_v8  ;;  %v3986_v63 = vld [vmem:[#allocation3 + $0xc] sm:$0x1]  ;;  %v4009_v8 = vunpack.c.l.b16 %v3989_v35  ;;  %v11646_v27 = vor.u32 %v14329_v16, %v11645_v52  ;;  %v14218_v52 = vld [vmem:[#allocation12 + $0x2d4] sm:$0xf0]  ;;  %v14337_v54 = vld [vmem:[#allocation12 + $0x68c] sm:$0xf0] }
 0x2cd   :  { %v3988_v13 = vpack.c.bf16 %v3986_v63, %v3986_v63  ;;  %v14215_v63 = vld [vmem:[#allocation12 + $0x2c4] sm:$0xf]  ;;  %v14238_v11 = vld [vmem:[#allocation12 + $0x374] sm:$0xf0]  ;;  %v14232_v60 = vld [vmem:[#allocation12 + $0x34c] sm:$0xf] }
 0x2cf   :  { %2940 = vmatpush.bf16.msra.mxu2 %v11086_v41  ;;  %2813 = vmatpush.bf16.msra.mxu1 %v11030_v49  ;;  %v14213_v41 = vld [vmem:[#allocation12 + $0x2ac] sm:$0xf0]  ;;  %v11629_v49 = vld [vmem:[#allocation12 + $0x620] sm:$0xf] }
 0x2d0   :  { %2953 = vmatpush.bf16.msra.mxu3 %v11090_v14  ;;  %4102 = vmatpush.bf16.msrb.mxu0 %v11562_v28  ;;  %v2848_v14 = vrot.slane %v2847_v59, 7  ;;  %v4010_v28 = vrot.slane %v4009_v8, 7  ;;  %v11154_v23 = vor.u32 %v14213_v41, %v11153_v45  ;;  %v11630_v40 = vor.u32 %v14325_v55, %v11629_v49  ;;  %v11171_v8 = vld [vmem:[#allocation12 + $0x2d0] sm:$0xf0]  ;;  %v14214_v41 = vld [vmem:[#allocation12 + $0x2b4] sm:$0xf0] }
 0x2d1   :  { %v11730_v59 = vor.u32 %v14349_v50, %v11729_v1  ;;  %v11178_v45 = vor.u32 %v14218_v52, %v11177_v20  ;;  %v11714_v55 = vor.u32 %v14345_v6, %v11713_v12  ;;  %v11162_v15 = vor.u32 %v14214_v41, %v11161_v62  ;;  %v14235_v50 = vld [vmem:[#allocation12 + $0x364] sm:$0xf]  ;;  %v11797_v20 = vld [vmem:[#allocation12 + $0x760] sm:$0xf]  ;;  %v14365_v52 = vld [vmem:[#allocation12 + $0x76c] sm:$0xf0] }
 0x2d2   :  { %v2849_v3 = vsel %vm2212_vm5, %v2848_v14, %v2846_v29  ;;  %v11155_v14 = vld [vmem:[#allocation12 + $0x2b0] sm:$0xf0]  ;;  %v11145_v29 = vld [vmem:[#allocation12 + $0x288] sm:$0xf]  ;;  %v14361_v62 = vld [vmem:[#allocation12 + $0x74c] sm:$0xf0] }
 0x2d3   :  { %2941 = vmatpush.bf16.msra.mxu2 %v11070_v34  ;;  %2814 = vmatpush.bf16.msra.mxu1 %v11014_v21  ;;  %v14209_v34 = vld [vmem:[#allocation12 + $0x28c] sm:$0xf0]  ;;  %v11613_v21 = vld [vmem:[#allocation12 + $0x600] sm:$0xf]  ;;  %v4318_v41 = vld [vmem:[#allocation3 + $0xe] sm:$0x1] }
 0x2d4   :  { %2954 = vmatpush.bf16.msra.mxu3 %v11074_v48  ;;  %4103 = vmatpush.bf16.msrb.mxu0 %v11546_v4  ;;  %v4008_v48 = vunpack.c.l.b16 %v3988_v13  ;;  %v11082_v4 = vor.u32 %v14192_v43, %v11079_v57  ;;  %v11138_v19 = vor.u32 %v14209_v34, %v11137_v39  ;;  %v11614_v46 = vor.u32 %v14321_v2, %v11613_v21  ;;  %v14211_v13 = vld [vmem:[#allocation12 + $0x2a4] sm:$0xf]  ;;  %v14341_v43 = vld [vmem:[#allocation12 + $0x6ac] sm:$0xf0]  ;;  %v14210_v34 = vld [vmem:[#allocation12 + $0x294] sm:$0xf0] }
 0x2d5   :  { %11063 = vmatmul.msk.bf16.vlgmr.msrb.gmra.mxu1 %vm2150_vm4, %v16192_v18  ;;  %11064 = vmatmul.msk.bf16.vlgmr.msrb.gmra.mxu2 %vm2150_vm4, %v16192_v18  ;;  %v11158_v39 = vor.u32 %v14211_v13, %v11155_v14  ;;  %v11229_v14 = vld [vmem:[#allocation12 + $0x328] sm:$0xf] }
 0x2d6   :  { %11065 = vmatmul.msk.bf16.vlgmr.msrb.gmra.mxu3 %vm2150_vm4, %v16192_v18  ;;  %11539 = vmatmul.msk.bf16.vlgmr.msra.gmra.mxu0 %vm2150_vm4, %v16194_v17  ;;  %v4011_v35 = vsel %vm2212_vm5, %v4010_v28, %v4008_v48  ;;  %v14212_v28 = vld [vmem:[#allocation12 + $0x2ac] sm:$0xf] }
 0x2d7   :  { %2977 = vmatpush.bf16.msrb.mxu2 %v11130_v24  ;;  %2964 = vmatpush.bf16.msrb.mxu1 %v11126_v26  ;;  %v14220_v24 = vld [vmem:[#allocation12 + $0x2ec] sm:$0xf]  ;;  %v11195_v26 = vld [vmem:[#allocation12 + $0x2f8] sm:$0xf0]  ;;  %v16208_v16 = vpack.c.b16 %v4011_v35, %v4011_v35 }
 0x2d8   :  { %3104 = vmatpush.bf16.msrb.mxu3 %v11186_v7  ;;  %4266 = vmatpush.bf16.msra.mxu0 %v11662_v44  ;;  %v16206_v7 = vpack.c.b16 %v2849_v3, %v2849_v3  ;;  %v2993_v44 = vpack.c.bf16 %v2991_v53, %v2991_v53  ;;  %v11198_v10 = vor.u32 %v14220_v24, %v11195_v26  ;;  %v14207_v53 = vld [vmem:[#allocation12 + $0x284] sm:$0xf]  ;;  %v11139_v3 = vld [vmem:[#allocation12 + $0x290] sm:$0xf0]  ;;  %v14208_v48 = vld [vmem:[#allocation12 + $0x28c] sm:$0xf] }
 0x2d9   :  { %v4319_v24 = vld [vmem:[#allocation3 + $0x4e] sm:$0x1] }
 0x2db   :  { %2978 = vmatpush.bf16.msrb.mxu2 %v11114_v36  ;;  %2965 = vmatpush.bf16.msrb.mxu1 %v11110_v38  ;;  %v14216_v36 = vld [vmem:[#allocation12 + $0x2cc] sm:$0xf]  ;;  %v11179_v38 = vld [vmem:[#allocation12 + $0x2d8] sm:$0xf0] }
 0x2dc   :  { %3105 = vmatpush.bf16.msrb.mxu3 %v11170_v22  ;;  %4267 = vmatpush.bf16.msra.mxu0 %v11646_v27  ;;  %v2990_v22 = vld [vmem:[#allocation3 + $0x5] sm:$0x1]  ;;  %v3013_v27 = vunpack.c.l.b16 %v2993_v44  ;;  %v11182_v49 = vor.u32 %v14216_v36, %v11179_v38  ;;  %v11255_v44 = vld [vmem:[#allocation12 + $0x370] sm:$0xf0]  ;;  %v11245_v36 = vld [vmem:[#allocation12 + $0x348] sm:$0xf] }
 0x2dd   :  { %v2992_v57 = vpack.c.bf16 %v2990_v22, %v2990_v22  ;;  %v14234_v38 = vld [vmem:[#allocation12 + $0x354] sm:$0xf0]  ;;  %v11798_v22 = vor.u32 %v14365_v52, %v11797_v20  ;;  %v11865_v20 = vld [vmem:[#allocation12 + $0x7e0] sm:$0xf]  ;;  %v14381_v52 = vld [vmem:[#allocation12 + $0x7ec] sm:$0xf0] }
 0x2df   :  { %2979 = vmatpush.bf16.msrb.mxu2 %v11098_v37  ;;  %2966 = vmatpush.bf16.msrb.mxu1 %v11094_v32  ;;  %v11163_v37 = vld [vmem:[#allocation12 + $0x2b8] sm:$0xf0]  ;;  %v11697_v32 = vld [vmem:[#allocation12 + $0x6a0] sm:$0xf]  ;;  %v3012_v58 = vunpack.c.l.b16 %v2992_v57  ;;  %v14228_v57 = vld [vmem:[#allocation12 + $0x32c] sm:$0xf] }
 0x2e0   :  { %3106 = vmatpush.bf16.msrb.mxu3 %v11154_v23  ;;  %4268 = vmatpush.bf16.msra.mxu0 %v11630_v40  ;;  %v4154_v23 = vpack.c.bf16 %v4152_v56, %v4152_v56  ;;  %v3014_v40 = vrot.slane %v3013_v27, 7  ;;  %v11166_v21 = vor.u32 %v14212_v28, %v11163_v37  ;;  %v11698_v2 = vor.u32 %v14341_v43, %v11697_v32  ;;  %v14231_v27 = vld [vmem:[#allocation12 + $0x344] sm:$0xf]  ;;  %v11239_v56 = vld [vmem:[#allocation12 + $0x350] sm:$0xf0] }
 0x2e1   :  { %v11242_v13 = vor.u32 %v14231_v27, %v11239_v56  ;;  %v14230_v28 = vld [vmem:[#allocation12 + $0x334] sm:$0xf0]  ;;  %v14227_v32 = vld [vmem:[#allocation12 + $0x324] sm:$0xf]  ;;  %v11223_v43 = vld [vmem:[#allocation12 + $0x330] sm:$0xf0]  ;;  %v11866_v27 = vor.u32 %v14381_v52, %v11865_v20 }
 0x2e2   :  { %v4174_v0 = vunpack.c.l.b16 %v4154_v23  ;;  %v3015_v35 = vsel %vm2212_vm5, %v3014_v40, %v3012_v58  ;;  %v11231_v23 = vld [vmem:[#allocation12 + $0x338] sm:$0xf0]  ;;  %v11765_v40 = vld [vmem:[#allocation12 + $0x720] sm:$0xf]  ;;  %v14247_v56 = vld [vmem:[#allocation12 + $0x3c4] sm:$0xf] }
 0x2e3   :  { %2980 = vmatpush.bf16.msrb.mxu2 %v11082_v4  ;;  %2967 = vmatpush.bf16.msrb.mxu1 %v11078_v9  ;;  %v11147_v4 = vld [vmem:[#allocation12 + $0x298] sm:$0xf0]  ;;  %v11681_v9 = vld [vmem:[#allocation12 + $0x680] sm:$0xf]  ;;  %v14397_v52 = vld [vmem:[#allocation12 + $0x86c] sm:$0xf0] }
 0x2e4   :  { %3107 = vmatpush.bf16.msrb.mxu3 %v11138_v19  ;;  %4269 = vmatpush.bf16.msra.mxu0 %v11614_v46  ;;  %v11146_v19 = vor.u32 %v14210_v34, %v11145_v29  ;;  %v11142_v46 = vor.u32 %v14207_v53, %v11139_v3  ;;  %v11150_v26 = vor.u32 %v14208_v48, %v11147_v4  ;;  %v14223_v48 = vld [vmem:[#allocation12 + $0x304] sm:$0xf]  ;;  %v11207_v4 = vld [vmem:[#allocation12 + $0x310] sm:$0xf0]  ;;  %v11749_v58 = vld [vmem:[#allocation12 + $0x700] sm:$0xf] }
 0x2e5   :  { %11066 = vmatmul.msk.bf16.vlgmr.msra.gmra.mxu1 %vm2150_vm4, %v16192_v18  ;;  %11131 = vmatmul.msk.bf16.vlgmr.msra.gmra.mxu2 %vm2150_vm4, %v16206_v7  ;;  %v11174_v18 = vor.u32 %v14215_v63, %v11171_v8  ;;  %v11682_v1 = vor.u32 %v14337_v54, %v11681_v9  ;;  %v4177_v5 = vsel %vm2212_vm5, %v4176_v33, %v4174_v0  ;;  %v14357_v33 = vld [vmem:[#allocation12 + $0x72c] sm:$0xf0]  ;;  %v14224_v9 = vld [vmem:[#allocation12 + $0x30c] sm:$0xf]  ;;  %v11215_v54 = vld [vmem:[#allocation12 + $0x318] sm:$0xf0] }
 0x2e6   :  { %11132 = vmatmul.msk.bf16.vlgmr.msra.gmra.mxu3 %vm2150_vm4, %v16206_v7  ;;  %11607 = vmatmul.msk.bf16.vlgmr.msrb.gmra.mxu0 %vm2150_vm4, %v16208_v16  ;;  %v11262_v63 = vor.u32 %v14238_v11, %v11261_v51  ;;  %v11258_v8 = vor.u32 %v14235_v50, %v11255_v44  ;;  %v16222_v12 = vpack.c.b16 %v4177_v5, %v4177_v5  ;;  %v14353_v0 = vld [vmem:[#allocation12 + $0x70c] sm:$0xf0]  ;;  %v11329_v11 = vld [vmem:[#allocation12 + $0x3e8] sm:$0xf]  ;;  %v14251_v50 = vld [vmem:[#allocation12 + $0x3e4] sm:$0xf] }
 0x2e7   :  { %3130 = vmatpush.bf16.msra.mxu2 %v11194_v30  ;;  %3117 = vmatpush.bf16.msra.mxu1 %v11190_v42  ;;  %v14236_v30 = vld [vmem:[#allocation12 + $0x36c] sm:$0xf]  ;;  %v11263_v42 = vld [vmem:[#allocation12 + $0x378] sm:$0xf0]  ;;  %v11230_v29 = vor.u32 %v14230_v28, %v11229_v14  ;;  %v11226_v34 = vor.u32 %v14227_v32, %v11223_v43  ;;  %v11234_v53 = vor.u32 %v14228_v57, %v11231_v23  ;;  %v11323_v44 = vld [vmem:[#allocation12 + $0x3f0] sm:$0xf0] }
 0x2e8   :  { %3143 = vmatpush.bf16.msra.mxu3 %v11198_v10  ;;  %4432 = vmatpush.bf16.msrb.mxu0 %v11730_v59  ;;  %v4321_v10 = vpack.c.bf16 %v4319_v24, %v4319_v24  ;;  %v16220_v59 = vpack.c.b16 %v3015_v35, %v3015_v35  ;;  %v11266_v6 = vor.u32 %v14236_v30, %v11263_v42  ;;  %v14254_v24 = vld [vmem:[#allocation12 + $0x3f4] sm:$0xf0]  ;;  %v4485_v35 = vld [vmem:[#allocation3 + $0x50] sm:$0x1]  ;;  %v14252_v30 = vld [vmem:[#allocation12 + $0x3ec] sm:$0xf] }
 0x2e9   :  { %v11766_v3 = vor.u32 %v14357_v33, %v11765_v40  ;;  %v11210_v51 = vor.u32 %v14223_v48, %v11207_v4  ;;  %v11331_v42 = vld [vmem:[#allocation12 + $0x3f8] sm:$0xf0]  ;;  %v11297_v28 = vld [vmem:[#allocation12 + $0x3a8] sm:$0xf]  ;;  %v14243_v43 = vld [vmem:[#allocation12 + $0x3a4] sm:$0xf] }
 0x2ea   :  { %v11291_v57 = vld [vmem:[#allocation12 + $0x3b0] sm:$0xf0]  ;;  %v14244_v23 = vld [vmem:[#allocation12 + $0x3ac] sm:$0xf]  ;;  %v11299_v40 = vld [vmem:[#allocation12 + $0x3b8] sm:$0xf0] }
 0x2eb   :  { %3131 = vmatpush.bf16.msra.mxu2 %v11178_v45  ;;  %3118 = vmatpush.bf16.msra.mxu1 %v11174_v18  ;;  %v11247_v45 = vld [vmem:[#allocation12 + $0x358] sm:$0xf0]  ;;  %v11781_v18 = vld [vmem:[#allocation12 + $0x740] sm:$0xf]  ;;  %v14373_v33 = vld [vmem:[#allocation12 + $0x7ac] sm:$0xf0] }
 0x2ec   :  { %3144 = vmatpush.bf16.msra.mxu3 %v11182_v49  ;;  %4433 = vmatpush.bf16.msrb.mxu0 %v11714_v55  ;;  %v4341_v49 = vunpack.c.l.b16 %v4321_v10  ;;  %v11246_v55 = vor.u32 %v14234_v38, %v11245_v36  ;;  %v11782_v37 = vor.u32 %v14361_v62, %v11781_v18  ;;  %v11330_v10 = vor.u32 %v14254_v24, %v11329_v11  ;;  %v11313_v36 = vld [vmem:[#allocation12 + $0x3c8] sm:$0xf]  ;;  %v14250_v38 = vld [vmem:[#allocation12 + $0x3d4] sm:$0xf0]  ;;  %v11315_v18 = vld [vmem:[#allocation12 + $0x3d8] sm:$0xf0] }
 0x2ed   :  { %v11849_v62 = vld [vmem:[#allocation12 + $0x7c0] sm:$0xf]  ;;  %v14239_v48 = vld [vmem:[#allocation12 + $0x384] sm:$0xf]  ;;  %v11275_v4 = vld [vmem:[#allocation12 + $0x390] sm:$0xf0] }
 0x2ee   :  { %v11397_v11 = vld [vmem:[#allocation12 + $0x468] sm:$0xf]  ;;  %v14270_v24 = vld [vmem:[#allocation12 + $0x474] sm:$0xf0]  ;;  %v11933_v20 = vld [vmem:[#allocation12 + $0x860] sm:$0xf] }
 0x2ef   :  { %3132 = vmatpush.bf16.msra.mxu2 %v11162_v15  ;;  %3119 = vmatpush.bf16.msra.mxu1 %v11158_v39  ;;  %v4320_v15 = vpack.c.bf16 %v4318_v41, %v4318_v41  ;;  %v4342_v39 = vrot.slane %v4341_v49, 7  ;;  %v14377_v41 = vld [vmem:[#allocation12 + $0x7cc] sm:$0xf0]  ;;  %v4484_v49 = vld [vmem:[#allocation3 + $0x10] sm:$0x1] }
 0x2f0   :  { %3145 = vmatpush.bf16.msra.mxu3 %v11166_v21  ;;  %4434 = vmatpush.bf16.msrb.mxu0 %v11698_v2  ;;  %v11213_v21 = vld [vmem:[#allocation12 + $0x308] sm:$0xf]  ;;  %v14226_v2 = vld [vmem:[#allocation12 + $0x314] sm:$0xf0]  ;;  %v11850_v32 = vor.u32 %v14377_v41, %v11849_v62  ;;  %v11375_v62 = vld [vmem:[#allocation12 + $0x450] sm:$0xf0] }
 0x2f1   :  { %v14264_v41 = vld [vmem:[#allocation12 + $0x44c] sm:$0xf] }
 0x2f3   :  { %3133 = vmatpush.bf16.msra.mxu2 %v11146_v19  ;;  %3120 = vmatpush.bf16.msra.mxu1 %v11142_v46  ;;  %v4340_v19 = vunpack.c.l.b16 %v4320_v15  ;;  %v11214_v46 = vor.u32 %v14226_v2, %v11213_v21  ;;  %v4486_v15 = vpack.c.bf16 %v4484_v49, %v4484_v49  ;;  %v11281_v21 = vld [vmem:[#allocation12 + $0x388] sm:$0xf]  ;;  %v14242_v2 = vld [vmem:[#allocation12 + $0x394] sm:$0xf0]  ;;  %v11383_v49 = vld [vmem:[#allocation12 + $0x458] sm:$0xf0] }
 0x2f4   :  { %3146 = vmatpush.bf16.msra.mxu3 %v11150_v26  ;;  %4435 = vmatpush.bf16.msrb.mxu0 %v11682_v1  ;;  %v11218_v26 = vor.u32 %v14224_v9, %v11215_v54  ;;  %v11750_v1 = vor.u32 %v14353_v0, %v11749_v58  ;;  %v14240_v9 = vld [vmem:[#allocation12 + $0x38c] sm:$0xf]  ;;  %v11283_v54 = vld [vmem:[#allocation12 + $0x398] sm:$0xf0]  ;;  %v11817_v58 = vld [vmem:[#allocation12 + $0x780] sm:$0xf] }
 0x2f5   :  { %11133 = vmatmul.msk.bf16.vlgmr.msrb.gmra.mxu1 %vm2150_vm4, %v16206_v7  ;;  %11134 = vmatmul.msk.bf16.vlgmr.msrb.gmra.mxu2 %vm2150_vm4, %v16206_v7  ;;  %v11250_v7 = vor.u32 %v14232_v60, %v11247_v45  ;;  %v4343_v5 = vsel %vm2212_vm5, %v4342_v39, %v4340_v19  ;;  %v11307_v60 = vld [vmem:[#allocation12 + $0x3d0] sm:$0xf0]  ;;  %v14248_v45 = vld [vmem:[#allocation12 + $0x3cc] sm:$0xf]  ;;  %v14369_v0 = vld [vmem:[#allocation12 + $0x78c] sm:$0xf0]  ;;  %v4506_v19 = vunpack.c.l.b16 %v4486_v15 }
 0x2f6   :  { %11199 = vmatmul.msk.bf16.vlgmr.msrb.gmra.mxu3 %vm2150_vm4, %v16220_v59  ;;  %11675 = vmatmul.msk.bf16.vlgmr.msra.gmra.mxu0 %vm2150_vm4, %v16222_v12  ;;  %v11310_v14 = vor.u32 %v14247_v56, %v11307_v60 }
 0x2f7   :  { %3296 = vmatpush.bf16.msrb.mxu2 %v11262_v63  ;;  %3283 = vmatpush.bf16.msrb.mxu1 %v11258_v8  ;;  %v4487_v63 = vpack.c.bf16 %v4485_v35, %v4485_v35  ;;  %v11326_v8 = vor.u32 %v14251_v50, %v11323_v44  ;;  %v4651_v35 = vld [vmem:[#allocation3 + $0x51] sm:$0x1]  ;;  %v14267_v50 = vld [vmem:[#allocation12 + $0x464] sm:$0xf]  ;;  %v11391_v44 = vld [vmem:[#allocation12 + $0x470] sm:$0xf0] }
 0x2f8   :  { %3309 = vmatpush.bf16.msrb.mxu3 %v11266_v6  ;;  %4598 = vmatpush.bf16.msra.mxu0 %v11798_v22  ;;  %v16233_v6 = vpack.c.b16 %v4343_v5, %v4343_v5  ;;  %v11334_v22 = vor.u32 %v14252_v30, %v11331_v42  ;;  %v14268_v30 = vld [vmem:[#allocation12 + $0x46c] sm:$0xf]  ;;  %v11399_v42 = vld [vmem:[#allocation12 + $0x478] sm:$0xf0] }
 0x2f9   :  { %v11402_v60 = vor.u32 %v14268_v30, %v11399_v42  ;;  %v14286_v30 = vld [vmem:[#allocation12 + $0x4f4] sm:$0xf0] }
 0x2fb   :  { %3297 = vmatpush.bf16.msrb.mxu2 %v11246_v55  ;;  %3284 = vmatpush.bf16.msrb.mxu1 %v11242_v13  ;;  %v4507_v55 = vunpack.c.l.b16 %v4487_v63  ;;  %v11314_v13 = vor.u32 %v14250_v38, %v11313_v36  ;;  %v4653_v36 = vpack.c.bf16 %v4651_v35, %v4651_v35  ;;  %v11394_v38 = vor.u32 %v14267_v50, %v11391_v44  ;;  %v14385_v35 = vld [vmem:[#allocation12 + $0x80c] sm:$0xf0]  ;;  %v11465_v44 = vld [vmem:[#allocation12 + $0x4e8] sm:$0xf] }
 0x2fc   :  { %3310 = vmatpush.bf16.msrb.mxu3 %v11250_v7  ;;  %4599 = vmatpush.bf16.msra.mxu0 %v11782_v37  ;;  %v14246_v7 = vld [vmem:[#allocation12 + $0x3b4] sm:$0xf0]  ;;  %v11318_v37 = vor.u32 %v14248_v45, %v11315_v18  ;;  %v11934_v45 = vor.u32 %v14397_v52, %v11933_v20  ;;  %v14263_v18 = vld [vmem:[#allocation12 + $0x444] sm:$0xf] }
 0x2fd   :  { %v4508_v39 = vrot.slane %v4507_v55, 7  ;;  %v11917_v55 = vld [vmem:[#allocation12 + $0x840] sm:$0xf] }
 0x2ff   :  { %3298 = vmatpush.bf16.msrb.mxu2 %v11230_v29  ;;  %3285 = vmatpush.bf16.msrb.mxu1 %v11226_v34  ;;  %v11298_v29 = vor.u32 %v14246_v7, %v11297_v28  ;;  %v11294_v34 = vor.u32 %v14243_v43, %v11291_v57  ;;  %v4509_v5 = vsel %vm2212_vm5, %v4508_v39, %v4506_v19  ;;  %v4673_v28 = vunpack.c.l.b16 %v4653_v36  ;;  %v14262_v43 = vld [vmem:[#allocation12 + $0x434] sm:$0xf0]  ;;  %v11367_v39 = vld [vmem:[#allocation12 + $0x438] sm:$0xf0]  ;;  %v14255_v19 = vld [vmem:[#allocation12 + $0x404] sm:$0xf] }
 0x300   :  { %3311 = vmatpush.bf16.msrb.mxu3 %v11234_v53  ;;  %4600 = vmatpush.bf16.msra.mxu0 %v11766_v3  ;;  %v11302_v53 = vor.u32 %v14244_v23, %v11299_v40  ;;  %v16248_v56 = vpack.c.b16 %v4509_v5, %v4509_v5  ;;  %v11386_v23 = vor.u32 %v14264_v41, %v11383_v49  ;;  %v4817_v5 = vld [vmem:[#allocation3 + $0x52] sm:$0x1]  ;;  %v11459_v36 = vld [vmem:[#allocation12 + $0x4f0] sm:$0xf0] }
 0x301   :  { %v11466_v49 = vor.u32 %v14286_v30, %v11465_v44  ;;  %v11417_v30 = vld [vmem:[#allocation12 + $0x488] sm:$0xf] }
 0x303   :  { %3299 = vmatpush.bf16.msrb.mxu2 %v11214_v46  ;;  %3286 = vmatpush.bf16.msrb.mxu1 %v11210_v51  ;;  %v11282_v46 = vor.u32 %v14242_v2, %v11281_v21  ;;  %v11278_v51 = vor.u32 %v14239_v48, %v11275_v4 }
 0x304   :  { %3312 = vmatpush.bf16.msrb.mxu3 %v11218_v26  ;;  %4601 = vmatpush.bf16.msra.mxu0 %v11750_v1  ;;  %v11286_v26 = vor.u32 %v14240_v9, %v11283_v54  ;;  %v11818_v1 = vor.u32 %v14369_v0, %v11817_v58  ;;  %v11349_v9 = vld [vmem:[#allocation12 + $0x408] sm:$0xf]  ;;  %v14258_v54 = vld [vmem:[#allocation12 + $0x414] sm:$0xf0] }
 0x305   :  { %11200 = vmatmul.msk.bf16.vlgmr.msra.gmra.mxu1 %vm2150_vm4, %v16220_v59  ;;  %11201 = vmatmul.msk.bf16.vlgmr.msra.gmra.mxu2 %vm2150_vm4, %v16220_v59 }
 0x306   :  { %11202 = vmatmul.msk.bf16.vlgmr.msra.gmra.mxu3 %vm2150_vm4, %v16220_v59  ;;  %11743 = vmatmul.msk.bf16.vlgmr.msrb.gmra.mxu0 %vm2150_vm4, %v16233_v6  ;;  %v11833_v59 = vld [vmem:[#allocation12 + $0x7a0] sm:$0xf] }
 0x307   :  { %3462 = vmatpush.bf16.msra.mxu2 %v11330_v10  ;;  %3449 = vmatpush.bf16.msra.mxu1 %v11326_v8  ;;  %v11834_v3 = vor.u32 %v14373_v33, %v11833_v59  ;;  %v11398_v8 = vor.u32 %v14270_v24, %v11397_v11  ;;  %v14259_v59 = vld [vmem:[#allocation12 + $0x424] sm:$0xf]  ;;  %v11359_v33 = vld [vmem:[#allocation12 + $0x430] sm:$0xf0]  ;;  %v11351_v11 = vld [vmem:[#allocation12 + $0x418] sm:$0xf0] }
 0x308   :  { %3475 = vmatpush.bf16.msra.mxu3 %v11334_v22  ;;  %4764 = vmatpush.bf16.msrb.mxu0 %v11866_v27  ;;  %v11381_v22 = vld [vmem:[#allocation12 + $0x448] sm:$0xf]  ;;  %v14266_v27 = vld [vmem:[#allocation12 + $0x454] sm:$0xf0]  ;;  %v11362_v4 = vor.u32 %v14259_v59, %v11359_v33  ;;  %v11885_v24 = vld [vmem:[#allocation12 + $0x800] sm:$0xf] }
 0x309   :  { %v11382_v7 = vor.u32 %v14266_v27, %v11381_v22  ;;  %v11886_v52 = vor.u32 %v14385_v35, %v11885_v24  ;;  %v11451_v59 = vld [vmem:[#allocation12 + $0x4d8] sm:$0xf0]  ;;  %v11985_v33 = vld [vmem:[#allocation12 + $0x8c0] sm:$0xf] }
 0x30b   :  { %3463 = vmatpush.bf16.msra.mxu2 %v11314_v13  ;;  %3450 = vmatpush.bf16.msra.mxu1 %v11310_v14  ;;  %v14393_v13 = vld [vmem:[#allocation12 + $0x84c] sm:$0xf0]  ;;  %v4650_v14 = vld [vmem:[#allocation3 + $0x11] sm:$0x1] }
 0x30c   :  { %3476 = vmatpush.bf16.msra.mxu3 %v11318_v37  ;;  %4765 = vmatpush.bf16.msrb.mxu0 %v11850_v32  ;;  %v11378_v37 = vor.u32 %v14263_v18, %v11375_v62  ;;  %v11365_v32 = vld [vmem:[#allocation12 + $0x428] sm:$0xf]  ;;  %v11918_v40 = vor.u32 %v14393_v13, %v11917_v55  ;;  %v14413_v18 = vld [vmem:[#allocation12 + $0x8ec] sm:$0xf0]  ;;  %v4819_v55 = vpack.c.bf16 %v4817_v5, %v4817_v5  ;;  %v14274_v5 = vld [vmem:[#allocation12 + $0x494] sm:$0xf0] }
 0x30d   :  { %v11366_v48 = vor.u32 %v14262_v43, %v11365_v32  ;;  %v14279_v43 = vld [vmem:[#allocation12 + $0x4c4] sm:$0xf] }
 0x30f   :  { %3464 = vmatpush.bf16.msra.mxu2 %v11298_v29  ;;  %3451 = vmatpush.bf16.msra.mxu1 %v11294_v34  ;;  %v11901_v29 = vld [vmem:[#allocation12 + $0x820] sm:$0xf]  ;;  %v14389_v34 = vld [vmem:[#allocation12 + $0x82c] sm:$0xf0] }
 0x310   :  { %3477 = vmatpush.bf16.msra.mxu3 %v11302_v53  ;;  %4766 = vmatpush.bf16.msrb.mxu0 %v11834_v3  ;;  %v4652_v53 = vpack.c.bf16 %v4650_v14, %v4650_v14  ;;  %v4674_v3 = vrot.slane %v4673_v28, 7  ;;  %v11902_v0 = vor.u32 %v14389_v34, %v11901_v29  ;;  %v11449_v14 = vld [vmem:[#allocation12 + $0x4c8] sm:$0xf]  ;;  %v14282_v28 = vld [vmem:[#allocation12 + $0x4d4] sm:$0xf0]  ;;  %v4839_v29 = vunpack.c.l.b16 %v4819_v55 }
 0x311   :  { %v11450_v34 = vor.u32 %v14282_v28, %v11449_v14  ;;  %v14299_v28 = vld [vmem:[#allocation12 + $0x564] sm:$0xf] }
 0x312   :  { %v16244_v10 = vpop.f32.mrf.mxu1 }
 0x313   :  { %v16246_v63 = vpop.f32.mrf.mxu0  ;;  %3465 = vmatpush.bf16.msra.mxu2 %v11282_v46  ;;  %3452 = vmatpush.bf16.msra.mxu1 %v11278_v51  ;;  %v11343_v46 = vld [vmem:[#allocation12 + $0x410] sm:$0xf0]  ;;  %v14256_v51 = vld [vmem:[#allocation12 + $0x40c] sm:$0xf] }
 0x314   :  { %3478 = vmatpush.bf16.msra.mxu3 %v11286_v26  ;;  %4767 = vmatpush.bf16.msrb.mxu0 %v11818_v1  ;;  %v4672_v26 = vunpack.c.l.b16 %v4652_v53  ;;  %v11350_v1 = vor.u32 %v14258_v54, %v11349_v9  ;;  %v11346_v50 = vor.u32 %v14255_v19, %v11343_v46  ;;  %v11354_v20 = vor.u32 %v14256_v51, %v11351_v11  ;;  %v14278_v53 = vld [vmem:[#allocation12 + $0x4b4] sm:$0xf0]  ;;  %v14275_v9 = vld [vmem:[#allocation12 + $0x4a4] sm:$0xf]  ;;  %v11427_v54 = vld [vmem:[#allocation12 + $0x4b0] sm:$0xf0] }
 0x315   :  { %11268 = vmatmul.msk.bf16.vlgmr.msrb.gmra.mxu1 %vm2150_vm4, %v16130_v25  ;;  %11269 = vmatmul.msk.bf16.vlgmr.msrb.gmra.mxu2 %vm2150_vm4, %v16130_v25  ;;  %v11435_v19 = vld [vmem:[#allocation12 + $0x4b8] sm:$0xf0]  ;;  %v11969_v46 = vld [vmem:[#allocation12 + $0x8a0] sm:$0xf]  ;;  %v14405_v51 = vld [vmem:[#allocation12 + $0x8ac] sm:$0xf0]  ;;  %v11430_v44 = vor.u32 %v14275_v9, %v11427_v54 }
 0x316   :  { %11270 = vmatmul.msk.bf16.vlgmr.msrb.gmra.mxu3 %vm2150_vm4, %v16130_v25  ;;  %11811 = vmatmul.msk.bf16.vlgmr.msra.gmra.mxu0 %vm2150_vm4, %v16248_v56  ;;  %v14260_v25 = vld [vmem:[#allocation12 + $0x42c] sm:$0xf]  ;;  %v4675_v27 = vsel %vm2212_vm5, %v4674_v3, %v4672_v26  ;;  %v14295_v54 = vld [vmem:[#allocation12 + $0x544] sm:$0xf] }
 0x317   :  { %3628 = vmatpush.bf16.msrb.mxu2 %v11398_v8  ;;  %3615 = vmatpush.bf16.msrb.mxu1 %v11394_v38  ;;  %v11370_v58 = vor.u32 %v14260_v25, %v11367_v39  ;;  %v14283_v8 = vld [vmem:[#allocation12 + $0x4e4] sm:$0xf]  ;;  %v14284_v38 = vld [vmem:[#allocation12 + $0x4ec] sm:$0xf]  ;;  %v14409_v25 = vld [vmem:[#allocation12 + $0x8cc] sm:$0xf0] }
 0x318   :  { %v16258_v57 = vpop.f32.mrf.mxu2  ;;  %3641 = vmatpush.bf16.msrb.mxu3 %v11402_v60  ;;  %4930 = vmatpush.bf16.msra.mxu0 %v11934_v45  ;;  %v11467_v60 = vld [vmem:[#allocation12 + $0x4f8] sm:$0xf0]  ;;  %v12001_v45 = vld [vmem:[#allocation12 + $0x8e0] sm:$0xf]  ;;  %v11462_v13 = vor.u32 %v14283_v8, %v11459_v36  ;;  %v4816_v39 = vld [vmem:[#allocation3 + $0x12] sm:$0x1] }
 0x319   :  { %v16260_v15 = vpop.f32.mrf.mxu3  ;;  %v12002_v32 = vor.u32 %v14413_v18, %v12001_v45  ;;  %v4818_v26 = vpack.c.bf16 %v4816_v39, %v4816_v39  ;;  %v14272_v8 = vld [vmem:[#allocation12 + $0x48c] sm:$0xf]  ;;  %v11419_v36 = vld [vmem:[#allocation12 + $0x498] sm:$0xf0]  ;;  %v11533_v45 = vld [vmem:[#allocation12 + $0x568] sm:$0xf] }
 0x31a   :  { %v2309_v21 = vpop.f32.mrf.mxu1  ;;  %v14302_v18 = vld [vmem:[#allocation12 + $0x574] sm:$0xf0] }
 0x31b   :  { %v3277_v2 = vpop.f32.mrf.mxu0  ;;  %3629 = vmatpush.bf16.msrb.mxu2 %v11382_v7  ;;  %3616 = vmatpush.bf16.msrb.mxu1 %v11378_v37  ;;  %v16267_v7 = vpack.c.b16 %v4675_v27, %v4675_v27  ;;  %v11470_v37 = vor.u32 %v14284_v38, %v11467_v60  ;;  %v14401_v38 = vld [vmem:[#allocation12 + $0x88c] sm:$0xf0]  ;;  %v11418_v27 = vor.u32 %v14274_v5, %v11417_v30 }
 0x31c   :  { %3642 = vmatpush.bf16.msrb.mxu3 %v11386_v23  ;;  %4931 = vmatpush.bf16.msra.mxu0 %v11918_v40  ;;  %v11443_v23 = vld [vmem:[#allocation12 + $0x4d0] sm:$0xf0]  ;;  %v14280_v40 = vld [vmem:[#allocation12 + $0x4cc] sm:$0xf]  ;;  %v11433_v2 = vld [vmem:[#allocation12 + $0x4a8] sm:$0xf] }
 0x31d   :  { %v11446_v21 = vor.u32 %v14279_v43, %v11443_v23 }
 0x31f   :  { %3630 = vmatpush.bf16.msrb.mxu2 %v11366_v48  ;;  %3617 = vmatpush.bf16.msrb.mxu1 %v11362_v4  ;;  %v11454_v48 = vor.u32 %v14280_v40, %v11451_v59  ;;  %v11986_v4 = vor.u32 %v14409_v25, %v11985_v33  ;;  %v11535_v40 = vld [vmem:[#allocation12 + $0x578] sm:$0xf0]  ;;  %v12069_v59 = vld [vmem:[#allocation12 + $0x960] sm:$0xf]  ;;  %v14429_v33 = vld [vmem:[#allocation12 + $0x96c] sm:$0xf0] }
 0x320   :  { %v2322_v42 = vpop.f32.mrf.mxu2  ;;  %3643 = vmatpush.bf16.msrb.mxu3 %v11370_v58  ;;  %4932 = vmatpush.bf16.msra.mxu0 %v11902_v0  ;;  %v14276_v58 = vld [vmem:[#allocation12 + $0x4ac] sm:$0xf]  ;;  %v12070_v9 = vor.u32 %v14429_v33, %v12069_v59 }
 0x321   :  { %v2335_v22 = vpop.f32.mrf.mxu3  ;;  %v11970_v42 = vor.u32 %v14405_v51, %v11969_v46  ;;  %v14425_v46 = vld [vmem:[#allocation12 + $0x94c] sm:$0xf0]  ;;  %v4982_v51 = vld [vmem:[#allocation3 + $0x13] sm:$0x1] }
 0x322   :  { %v16263_v62 = vpop.f32.mrf.mxu1  ;;  %v4838_v22 = vunpack.c.l.b16 %v4818_v26 }
 0x323   :  { %v16265_v41 = vpop.f32.mrf.mxu0  ;;  %3631 = vmatpush.bf16.msrb.mxu2 %v11350_v1  ;;  %3618 = vmatpush.bf16.msrb.mxu1 %v11346_v50  ;;  %v4840_v1 = vrot.slane %v4839_v29, 7  ;;  %v11434_v50 = vor.u32 %v14278_v53, %v11433_v2  ;;  %v11517_v53 = vld [vmem:[#allocation12 + $0x548] sm:$0xf] }
 0x324   :  { %3644 = vmatpush.bf16.msrb.mxu3 %v11354_v20  ;;  %4933 = vmatpush.bf16.msra.mxu0 %v11886_v52  ;;  %v14271_v20 = vld [vmem:[#allocation12 + $0x484] sm:$0xf]  ;;  %v11411_v52 = vld [vmem:[#allocation12 + $0x490] sm:$0xf0] }
 0x325   :  { %11336 = vmatmul.msk.bf16.vlgmr.msra.gmra.mxu1 %vm2150_vm4, %v16150_v61  ;;  %11337 = vmatmul.msk.bf16.vlgmr.msra.gmra.mxu2 %vm2150_vm4, %v16150_v61  ;;  %v11414_v60 = vor.u32 %v14271_v20, %v11411_v52  ;;  %v4841_v23 = vsel %vm2212_vm5, %v4840_v1, %v4838_v22  ;;  %v11501_v1 = vld [vmem:[#allocation12 + $0x528] sm:$0xf]  ;;  %v14292_v20 = vld [vmem:[#allocation12 + $0x52c] sm:$0xf] }
 0x326   :  { %11338 = vmatmul.msk.bf16.vlgmr.msra.gmra.mxu3 %vm2150_vm4, %v16150_v61  ;;  %11879 = vmatmul.msk.bf16.vlgmr.msrb.gmra.mxu0 %vm2150_vm4, %v16267_v7 }
 0x327   :  { %3794 = vmatpush.bf16.msra.mxu2 %v11466_v49  ;;  %3781 = vmatpush.bf16.msra.mxu1 %v11462_v13  ;;  %v4983_v49 = vld [vmem:[#allocation3 + $0x53] sm:$0x1]  ;;  %v11422_v13 = vor.u32 %v14272_v8, %v11419_v36  ;;  %v11503_v8 = vld [vmem:[#allocation12 + $0x538] sm:$0xf0]  ;;  %v12037_v36 = vld [vmem:[#allocation12 + $0x920] sm:$0xf] }
 0x328   :  { %v2449_v3 = vpop.f32.mrf.mxu2  ;;  %3807 = vmatpush.bf16.msra.mxu3 %v11470_v37  ;;  %5096 = vmatpush.bf16.msrb.mxu0 %v12002_v32  ;;  %v11527_v37 = vld [vmem:[#allocation12 + $0x570] sm:$0xf0]  ;;  %v14300_v32 = vld [vmem:[#allocation12 + $0x56c] sm:$0xf]  ;;  %v4985_v39 = vpack.c.bf16 %v4983_v49, %v4983_v49 }
 0x329   :  { %v16278_v61 = vadd.f32 %v2449_v3, %v16244_v10  ;;  %v2462_v0 = vpop.f32.mrf.mxu3  ;;  %v11438_v10 = vor.u32 %v14276_v58, %v11435_v19  ;;  %v11530_v2 = vor.u32 %v14299_v28, %v11527_v37  ;;  %v14298_v3 = vld [vmem:[#allocation12 + $0x554] sm:$0xf0]  ;;  %v11511_v58 = vld [vmem:[#allocation12 + $0x550] sm:$0xf0]  ;;  %v12053_v19 = vld [vmem:[#allocation12 + $0x940] sm:$0xf] }
 0x32a   :  { %v16281_v11 = vadd.f32 %v2462_v0, %v16258_v57  ;;  %v2348_v24 = vpop.f32.mrf.mxu1  ;;  %v11953_v57 = vld [vmem:[#allocation12 + $0x880] sm:$0xf]  ;;  %v14296_v0 = vld [vmem:[#allocation12 + $0x54c] sm:$0xf]  ;;  %v11514_v26 = vor.u32 %v14295_v54, %v11511_v58  ;;  %v12054_v5 = vor.u32 %v14425_v46, %v12053_v19  ;;  %v14287_v28 = vld [vmem:[#allocation12 + $0x504] sm:$0xf] }
 0x32b   :  { %v3443_v35 = vpop.f32.mrf.mxu0  ;;  %3795 = vmatpush.bf16.msra.mxu2 %v11450_v34  ;;  %3782 = vmatpush.bf16.msra.mxu1 %v11446_v21  ;;  %v11954_v14 = vor.u32 %v14401_v38, %v11953_v57  ;;  %v11534_v21 = vor.u32 %v14302_v18, %v11533_v45  ;;  %v5005_v24 = vunpack.c.l.b16 %v4985_v39  ;;  %v14421_v57 = vld [vmem:[#allocation12 + $0x92c] sm:$0xf0]  ;;  %v11479_v37 = vld [vmem:[#allocation12 + $0x510] sm:$0xf0]  ;;  %v14318_v39 = vld [vmem:[#allocation12 + $0x5f4] sm:$0xf0] }
 0x32c   :  { %3808 = vmatpush.bf16.msra.mxu3 %v11454_v48  ;;  %5097 = vmatpush.bf16.msrb.mxu0 %v11986_v4  ;;  %v16289_v48 = vpack.c.b16 %v4841_v23, %v4841_v23  ;;  %v11538_v4 = vor.u32 %v14300_v32, %v11535_v40  ;;  %v11518_v35 = vor.u32 %v14298_v3, %v11517_v53  ;;  %v14288_v32 = vld [vmem:[#allocation12 + $0x50c] sm:$0xf]  ;;  %v14417_v23 = vld [vmem:[#allocation12 + $0x90c] sm:$0xf0]  ;;  %v12137_v19 = vld [vmem:[#allocation12 + $0x9e0] sm:$0xf] }
 0x32d   :  { %v5006_v45 = vrot.slane %v5005_v24, 7  ;;  %v11482_v33 = vor.u32 %v14287_v28, %v11479_v37  ;;  %v14316_v54 = vld [vmem:[#allocation12 + $0x5ec] sm:$0xf]  ;;  %v14445_v46 = vld [vmem:[#allocation12 + $0x9ec] sm:$0xf0] }
 0x32e   :  { %v11563_v28 = vld [vmem:[#allocation12 + $0x5b0] sm:$0xf0]  ;;  %v14308_v37 = vld [vmem:[#allocation12 + $0x5ac] sm:$0xf] }
 0x32f   :  { %3796 = vmatpush.bf16.msra.mxu2 %v11434_v50  ;;  %3783 = vmatpush.bf16.msra.mxu1 %v11430_v44  ;;  %v14294_v50 = vld [vmem:[#allocation12 + $0x534] sm:$0xf0] }
 0x330   :  { %v2451_v55 = vpop.f32.mrf.mxu2  ;;  %3809 = vmatpush.bf16.msra.mxu3 %v11438_v10  ;;  %5098 = vmatpush.bf16.msrb.mxu0 %v11970_v42  ;;  %v14291_v10 = vld [vmem:[#allocation12 + $0x524] sm:$0xf]  ;;  %v11495_v42 = vld [vmem:[#allocation12 + $0x530] sm:$0xf0]  ;;  %v11502_v18 = vor.u32 %v14294_v50, %v11501_v1 }
 0x331   :  { %v2464_v43 = vpop.f32.mrf.mxu3  ;;  %v11498_v49 = vor.u32 %v14291_v10, %v11495_v42  ;;  %v11485_v55 = vld [vmem:[#allocation12 + $0x508] sm:$0xf]  ;;  %v12138_v42 = vor.u32 %v14445_v46, %v12137_v19 }
 0x332   :  { %v2475_v25 = vpop.f32.mrf.mxu1  ;;  %v11487_v43 = vld [vmem:[#allocation12 + $0x518] sm:$0xf0] }
 0x333   :  { %v16285_v29 = vadd.f32 %v2475_v25, %v16260_v15  ;;  %v16287_v34 = vpop.f32.mrf.mxu0  ;;  %3797 = vmatpush.bf16.msra.mxu2 %v11418_v27  ;;  %3784 = vmatpush.bf16.msra.mxu1 %v11414_v60  ;;  %v11519_v15 = vld [vmem:[#allocation12 + $0x558] sm:$0xf0]  ;;  %v4984_v60 = vpack.c.bf16 %v4982_v51, %v4982_v51  ;;  %v11601_v25 = vld [vmem:[#allocation12 + $0x5e8] sm:$0xf]  ;;  %v11490_v53 = vor.u32 %v14288_v32, %v11487_v43 }
 0x334   :  { %3810 = vmatpush.bf16.msra.mxu3 %v11422_v13  ;;  %5099 = vmatpush.bf16.msrb.mxu0 %v11954_v14  ;;  %v11522_v30 = vor.u32 %v14296_v0, %v11519_v15  ;;  %v14290_v13 = vld [vmem:[#allocation12 + $0x514] sm:$0xf0]  ;;  %v12038_v14 = vor.u32 %v14421_v57, %v12037_v36  ;;  %v11603_v15 = vld [vmem:[#allocation12 + $0x5f8] sm:$0xf0]  ;;  %v11602_v1 = vor.u32 %v14318_v39, %v11601_v25  ;;  %v12121_v36 = vld [vmem:[#allocation12 + $0x9c0] sm:$0xf] }
 0x335   :  { %11404 = vmatmul.msk.bf16.vlgmr.msrb.gmra.mxu1 %vm2150_vm4, %v16168_v31  ;;  %11405 = vmatmul.msk.bf16.vlgmr.msrb.gmra.mxu2 %vm2150_vm4, %v16168_v31  ;;  %v5004_v40 = vunpack.c.l.b16 %v4984_v60  ;;  %v11486_v59 = vor.u32 %v14290_v13, %v11485_v55  ;;  %v11606_v10 = vor.u32 %v14316_v54, %v11603_v15  ;;  %v14441_v57 = vld [vmem:[#allocation12 + $0x9cc] sm:$0xf0]  ;;  %v11571_v43 = vld [vmem:[#allocation12 + $0x5b8] sm:$0xf0]  ;;  %v11547_v54 = vld [vmem:[#allocation12 + $0x590] sm:$0xf0] }
 0x336   :  { %11406 = vmatmul.msk.bf16.vlgmr.msrb.gmra.mxu3 %vm2150_vm4, %v16168_v31  ;;  %11947 = vmatmul.msk.bf16.vlgmr.msra.gmra.mxu0 %vm2150_vm4, %v16289_v48  ;;  %v14433_v15 = vld [vmem:[#allocation12 + $0x98c] sm:$0xf0] }
 0x337   :  { %3960 = vmatpush.bf16.msrb.mxu2 %v11534_v21  ;;  %3947 = vmatpush.bf16.msrb.mxu1 %v11530_v2  ;;  %v5149_v21 = vld [vmem:[#allocation3 + $0x54] sm:$0x1]  ;;  %v5007_v0 = vsel %vm2212_vm5, %v5006_v45, %v5004_v40 }
 0x338   :  { %v2488_v44 = vpop.f32.mrf.mxu2  ;;  %3973 = vmatpush.bf16.msrb.mxu3 %v11538_v4  ;;  %5262 = vmatpush.bf16.msra.mxu0 %v12070_v9  ;;  %v14315_v4 = vld [vmem:[#allocation12 + $0x5e4] sm:$0xf]  ;;  %v11595_v9 = vld [vmem:[#allocation12 + $0x5f0] sm:$0xf0]  ;;  %v5151_v24 = vpack.c.bf16 %v5149_v21, %v5149_v21 }
 0x339   :  { %v16300_v31 = vadd.f32 %v2488_v44, %v16263_v62  ;;  %v2611_v52 = vpop.f32.mrf.mxu3  ;;  %v11506_v62 = vor.u32 %v14292_v20, %v11503_v8  ;;  %v11598_v50 = vor.u32 %v14315_v4, %v11595_v9  ;;  %v11585_v44 = vld [vmem:[#allocation12 + $0x5c8] sm:$0xf]  ;;  %v14311_v20 = vld [vmem:[#allocation12 + $0x5c4] sm:$0xf]  ;;  %v14312_v8 = vld [vmem:[#allocation12 + $0x5cc] sm:$0xf] }
 0x33a   :  { %v16303_v38 = vadd.f32 %v2611_v52, %v16278_v61  ;;  %v2477_v22 = vpop.f32.mrf.mxu1  ;;  %v12021_v61 = vld [vmem:[#allocation12 + $0x900] sm:$0xf]  ;;  %v11579_v52 = vld [vmem:[#allocation12 + $0x5d0] sm:$0xf0]  ;;  %v14303_v9 = vld [vmem:[#allocation12 + $0x584] sm:$0xf] }
 0x33b   :  { %v3609_v27 = vpop.f32.mrf.mxu0  ;;  %3961 = vmatpush.bf16.msrb.mxu2 %v11518_v35  ;;  %3948 = vmatpush.bf16.msrb.mxu1 %v11514_v26  ;;  %v12022_v3 = vor.u32 %v14417_v23, %v12021_v61  ;;  %v5148_v22 = vld [vmem:[#allocation3 + $0x14] sm:$0x1]  ;;  %v11582_v45 = vor.u32 %v14311_v20, %v11579_v52  ;;  %v12105_v61 = vld [vmem:[#allocation12 + $0x9a0] sm:$0xf]  ;;  %v14437_v23 = vld [vmem:[#allocation12 + $0x9ac] sm:$0xf0] }
 0x33c   :  { %3974 = vmatpush.bf16.msrb.mxu3 %v11522_v30  ;;  %5263 = vmatpush.bf16.msra.mxu0 %v12054_v5  ;;  %v14314_v30 = vld [vmem:[#allocation12 + $0x5d4] sm:$0xf0]  ;;  %v16311_v5 = vpack.c.b16 %v5007_v0, %v5007_v0  ;;  %v5171_v27 = vunpack.c.l.b16 %v5151_v24  ;;  %v5150_v25 = vpack.c.bf16 %v5148_v22, %v5148_v22  ;;  %v12106_v4 = vor.u32 %v14437_v23, %v12105_v61  ;;  %v11555_v0 = vld [vmem:[#allocation12 + $0x598] sm:$0xf0]  ;;  %v11669_v24 = vld [vmem:[#allocation12 + $0x668] sm:$0xf] }
 0x33d   :  { %v11586_v60 = vor.u32 %v14314_v30, %v11585_v44  ;;  %v11663_v20 = vld [vmem:[#allocation12 + $0x670] sm:$0xf0]  ;;  %v14332_v52 = vld [vmem:[#allocation12 + $0x66c] sm:$0xf]  ;;  %v14461_v22 = vld [vmem:[#allocation12 + $0xa6c] sm:$0xf0] }
 0x33e   :  { %v5172_v39 = vrot.slane %v5171_v27, 7  ;;  %v5170_v19 = vunpack.c.l.b16 %v5150_v25  ;;  %v14328_v61 = vld [vmem:[#allocation12 + $0x64c] sm:$0xf]  ;;  %v12189_v23 = vld [vmem:[#allocation12 + $0xa40] sm:$0xf] }
 0x33f   :  { %3962 = vmatpush.bf16.msrb.mxu2 %v11502_v18  ;;  %3949 = vmatpush.bf16.msrb.mxu1 %v11498_v49  ;;  %v11569_v18 = vld [vmem:[#allocation12 + $0x5a8] sm:$0xf]  ;;  %v14310_v49 = vld [vmem:[#allocation12 + $0x5b4] sm:$0xf0] }
 0x340   :  { %v2490_v2 = vpop.f32.mrf.mxu2  ;;  %3975 = vmatpush.bf16.msrb.mxu3 %v11506_v62  ;;  %5264 = vmatpush.bf16.msra.mxu0 %v12038_v14  ;;  %v12122_v62 = vor.u32 %v14441_v57, %v12121_v36  ;;  %v14307_v14 = vld [vmem:[#allocation12 + $0x5a4] sm:$0xf]  ;;  %v11570_v21 = vor.u32 %v14310_v49, %v11569_v18  ;;  %v11671_v36 = vld [vmem:[#allocation12 + $0x678] sm:$0xf0]  ;;  %v12205_v57 = vld [vmem:[#allocation12 + $0xa60] sm:$0xf] }
 0x341   :  { %v2613_v58 = vpop.f32.mrf.mxu3  ;;  %v11566_v2 = vor.u32 %v14307_v14, %v11563_v28  ;;  %v11674_v28 = vor.u32 %v14332_v52, %v11671_v36  ;;  %v14320_v36 = vld [vmem:[#allocation12 + $0x60c] sm:$0xf] }
 0x342   :  { %v2624_v51 = vpop.f32.mrf.mxu1  ;;  %v14304_v58 = vld [vmem:[#allocation12 + $0x58c] sm:$0xf] }
 0x343   :  { %v16307_v35 = vadd.f32 %v2624_v51, %v16281_v11  ;;  %v16309_v26 = vpop.f32.mrf.mxu0  ;;  %3963 = vmatpush.bf16.msrb.mxu2 %v11486_v59  ;;  %3950 = vmatpush.bf16.msrb.mxu1 %v11482_v33  ;;  %v11587_v11 = vld [vmem:[#allocation12 + $0x5d8] sm:$0xf0]  ;;  %v11550_v51 = vor.u32 %v14303_v9, %v11547_v54  ;;  %v11558_v30 = vor.u32 %v14304_v58, %v11555_v0  ;;  %v14323_v9 = vld [vmem:[#allocation12 + $0x624] sm:$0xf]  ;;  %v11631_v54 = vld [vmem:[#allocation12 + $0x630] sm:$0xf0] }
 0x344   :  { %3976 = vmatpush.bf16.msrb.mxu3 %v11490_v53  ;;  %5265 = vmatpush.bf16.msra.mxu0 %v12022_v3  ;;  %v11590_v13 = vor.u32 %v14312_v8, %v11587_v11  ;;  %v11553_v53 = vld [vmem:[#allocation12 + $0x588] sm:$0xf]  ;;  %v14306_v3 = vld [vmem:[#allocation12 + $0x594] sm:$0xf0]  ;;  %v5173_v11 = vsel %vm2212_vm5, %v5172_v39, %v5170_v19  ;;  %v14324_v58 = vld [vmem:[#allocation12 + $0x62c] sm:$0xf] }
 0x345   :  { %11472 = vmatmul.msk.bf16.vlgmr.msra.gmra.mxu1 %vm2150_vm4, %v16180_v47  ;;  %11473 = vmatmul.msk.bf16.vlgmr.msra.gmra.mxu2 %vm2150_vm4, %v16180_v47  ;;  %v11554_v46 = vor.u32 %v14306_v3, %v11553_v53  ;;  %v16333_v14 = vpack.c.b16 %v5173_v11, %v5173_v11  ;;  %v14326_v53 = vld [vmem:[#allocation12 + $0x634] sm:$0xf0]  ;;  %v14453_v19 = vld [vmem:[#allocation12 + $0xa2c] sm:$0xf0]  ;;  %v11615_v11 = vld [vmem:[#allocation12 + $0x610] sm:$0xf0] }
 0x346   :  { %11474 = vmatmul.msk.bf16.vlgmr.msra.gmra.mxu3 %vm2150_vm4, %v16180_v47  ;;  %12015 = vmatmul.msk.bf16.vlgmr.msrb.gmra.mxu0 %vm2150_vm4, %v16311_v5 }
 0x347   :  { %4126 = vmatpush.bf16.msra.mxu2 %v11602_v1  ;;  %4113 = vmatpush.bf16.msra.mxu1 %v11598_v50  ;;  %v14334_v1 = vld [vmem:[#allocation12 + $0x674] sm:$0xf0]  ;;  %v5315_v50 = vld [vmem:[#allocation3 + $0x55] sm:$0x1] }
 0x348   :  { %v2637_v55 = vpop.f32.mrf.mxu2  ;;  %4139 = vmatpush.bf16.msra.mxu3 %v11606_v10  ;;  %5428 = vmatpush.bf16.msrb.mxu0 %v12138_v42  ;;  %v14331_v42 = vld [vmem:[#allocation12 + $0x664] sm:$0xf]  ;;  %v11670_v49 = vor.u32 %v14334_v1, %v11669_v24  ;;  %v5481_v24 = vld [vmem:[#allocation3 + $0x56] sm:$0x1] }
 0x349   :  { %v16322_v47 = vadd.f32 %v2637_v55, %v16285_v29  ;;  %v2650_v32 = vpop.f32.mrf.mxu3  ;;  %v11574_v29 = vor.u32 %v14308_v37, %v11571_v43  ;;  %v11666_v55 = vor.u32 %v14331_v42, %v11663_v20  ;;  %v12206_v37 = vor.u32 %v14461_v22, %v12205_v57  ;;  %v11647_v43 = vld [vmem:[#allocation12 + $0x650] sm:$0xf0]  ;;  %v11621_v42 = vld [vmem:[#allocation12 + $0x608] sm:$0xf]  ;;  %v14322_v20 = vld [vmem:[#allocation12 + $0x614] sm:$0xf0] }
 0x34a   :  { %v16325_v40 = vadd.f32 %v2650_v32, %v16300_v31  ;;  %v2626_v59 = vpop.f32.mrf.mxu1  ;;  %v12089_v31 = vld [vmem:[#allocation12 + $0x980] sm:$0xf]  ;;  %v14327_v32 = vld [vmem:[#allocation12 + $0x644] sm:$0xf]  ;;  %v14449_v22 = vld [vmem:[#allocation12 + $0xa0c] sm:$0xf0] }
 0x34b   :  { %v3775_v33 = vpop.f32.mrf.mxu0  ;;  %4127 = vmatpush.bf16.msra.mxu2 %v11586_v60  ;;  %4114 = vmatpush.bf16.msra.mxu1 %v11582_v45  ;;  %v12090_v10 = vor.u32 %v14433_v15, %v12089_v31  ;;  %v5317_v60 = vpack.c.bf16 %v5315_v50, %v5315_v50  ;;  %v14457_v59 = vld [vmem:[#allocation12 + $0xa4c] sm:$0xf0]  ;;  %v11639_v31 = vld [vmem:[#allocation12 + $0x638] sm:$0xf0]  ;;  %v12173_v15 = vld [vmem:[#allocation12 + $0xa20] sm:$0xf] }
 0x34c   :  { %4140 = vmatpush.bf16.msra.mxu3 %v11590_v13  ;;  %5429 = vmatpush.bf16.msrb.mxu0 %v12122_v62  ;;  %v11653_v13 = vld [vmem:[#allocation12 + $0x648] sm:$0xf]  ;;  %v14330_v62 = vld [vmem:[#allocation12 + $0x654] sm:$0xf0]  ;;  %v5314_v33 = vld [vmem:[#allocation3 + $0x15] sm:$0x1]  ;;  %v12174_v52 = vor.u32 %v14453_v19, %v12173_v15 }
 0x34d   :  { %v5337_v25 = vunpack.c.l.b16 %v5317_v60  ;;  %v11654_v39 = vor.u32 %v14330_v62, %v11653_v13  ;;  %v5316_v50 = vpack.c.bf16 %v5314_v33, %v5314_v33  ;;  %v12157_v57 = vld [vmem:[#allocation12 + $0xa00] sm:$0xf]  ;;  %v11737_v13 = vld [vmem:[#allocation12 + $0x6e8] sm:$0xf]  ;;  %v14350_v62 = vld [vmem:[#allocation12 + $0x6f4] sm:$0xf0] }
 0x34e   :  { %v14346_v15 = vld [vmem:[#allocation12 + $0x6d4] sm:$0xf0]  ;;  %v14343_v19 = vld [vmem:[#allocation12 + $0x6c4] sm:$0xf] }
 0x34f   :  { %4128 = vmatpush.bf16.msra.mxu2 %v11570_v21  ;;  %4115 = vmatpush.bf16.msra.mxu1 %v11566_v2  ;;  %v11650_v21 = vor.u32 %v14327_v32, %v11647_v43  ;;  %v11637_v2 = vld [vmem:[#allocation12 + $0x628] sm:$0xf]  ;;  %v5336_v60 = vunpack.c.l.b16 %v5316_v50  ;;  %v12158_v32 = vor.u32 %v14449_v22, %v12157_v57  ;;  %v14347_v43 = vld [vmem:[#allocation12 + $0x6e4] sm:$0xf]  ;;  %v11723_v50 = vld [vmem:[#allocation12 + $0x6d8] sm:$0xf0] }
 0x350   :  { %v2639_v44 = vpop.f32.mrf.mxu2  ;;  %4141 = vmatpush.bf16.msra.mxu3 %v11574_v29  ;;  %5430 = vmatpush.bf16.msrb.mxu0 %v12106_v4  ;;  %v12190_v4 = vor.u32 %v14457_v59, %v12189_v23 }
 0x351   :  { %v2652_v8 = vpop.f32.mrf.mxu3  ;;  %v5338_v44 = vrot.slane %v5337_v25, 7  ;;  %v11739_v25 = vld [vmem:[#allocation12 + $0x6f8] sm:$0xf0] }
 0x352   :  { %v2777_v27 = vpop.f32.mrf.mxu1  ;;  %v14319_v8 = vld [vmem:[#allocation12 + $0x604] sm:$0xf] }
 0x353   :  { %v16329_v45 = vadd.f32 %v2777_v27, %v16303_v38  ;;  %v16331_v18 = vpop.f32.mrf.mxu0  ;;  %4129 = vmatpush.bf16.msra.mxu2 %v11554_v46  ;;  %4116 = vmatpush.bf16.msra.mxu1 %v11550_v51  ;;  %v11655_v38 = vld [vmem:[#allocation12 + $0x658] sm:$0xf0]  ;;  %v5483_v27 = vpack.c.bf16 %v5481_v24, %v5481_v24  ;;  %v5339_v59 = vsel %vm2212_vm5, %v5338_v44, %v5336_v60  ;;  %v11715_v24 = vld [vmem:[#allocation12 + $0x6d0] sm:$0xf0] }
 0x354   :  { %4142 = vmatpush.bf16.msra.mxu3 %v11558_v30  ;;  %5431 = vmatpush.bf16.msrb.mxu0 %v12090_v10  ;;  %v11658_v29 = vor.u32 %v14328_v61, %v11655_v38  ;;  %v11638_v30 = vor.u32 %v14326_v53, %v11637_v2  ;;  %v11634_v10 = vor.u32 %v14323_v9, %v11631_v54  ;;  %v11731_v61 = vld [vmem:[#allocation12 + $0x6f0] sm:$0xf0]  ;;  %v14348_v38 = vld [vmem:[#allocation12 + $0x6ec] sm:$0xf]  ;;  %v11707_v60 = vld [vmem:[#allocation12 + $0x6b8] sm:$0xf0] }
 0x355   :  { %11540 = vmatmul.msk.bf16.vlgmr.msrb.gmra.mxu1 %vm2150_vm4, %v16194_v17  ;;  %11541 = vmatmul.msk.bf16.vlgmr.msrb.gmra.mxu2 %vm2150_vm4, %v16194_v17  ;;  %v16350_v33 = vunpack.c.l.b16 %v5483_v27  ;;  %v16357_v9 = vpack.c.b16 %v5339_v59, %v5339_v59  ;;  %v11742_v54 = vor.u32 %v14348_v38, %v11739_v25  ;;  %v14340_v27 = vld [vmem:[#allocation12 + $0x6ac] sm:$0xf]  ;;  %v14335_v38 = vld [vmem:[#allocation12 + $0x684] sm:$0xf]  ;;  %v11691_v59 = vld [vmem:[#allocation12 + $0x698] sm:$0xf0] }
 0x356   :  { %11542 = vmatmul.msk.bf16.vlgmr.msrb.gmra.mxu3 %vm2150_vm4, %v16194_v17  ;;  %12083 = vmatmul.msk.bf16.vlgmr.msra.gmra.mxu0 %vm2150_vm4, %v16333_v14  ;;  %v12225_v25 = vld [vmem:[#allocation12 + $0xa80] sm:$0xf] }
 0x357   :  { %4292 = vmatpush.bf16.msrb.mxu2 %v11670_v49  ;;  %4279 = vmatpush.bf16.msrb.mxu1 %v11666_v55  ;;  %v11622_v49 = vor.u32 %v14322_v20, %v11621_v42  ;;  %v11618_v55 = vor.u32 %v14319_v8, %v11615_v11  ;;  %v12257_v42 = vld [vmem:[#allocation12 + $0xac0] sm:$0xf]  ;;  %v11705_v20 = vld [vmem:[#allocation12 + $0x6a8] sm:$0xf]  ;;  %v14342_v11 = vld [vmem:[#allocation12 + $0x6b4] sm:$0xf0] }
 0x358   :  { %v2790_v3 = vpop.f32.mrf.mxu2  ;;  %4305 = vmatpush.bf16.msrb.mxu3 %v11674_v28  ;;  %5594 = vmatpush.bf16.msra.mxu0 %v12206_v37 }
 0x359   :  { %v16344_v17 = vadd.f32 %v2790_v3, %v16307_v35  ;;  %v2803_v0 = vpop.f32.mrf.mxu3  ;;  %v11642_v35 = vor.u32 %v14324_v58, %v11639_v31  ;;  %v11721_v31 = vld [vmem:[#allocation12 + $0x6c8] sm:$0xf] }
 0x35a   :  { %v16347_v46 = vadd.f32 %v2803_v0, %v16322_v47  ;;  %v2779_v51 = vpop.f32.mrf.mxu1  ;;  %v11623_v47 = vld [vmem:[#allocation12 + $0x618] sm:$0xf0]  ;;  %v5480_v0 = vld [vmem:[#allocation3 + $0x16] sm:$0x1] }
 0x35b   :  { %v3941_v1 = vpop.f32.mrf.mxu0  ;;  %4293 = vmatpush.bf16.msrb.mxu2 %v11654_v39  ;;  %4280 = vmatpush.bf16.msrb.mxu1 %v11650_v21  ;;  %v11626_v37 = vor.u32 %v14320_v36, %v11623_v47  ;;  %v12273_v39 = vld [vmem:[#allocation12 + $0xae0] sm:$0xf]  ;;  %v14477_v21 = vld [vmem:[#allocation12 + $0xaec] sm:$0xf0]  ;;  %v11722_v51 = vor.u32 %v14346_v15, %v11721_v31  ;;  %v14339_v36 = vld [vmem:[#allocation12 + $0x6a4] sm:$0xf] }
 0x35c   :  { %4306 = vmatpush.bf16.msrb.mxu3 %v11658_v29  ;;  %5595 = vmatpush.bf16.msra.mxu0 %v12190_v4  ;;  %v11738_v29 = vor.u32 %v14350_v62, %v11737_v13  ;;  %v11734_v4 = vor.u32 %v14347_v43, %v11731_v61  ;;  %v12274_v58 = vor.u32 %v14477_v21, %v12273_v39  ;;  %v14344_v1 = vld [vmem:[#allocation12 + $0x6cc] sm:$0xf]  ;;  %v11699_v47 = vld [vmem:[#allocation12 + $0x6b0] sm:$0xf0]  ;;  %v14465_v39 = vld [vmem:[#allocation12 + $0xa8c] sm:$0xf0] }
 0x35d   :  { %v5482_v13 = vpack.c.bf16 %v5480_v0, %v5480_v0  ;;  %v11706_v62 = vor.u32 %v14342_v11, %v11705_v20  ;;  %v11710_v43 = vor.u32 %v14340_v27, %v11707_v60  ;;  %v12226_v15 = vor.u32 %v14465_v39, %v12225_v25  ;;  %v14359_v27 = vld [vmem:[#allocation12 + $0x744] sm:$0xf]  ;;  %v11783_v60 = vld [vmem:[#allocation12 + $0x750] sm:$0xf0]  ;;  %v14356_v25 = vld [vmem:[#allocation12 + $0x72c] sm:$0xf] }
 0x35f   :  { %4294 = vmatpush.bf16.msrb.mxu2 %v11638_v30  ;;  %4281 = vmatpush.bf16.msrb.mxu1 %v11634_v10  ;;  %v11718_v30 = vor.u32 %v14343_v19, %v11715_v24  ;;  %v11726_v10 = vor.u32 %v14344_v1, %v11723_v50  ;;  %v5502_v21 = vunpack.c.l.b16 %v5482_v13  ;;  %v14363_v19 = vld [vmem:[#allocation12 + $0x764] sm:$0xf]  ;;  %v14364_v24 = vld [vmem:[#allocation12 + $0x76c] sm:$0xf]  ;;  %v14489_v13 = vld [vmem:[#allocation12 + $0xb4c] sm:$0xf0] }
 0x360   :  { %v2792_v28 = vpop.f32.mrf.mxu2  ;;  %4307 = vmatpush.bf16.msrb.mxu3 %v11642_v35  ;;  %5596 = vmatpush.bf16.msra.mxu0 %v12174_v52 }
 0x361   :  { %v2805_v23 = vpop.f32.mrf.mxu3  ;;  %v11702_v28 = vor.u32 %v14339_v36, %v11699_v47  ;;  %v11789_v36 = vld [vmem:[#allocation12 + $0x748] sm:$0xf]  ;;  %v14362_v47 = vld [vmem:[#allocation12 + $0x754] sm:$0xf0] }
 0x362   :  { %v2816_v2 = vpop.f32.mrf.mxu1  ;;  %v14336_v23 = vld [vmem:[#allocation12 + $0x68c] sm:$0xf] }
 0x363   :  { %v16353_v53 = vadd.f32 %v2816_v2, %v16325_v40  ;;  %v16355_v3 = vpop.f32.mrf.mxu0  ;;  %4295 = vmatpush.bf16.msrb.mxu2 %v11622_v49  ;;  %4282 = vmatpush.bf16.msrb.mxu1 %v11618_v55  ;;  %v5504_v40 = vrot.slane %v16350_v33, 7  ;;  %v12241_v49 = vld [vmem:[#allocation12 + $0xaa0] sm:$0xf]  ;;  %v11694_v31 = vor.u32 %v14336_v23, %v11691_v59  ;;  %v14355_v23 = vld [vmem:[#allocation12 + $0x724] sm:$0xf] }
 0x364   :  { %4308 = vmatpush.bf16.msrb.mxu3 %v11626_v37  ;;  %5597 = vmatpush.bf16.msra.mxu0 %v12158_v32  ;;  %v11689_v37 = vld [vmem:[#allocation12 + $0x688] sm:$0xf]  ;;  %v14338_v32 = vld [vmem:[#allocation12 + $0x694] sm:$0xf0]  ;;  %v11767_v59 = vld [vmem:[#allocation12 + $0x730] sm:$0xf0] }
 0x365   :  { %11608 = vmatmul.msk.bf16.vlgmr.msra.gmra.mxu1 %vm2150_vm4, %v16208_v16  ;;  %11609 = vmatmul.msk.bf16.vlgmr.msra.gmra.mxu2 %vm2150_vm4, %v16208_v16  ;;  %v11690_v2 = vor.u32 %v14338_v32, %v11689_v37  ;;  %v5505_v50 = vsel %vm2212_vm5, %v5504_v40, %v5502_v21  ;;  %v11786_v37 = vor.u32 %v14359_v27, %v11783_v60  ;;  %v11773_v32 = vld [vmem:[#allocation12 + $0x728] sm:$0xf]  ;;  %v5813_v27 = vld [vmem:[#allocation3 + $0x59] sm:$0x1] }
 0x366   :  { %11610 = vmatmul.msk.bf16.vlgmr.msra.gmra.mxu3 %vm2150_vm4, %v16208_v16  ;;  %12151 = vmatmul.msk.bf16.vlgmr.msrb.gmra.mxu0 %vm2150_vm4, %v16357_v9  ;;  %v14473_v16 = vld [vmem:[#allocation12 + $0xacc] sm:$0xf0] }
 0x367   :  { %4458 = vmatpush.bf16.msra.mxu2 %v11738_v29  ;;  %4445 = vmatpush.bf16.msra.mxu1 %v11734_v4  ;;  %v12258_v8 = vor.u32 %v14473_v16, %v12257_v42  ;;  %v11805_v4 = vld [vmem:[#allocation12 + $0x768] sm:$0xf] }
 0x368   :  { %v2943_v44 = vpop.f32.mrf.mxu2  ;;  %4471 = vmatpush.bf16.msra.mxu3 %v11742_v54  ;;  %5760 = vmatpush.bf16.msrb.mxu0 %v12274_v58  ;;  %v14366_v54 = vld [vmem:[#allocation12 + $0x774] sm:$0xf0]  ;;  %v5647_v58 = vld [vmem:[#allocation3 + $0x58] sm:$0x1] }
 0x369   :  { %v16369_v35 = vadd.f32 %v2943_v44, %v16329_v45  ;;  %v2956_v52 = vpop.f32.mrf.mxu3  ;;  %v14469_v45 = vld [vmem:[#allocation12 + $0xaac] sm:$0xf0]  ;;  %v11807_v44 = vld [vmem:[#allocation12 + $0x778] sm:$0xf0]  ;;  %v5649_v16 = vpack.c.bf16 %v5647_v58, %v5647_v58 }
 0x36a   :  { %v16372_v57 = vadd.f32 %v2956_v52, %v16344_v17  ;;  %v2818_v22 = vpop.f32.mrf.mxu1  ;;  %v12242_v61 = vor.u32 %v14469_v45, %v12241_v49  ;;  %v11683_v17 = vld [vmem:[#allocation12 + $0x690] sm:$0xf0]  ;;  %v11810_v33 = vor.u32 %v14364_v24, %v11807_v44  ;;  %v14360_v49 = vld [vmem:[#allocation12 + $0x74c] sm:$0xf]  ;;  %v11790_v45 = vor.u32 %v14362_v47, %v11789_v36  ;;  %v14354_v24 = vld [vmem:[#allocation12 + $0x714] sm:$0xf0] }
 0x36b   :  { %v4107_v55 = vpop.f32.mrf.mxu0  ;;  %4459 = vmatpush.bf16.msra.mxu2 %v11722_v51  ;;  %4446 = vmatpush.bf16.msra.mxu1 %v11718_v30  ;;  %v11686_v29 = vor.u32 %v14335_v38, %v11683_v17  ;;  %v11799_v51 = vld [vmem:[#allocation12 + $0x770] sm:$0xf0]  ;;  %v12341_v30 = vld [vmem:[#allocation12 + $0xb60] sm:$0xf]  ;;  %v16382_v22 = vpack.c.b16 %v5505_v50, %v5505_v50  ;;  %v14351_v44 = vld [vmem:[#allocation12 + $0x704] sm:$0xf] }
 0x36c   :  { %4472 = vmatpush.bf16.msra.mxu3 %v11726_v10  ;;  %5761 = vmatpush.bf16.msrb.mxu0 %v12258_v8  ;;  %v14493_v10 = vld [vmem:[#allocation12 + $0xb6c] sm:$0xf0]  ;;  %v11806_v8 = vor.u32 %v14366_v54, %v11805_v4  ;;  %v11802_v11 = vor.u32 %v14363_v19, %v11799_v51  ;;  %v12325_v55 = vld [vmem:[#allocation12 + $0xb40] sm:$0xf]  ;;  %v11770_v19 = vor.u32 %v14355_v23, %v11767_v59  ;;  %v11757_v51 = vld [vmem:[#allocation12 + $0x708] sm:$0xf] }
 0x36d   :  { %v12342_v40 = vor.u32 %v14493_v10, %v12341_v30  ;;  %v12326_v17 = vor.u32 %v14489_v13, %v12325_v55  ;;  %v14485_v4 = vld [vmem:[#allocation12 + $0xb2c] sm:$0xf0]  ;;  %v11751_v30 = vld [vmem:[#allocation12 + $0x710] sm:$0xf0]  ;;  %v14352_v10 = vld [vmem:[#allocation12 + $0x70c] sm:$0xf]  ;;  %v11758_v47 = vor.u32 %v14354_v24, %v11757_v51 }
 0x36e   :  { %v14379_v13 = vld [vmem:[#allocation12 + $0x7e4] sm:$0xf] }
 0x36f   :  { %4460 = vmatpush.bf16.msra.mxu2 %v11706_v62  ;;  %4447 = vmatpush.bf16.msra.mxu1 %v11702_v28  ;;  %v5646_v62 = vld [vmem:[#allocation3 + $0x18] sm:$0x1]  ;;  %v5669_v28 = vunpack.c.l.b16 %v5649_v16  ;;  %v12293_v16 = vld [vmem:[#allocation12 + $0xb00] sm:$0xf] }
 0x370   :  { %v2945_v0 = vpop.f32.mrf.mxu2  ;;  %4473 = vmatpush.bf16.msra.mxu3 %v11710_v43  ;;  %5762 = vmatpush.bf16.msrb.mxu0 %v12242_v61  ;;  %v14358_v43 = vld [vmem:[#allocation12 + $0x734] sm:$0xf0]  ;;  %v5648_v21 = vpack.c.bf16 %v5646_v62, %v5646_v62  ;;  %v11867_v62 = vld [vmem:[#allocation12 + $0x7f0] sm:$0xf0] }
 0x371   :  { %v2958_v1 = vpop.f32.mrf.mxu3 }
 0x372   :  { %v2969_v42 = vpop.f32.mrf.mxu1 }
 0x373   :  { %v16378_v20 = vadd.f32 %v2969_v42, %v16347_v46  ;;  %v16380_v52 = vpop.f32.mrf.mxu0  ;;  %4461 = vmatpush.bf16.msra.mxu2 %v11690_v2  ;;  %4448 = vmatpush.bf16.msra.mxu1 %v11686_v29  ;;  %v11791_v46 = vld [vmem:[#allocation12 + $0x758] sm:$0xf0]  ;;  %v12309_v29 = vld [vmem:[#allocation12 + $0xb20] sm:$0xf]  ;;  %v5668_v42 = vunpack.c.l.b16 %v5648_v21  ;;  %v14378_v21 = vld [vmem:[#allocation12 + $0x7d4] sm:$0xf0] }
 0x374   :  { %4474 = vmatpush.bf16.msra.mxu3 %v11694_v31  ;;  %5763 = vmatpush.bf16.msrb.mxu0 %v12226_v15  ;;  %v11794_v38 = vor.u32 %v14360_v49, %v11791_v46  ;;  %v11775_v2 = vld [vmem:[#allocation12 + $0x738] sm:$0xf0]  ;;  %v5670_v31 = vrot.slane %v5669_v28, 7  ;;  %v11774_v15 = vor.u32 %v14358_v43, %v11773_v32  ;;  %v12310_v50 = vor.u32 %v14485_v4, %v12309_v29  ;;  %v14380_v28 = vld [vmem:[#allocation12 + $0x7ec] sm:$0xf] }
 0x375   :  { %11676 = vmatmul.msk.bf16.vlgmr.msrb.gmra.mxu1 %vm2150_vm4, %v16222_v12  ;;  %11677 = vmatmul.msk.bf16.vlgmr.msrb.gmra.mxu2 %vm2150_vm4, %v16222_v12  ;;  %v14509_v32 = vld [vmem:[#allocation12 + $0xbec] sm:$0xf0]  ;;  %v14375_v4 = vld [vmem:[#allocation12 + $0x7c4] sm:$0xf] }
 0x376   :  { %11678 = vmatmul.msk.bf16.vlgmr.msrb.gmra.mxu3 %vm2150_vm4, %v16222_v12  ;;  %12219 = vmatmul.msk.bf16.vlgmr.msra.gmra.mxu0 %vm2150_vm4, %v16382_v22  ;;  %v5671_v36 = vsel %vm2212_vm5, %v5670_v31, %v5668_v42  ;;  %v14505_v31 = vld [vmem:[#allocation12 + $0xbcc] sm:$0xf0]  ;;  %v14372_v42 = vld [vmem:[#allocation12 + $0x7ac] sm:$0xf] }
 0x377   :  { %4624 = vmatpush.bf16.msrb.mxu2 %v11806_v8  ;;  %4611 = vmatpush.bf16.msrb.mxu1 %v11802_v11  ;;  %v14481_v8 = vld [vmem:[#allocation12 + $0xb0c] sm:$0xf0] }
 0x378   :  { %v2982_v61 = vpop.f32.mrf.mxu2  ;;  %4637 = vmatpush.bf16.msrb.mxu3 %v11810_v33  ;;  %5926 = vmatpush.bf16.msra.mxu0 %v12342_v40  ;;  %v11754_v33 = vor.u32 %v14351_v44, %v11751_v30  ;;  %v14382_v40 = vld [vmem:[#allocation12 + $0x7f4] sm:$0xf0]  ;;  %v12294_v55 = vor.u32 %v14481_v8, %v12293_v16 }
 0x379   :  { %v16393_v12 = vadd.f32 %v2982_v61, %v16353_v53  ;;  %v3109_v39 = vpop.f32.mrf.mxu3  ;;  %v11778_v53 = vor.u32 %v14356_v25, %v11775_v2  ;;  %v11870_v25 = vor.u32 %v14379_v13, %v11867_v62  ;;  %v14367_v62 = vld [vmem:[#allocation12 + $0x784] sm:$0xf] }
 0x37a   :  { %v3152_v54 = vadd.f32 %v3109_v39, %v16369_v35  ;;  %v2971_v58 = vpop.f32.mrf.mxu1  ;;  %v11759_v35 = vld [vmem:[#allocation12 + $0x718] sm:$0xf0]  ;;  %v11857_v39 = vld [vmem:[#allocation12 + $0x7c8] sm:$0xf] }
 0x37b   :  { %v4273_v0 = vpop.f32.mrf.mxu0  ;;  %4625 = vmatpush.bf16.msrb.mxu2 %v11790_v45  ;;  %4612 = vmatpush.bf16.msrb.mxu1 %v11786_v37  ;;  %v11762_v46 = vor.u32 %v14352_v10, %v11759_v35  ;;  %v11875_v45 = vld [vmem:[#allocation12 + $0x7f8] sm:$0xf0]  ;;  %v12409_v37 = vld [vmem:[#allocation12 + $0xbe0] sm:$0xf]  ;;  %v14376_v58 = vld [vmem:[#allocation12 + $0x7cc] sm:$0xf]  ;;  %v11858_v51 = vor.u32 %v14378_v21, %v11857_v39 }
 0x37c   :  { %v3318_v1 = vadd.f32 %v16246_v63, %v3152_v54  ;;  %4638 = vmatpush.bf16.msrb.mxu3 %v11794_v38  ;;  %5927 = vmatpush.bf16.msra.mxu0 %v12326_v17  ;;  %v11873_v63 = vld [vmem:[#allocation12 + $0x7e8] sm:$0xf]  ;;  %v16401_v38 = vpack.c.b16 %v5671_v36, %v5671_v36  ;;  %v5815_v17 = vpack.c.bf16 %v5813_v27, %v5813_v27  ;;  %v11851_v54 = vld [vmem:[#allocation12 + $0x7d0] sm:$0xf0]  ;;  %v12393_v0 = vld [vmem:[#allocation12 + $0xbc0] sm:$0xf] }
 0x37d   :  { %v11874_v59 = vor.u32 %v14382_v40, %v11873_v63  ;;  %v11878_v29 = vor.u32 %v14380_v28, %v11875_v45  ;;  %v11854_v24 = vor.u32 %v14375_v4, %v11851_v54  ;;  %v12394_v30 = vor.u32 %v14505_v31, %v12393_v0  ;;  %v14371_v10 = vld [vmem:[#allocation12 + $0x7a4] sm:$0xf]  ;;  %v12377_v36 = vld [vmem:[#allocation12 + $0xba0] sm:$0xf]  ;;  %v11819_v28 = vld [vmem:[#allocation12 + $0x790] sm:$0xf0] }
 0x37e   :  { %v3484_v11 = vadd.f32 %v16265_v41, %v3318_v1  ;;  %v11841_v1 = vld [vmem:[#allocation12 + $0x7a8] sm:$0xf]  ;;  %v14396_v4 = vld [vmem:[#allocation12 + $0x86c] sm:$0xf]  ;;  %v14525_v0 = vld [vmem:[#allocation12 + $0xc6c] sm:$0xf0] }
 0x37f   :  { %4626 = vmatpush.bf16.msrb.mxu2 %v11774_v15  ;;  %4613 = vmatpush.bf16.msrb.mxu1 %v11770_v19  ;;  %v5835_v19 = vunpack.c.l.b16 %v5815_v17  ;;  %v11822_v17 = vor.u32 %v14367_v62, %v11819_v28  ;;  %v11911_v28 = vld [vmem:[#allocation12 + $0x838] sm:$0xf0] }
 0x380   :  { %v3650_v60 = vadd.f32 %v16287_v34, %v3484_v11  ;;  %v2984_v49 = vpop.f32.mrf.mxu2  ;;  %4639 = vmatpush.bf16.msrb.mxu3 %v11778_v53  ;;  %5928 = vmatpush.bf16.msra.mxu0 %v12310_v50  ;;  %v14374_v53 = vld [vmem:[#allocation12 + $0x7b4] sm:$0xf0]  ;;  %v11843_v11 = vld [vmem:[#allocation12 + $0x7b8] sm:$0xf0] }
 0x381   :  { %v3111_v41 = vpop.f32.mrf.mxu3  ;;  %v5836_v27 = vrot.slane %v5835_v19, 7 }
 0x382   :  { %v3816_v43 = vadd.f32 %v16309_v26, %v3650_v60  ;;  %v3122_v61 = vpop.f32.mrf.mxu1  ;;  %v12410_v26 = vor.u32 %v14509_v32, %v12409_v37  ;;  %v11842_v60 = vor.u32 %v14374_v53, %v11841_v1  ;;  %v14368_v41 = vld [vmem:[#allocation12 + $0x78c] sm:$0xf]  ;;  %v11827_v37 = vld [vmem:[#allocation12 + $0x798] sm:$0xf0]  ;;  %v14497_v32 = vld [vmem:[#allocation12 + $0xb8c] sm:$0xf0] }
 0x383   :  { %v16404_v34 = vadd.f32 %v3122_v61, %v16372_v57  ;;  %v4437_v23 = vpop.f32.mrf.mxu0  ;;  %4627 = vmatpush.bf16.msrb.mxu2 %v11758_v47  ;;  %4614 = vmatpush.bf16.msrb.mxu1 %v11754_v33  ;;  %v11859_v57 = vld [vmem:[#allocation12 + $0x7d8] sm:$0xf0]  ;;  %v14501_v47 = vld [vmem:[#allocation12 + $0xbac] sm:$0xf0]  ;;  %v11830_v21 = vor.u32 %v14368_v41, %v11827_v37  ;;  %v11925_v53 = vld [vmem:[#allocation12 + $0x848] sm:$0xf] }
 0x384   :  { %v3982_v2 = vadd.f32 %v16331_v18, %v3816_v43  ;;  %4640 = vmatpush.bf16.msrb.mxu3 %v11762_v46  ;;  %5929 = vmatpush.bf16.msra.mxu0 %v12294_v55  ;;  %v5812_v18 = vld [vmem:[#allocation3 + $0x19] sm:$0x1]  ;;  %v11825_v46 = vld [vmem:[#allocation12 + $0x788] sm:$0xf]  ;;  %v14370_v55 = vld [vmem:[#allocation12 + $0x794] sm:$0xf0]  ;;  %v12378_v13 = vor.u32 %v14501_v47, %v12377_v36 }
 0x385   :  { %11744 = vmatmul.msk.bf16.vlgmr.msra.gmra.mxu1 %vm2150_vm4, %v16233_v6  ;;  %11745 = vmatmul.msk.bf16.vlgmr.msra.gmra.mxu2 %vm2150_vm4, %v16233_v6  ;;  %v5814_v8 = vpack.c.bf16 %v5812_v18, %v5812_v18  ;;  %v11826_v61 = vor.u32 %v14370_v55, %v11825_v46  ;;  %v14387_v46 = vld [vmem:[#allocation12 + $0x824] sm:$0xf]  ;;  %v11903_v55 = vld [vmem:[#allocation12 + $0x830] sm:$0xf0]  ;;  %v12445_v41 = vld [vmem:[#allocation12 + $0xc20] sm:$0xf] }
 0x386   :  { %v4148_v15 = vadd.f32 %v16355_v3, %v3982_v2  ;;  %11746 = vmatmul.msk.bf16.vlgmr.msra.gmra.mxu3 %vm2150_vm4, %v16233_v6  ;;  %12287 = vmatmul.msk.bf16.vlgmr.msrb.gmra.mxu0 %vm2150_vm4, %v16401_v38  ;;  %v11862_v3 = vor.u32 %v14376_v58, %v11859_v57  ;;  %v11835_v6 = vld [vmem:[#allocation12 + $0x7b0] sm:$0xf0]  ;;  %v11943_v58 = vld [vmem:[#allocation12 + $0x878] sm:$0xf0]  ;;  %v12477_v57 = vld [vmem:[#allocation12 + $0xc60] sm:$0xf] }
 0x387   :  { %4790 = vmatpush.bf16.msra.mxu2 %v11874_v59  ;;  %4777 = vmatpush.bf16.msra.mxu1 %v11870_v25  ;;  %v11838_v49 = vor.u32 %v14371_v10, %v11835_v6  ;;  %v5834_v45 = vunpack.c.l.b16 %v5814_v8  ;;  %v14398_v59 = vld [vmem:[#allocation12 + $0x874] sm:$0xf0]  ;;  %v5979_v25 = vld [vmem:[#allocation3 + $0x5a] sm:$0x1]  ;;  %v14391_v10 = vld [vmem:[#allocation12 + $0x844] sm:$0xf] }
 0x388   :  { %v4314_v50 = vadd.f32 %v16380_v52, %v4148_v15  ;;  %v3135_v44 = vpop.f32.mrf.mxu2  ;;  %4803 = vmatpush.bf16.msra.mxu3 %v11878_v29  ;;  %6092 = vmatpush.bf16.msrb.mxu0 %v12410_v26  ;;  %v14395_v29 = vld [vmem:[#allocation12 + $0x864] sm:$0xf]  ;;  %v11935_v26 = vld [vmem:[#allocation12 + $0x870] sm:$0xf0]  ;;  %v5981_v18 = vpack.c.bf16 %v5979_v25, %v5979_v25  ;;  %v14521_v8 = vld [vmem:[#allocation12 + $0xc4c] sm:$0xf0] }
 0x389   :  { %v16418_v35 = vadd.f32 %v3135_v44, %v16378_v20  ;;  %v3148_v16 = vpop.f32.mrf.mxu3  ;;  %v11846_v20 = vor.u32 %v14372_v42, %v11843_v11  ;;  %v5837_v43 = vsel %vm2212_vm5, %v5836_v27, %v5834_v45  ;;  %v11938_v1 = vor.u32 %v14395_v29, %v11935_v26  ;;  %v11919_v6 = vld [vmem:[#allocation12 + $0x850] sm:$0xf0]  ;;  %v14392_v42 = vld [vmem:[#allocation12 + $0x84c] sm:$0xf]  ;;  %v5978_v11 = vld [vmem:[#allocation3 + $0x1a] sm:$0x1] }
 0x38a   :  { %v4480_v33 = vadd.f32 %v4437_v23, %v4314_v50  ;;  %v16421_v63 = vadd.f32 %v3148_v16, %v16393_v12  ;;  %v3124_v52 = vpop.f32.mrf.mxu1  ;;  %v12361_v12 = vld [vmem:[#allocation12 + $0xb80] sm:$0xf]  ;;  %v11941_v23 = vld [vmem:[#allocation12 + $0x868] sm:$0xf]  ;;  %v16424_v15 = vpack.c.b16 %v5837_v43, %v5837_v43  ;;  %v14394_v50 = vld [vmem:[#allocation12 + $0x854] sm:$0xf0]  ;;  %v6001_v36 = vunpack.c.l.b16 %v5981_v18 }
 0x38b   :  { %v4439_v40 = vpop.f32.mrf.mxu0  ;;  %4791 = vmatpush.bf16.msra.mxu2 %v11858_v51  ;;  %4778 = vmatpush.bf16.msra.mxu1 %v11854_v24  ;;  %v12362_v2 = vor.u32 %v14497_v32, %v12361_v12  ;;  %v11942_v24 = vor.u32 %v14398_v59, %v11941_v23  ;;  %v12461_v16 = vld [vmem:[#allocation12 + $0xc40] sm:$0xf]  ;;  %v11926_v47 = vor.u32 %v14394_v50, %v11925_v53  ;;  %v11909_v52 = vld [vmem:[#allocation12 + $0x828] sm:$0xf]  ;;  %v14517_v45 = vld [vmem:[#allocation12 + $0xc2c] sm:$0xf0] }
 0x38c   :  { %4804 = vmatpush.bf16.msra.mxu3 %v11862_v3  ;;  %6093 = vmatpush.bf16.msrb.mxu0 %v12394_v30  ;;  %v11946_v3 = vor.u32 %v14396_v4, %v11943_v58  ;;  %v12478_v30 = vor.u32 %v14525_v0, %v12477_v57  ;;  %v14390_v40 = vld [vmem:[#allocation12 + $0x834] sm:$0xf0]  ;;  %v5980_v62 = vpack.c.bf16 %v5978_v11, %v5978_v11  ;;  %v6002_v43 = vrot.slane %v6001_v36, 7  ;;  %v11893_v23 = vld [vmem:[#allocation12 + $0x808] sm:$0xf] }
 0x38d   :  { %v14386_v59 = vld [vmem:[#allocation12 + $0x814] sm:$0xf0]  ;;  %v12446_v25 = vor.u32 %v14517_v45, %v12445_v41  ;;  %v11895_v26 = vld [vmem:[#allocation12 + $0x818] sm:$0xf0]  ;;  %v14513_v4 = vld [vmem:[#allocation12 + $0xc0c] sm:$0xf0] }
 0x38e   :  { %v6000_v29 = vunpack.c.l.b16 %v5980_v62  ;;  %v11894_v58 = vor.u32 %v14386_v59, %v11893_v23  ;;  %v12009_v0 = vld [vmem:[#allocation12 + $0x8e8] sm:$0xf]  ;;  %v6145_v18 = vld [vmem:[#allocation3 + $0x5b] sm:$0x1]  ;;  %v14411_v53 = vld [vmem:[#allocation12 + $0x8e4] sm:$0xf] }
 0x38f   :  { %4792 = vmatpush.bf16.msra.mxu2 %v11842_v60  ;;  %4779 = vmatpush.bf16.msra.mxu1 %v11838_v49  ;;  %v12462_v49 = vor.u32 %v14521_v8, %v12461_v16  ;;  %v12003_v50 = vld [vmem:[#allocation12 + $0x8f0] sm:$0xf0]  ;;  %v6147_v8 = vpack.c.bf16 %v6145_v18, %v6145_v18  ;;  %v14537_v62 = vld [vmem:[#allocation12 + $0xccc] sm:$0xf0]  ;;  %v14403_v23 = vld [vmem:[#allocation12 + $0x8a4] sm:$0xf] }
 0x390   :  { %v3137_v39 = vpop.f32.mrf.mxu2  ;;  %4805 = vmatpush.bf16.msra.mxu3 %v11846_v20  ;;  %6094 = vmatpush.bf16.msrb.mxu0 %v12378_v13  ;;  %v14388_v20 = vld [vmem:[#allocation12 + $0x82c] sm:$0xf]  ;;  %v11971_v59 = vld [vmem:[#allocation12 + $0x8b0] sm:$0xf0] }
 0x391   :  { %v3150_v54 = vpop.f32.mrf.mxu3  ;;  %v14383_v39 = vld [vmem:[#allocation12 + $0x804] sm:$0xf] }
 0x392   :  { %v3288_v31 = vpop.f32.mrf.mxu1  ;;  %v6003_v54 = vsel %vm2212_vm5, %v6002_v43, %v6000_v29  ;;  %v14533_v29 = vld [vmem:[#allocation12 + $0xcac] sm:$0xf0] }
 0x393   :  { %v16427_v19 = vadd.f32 %v3288_v31, %v16404_v34  ;;  %v4603_v51 = vpop.f32.mrf.mxu0  ;;  %4793 = vmatpush.bf16.msra.mxu2 %v11826_v61  ;;  %4780 = vmatpush.bf16.msra.mxu1 %v11822_v17  ;;  %v11927_v34 = vld [vmem:[#allocation12 + $0x858] sm:$0xf0]  ;;  %v11910_v61 = vor.u32 %v14390_v40, %v11909_v52  ;;  %v11906_v17 = vor.u32 %v14387_v46, %v11903_v55  ;;  %v14414_v31 = vld [vmem:[#allocation12 + $0x8f4] sm:$0xf0]  ;;  %v11993_v52 = vld [vmem:[#allocation12 + $0x8c8] sm:$0xf] }
 0x394   :  { %v16429_v44 = vadd.f32 %v4603_v51, %v4480_v33  ;;  %4806 = vmatpush.bf16.msra.mxu3 %v11830_v21  ;;  %6095 = vmatpush.bf16.msrb.mxu0 %v12362_v2  ;;  %v11922_v33 = vor.u32 %v14391_v10, %v11919_v6  ;;  %v11930_v60 = vor.u32 %v14392_v42, %v11927_v34  ;;  %v11887_v21 = vld [vmem:[#allocation12 + $0x810] sm:$0xf0]  ;;  %v14384_v2 = vld [vmem:[#allocation12 + $0x80c] sm:$0xf]  ;;  %v12011_v10 = vld [vmem:[#allocation12 + $0x8f8] sm:$0xf0] }
 0x395   :  { %11812 = vmatmul.msk.bf16.vlgmr.msrb.gmra.mxu1 %vm2150_vm4, %v16248_v56  ;;  %11813 = vmatmul.msk.bf16.vlgmr.msrb.gmra.mxu2 %vm2150_vm4, %v16248_v56  ;;  %v11890_v57 = vor.u32 %v14383_v39, %v11887_v21  ;;  %v12545_v6 = vld [vmem:[#allocation12 + $0xce0] sm:$0xf]  ;;  %v14541_v42 = vld [vmem:[#allocation12 + $0xcec] sm:$0xf0]  ;;  %v16446_v16 = vpack.c.b16 %v6003_v54, %v6003_v54  ;;  %v14410_v40 = vld [vmem:[#allocation12 + $0x8d4] sm:$0xf0] }
 0x396   :  { %11814 = vmatmul.msk.bf16.vlgmr.msrb.gmra.mxu3 %vm2150_vm4, %v16248_v56  ;;  %12355 = vmatmul.msk.bf16.vlgmr.msra.gmra.mxu0 %vm2150_vm4, %v16424_v15  ;;  %v14407_v46 = vld [vmem:[#allocation12 + $0x8c4] sm:$0xf]  ;;  %v11987_v55 = vld [vmem:[#allocation12 + $0x8d0] sm:$0xf0]  ;;  %v11994_v41 = vor.u32 %v14410_v40, %v11993_v52  ;;  %v11979_v21 = vld [vmem:[#allocation12 + $0x8b8] sm:$0xf0] }
 0x397   :  { %4956 = vmatpush.bf16.msrb.mxu2 %v11942_v24  ;;  %4943 = vmatpush.bf16.msrb.mxu1 %v11938_v1  ;;  %v11898_v24 = vor.u32 %v14384_v2, %v11895_v26  ;;  %v11990_v45 = vor.u32 %v14407_v46, %v11987_v55  ;;  %v12513_v2 = vld [vmem:[#allocation12 + $0xca0] sm:$0xf]  ;;  %v14427_v52 = vld [vmem:[#allocation12 + $0x964] sm:$0xf]  ;;  %v12071_v40 = vld [vmem:[#allocation12 + $0x970] sm:$0xf0] }
 0x398   :  { %v3301_v27 = vpop.f32.mrf.mxu2  ;;  %4969 = vmatpush.bf16.msrb.mxu3 %v11946_v3  ;;  %6258 = vmatpush.bf16.msra.mxu0 %v12478_v30  ;;  %v14412_v3 = vld [vmem:[#allocation12 + $0x8ec] sm:$0xf]  ;;  %v12514_v18 = vor.u32 %v14533_v29, %v12513_v2  ;;  %v12079_v46 = vld [vmem:[#allocation12 + $0x978] sm:$0xf0]  ;;  %v12613_v55 = vld [vmem:[#allocation12 + $0xd60] sm:$0xf] }
 0x399   :  { %v16440_v56 = vadd.f32 %v3301_v27, %v16418_v35  ;;  %v3314_v13 = vpop.f32.mrf.mxu3  ;;  %v11914_v35 = vor.u32 %v14388_v20, %v11911_v28  ;;  %v14408_v20 = vld [vmem:[#allocation12 + $0x8cc] sm:$0xf]  ;;  %v6167_v28 = vunpack.c.l.b16 %v6147_v8  ;;  %v6311_v8 = vld [vmem:[#allocation3 + $0x5c] sm:$0x1] }
 0x39a   :  { %v16443_v37 = vadd.f32 %v3314_v13, %v16421_v63  ;;  %v3290_v12 = vpop.f32.mrf.mxu1  ;;  %v12429_v63 = vld [vmem:[#allocation12 + $0xc00] sm:$0xf] }
 0x39b   :  { %v4605_v32 = vpop.f32.mrf.mxu0  ;;  %4957 = vmatpush.bf16.msrb.mxu2 %v11926_v47  ;;  %4944 = vmatpush.bf16.msrb.mxu1 %v11922_v33  ;;  %v12430_v1 = vor.u32 %v14513_v4, %v12429_v63  ;;  %v12010_v47 = vor.u32 %v14414_v31, %v12009_v0  ;;  %v12006_v33 = vor.u32 %v14411_v53, %v12003_v50  ;;  %v12529_v13 = vld [vmem:[#allocation12 + $0xcc0] sm:$0xf]  ;;  %v11977_v12 = vld [vmem:[#allocation12 + $0x8a8] sm:$0xf]  ;;  %v6168_v54 = vrot.slane %v6167_v28, 7 }
 0x39c   :  { %4970 = vmatpush.bf16.msrb.mxu3 %v11930_v60  ;;  %6259 = vmatpush.bf16.msra.mxu0 %v12462_v49  ;;  %v12014_v60 = vor.u32 %v14412_v3, %v12011_v10  ;;  %v12546_v49 = vor.u32 %v14541_v42, %v12545_v6  ;;  %v14406_v32 = vld [vmem:[#allocation12 + $0x8b4] sm:$0xf0]  ;;  %v11961_v0 = vld [vmem:[#allocation12 + $0x888] sm:$0xf]  ;;  %v11963_v50 = vld [vmem:[#allocation12 + $0x898] sm:$0xf0] }
 0x39d   :  { %v14402_v31 = vld [vmem:[#allocation12 + $0x894] sm:$0xf0]  ;;  %v14529_v3 = vld [vmem:[#allocation12 + $0xc8c] sm:$0xf0]  ;;  %v12077_v42 = vld [vmem:[#allocation12 + $0x968] sm:$0xf] }
 0x39e   :  { %v11962_v10 = vor.u32 %v14402_v31, %v11961_v0  ;;  %v14419_v0 = vld [vmem:[#allocation12 + $0x924] sm:$0xf]  ;;  %v12039_v31 = vld [vmem:[#allocation12 + $0x930] sm:$0xf0] }
 0x39f   :  { %4958 = vmatpush.bf16.msrb.mxu2 %v11910_v61  ;;  %4945 = vmatpush.bf16.msrb.mxu1 %v11906_v17  ;;  %v12530_v17 = vor.u32 %v14537_v62, %v12529_v13  ;;  %v6313_v62 = vpack.c.bf16 %v6311_v8, %v6311_v8 }
 0x3a0   :  { %v3303_v51 = vpop.f32.mrf.mxu2  ;;  %4971 = vmatpush.bf16.msrb.mxu3 %v11914_v35  ;;  %6260 = vmatpush.bf16.msra.mxu0 %v12446_v25  ;;  %v14404_v35 = vld [vmem:[#allocation12 + $0x8ac] sm:$0xf] }
 0x3a1   :  { %v3316_v30 = vpop.f32.mrf.mxu3  ;;  %v14399_v51 = vld [vmem:[#allocation12 + $0x884] sm:$0xf] }
 0x3a2   :  { %v3454_v34 = vpop.f32.mrf.mxu1 }
 0x3a3   :  { %v16449_v11 = vadd.f32 %v3454_v34, %v16427_v19  ;;  %v4769_v36 = vpop.f32.mrf.mxu0  ;;  %4959 = vmatpush.bf16.msrb.mxu2 %v11894_v58  ;;  %4946 = vmatpush.bf16.msrb.mxu1 %v11890_v57  ;;  %v11995_v19 = vld [vmem:[#allocation12 + $0x8d8] sm:$0xf0]  ;;  %v11978_v58 = vor.u32 %v14406_v32, %v11977_v12  ;;  %v11974_v57 = vor.u32 %v14403_v23, %v11971_v59  ;;  %v14430_v34 = vld [vmem:[#allocation12 + $0x974] sm:$0xf0]  ;;  %v12061_v12 = vld [vmem:[#allocation12 + $0x948] sm:$0xf] }
 0x3a4   :  { %v16452_v27 = vadd.f32 %v4769_v36, %v16429_v44  ;;  %4972 = vmatpush.bf16.msrb.mxu3 %v11898_v24  ;;  %6261 = vmatpush.bf16.msra.mxu0 %v12430_v1  ;;  %v6144_v44 = vld [vmem:[#allocation3 + $0x1b] sm:$0x1]  ;;  %v11998_v61 = vor.u32 %v14408_v20, %v11995_v19  ;;  %v11955_v24 = vld [vmem:[#allocation12 + $0x890] sm:$0xf0]  ;;  %v14400_v1 = vld [vmem:[#allocation12 + $0x88c] sm:$0xf] }
 0x3a5   :  { %11880 = vmatmul.msk.bf16.vlgmr.msra.gmra.mxu1 %vm2150_vm4, %v16267_v7  ;;  %11881 = vmatmul.msk.bf16.vlgmr.msra.gmra.mxu2 %vm2150_vm4, %v16267_v7  ;;  %v6146_v39 = vpack.c.bf16 %v6144_v44, %v6144_v44  ;;  %v11958_v6 = vor.u32 %v14399_v51, %v11955_v24  ;;  %v14557_v20 = vld [vmem:[#allocation12 + $0xd6c] sm:$0xf0]  ;;  %v14426_v32 = vld [vmem:[#allocation12 + $0x954] sm:$0xf0]  ;;  %v14423_v23 = vld [vmem:[#allocation12 + $0x944] sm:$0xf] }
 0x3a6   :  { %11882 = vmatmul.msk.bf16.vlgmr.msra.gmra.mxu3 %vm2150_vm4, %v16267_v7  ;;  %12423 = vmatmul.msk.bf16.vlgmr.msrb.gmra.mxu0 %vm2150_vm4, %v16446_v16  ;;  %v12055_v59 = vld [vmem:[#allocation12 + $0x950] sm:$0xf0]  ;;  %v12062_v2 = vor.u32 %v14426_v32, %v12061_v12  ;;  %v12047_v24 = vld [vmem:[#allocation12 + $0x938] sm:$0xf0]  ;;  %v14443_v12 = vld [vmem:[#allocation12 + $0x9e4] sm:$0xf] }
 0x3a7   :  { %5122 = vmatpush.bf16.msra.mxu2 %v12010_v47  ;;  %5109 = vmatpush.bf16.msra.mxu1 %v12006_v33  ;;  %v6166_v53 = vunpack.c.l.b16 %v6146_v39  ;;  %v11966_v47 = vor.u32 %v14400_v1, %v11963_v50  ;;  %v14553_v39 = vld [vmem:[#allocation12 + $0xd4c] sm:$0xf0]  ;;  %v12058_v29 = vor.u32 %v14423_v23, %v12055_v59  ;;  %v12581_v1 = vld [vmem:[#allocation12 + $0xd20] sm:$0xf]  ;;  %v12139_v32 = vld [vmem:[#allocation12 + $0x9f0] sm:$0xf0] }
 0x3a8   :  { %v3467_v43 = vpop.f32.mrf.mxu2  ;;  %5135 = vmatpush.bf16.msra.mxu3 %v12014_v60  ;;  %6424 = vmatpush.bf16.msrb.mxu0 %v12546_v49  ;;  %v14428_v60 = vld [vmem:[#allocation12 + $0x96c] sm:$0xf]  ;;  %v12147_v23 = vld [vmem:[#allocation12 + $0x9f8] sm:$0xf0]  ;;  %v12681_v59 = vld [vmem:[#allocation12 + $0xde0] sm:$0xf] }
 0x3a9   :  { %v16463_v7 = vadd.f32 %v3467_v43, %v16440_v56  ;;  %v3480_v25 = vpop.f32.mrf.mxu3  ;;  %v11982_v56 = vor.u32 %v14404_v35, %v11979_v21  ;;  %v6169_v30 = vsel %vm2212_vm5, %v6168_v54, %v6166_v53  ;;  %v14424_v35 = vld [vmem:[#allocation12 + $0x94c] sm:$0xf]  ;;  %v6333_v21 = vunpack.c.l.b16 %v6313_v62  ;;  %v14549_v53 = vld [vmem:[#allocation12 + $0xd2c] sm:$0xf0]  ;;  %v6477_v62 = vld [vmem:[#allocation3 + $0x5d] sm:$0x1] }
 0x3aa   :  { %v16466_v26 = vadd.f32 %v3480_v25, %v16443_v37  ;;  %v3456_v63 = vpop.f32.mrf.mxu1  ;;  %v12497_v37 = vld [vmem:[#allocation12 + $0xc80] sm:$0xf]  ;;  %v16469_v13 = vpack.c.b16 %v6169_v30, %v6169_v30  ;;  %v12582_v8 = vor.u32 %v14549_v53, %v12581_v1 }
 0x3ab   :  { %v4771_v4 = vpop.f32.mrf.mxu0  ;;  %5123 = vmatpush.bf16.msra.mxu2 %v11994_v41  ;;  %5110 = vmatpush.bf16.msra.mxu1 %v11990_v45  ;;  %v12498_v33 = vor.u32 %v14529_v3, %v12497_v37  ;;  %v12078_v41 = vor.u32 %v14430_v34, %v12077_v42  ;;  %v12074_v45 = vor.u32 %v14427_v52, %v12071_v40  ;;  %v12597_v25 = vld [vmem:[#allocation12 + $0xd40] sm:$0xf]  ;;  %v12045_v63 = vld [vmem:[#allocation12 + $0x928] sm:$0xf]  ;;  %v6334_v30 = vrot.slane %v6333_v21, 7 }
 0x3ac   :  { %5136 = vmatpush.bf16.msra.mxu3 %v11998_v61  ;;  %6425 = vmatpush.bf16.msrb.mxu0 %v12530_v17  ;;  %v12082_v61 = vor.u32 %v14428_v60, %v12079_v46  ;;  %v12614_v17 = vor.u32 %v14557_v20, %v12613_v55  ;;  %v14422_v4 = vld [vmem:[#allocation12 + $0x934] sm:$0xf0]  ;;  %v12029_v42 = vld [vmem:[#allocation12 + $0x908] sm:$0xf]  ;;  %v12031_v40 = vld [vmem:[#allocation12 + $0x918] sm:$0xf0] }
 0x3ad   :  { %v14418_v34 = vld [vmem:[#allocation12 + $0x914] sm:$0xf0]  ;;  %v14545_v60 = vld [vmem:[#allocation12 + $0xd0c] sm:$0xf0]  ;;  %v12145_v20 = vld [vmem:[#allocation12 + $0x9e8] sm:$0xf] }
 0x3ae   :  { %v12030_v46 = vor.u32 %v14418_v34, %v12029_v42  ;;  %v14435_v42 = vld [vmem:[#allocation12 + $0x9a4] sm:$0xf]  ;;  %v12107_v34 = vld [vmem:[#allocation12 + $0x9b0] sm:$0xf0] }
 0x3af   :  { %5124 = vmatpush.bf16.msra.mxu2 %v11978_v58  ;;  %5111 = vmatpush.bf16.msra.mxu1 %v11974_v57  ;;  %v12598_v57 = vor.u32 %v14553_v39, %v12597_v25  ;;  %v6479_v39 = vpack.c.bf16 %v6477_v62, %v6477_v62 }
 0x3b0   :  { %v3469_v36 = vpop.f32.mrf.mxu2  ;;  %5137 = vmatpush.bf16.msra.mxu3 %v11982_v56  ;;  %6426 = vmatpush.bf16.msrb.mxu0 %v12514_v18  ;;  %v14420_v56 = vld [vmem:[#allocation12 + $0x92c] sm:$0xf] }
 0x3b1   :  { %v3482_v49 = vpop.f32.mrf.mxu3  ;;  %v14415_v36 = vld [vmem:[#allocation12 + $0x904] sm:$0xf] }
 0x3b2   :  { %v3620_v19 = vpop.f32.mrf.mxu1 }
 0x3b3   :  { %v16472_v44 = vadd.f32 %v3620_v19, %v16449_v11  ;;  %v4935_v28 = vpop.f32.mrf.mxu0  ;;  %5125 = vmatpush.bf16.msra.mxu2 %v11962_v10  ;;  %5112 = vmatpush.bf16.msra.mxu1 %v11958_v6  ;;  %v12063_v11 = vld [vmem:[#allocation12 + $0x958] sm:$0xf0]  ;;  %v12046_v10 = vor.u32 %v14422_v4, %v12045_v63  ;;  %v12042_v6 = vor.u32 %v14419_v0, %v12039_v31  ;;  %v14446_v19 = vld [vmem:[#allocation12 + $0x9f4] sm:$0xf0]  ;;  %v12129_v63 = vld [vmem:[#allocation12 + $0x9c8] sm:$0xf] }
 0x3b4   :  { %v16475_v43 = vadd.f32 %v4935_v28, %v16452_v27  ;;  %5138 = vmatpush.bf16.msra.mxu3 %v11966_v47  ;;  %6427 = vmatpush.bf16.msrb.mxu0 %v12498_v33  ;;  %v6310_v27 = vld [vmem:[#allocation3 + $0x1c] sm:$0x1]  ;;  %v12066_v58 = vor.u32 %v14424_v35, %v12063_v11  ;;  %v14416_v33 = vld [vmem:[#allocation12 + $0x90c] sm:$0xf]  ;;  %v14573_v35 = vld [vmem:[#allocation12 + $0xdec] sm:$0xf0] }
 0x3b5   :  { %11948 = vmatmul.msk.bf16.vlgmr.msrb.gmra.mxu1 %vm2150_vm4, %v16289_v48  ;;  %11949 = vmatmul.msk.bf16.vlgmr.msrb.gmra.mxu2 %vm2150_vm4, %v16289_v48  ;;  %v6312_v51 = vpack.c.bf16 %v6310_v27, %v6310_v27  ;;  %v12023_v47 = vld [vmem:[#allocation12 + $0x910] sm:$0xf0]  ;;  %v14442_v4 = vld [vmem:[#allocation12 + $0x9d4] sm:$0xf0]  ;;  %v14439_v0 = vld [vmem:[#allocation12 + $0x9c4] sm:$0xf] }
 0x3b6   :  { %11950 = vmatmul.msk.bf16.vlgmr.msrb.gmra.mxu3 %vm2150_vm4, %v16289_v48  ;;  %12491 = vmatmul.msk.bf16.vlgmr.msra.gmra.mxu0 %vm2150_vm4, %v16469_v13  ;;  %v12026_v55 = vor.u32 %v14415_v36, %v12023_v47  ;;  %v12123_v31 = vld [vmem:[#allocation12 + $0x9d0] sm:$0xf0]  ;;  %v12130_v1 = vor.u32 %v14442_v4, %v12129_v63  ;;  %v12115_v47 = vld [vmem:[#allocation12 + $0x9b8] sm:$0xf0]  ;;  %v14459_v63 = vld [vmem:[#allocation12 + $0xa64] sm:$0xf] }
 0x3b7   :  { %5288 = vmatpush.bf16.msrb.mxu2 %v12078_v41  ;;  %5275 = vmatpush.bf16.msrb.mxu1 %v12074_v45  ;;  %v6332_v52 = vunpack.c.l.b16 %v6312_v51  ;;  %v12034_v41 = vor.u32 %v14416_v33, %v12031_v40  ;;  %v14569_v51 = vld [vmem:[#allocation12 + $0xdcc] sm:$0xf0]  ;;  %v12126_v53 = vor.u32 %v14439_v0, %v12123_v31  ;;  %v12649_v33 = vld [vmem:[#allocation12 + $0xda0] sm:$0xf]  ;;  %v12207_v4 = vld [vmem:[#allocation12 + $0xa70] sm:$0xf0] }
 0x3b8   :  { %v3633_v54 = vpop.f32.mrf.mxu2  ;;  %5301 = vmatpush.bf16.msrb.mxu3 %v12082_v61  ;;  %6590 = vmatpush.bf16.msra.mxu0 %v12614_v17  ;;  %v14444_v61 = vld [vmem:[#allocation12 + $0x9ec] sm:$0xf]  ;;  %v12215_v0 = vld [vmem:[#allocation12 + $0xa78] sm:$0xf0]  ;;  %v12749_v31 = vld [vmem:[#allocation12 + $0xe60] sm:$0xf] }
 0x3b9   :  { %v16486_v48 = vadd.f32 %v3633_v54, %v16463_v7  ;;  %v3646_v18 = vpop.f32.mrf.mxu3  ;;  %v12050_v7 = vor.u32 %v14420_v56, %v12047_v24  ;;  %v6335_v49 = vsel %vm2212_vm5, %v6334_v30, %v6332_v52  ;;  %v14440_v56 = vld [vmem:[#allocation12 + $0x9cc] sm:$0xf]  ;;  %v6499_v24 = vunpack.c.l.b16 %v6479_v39  ;;  %v14565_v52 = vld [vmem:[#allocation12 + $0xdac] sm:$0xf0]  ;;  %v6643_v39 = vld [vmem:[#allocation3 + $0x5e] sm:$0x1] }
 0x3ba   :  { %v16489_v50 = vadd.f32 %v3646_v18, %v16466_v26  ;;  %v3622_v37 = vpop.f32.mrf.mxu1  ;;  %v12565_v26 = vld [vmem:[#allocation12 + $0xd00] sm:$0xf]  ;;  %v16492_v25 = vpack.c.b16 %v6335_v49, %v6335_v49  ;;  %v12650_v62 = vor.u32 %v14565_v52, %v12649_v33 }
 0x3bb   :  { %v4937_v3 = vpop.f32.mrf.mxu0  ;;  %5289 = vmatpush.bf16.msrb.mxu2 %v12062_v2  ;;  %5276 = vmatpush.bf16.msrb.mxu1 %v12058_v29  ;;  %v12566_v45 = vor.u32 %v14545_v60, %v12565_v26  ;;  %v12146_v2 = vor.u32 %v14446_v19, %v12145_v20  ;;  %v12142_v29 = vor.u32 %v14443_v12, %v12139_v32  ;;  %v12665_v18 = vld [vmem:[#allocation12 + $0xdc0] sm:$0xf]  ;;  %v12113_v37 = vld [vmem:[#allocation12 + $0x9a8] sm:$0xf]  ;;  %v6500_v49 = vrot.slane %v6499_v24, 7 }
 0x3bc   :  { %5302 = vmatpush.bf16.msrb.mxu3 %v12066_v58  ;;  %6591 = vmatpush.bf16.msra.mxu0 %v12598_v57  ;;  %v12150_v58 = vor.u32 %v14444_v61, %v12147_v23  ;;  %v12682_v57 = vor.u32 %v14573_v35, %v12681_v59  ;;  %v14438_v3 = vld [vmem:[#allocation12 + $0x9b4] sm:$0xf0]  ;;  %v12097_v20 = vld [vmem:[#allocation12 + $0x988] sm:$0xf]  ;;  %v12099_v32 = vld [vmem:[#allocation12 + $0x998] sm:$0xf0] }
 0x3bd   :  { %v14434_v19 = vld [vmem:[#allocation12 + $0x994] sm:$0xf0]  ;;  %v14561_v61 = vld [vmem:[#allocation12 + $0xd8c] sm:$0xf0]  ;;  %v12213_v35 = vld [vmem:[#allocation12 + $0xa68] sm:$0xf] }
 0x3be   :  { %v12098_v23 = vor.u32 %v14434_v19, %v12097_v20  ;;  %v14451_v20 = vld [vmem:[#allocation12 + $0xa24] sm:$0xf]  ;;  %v12175_v19 = vld [vmem:[#allocation12 + $0xa30] sm:$0xf0] }
 0x3bf   :  { %5290 = vmatpush.bf16.msrb.mxu2 %v12046_v10  ;;  %5277 = vmatpush.bf16.msrb.mxu1 %v12042_v6  ;;  %v12666_v6 = vor.u32 %v14569_v51, %v12665_v18  ;;  %v6645_v51 = vpack.c.bf16 %v6643_v39, %v6643_v39 }
 0x3c0   :  { %v3635_v28 = vpop.f32.mrf.mxu2  ;;  %5303 = vmatpush.bf16.msrb.mxu3 %v12050_v7  ;;  %6592 = vmatpush.bf16.msra.mxu0 %v12582_v8  ;;  %v14436_v7 = vld [vmem:[#allocation12 + $0x9ac] sm:$0xf] }
 0x3c1   :  { %v3648_v17 = vpop.f32.mrf.mxu3  ;;  %v14431_v28 = vld [vmem:[#allocation12 + $0x984] sm:$0xf] }
 0x3c2   :  { %v3786_v11 = vpop.f32.mrf.mxu1 }
 0x3c3   :  { %v16495_v27 = vadd.f32 %v3786_v11, %v16472_v44  ;;  %v5101_v21 = vpop.f32.mrf.mxu0  ;;  %5291 = vmatpush.bf16.msrb.mxu2 %v12030_v46  ;;  %5278 = vmatpush.bf16.msrb.mxu1 %v12026_v55  ;;  %v12131_v44 = vld [vmem:[#allocation12 + $0x9d8] sm:$0xf0]  ;;  %v12114_v46 = vor.u32 %v14438_v3, %v12113_v37  ;;  %v12110_v55 = vor.u32 %v14435_v42, %v12107_v34  ;;  %v14462_v11 = vld [vmem:[#allocation12 + $0xa74] sm:$0xf0]  ;;  %v12197_v37 = vld [vmem:[#allocation12 + $0xa48] sm:$0xf] }
 0x3c4   :  { %v16498_v54 = vadd.f32 %v5101_v21, %v16475_v43  ;;  %5304 = vmatpush.bf16.msrb.mxu3 %v12034_v41  ;;  %6593 = vmatpush.bf16.msra.mxu0 %v12566_v45  ;;  %v6476_v43 = vld [vmem:[#allocation3 + $0x1d] sm:$0x1]  ;;  %v12134_v10 = vor.u32 %v14440_v56, %v12131_v44  ;;  %v14432_v45 = vld [vmem:[#allocation12 + $0x98c] sm:$0xf]  ;;  %v14589_v56 = vld [vmem:[#allocation12 + $0xe6c] sm:$0xf0] }
 0x3c5   :  { %12016 = vmatmul.msk.bf16.vlgmr.msra.gmra.mxu1 %vm2150_vm4, %v16311_v5  ;;  %12017 = vmatmul.msk.bf16.vlgmr.msra.gmra.mxu2 %vm2150_vm4, %v16311_v5  ;;  %v6478_v36 = vpack.c.bf16 %v6476_v43, %v6476_v43  ;;  %v12091_v41 = vld [vmem:[#allocation12 + $0x990] sm:$0xf0]  ;;  %v14458_v3 = vld [vmem:[#allocation12 + $0xa54] sm:$0xf0]  ;;  %v14455_v42 = vld [vmem:[#allocation12 + $0xa44] sm:$0xf] }
 0x3c6   :  { %12018 = vmatmul.msk.bf16.vlgmr.msra.gmra.mxu3 %vm2150_vm4, %v16311_v5  ;;  %12559 = vmatmul.msk.bf16.vlgmr.msrb.gmra.mxu0 %vm2150_vm4, %v16492_v25  ;;  %v12094_v59 = vor.u32 %v14431_v28, %v12091_v41  ;;  %v12191_v34 = vld [vmem:[#allocation12 + $0xa50] sm:$0xf0]  ;;  %v12198_v33 = vor.u32 %v14458_v3, %v12197_v37  ;;  %v12183_v41 = vld [vmem:[#allocation12 + $0xa38] sm:$0xf0]  ;;  %v14475_v37 = vld [vmem:[#allocation12 + $0xae4] sm:$0xf] }
 0x3c7   :  { %5454 = vmatpush.bf16.msra.mxu2 %v12146_v2  ;;  %5441 = vmatpush.bf16.msra.mxu1 %v12142_v29  ;;  %v6498_v12 = vunpack.c.l.b16 %v6478_v36  ;;  %v12102_v2 = vor.u32 %v14432_v45, %v12099_v32  ;;  %v14585_v36 = vld [vmem:[#allocation12 + $0xe4c] sm:$0xf0]  ;;  %v12194_v52 = vor.u32 %v14455_v42, %v12191_v34  ;;  %v12717_v45 = vld [vmem:[#allocation12 + $0xe20] sm:$0xf]  ;;  %v12275_v3 = vld [vmem:[#allocation12 + $0xaf0] sm:$0xf0] }
 0x3c8   :  { %v3799_v30 = vpop.f32.mrf.mxu2  ;;  %5467 = vmatpush.bf16.msra.mxu3 %v12150_v58  ;;  %6756 = vmatpush.bf16.msrb.mxu0 %v12682_v57  ;;  %v14460_v58 = vld [vmem:[#allocation12 + $0xa6c] sm:$0xf]  ;;  %v12283_v42 = vld [vmem:[#allocation12 + $0xaf8] sm:$0xf0]  ;;  %v12817_v34 = vld [vmem:[#allocation12 + $0xee0] sm:$0xf] }
 0x3c9   :  { %v16509_v5 = vadd.f32 %v3799_v30, %v16486_v48  ;;  %v3812_v8 = vpop.f32.mrf.mxu3  ;;  %v12118_v48 = vor.u32 %v14436_v7, %v12115_v47  ;;  %v6501_v17 = vsel %vm2212_vm5, %v6500_v49, %v6498_v12  ;;  %v14456_v7 = vld [vmem:[#allocation12 + $0xa4c] sm:$0xf]  ;;  %v6665_v47 = vunpack.c.l.b16 %v6645_v51  ;;  %v14581_v12 = vld [vmem:[#allocation12 + $0xe2c] sm:$0xf0]  ;;  %v6809_v51 = vld [vmem:[#allocation3 + $0x60] sm:$0x1] }
 0x3ca   :  { %v16512_v40 = vadd.f32 %v3812_v8, %v16489_v50  ;;  %v3788_v26 = vpop.f32.mrf.mxu1  ;;  %v12633_v50 = vld [vmem:[#allocation12 + $0xd80] sm:$0xf]  ;;  %v16515_v18 = vpack.c.b16 %v6501_v17, %v6501_v17  ;;  %v12718_v39 = vor.u32 %v14581_v12, %v12717_v45 }
 0x3cb   :  { %v5103_v60 = vpop.f32.mrf.mxu0  ;;  %5455 = vmatpush.bf16.msra.mxu2 %v12130_v1  ;;  %5442 = vmatpush.bf16.msra.mxu1 %v12126_v53  ;;  %v12634_v29 = vor.u32 %v14561_v61, %v12633_v50  ;;  %v12214_v1 = vor.u32 %v14462_v11, %v12213_v35  ;;  %v12210_v53 = vor.u32 %v14459_v63, %v12207_v4  ;;  %v12733_v8 = vld [vmem:[#allocation12 + $0xe40] sm:$0xf]  ;;  %v12181_v26 = vld [vmem:[#allocation12 + $0xa28] sm:$0xf]  ;;  %v6666_v17 = vrot.slane %v6665_v47, 7 }
 0x3cc   :  { %5468 = vmatpush.bf16.msra.mxu3 %v12134_v10  ;;  %6757 = vmatpush.bf16.msrb.mxu0 %v12666_v6  ;;  %v12218_v10 = vor.u32 %v14460_v58, %v12215_v0  ;;  %v12750_v6 = vor.u32 %v14589_v56, %v12749_v31  ;;  %v14454_v60 = vld [vmem:[#allocation12 + $0xa34] sm:$0xf0]  ;;  %v12165_v35 = vld [vmem:[#allocation12 + $0xa08] sm:$0xf]  ;;  %v12167_v4 = vld [vmem:[#allocation12 + $0xa18] sm:$0xf0] }
 0x3cd   :  { %v14450_v11 = vld [vmem:[#allocation12 + $0xa14] sm:$0xf0]  ;;  %v14577_v58 = vld [vmem:[#allocation12 + $0xe0c] sm:$0xf0]  ;;  %v12281_v56 = vld [vmem:[#allocation12 + $0xae8] sm:$0xf] }
 0x3ce   :  { %v12166_v0 = vor.u32 %v14450_v11, %v12165_v35  ;;  %v14467_v35 = vld [vmem:[#allocation12 + $0xaa4] sm:$0xf]  ;;  %v12243_v11 = vld [vmem:[#allocation12 + $0xab0] sm:$0xf0] }
 0x3cf   :  { %5456 = vmatpush.bf16.msra.mxu2 %v12114_v46  ;;  %5443 = vmatpush.bf16.msra.mxu1 %v12110_v55  ;;  %v12734_v55 = vor.u32 %v14585_v36, %v12733_v8  ;;  %v6811_v36 = vpack.c.bf16 %v6809_v51, %v6809_v51 }
 0x3d0   :  { %v3801_v21 = vpop.f32.mrf.mxu2  ;;  %5469 = vmatpush.bf16.msra.mxu3 %v12118_v48  ;;  %6758 = vmatpush.bf16.msrb.mxu0 %v12650_v62  ;;  %v14452_v48 = vld [vmem:[#allocation12 + $0xa2c] sm:$0xf] }
 0x3d1   :  { %v3814_v57 = vpop.f32.mrf.mxu3  ;;  %v14447_v21 = vld [vmem:[#allocation12 + $0xa04] sm:$0xf] }
 0x3d2   :  { %v3952_v44 = vpop.f32.mrf.mxu1 }
 0x3d3   :  { %v16518_v43 = vadd.f32 %v3952_v44, %v16495_v27  ;;  %v5267_v24 = vpop.f32.mrf.mxu0  ;;  %5457 = vmatpush.bf16.msra.mxu2 %v12098_v23  ;;  %5444 = vmatpush.bf16.msra.mxu1 %v12094_v59  ;;  %v12199_v27 = vld [vmem:[#allocation12 + $0xa58] sm:$0xf0]  ;;  %v12182_v23 = vor.u32 %v14454_v60, %v12181_v26  ;;  %v12178_v59 = vor.u32 %v14451_v20, %v12175_v19  ;;  %v14478_v44 = vld [vmem:[#allocation12 + $0xaf4] sm:$0xf0]  ;;  %v12265_v26 = vld [vmem:[#allocation12 + $0xac8] sm:$0xf] }
 0x3d4   :  { %v16521_v30 = vadd.f32 %v5267_v24, %v16498_v54  ;;  %5470 = vmatpush.bf16.msra.mxu3 %v12102_v2  ;;  %6759 = vmatpush.bf16.msrb.mxu0 %v12634_v29  ;;  %v6642_v54 = vld [vmem:[#allocation3 + $0x1e] sm:$0x1]  ;;  %v12202_v46 = vor.u32 %v14456_v7, %v12199_v27  ;;  %v14448_v29 = vld [vmem:[#allocation12 + $0xa0c] sm:$0xf]  ;;  %v14605_v7 = vld [vmem:[#allocation12 + $0xeec] sm:$0xf0] }
 0x3d5   :  { %12084 = vmatmul.msk.bf16.vlgmr.msrb.gmra.mxu1 %vm2150_vm4, %v16333_v14  ;;  %12085 = vmatmul.msk.bf16.vlgmr.msrb.gmra.mxu2 %vm2150_vm4, %v16333_v14  ;;  %v6644_v28 = vpack.c.bf16 %v6642_v54, %v6642_v54  ;;  %v12159_v2 = vld [vmem:[#allocation12 + $0xa10] sm:$0xf0]  ;;  %v14474_v60 = vld [vmem:[#allocation12 + $0xad4] sm:$0xf0]  ;;  %v14471_v20 = vld [vmem:[#allocation12 + $0xac4] sm:$0xf] }
 0x3d6   :  { %12086 = vmatmul.msk.bf16.vlgmr.msrb.gmra.mxu3 %vm2150_vm4, %v16333_v14  ;;  %12627 = vmatmul.msk.bf16.vlgmr.msra.gmra.mxu0 %vm2150_vm4, %v16515_v18  ;;  %v12162_v31 = vor.u32 %v14447_v21, %v12159_v2  ;;  %v12259_v19 = vld [vmem:[#allocation12 + $0xad0] sm:$0xf0]  ;;  %v12266_v45 = vor.u32 %v14474_v60, %v12265_v26  ;;  %v12251_v2 = vld [vmem:[#allocation12 + $0xab8] sm:$0xf0]  ;;  %v14491_v26 = vld [vmem:[#allocation12 + $0xb64] sm:$0xf] }
 0x3d7   :  { %5620 = vmatpush.bf16.msrb.mxu2 %v12214_v1  ;;  %5607 = vmatpush.bf16.msrb.mxu1 %v12210_v53  ;;  %v6664_v63 = vunpack.c.l.b16 %v6644_v28  ;;  %v12170_v1 = vor.u32 %v14448_v29, %v12167_v4  ;;  %v14601_v28 = vld [vmem:[#allocation12 + $0xecc] sm:$0xf0]  ;;  %v12262_v12 = vor.u32 %v14471_v20, %v12259_v19  ;;  %v12785_v29 = vld [vmem:[#allocation12 + $0xea0] sm:$0xf]  ;;  %v12343_v60 = vld [vmem:[#allocation12 + $0xb70] sm:$0xf0] }
 0x3d8   :  { %v3965_v49 = vpop.f32.mrf.mxu2  ;;  %5633 = vmatpush.bf16.msrb.mxu3 %v12218_v10  ;;  %6922 = vmatpush.bf16.msra.mxu0 %v12750_v6  ;;  %v14476_v10 = vld [vmem:[#allocation12 + $0xaec] sm:$0xf]  ;;  %v12351_v20 = vld [vmem:[#allocation12 + $0xb78] sm:$0xf0]  ;;  %v12885_v19 = vld [vmem:[#allocation12 + $0xf60] sm:$0xf] }
 0x3d9   :  { %v16532_v14 = vadd.f32 %v3965_v49, %v16509_v5  ;;  %v3978_v62 = vpop.f32.mrf.mxu3  ;;  %v12186_v5 = vor.u32 %v14452_v48, %v12183_v41  ;;  %v6667_v57 = vsel %vm2212_vm5, %v6666_v17, %v6664_v63  ;;  %v14472_v48 = vld [vmem:[#allocation12 + $0xacc] sm:$0xf]  ;;  %v6831_v41 = vunpack.c.l.b16 %v6811_v36  ;;  %v14597_v63 = vld [vmem:[#allocation12 + $0xeac] sm:$0xf0]  ;;  %v6975_v36 = vld [vmem:[#allocation3 + $0x61] sm:$0x1] }
 0x3da   :  { %v16535_v32 = vadd.f32 %v3978_v62, %v16512_v40  ;;  %v3954_v50 = vpop.f32.mrf.mxu1  ;;  %v12701_v40 = vld [vmem:[#allocation12 + $0xe00] sm:$0xf]  ;;  %v16538_v8 = vpack.c.b16 %v6667_v57, %v6667_v57  ;;  %v12786_v51 = vor.u32 %v14597_v63, %v12785_v29 }
 0x3db   :  { %v5269_v61 = vpop.f32.mrf.mxu0  ;;  %5621 = vmatpush.bf16.msrb.mxu2 %v12198_v33  ;;  %5608 = vmatpush.bf16.msrb.mxu1 %v12194_v52  ;;  %v12702_v53 = vor.u32 %v14577_v58, %v12701_v40  ;;  %v12282_v33 = vor.u32 %v14478_v44, %v12281_v56  ;;  %v12278_v52 = vor.u32 %v14475_v37, %v12275_v3  ;;  %v12801_v62 = vld [vmem:[#allocation12 + $0xec0] sm:$0xf]  ;;  %v12249_v50 = vld [vmem:[#allocation12 + $0xaa8] sm:$0xf]  ;;  %v6832_v57 = vrot.slane %v6831_v41, 7 }
 0x3dc   :  { %5634 = vmatpush.bf16.msrb.mxu3 %v12202_v46  ;;  %6923 = vmatpush.bf16.msra.mxu0 %v12734_v55  ;;  %v12286_v46 = vor.u32 %v14476_v10, %v12283_v42  ;;  %v12818_v55 = vor.u32 %v14605_v7, %v12817_v34  ;;  %v14470_v61 = vld [vmem:[#allocation12 + $0xab4] sm:$0xf0]  ;;  %v12233_v56 = vld [vmem:[#allocation12 + $0xa88] sm:$0xf]  ;;  %v12235_v3 = vld [vmem:[#allocation12 + $0xa98] sm:$0xf0] }
 0x3dd   :  { %v14466_v44 = vld [vmem:[#allocation12 + $0xa94] sm:$0xf0]  ;;  %v14593_v10 = vld [vmem:[#allocation12 + $0xe8c] sm:$0xf0]  ;;  %v12349_v7 = vld [vmem:[#allocation12 + $0xb68] sm:$0xf] }
 0x3de   :  { %v12234_v42 = vor.u32 %v14466_v44, %v12233_v56  ;;  %v14483_v56 = vld [vmem:[#allocation12 + $0xb24] sm:$0xf]  ;;  %v12311_v44 = vld [vmem:[#allocation12 + $0xb30] sm:$0xf0] }
 0x3df   :  { %5622 = vmatpush.bf16.msrb.mxu2 %v12182_v23  ;;  %5609 = vmatpush.bf16.msrb.mxu1 %v12178_v59  ;;  %v12802_v59 = vor.u32 %v14601_v28, %v12801_v62  ;;  %v6977_v28 = vpack.c.bf16 %v6975_v36, %v6975_v36 }
 0x3e0   :  { %v3967_v24 = vpop.f32.mrf.mxu2  ;;  %5635 = vmatpush.bf16.msrb.mxu3 %v12186_v5  ;;  %6924 = vmatpush.bf16.msra.mxu0 %v12718_v39  ;;  %v14468_v5 = vld [vmem:[#allocation12 + $0xaac] sm:$0xf] }
 0x3e1   :  { %v3980_v6 = vpop.f32.mrf.mxu3  ;;  %v14463_v24 = vld [vmem:[#allocation12 + $0xa84] sm:$0xf] }
 0x3e2   :  { %v4118_v27 = vpop.f32.mrf.mxu1 }
 0x3e3   :  { %v16541_v54 = vadd.f32 %v4118_v27, %v16518_v43  ;;  %v5433_v47 = vpop.f32.mrf.mxu0  ;;  %5623 = vmatpush.bf16.msrb.mxu2 %v12166_v0  ;;  %5610 = vmatpush.bf16.msrb.mxu1 %v12162_v31  ;;  %v12267_v43 = vld [vmem:[#allocation12 + $0xad8] sm:$0xf0]  ;;  %v12250_v0 = vor.u32 %v14470_v61, %v12249_v50  ;;  %v12246_v31 = vor.u32 %v14467_v35, %v12243_v11  ;;  %v14494_v27 = vld [vmem:[#allocation12 + $0xb74] sm:$0xf0]  ;;  %v12333_v50 = vld [vmem:[#allocation12 + $0xb48] sm:$0xf] }
 0x3e4   :  { %v16544_v49 = vadd.f32 %v5433_v47, %v16521_v30  ;;  %5636 = vmatpush.bf16.msrb.mxu3 %v12170_v1  ;;  %6925 = vmatpush.bf16.msra.mxu0 %v12702_v53  ;;  %v6808_v30 = vld [vmem:[#allocation3 + $0x20] sm:$0x1]  ;;  %v12270_v23 = vor.u32 %v14472_v48, %v12267_v43  ;;  %v12227_v1 = vld [vmem:[#allocation12 + $0xa90] sm:$0xf0]  ;;  %v14464_v53 = vld [vmem:[#allocation12 + $0xa8c] sm:$0xf] }
 0x3e5   :  { %12152 = vmatmul.msk.bf16.vlgmr.msra.gmra.mxu1 %vm2150_vm4, %v16357_v9  ;;  %12153 = vmatmul.msk.bf16.vlgmr.msra.gmra.mxu2 %vm2150_vm4, %v16357_v9  ;;  %v6810_v21 = vpack.c.bf16 %v6808_v30, %v6808_v30  ;;  %v12230_v34 = vor.u32 %v14463_v24, %v12227_v1  ;;  %v14621_v48 = vld [vmem:[#allocation12 + $0xf6c] sm:$0xf0]  ;;  %v14490_v61 = vld [vmem:[#allocation12 + $0xb54] sm:$0xf0]  ;;  %v14487_v35 = vld [vmem:[#allocation12 + $0xb44] sm:$0xf] }
 0x3e6   :  { %12154 = vmatmul.msk.bf16.vlgmr.msra.gmra.mxu3 %vm2150_vm4, %v16357_v9  ;;  %12695 = vmatmul.msk.bf16.vlgmr.msrb.gmra.mxu0 %vm2150_vm4, %v16538_v8  ;;  %v12327_v11 = vld [vmem:[#allocation12 + $0xb50] sm:$0xf0]  ;;  %v12334_v29 = vor.u32 %v14490_v61, %v12333_v50  ;;  %v12319_v1 = vld [vmem:[#allocation12 + $0xb38] sm:$0xf0]  ;;  %v14507_v50 = vld [vmem:[#allocation12 + $0xbe4] sm:$0xf] }
 0x3e7   :  { %5786 = vmatpush.bf16.msra.mxu2 %v12282_v33  ;;  %5773 = vmatpush.bf16.msra.mxu1 %v12278_v52  ;;  %v6830_v37 = vunpack.c.l.b16 %v6810_v21  ;;  %v12238_v33 = vor.u32 %v14464_v53, %v12235_v3  ;;  %v14617_v21 = vld [vmem:[#allocation12 + $0xf4c] sm:$0xf0]  ;;  %v12330_v63 = vor.u32 %v14487_v35, %v12327_v11  ;;  %v12853_v53 = vld [vmem:[#allocation12 + $0xf20] sm:$0xf]  ;;  %v12411_v61 = vld [vmem:[#allocation12 + $0xbf0] sm:$0xf0] }
 0x3e8   :  { %v4131_v17 = vpop.f32.mrf.mxu2  ;;  %5799 = vmatpush.bf16.msra.mxu3 %v12286_v46  ;;  %7088 = vmatpush.bf16.msrb.mxu0 %v12818_v55  ;;  %v14492_v46 = vld [vmem:[#allocation12 + $0xb6c] sm:$0xf]  ;;  %v12419_v35 = vld [vmem:[#allocation12 + $0xbf8] sm:$0xf0]  ;;  %v12953_v11 = vld [vmem:[#allocation12 + $0xfe0] sm:$0xf] }
 0x3e9   :  { %v16555_v9 = vadd.f32 %v4131_v17, %v16532_v14  ;;  %v4144_v39 = vpop.f32.mrf.mxu3  ;;  %v12254_v14 = vor.u32 %v14468_v5, %v12251_v2  ;;  %v6833_v6 = vsel %vm2212_vm5, %v6832_v57, %v6830_v37  ;;  %v14488_v5 = vld [vmem:[#allocation12 + $0xb4c] sm:$0xf]  ;;  %v6997_v2 = vunpack.c.l.b16 %v6977_v28  ;;  %v14613_v37 = vld [vmem:[#allocation12 + $0xf2c] sm:$0xf0]  ;;  %v7141_v28 = vld [vmem:[#allocation3 + $0x62] sm:$0x1] }
 0x3ea   :  { %v16558_v4 = vadd.f32 %v4144_v39, %v16535_v32  ;;  %v4120_v40 = vpop.f32.mrf.mxu1  ;;  %v12769_v32 = vld [vmem:[#allocation12 + $0xe80] sm:$0xf]  ;;  %v16561_v62 = vpack.c.b16 %v6833_v6, %v6833_v6  ;;  %v12854_v36 = vor.u32 %v14613_v37, %v12853_v53 }
 0x3eb   :  { %v5435_v58 = vpop.f32.mrf.mxu0  ;;  %5787 = vmatpush.bf16.msra.mxu2 %v12266_v45  ;;  %5774 = vmatpush.bf16.msra.mxu1 %v12262_v12  ;;  %v12770_v52 = vor.u32 %v14593_v10, %v12769_v32  ;;  %v12350_v45 = vor.u32 %v14494_v27, %v12349_v7  ;;  %v12346_v12 = vor.u32 %v14491_v26, %v12343_v60  ;;  %v12869_v39 = vld [vmem:[#allocation12 + $0xf40] sm:$0xf]  ;;  %v12317_v40 = vld [vmem:[#allocation12 + $0xb28] sm:$0xf]  ;;  %v6998_v6 = vrot.slane %v6997_v2, 7 }
 0x3ec   :  { %5800 = vmatpush.bf16.msra.mxu3 %v12270_v23  ;;  %7089 = vmatpush.bf16.msrb.mxu0 %v12802_v59  ;;  %v12354_v23 = vor.u32 %v14492_v46, %v12351_v20  ;;  %v12886_v59 = vor.u32 %v14621_v48, %v12885_v19  ;;  %v14486_v58 = vld [vmem:[#allocation12 + $0xb34] sm:$0xf0]  ;;  %v12301_v7 = vld [vmem:[#allocation12 + $0xb08] sm:$0xf]  ;;  %v12303_v60 = vld [vmem:[#allocation12 + $0xb18] sm:$0xf0] }
 0x3ed   :  { %v14482_v27 = vld [vmem:[#allocation12 + $0xb14] sm:$0xf0]  ;;  %v14609_v46 = vld [vmem:[#allocation12 + $0xf0c] sm:$0xf0]  ;;  %v12417_v48 = vld [vmem:[#allocation12 + $0xbe8] sm:$0xf] }
 0x3ee   :  { %v12302_v20 = vor.u32 %v14482_v27, %v12301_v7  ;;  %v14499_v7 = vld [vmem:[#allocation12 + $0xba4] sm:$0xf]  ;;  %v12379_v27 = vld [vmem:[#allocation12 + $0xbb0] sm:$0xf0] }
 0x3ef   :  { %5788 = vmatpush.bf16.msra.mxu2 %v12250_v0  ;;  %5775 = vmatpush.bf16.msra.mxu1 %v12246_v31  ;;  %v12870_v31 = vor.u32 %v14617_v21, %v12869_v39  ;;  %v7143_v21 = vpack.c.bf16 %v7141_v28, %v7141_v28 }
 0x3f0   :  { %v4133_v47 = vpop.f32.mrf.mxu2  ;;  %5801 = vmatpush.bf16.msra.mxu3 %v12254_v14  ;;  %7090 = vmatpush.bf16.msrb.mxu0 %v12786_v51  ;;  %v14484_v14 = vld [vmem:[#allocation12 + $0xb2c] sm:$0xf] }
 0x3f1   :  { %v4146_v55 = vpop.f32.mrf.mxu3  ;;  %v14479_v47 = vld [vmem:[#allocation12 + $0xb04] sm:$0xf] }
 0x3f2   :  { %v4284_v43 = vpop.f32.mrf.mxu1 }
 0x3f3   :  { %v16564_v30 = vadd.f32 %v4284_v43, %v16541_v54  ;;  %v5599_v41 = vpop.f32.mrf.mxu0  ;;  %5789 = vmatpush.bf16.msra.mxu2 %v12234_v42  ;;  %5776 = vmatpush.bf16.msra.mxu1 %v12230_v34  ;;  %v12335_v54 = vld [vmem:[#allocation12 + $0xb58] sm:$0xf0]  ;;  %v12318_v42 = vor.u32 %v14486_v58, %v12317_v40  ;;  %v12314_v34 = vor.u32 %v14483_v56, %v12311_v44  ;;  %v14510_v43 = vld [vmem:[#allocation12 + $0xbf4] sm:$0xf0]  ;;  %v12401_v40 = vld [vmem:[#allocation12 + $0xbc8] sm:$0xf] }
 0x3f4   :  { %v16567_v17 = vadd.f32 %v5599_v41, %v16544_v49  ;;  %5802 = vmatpush.bf16.msra.mxu3 %v12238_v33  ;;  %7091 = vmatpush.bf16.msrb.mxu0 %v12770_v52  ;;  %v6974_v49 = vld [vmem:[#allocation3 + $0x21] sm:$0x1]  ;;  %v12338_v0 = vor.u32 %v14488_v5, %v12335_v54  ;;  %v12295_v33 = vld [vmem:[#allocation12 + $0xb10] sm:$0xf0]  ;;  %v14480_v52 = vld [vmem:[#allocation12 + $0xb0c] sm:$0xf] }
 0x3f5   :  { %12220 = vmatmul.msk.bf16.vlgmr.msrb.gmra.mxu1 %vm2150_vm4, %v16382_v22  ;;  %12221 = vmatmul.msk.bf16.vlgmr.msrb.gmra.mxu2 %vm2150_vm4, %v16382_v22  ;;  %v6976_v24 = vpack.c.bf16 %v6974_v49, %v6974_v49  ;;  %v12298_v19 = vor.u32 %v14479_v47, %v12295_v33  ;;  %v14637_v5 = vld [vmem:[#allocation12 + $0xfec] sm:$0xf0]  ;;  %v14506_v58 = vld [vmem:[#allocation12 + $0xbd4] sm:$0xf0]  ;;  %v14503_v56 = vld [vmem:[#allocation12 + $0xbc4] sm:$0xf] }
 0x3f6   :  { %12222 = vmatmul.msk.bf16.vlgmr.msrb.gmra.mxu3 %vm2150_vm4, %v16382_v22  ;;  %12763 = vmatmul.msk.bf16.vlgmr.msra.gmra.mxu0 %vm2150_vm4, %v16561_v62  ;;  %v12395_v44 = vld [vmem:[#allocation12 + $0xbd0] sm:$0xf0]  ;;  %v12402_v53 = vor.u32 %v14506_v58, %v12401_v40  ;;  %v12387_v33 = vld [vmem:[#allocation12 + $0xbb8] sm:$0xf0]  ;;  %v14523_v40 = vld [vmem:[#allocation12 + $0xc64] sm:$0xf] }
 0x3f7   :  { %5952 = vmatpush.bf16.msrb.mxu2 %v12350_v45  ;;  %5939 = vmatpush.bf16.msrb.mxu1 %v12346_v12  ;;  %v6996_v26 = vunpack.c.l.b16 %v6976_v24  ;;  %v12306_v45 = vor.u32 %v14480_v52, %v12303_v60  ;;  %v14633_v24 = vld [vmem:[#allocation12 + $0xfcc] sm:$0xf0]  ;;  %v12398_v37 = vor.u32 %v14503_v56, %v12395_v44  ;;  %v12921_v52 = vld [vmem:[#allocation12 + $0xfa0] sm:$0xf]  ;;  %v12479_v58 = vld [vmem:[#allocation12 + $0xc70] sm:$0xf0] }
 0x3f8   :  { %v4297_v57 = vpop.f32.mrf.mxu2  ;;  %5965 = vmatpush.bf16.msrb.mxu3 %v12354_v23  ;;  %7254 = vmatpush.bf16.msra.mxu0 %v12886_v59  ;;  %v14508_v23 = vld [vmem:[#allocation12 + $0xbec] sm:$0xf]  ;;  %v12487_v56 = vld [vmem:[#allocation12 + $0xc78] sm:$0xf0]  ;;  %v13021_v44 = vld [vmem:[#allocation12 + $0x1060] sm:$0xf] }
 0x3f9   :  { %v16578_v22 = vadd.f32 %v4297_v57, %v16555_v9  ;;  %v4310_v51 = vpop.f32.mrf.mxu3  ;;  %v12322_v9 = vor.u32 %v14484_v14, %v12319_v1  ;;  %v6999_v55 = vsel %vm2212_vm5, %v6998_v6, %v6996_v26  ;;  %v14504_v14 = vld [vmem:[#allocation12 + $0xbcc] sm:$0xf]  ;;  %v7163_v1 = vunpack.c.l.b16 %v7143_v21  ;;  %v14629_v26 = vld [vmem:[#allocation12 + $0xfac] sm:$0xf0]  ;;  %v7307_v21 = vld [vmem:[#allocation3 + $0x63] sm:$0x1] }
 0x3fa   :  { %v16581_v3 = vadd.f32 %v4310_v51, %v16558_v4  ;;  %v4286_v32 = vpop.f32.mrf.mxu1  ;;  %v12837_v4 = vld [vmem:[#allocation12 + $0xf00] sm:$0xf]  ;;  %v16584_v39 = vpack.c.b16 %v6999_v55, %v6999_v55  ;;  %v12922_v28 = vor.u32 %v14629_v26, %v12921_v52 }
 0x3fb   :  { %v5601_v10 = vpop.f32.mrf.mxu0  ;;  %5953 = vmatpush.bf16.msrb.mxu2 %v12334_v29  ;;  %5940 = vmatpush.bf16.msrb.mxu1 %v12330_v63  ;;  %v12838_v12 = vor.u32 %v14609_v46, %v12837_v4  ;;  %v12418_v29 = vor.u32 %v14510_v43, %v12417_v48  ;;  %v12414_v63 = vor.u32 %v14507_v50, %v12411_v61  ;;  %v12937_v51 = vld [vmem:[#allocation12 + $0xfc0] sm:$0xf]  ;;  %v12385_v32 = vld [vmem:[#allocation12 + $0xba8] sm:$0xf]  ;;  %v7164_v55 = vrot.slane %v7163_v1, 7 }
 0x3fc   :  { %5966 = vmatpush.bf16.msrb.mxu3 %v12338_v0  ;;  %7255 = vmatpush.bf16.msra.mxu0 %v12870_v31  ;;  %v12422_v0 = vor.u32 %v14508_v23, %v12419_v35  ;;  %v12954_v31 = vor.u32 %v14637_v5, %v12953_v11  ;;  %v14502_v10 = vld [vmem:[#allocation12 + $0xbb4] sm:$0xf0]  ;;  %v12369_v48 = vld [vmem:[#allocation12 + $0xb88] sm:$0xf]  ;;  %v12371_v61 = vld [vmem:[#allocation12 + $0xb98] sm:$0xf0] }
 0x3fd   :  { %v14498_v43 = vld [vmem:[#allocation12 + $0xb94] sm:$0xf0]  ;;  %v14625_v23 = vld [vmem:[#allocation12 + $0xf8c] sm:$0xf0]  ;;  %v12485_v5 = vld [vmem:[#allocation12 + $0xc68] sm:$0xf] }
 0x3fe   :  { %v12370_v35 = vor.u32 %v14498_v43, %v12369_v48  ;;  %v14515_v48 = vld [vmem:[#allocation12 + $0xc24] sm:$0xf]  ;;  %v12447_v43 = vld [vmem:[#allocation12 + $0xc30] sm:$0xf0] }
 0x3ff   :  { %5954 = vmatpush.bf16.msrb.mxu2 %v12318_v42  ;;  %5941 = vmatpush.bf16.msrb.mxu1 %v12314_v34  ;;  %v12938_v34 = vor.u32 %v14633_v24, %v12937_v51  ;;  %v7309_v24 = vpack.c.bf16 %v7307_v21, %v7307_v21 }
 0x400   :  { %v4299_v41 = vpop.f32.mrf.mxu2  ;;  %5967 = vmatpush.bf16.msrb.mxu3 %v12322_v9  ;;  %7256 = vmatpush.bf16.msra.mxu0 %v12854_v36  ;;  %v14500_v9 = vld [vmem:[#allocation12 + $0xbac] sm:$0xf] }
 0x401   :  { %v4312_v59 = vpop.f32.mrf.mxu3  ;;  %v14495_v41 = vld [vmem:[#allocation12 + $0xb84] sm:$0xf] }
 0x402   :  { %v4450_v54 = vpop.f32.mrf.mxu1 }
 0x403   :  { %v16587_v49 = vadd.f32 %v4450_v54, %v16564_v30  ;;  %v5765_v2 = vpop.f32.mrf.mxu0  ;;  %5955 = vmatpush.bf16.msrb.mxu2 %v12302_v20  ;;  %5942 = vmatpush.bf16.msrb.mxu1 %v12298_v19  ;;  %v12403_v30 = vld [vmem:[#allocation12 + $0xbd8] sm:$0xf0]  ;;  %v12386_v20 = vor.u32 %v14502_v10, %v12385_v32  ;;  %v12382_v19 = vor.u32 %v14499_v7, %v12379_v27  ;;  %v14526_v54 = vld [vmem:[#allocation12 + $0xc74] sm:$0xf0]  ;;  %v12469_v32 = vld [vmem:[#allocation12 + $0xc48] sm:$0xf] }
 0x404   :  { %v16590_v57 = vadd.f32 %v5765_v2, %v16567_v17  ;;  %5968 = vmatpush.bf16.msrb.mxu3 %v12306_v45  ;;  %7257 = vmatpush.bf16.msra.mxu0 %v12838_v12  ;;  %v7140_v17 = vld [vmem:[#allocation3 + $0x22] sm:$0x1]  ;;  %v12406_v42 = vor.u32 %v14504_v14, %v12403_v30  ;;  %v12363_v45 = vld [vmem:[#allocation12 + $0xb90] sm:$0xf0]  ;;  %v14496_v12 = vld [vmem:[#allocation12 + $0xb8c] sm:$0xf] }
 0x405   :  { %12288 = vmatmul.msk.bf16.vlgmr.msra.gmra.mxu1 %vm2150_vm4, %v16401_v38  ;;  %12289 = vmatmul.msk.bf16.vlgmr.msra.gmra.mxu2 %vm2150_vm4, %v16401_v38  ;;  %v7142_v47 = vpack.c.bf16 %v7140_v17, %v7140_v17  ;;  %v12366_v11 = vor.u32 %v14495_v41, %v12363_v45  ;;  %v14653_v14 = vld [vmem:[#allocation12 + $0x106c] sm:$0xf0]  ;;  %v14522_v10 = vld [vmem:[#allocation12 + $0xc54] sm:$0xf0]  ;;  %v14519_v7 = vld [vmem:[#allocation12 + $0xc44] sm:$0xf] }
 0x406   :  { %12290 = vmatmul.msk.bf16.vlgmr.msra.gmra.mxu3 %vm2150_vm4, %v16401_v38  ;;  %12831 = vmatmul.msk.bf16.vlgmr.msrb.gmra.mxu0 %vm2150_vm4, %v16584_v39  ;;  %v12463_v27 = vld [vmem:[#allocation12 + $0xc50] sm:$0xf0]  ;;  %v12470_v52 = vor.u32 %v14522_v10, %v12469_v32  ;;  %v12455_v45 = vld [vmem:[#allocation12 + $0xc38] sm:$0xf0]  ;;  %v14539_v32 = vld [vmem:[#allocation12 + $0xce4] sm:$0xf] }
 0x407   :  { %6118 = vmatpush.bf16.msra.mxu2 %v12418_v29  ;;  %6105 = vmatpush.bf16.msra.mxu1 %v12414_v63  ;;  %v7162_v50 = vunpack.c.l.b16 %v7142_v47  ;;  %v12374_v29 = vor.u32 %v14496_v12, %v12371_v61  ;;  %v14649_v47 = vld [vmem:[#allocation12 + $0x104c] sm:$0xf0]  ;;  %v12466_v26 = vor.u32 %v14519_v7, %v12463_v27  ;;  %v12989_v12 = vld [vmem:[#allocation12 + $0x1020] sm:$0xf]  ;;  %v12547_v10 = vld [vmem:[#allocation12 + $0xcf0] sm:$0xf0] }
 0x408   :  { %v4463_v6 = vpop.f32.mrf.mxu2  ;;  %6131 = vmatpush.bf16.msra.mxu3 %v12422_v0  ;;  %7420 = vmatpush.bf16.msrb.mxu0 %v12954_v31  ;;  %v14524_v0 = vld [vmem:[#allocation12 + $0xc6c] sm:$0xf]  ;;  %v12555_v7 = vld [vmem:[#allocation12 + $0xcf8] sm:$0xf0]  ;;  %v13089_v27 = vld [vmem:[#allocation12 + $0x10e0] sm:$0xf] }
 0x409   :  { %v16601_v38 = vadd.f32 %v4463_v6, %v16578_v22  ;;  %v4476_v36 = vpop.f32.mrf.mxu3  ;;  %v12390_v22 = vor.u32 %v14500_v9, %v12387_v33  ;;  %v7165_v59 = vsel %vm2212_vm5, %v7164_v55, %v7162_v50  ;;  %v14520_v9 = vld [vmem:[#allocation12 + $0xc4c] sm:$0xf]  ;;  %v7329_v33 = vunpack.c.l.b16 %v7309_v24  ;;  %v14645_v50 = vld [vmem:[#allocation12 + $0x102c] sm:$0xf0]  ;;  %v7473_v24 = vld [vmem:[#allocation3 + $0x64] sm:$0x1] }
 0x40a   :  { %v16604_v60 = vadd.f32 %v4476_v36, %v16581_v3  ;;  %v4452_v4 = vpop.f32.mrf.mxu1  ;;  %v12905_v3 = vld [vmem:[#allocation12 + $0xf80] sm:$0xf]  ;;  %v16607_v51 = vpack.c.b16 %v7165_v59, %v7165_v59  ;;  %v12990_v21 = vor.u32 %v14645_v50, %v12989_v12 }
 0x40b   :  { %v5767_v46 = vpop.f32.mrf.mxu0  ;;  %6119 = vmatpush.bf16.msra.mxu2 %v12402_v53  ;;  %6106 = vmatpush.bf16.msra.mxu1 %v12398_v37  ;;  %v12906_v63 = vor.u32 %v14625_v23, %v12905_v3  ;;  %v12486_v53 = vor.u32 %v14526_v54, %v12485_v5  ;;  %v12482_v37 = vor.u32 %v14523_v40, %v12479_v58  ;;  %v13005_v36 = vld [vmem:[#allocation12 + $0x1040] sm:$0xf]  ;;  %v12453_v4 = vld [vmem:[#allocation12 + $0xc28] sm:$0xf]  ;;  %v7330_v59 = vrot.slane %v7329_v33, 7 }
 0x40c   :  { %6132 = vmatpush.bf16.msra.mxu3 %v12406_v42  ;;  %7421 = vmatpush.bf16.msrb.mxu0 %v12938_v34  ;;  %v12490_v42 = vor.u32 %v14524_v0, %v12487_v56  ;;  %v13022_v34 = vor.u32 %v14653_v14, %v13021_v44  ;;  %v14518_v46 = vld [vmem:[#allocation12 + $0xc34] sm:$0xf0]  ;;  %v12437_v5 = vld [vmem:[#allocation12 + $0xc08] sm:$0xf]  ;;  %v12439_v58 = vld [vmem:[#allocation12 + $0xc18] sm:$0xf0] }
 0x40d   :  { %v14514_v54 = vld [vmem:[#allocation12 + $0xc14] sm:$0xf0]  ;;  %v14641_v0 = vld [vmem:[#allocation12 + $0x100c] sm:$0xf0]  ;;  %v12553_v14 = vld [vmem:[#allocation12 + $0xce8] sm:$0xf] }
 0x40e   :  { %v12438_v56 = vor.u32 %v14514_v54, %v12437_v5  ;;  %v14531_v5 = vld [vmem:[#allocation12 + $0xca4] sm:$0xf]  ;;  %v12515_v54 = vld [vmem:[#allocation12 + $0xcb0] sm:$0xf0] }
 0x40f   :  { %6120 = vmatpush.bf16.msra.mxu2 %v12386_v20  ;;  %6107 = vmatpush.bf16.msra.mxu1 %v12382_v19  ;;  %v13006_v19 = vor.u32 %v14649_v47, %v13005_v36  ;;  %v7475_v47 = vpack.c.bf16 %v7473_v24, %v7473_v24 }
 0x410   :  { %v4465_v2 = vpop.f32.mrf.mxu2  ;;  %6133 = vmatpush.bf16.msra.mxu3 %v12390_v22  ;;  %7422 = vmatpush.bf16.msrb.mxu0 %v12922_v28  ;;  %v14516_v22 = vld [vmem:[#allocation12 + $0xc2c] sm:$0xf] }
 0x411   :  { %v4478_v31 = vpop.f32.mrf.mxu3  ;;  %v14511_v2 = vld [vmem:[#allocation12 + $0xc04] sm:$0xf] }
 0x412   :  { %v4616_v30 = vpop.f32.mrf.mxu1 }
 0x413   :  { %v16610_v17 = vadd.f32 %v4616_v30, %v16587_v49  ;;  %v5931_v1 = vpop.f32.mrf.mxu0  ;;  %6121 = vmatpush.bf16.msra.mxu2 %v12370_v35  ;;  %6108 = vmatpush.bf16.msra.mxu1 %v12366_v11  ;;  %v12471_v49 = vld [vmem:[#allocation12 + $0xc58] sm:$0xf0]  ;;  %v12454_v35 = vor.u32 %v14518_v46, %v12453_v4  ;;  %v12450_v11 = vor.u32 %v14515_v48, %v12447_v43  ;;  %v14542_v30 = vld [vmem:[#allocation12 + $0xcf4] sm:$0xf0]  ;;  %v12537_v4 = vld [vmem:[#allocation12 + $0xcc8] sm:$0xf] }
 0x414   :  { %v16613_v6 = vadd.f32 %v5931_v1, %v16590_v57  ;;  %6134 = vmatpush.bf16.msra.mxu3 %v12374_v29  ;;  %7423 = vmatpush.bf16.msrb.mxu0 %v12906_v63  ;;  %v7306_v57 = vld [vmem:[#allocation3 + $0x23] sm:$0x1]  ;;  %v12474_v20 = vor.u32 %v14520_v9, %v12471_v49  ;;  %v12431_v29 = vld [vmem:[#allocation12 + $0xc10] sm:$0xf0]  ;;  %v14512_v63 = vld [vmem:[#allocation12 + $0xc0c] sm:$0xf] }
 0x415   :  { %12356 = vmatmul.msk.bf16.vlgmr.msrb.gmra.mxu1 %vm2150_vm4, %v16424_v15  ;;  %12357 = vmatmul.msk.bf16.vlgmr.msrb.gmra.mxu2 %vm2150_vm4, %v16424_v15  ;;  %v7308_v41 = vpack.c.bf16 %v7306_v57, %v7306_v57  ;;  %v12434_v44 = vor.u32 %v14511_v2, %v12431_v29  ;;  %v14669_v9 = vld [vmem:[#allocation12 + $0x10ec] sm:$0xf0]  ;;  %v14538_v46 = vld [vmem:[#allocation12 + $0xcd4] sm:$0xf0]  ;;  %v14535_v48 = vld [vmem:[#allocation12 + $0xcc4] sm:$0xf] }
 0x416   :  { %12358 = vmatmul.msk.bf16.vlgmr.msrb.gmra.mxu3 %vm2150_vm4, %v16424_v15  ;;  %12899 = vmatmul.msk.bf16.vlgmr.msra.gmra.mxu0 %vm2150_vm4, %v16607_v51  ;;  %v12531_v43 = vld [vmem:[#allocation12 + $0xcd0] sm:$0xf0]  ;;  %v12538_v12 = vor.u32 %v14538_v46, %v12537_v4  ;;  %v12523_v29 = vld [vmem:[#allocation12 + $0xcb8] sm:$0xf0]  ;;  %v14555_v4 = vld [vmem:[#allocation12 + $0xd64] sm:$0xf] }
 0x417   :  { %6284 = vmatpush.bf16.msrb.mxu2 %v12486_v53  ;;  %6271 = vmatpush.bf16.msrb.mxu1 %v12482_v37  ;;  %v7328_v40 = vunpack.c.l.b16 %v7308_v41  ;;  %v12442_v53 = vor.u32 %v14512_v63, %v12439_v58  ;;  %v14665_v41 = vld [vmem:[#allocation12 + $0x10cc] sm:$0xf0]  ;;  %v12534_v50 = vor.u32 %v14535_v48, %v12531_v43  ;;  %v13057_v63 = vld [vmem:[#allocation12 + $0x10a0] sm:$0xf]  ;;  %v12615_v46 = vld [vmem:[#allocation12 + $0xd70] sm:$0xf0] }
 0x418   :  { %v4629_v55 = vpop.f32.mrf.mxu2  ;;  %6297 = vmatpush.bf16.msrb.mxu3 %v12490_v42  ;;  %7586 = vmatpush.bf16.msra.mxu0 %v13022_v34  ;;  %v14540_v42 = vld [vmem:[#allocation12 + $0xcec] sm:$0xf]  ;;  %v12623_v48 = vld [vmem:[#allocation12 + $0xd78] sm:$0xf0]  ;;  %v13157_v43 = vld [vmem:[#allocation12 + $0x1160] sm:$0xf] }
 0x419   :  { %v16624_v15 = vadd.f32 %v4629_v55, %v16601_v38  ;;  %v4642_v28 = vpop.f32.mrf.mxu3  ;;  %v12458_v38 = vor.u32 %v14516_v22, %v12455_v45  ;;  %v7331_v31 = vsel %vm2212_vm5, %v7330_v59, %v7328_v40  ;;  %v14536_v22 = vld [vmem:[#allocation12 + $0xccc] sm:$0xf]  ;;  %v7495_v45 = vunpack.c.l.b16 %v7475_v47  ;;  %v14661_v40 = vld [vmem:[#allocation12 + $0x10ac] sm:$0xf0]  ;;  %v7639_v47 = vld [vmem:[#allocation3 + $0x65] sm:$0x1] }
 0x41a   :  { %v16627_v61 = vadd.f32 %v4642_v28, %v16604_v60  ;;  %v4618_v3 = vpop.f32.mrf.mxu1  ;;  %v12973_v60 = vld [vmem:[#allocation12 + $0x1000] sm:$0xf]  ;;  %v16630_v36 = vpack.c.b16 %v7331_v31, %v7331_v31  ;;  %v13058_v24 = vor.u32 %v14661_v40, %v13057_v63 }
 0x41b   :  { %v5933_v23 = vpop.f32.mrf.mxu0  ;;  %6285 = vmatpush.bf16.msrb.mxu2 %v12470_v52  ;;  %6272 = vmatpush.bf16.msrb.mxu1 %v12466_v26  ;;  %v12974_v37 = vor.u32 %v14641_v0, %v12973_v60  ;;  %v12554_v52 = vor.u32 %v14542_v30, %v12553_v14  ;;  %v12550_v26 = vor.u32 %v14539_v32, %v12547_v10  ;;  %v13073_v28 = vld [vmem:[#allocation12 + $0x10c0] sm:$0xf]  ;;  %v12521_v3 = vld [vmem:[#allocation12 + $0xca8] sm:$0xf]  ;;  %v7496_v31 = vrot.slane %v7495_v45, 7 }
 0x41c   :  { %6298 = vmatpush.bf16.msrb.mxu3 %v12474_v20  ;;  %7587 = vmatpush.bf16.msra.mxu0 %v13006_v19  ;;  %v12558_v20 = vor.u32 %v14540_v42, %v12555_v7  ;;  %v13090_v19 = vor.u32 %v14669_v9, %v13089_v27  ;;  %v14534_v23 = vld [vmem:[#allocation12 + $0xcb4] sm:$0xf0]  ;;  %v12505_v14 = vld [vmem:[#allocation12 + $0xc88] sm:$0xf]  ;;  %v12507_v10 = vld [vmem:[#allocation12 + $0xc98] sm:$0xf0] }
 0x41d   :  { %v14530_v30 = vld [vmem:[#allocation12 + $0xc94] sm:$0xf0]  ;;  %v14657_v42 = vld [vmem:[#allocation12 + $0x108c] sm:$0xf0]  ;;  %v12621_v9 = vld [vmem:[#allocation12 + $0xd68] sm:$0xf] }
 0x41e   :  { %v12506_v7 = vor.u32 %v14530_v30, %v12505_v14  ;;  %v14547_v14 = vld [vmem:[#allocation12 + $0xd24] sm:$0xf]  ;;  %v12583_v30 = vld [vmem:[#allocation12 + $0xd30] sm:$0xf0] }
 0x41f   :  { %6286 = vmatpush.bf16.msrb.mxu2 %v12454_v35  ;;  %6273 = vmatpush.bf16.msrb.mxu1 %v12450_v11  ;;  %v13074_v11 = vor.u32 %v14665_v41, %v13073_v28  ;;  %v7641_v41 = vpack.c.bf16 %v7639_v47, %v7639_v47 }
 0x420   :  { %v4631_v1 = vpop.f32.mrf.mxu2  ;;  %6299 = vmatpush.bf16.msrb.mxu3 %v12458_v38  ;;  %7588 = vmatpush.bf16.msra.mxu0 %v12990_v21  ;;  %v14532_v38 = vld [vmem:[#allocation12 + $0xcac] sm:$0xf] }
 0x421   :  { %v4644_v34 = vpop.f32.mrf.mxu3  ;;  %v14527_v1 = vld [vmem:[#allocation12 + $0xc84] sm:$0xf] }
 0x422   :  { %v4782_v49 = vpop.f32.mrf.mxu1 }
 0x423   :  { %v16633_v57 = vadd.f32 %v4782_v49, %v16610_v17  ;;  %v6097_v33 = vpop.f32.mrf.mxu0  ;;  %6287 = vmatpush.bf16.msrb.mxu2 %v12438_v56  ;;  %6274 = vmatpush.bf16.msrb.mxu1 %v12434_v44  ;;  %v12539_v17 = vld [vmem:[#allocation12 + $0xcd8] sm:$0xf0]  ;;  %v12522_v56 = vor.u32 %v14534_v23, %v12521_v3  ;;  %v12518_v44 = vor.u32 %v14531_v5, %v12515_v54  ;;  %v14558_v49 = vld [vmem:[#allocation12 + $0xd74] sm:$0xf0]  ;;  %v12605_v3 = vld [vmem:[#allocation12 + $0xd48] sm:$0xf] }
 0x424   :  { %v16636_v55 = vadd.f32 %v6097_v33, %v16613_v6  ;;  %6300 = vmatpush.bf16.msrb.mxu3 %v12442_v53  ;;  %7589 = vmatpush.bf16.msra.mxu0 %v12974_v37  ;;  %v7472_v6 = vld [vmem:[#allocation3 + $0x24] sm:$0x1]  ;;  %v12542_v35 = vor.u32 %v14536_v22, %v12539_v17  ;;  %v12499_v53 = vld [vmem:[#allocation12 + $0xc90] sm:$0xf0]  ;;  %v14528_v37 = vld [vmem:[#allocation12 + $0xc8c] sm:$0xf] }
 0x425   :  { %12424 = vmatmul.msk.bf16.vlgmr.msra.gmra.mxu1 %vm2150_vm4, %v16446_v16  ;;  %12425 = vmatmul.msk.bf16.vlgmr.msra.gmra.mxu2 %vm2150_vm4, %v16446_v16  ;;  %v7474_v2 = vpack.c.bf16 %v7472_v6, %v7472_v6  ;;  %v12502_v27 = vor.u32 %v14527_v1, %v12499_v53  ;;  %v14685_v22 = vld [vmem:[#allocation12 + $0x116c] sm:$0xf0]  ;;  %v14554_v23 = vld [vmem:[#allocation12 + $0xd54] sm:$0xf0]  ;;  %v14551_v5 = vld [vmem:[#allocation12 + $0xd44] sm:$0xf] }
 0x426   :  { %12426 = vmatmul.msk.bf16.vlgmr.msra.gmra.mxu3 %vm2150_vm4, %v16446_v16  ;;  %12967 = vmatmul.msk.bf16.vlgmr.msrb.gmra.mxu0 %vm2150_vm4, %v16630_v36  ;;  %v12599_v54 = vld [vmem:[#allocation12 + $0xd50] sm:$0xf0]  ;;  %v12606_v63 = vor.u32 %v14554_v23, %v12605_v3  ;;  %v12591_v53 = vld [vmem:[#allocation12 + $0xd38] sm:$0xf0]  ;;  %v14571_v3 = vld [vmem:[#allocation12 + $0xde4] sm:$0xf] }
 0x427   :  { %6450 = vmatpush.bf16.msra.mxu2 %v12554_v52  ;;  %6437 = vmatpush.bf16.msra.mxu1 %v12550_v26  ;;  %v7494_v32 = vunpack.c.l.b16 %v7474_v2  ;;  %v12510_v52 = vor.u32 %v14528_v37, %v12507_v10  ;;  %v14681_v2 = vld [vmem:[#allocation12 + $0x114c] sm:$0xf0]  ;;  %v12602_v40 = vor.u32 %v14551_v5, %v12599_v54  ;;  %v13125_v37 = vld [vmem:[#allocation12 + $0x1120] sm:$0xf]  ;;  %v12683_v23 = vld [vmem:[#allocation12 + $0xdf0] sm:$0xf0] }
 0x428   :  { %v4795_v59 = vpop.f32.mrf.mxu2  ;;  %6463 = vmatpush.bf16.msra.mxu3 %v12558_v20  ;;  %7752 = vmatpush.bf16.msrb.mxu0 %v13090_v19  ;;  %v14556_v20 = vld [vmem:[#allocation12 + $0xd6c] sm:$0xf]  ;;  %v12691_v5 = vld [vmem:[#allocation12 + $0xdf8] sm:$0xf0]  ;;  %v13225_v54 = vld [vmem:[#allocation12 + $0x11e0] sm:$0xf] }
 0x429   :  { %v16647_v16 = vadd.f32 %v4795_v59, %v16624_v15  ;;  %v4808_v21 = vpop.f32.mrf.mxu3  ;;  %v12526_v15 = vor.u32 %v14532_v38, %v12523_v29  ;;  %v7497_v34 = vsel %vm2212_vm5, %v7496_v31, %v7494_v32  ;;  %v14552_v38 = vld [vmem:[#allocation12 + $0xd4c] sm:$0xf]  ;;  %v7661_v29 = vunpack.c.l.b16 %v7641_v41  ;;  %v14677_v32 = vld [vmem:[#allocation12 + $0x112c] sm:$0xf0]  ;;  %v7805_v41 = vld [vmem:[#allocation3 + $0x66] sm:$0x1] }
 0x42a   :  { %v16650_v58 = vadd.f32 %v4808_v21, %v16627_v61  ;;  %v4784_v60 = vpop.f32.mrf.mxu1  ;;  %v13041_v61 = vld [vmem:[#allocation12 + $0x1080] sm:$0xf]  ;;  %v16653_v28 = vpack.c.b16 %v7497_v34, %v7497_v34  ;;  %v13126_v47 = vor.u32 %v14677_v32, %v13125_v37 }
 0x42b   :  { %v6099_v0 = vpop.f32.mrf.mxu0  ;;  %6451 = vmatpush.bf16.msra.mxu2 %v12538_v12  ;;  %6438 = vmatpush.bf16.msra.mxu1 %v12534_v50  ;;  %v13042_v26 = vor.u32 %v14657_v42, %v13041_v61  ;;  %v12622_v12 = vor.u32 %v14558_v49, %v12621_v9  ;;  %v12618_v50 = vor.u32 %v14555_v4, %v12615_v46  ;;  %v13141_v21 = vld [vmem:[#allocation12 + $0x1140] sm:$0xf]  ;;  %v12589_v60 = vld [vmem:[#allocation12 + $0xd28] sm:$0xf]  ;;  %v7662_v34 = vrot.slane %v7661_v29, 7 }
 0x42c   :  { %6464 = vmatpush.bf16.msra.mxu3 %v12542_v35  ;;  %7753 = vmatpush.bf16.msrb.mxu0 %v13074_v11  ;;  %v12626_v35 = vor.u32 %v14556_v20, %v12623_v48  ;;  %v13158_v11 = vor.u32 %v14685_v22, %v13157_v43  ;;  %v14550_v0 = vld [vmem:[#allocation12 + $0xd34] sm:$0xf0]  ;;  %v12573_v9 = vld [vmem:[#allocation12 + $0xd08] sm:$0xf]  ;;  %v12575_v46 = vld [vmem:[#allocation12 + $0xd18] sm:$0xf0] }
 0x42d   :  { %v14546_v49 = vld [vmem:[#allocation12 + $0xd14] sm:$0xf0]  ;;  %v14673_v20 = vld [vmem:[#allocation12 + $0x110c] sm:$0xf0]  ;;  %v12689_v22 = vld [vmem:[#allocation12 + $0xde8] sm:$0xf] }
 0x42e   :  { %v12574_v48 = vor.u32 %v14546_v49, %v12573_v9  ;;  %v14563_v9 = vld [vmem:[#allocation12 + $0xda4] sm:$0xf]  ;;  %v12651_v49 = vld [vmem:[#allocation12 + $0xdb0] sm:$0xf0] }
 0x42f   :  { %6452 = vmatpush.bf16.msra.mxu2 %v12522_v56  ;;  %6439 = vmatpush.bf16.msra.mxu1 %v12518_v44  ;;  %v13142_v44 = vor.u32 %v14681_v2, %v13141_v21  ;;  %v7807_v2 = vpack.c.bf16 %v7805_v41, %v7805_v41 }
 0x430   :  { %v4797_v33 = vpop.f32.mrf.mxu2  ;;  %6465 = vmatpush.bf16.msra.mxu3 %v12526_v15  ;;  %7754 = vmatpush.bf16.msrb.mxu0 %v13058_v24  ;;  %v14548_v15 = vld [vmem:[#allocation12 + $0xd2c] sm:$0xf] }
 0x431   :  { %v4810_v19 = vpop.f32.mrf.mxu3  ;;  %v14543_v33 = vld [vmem:[#allocation12 + $0xd04] sm:$0xf] }
 0x432   :  { %v4948_v17 = vpop.f32.mrf.mxu1 }
 0x433   :  { %v16656_v6 = vadd.f32 %v4948_v17, %v16633_v57  ;;  %v6263_v45 = vpop.f32.mrf.mxu0  ;;  %6453 = vmatpush.bf16.msra.mxu2 %v12506_v7  ;;  %6440 = vmatpush.bf16.msra.mxu1 %v12502_v27  ;;  %v12607_v57 = vld [vmem:[#allocation12 + $0xd58] sm:$0xf0]  ;;  %v12590_v7 = vor.u32 %v14550_v0, %v12589_v60  ;;  %v12586_v27 = vor.u32 %v14547_v14, %v12583_v30  ;;  %v14574_v17 = vld [vmem:[#allocation12 + $0xdf4] sm:$0xf0]  ;;  %v12673_v60 = vld [vmem:[#allocation12 + $0xdc8] sm:$0xf] }
 0x434   :  { %v16659_v59 = vadd.f32 %v6263_v45, %v16636_v55  ;;  %6466 = vmatpush.bf16.msra.mxu3 %v12510_v52  ;;  %7755 = vmatpush.bf16.msrb.mxu0 %v13042_v26  ;;  %v7638_v55 = vld [vmem:[#allocation3 + $0x25] sm:$0x1]  ;;  %v12610_v56 = vor.u32 %v14552_v38, %v12607_v57  ;;  %v12567_v52 = vld [vmem:[#allocation12 + $0xd10] sm:$0xf0]  ;;  %v14544_v26 = vld [vmem:[#allocation12 + $0xd0c] sm:$0xf] }
 0x435   :  { %12492 = vmatmul.msk.bf16.vlgmr.msrb.gmra.mxu1 %vm2150_vm4, %v16469_v13  ;;  %12493 = vmatmul.msk.bf16.vlgmr.msrb.gmra.mxu2 %vm2150_vm4, %v16469_v13  ;;  %v7640_v1 = vpack.c.bf16 %v7638_v55, %v7638_v55  ;;  %v12570_v43 = vor.u32 %v14543_v33, %v12567_v52  ;;  %v14701_v38 = vld [vmem:[#allocation12 + $0x11ec] sm:$0xf0]  ;;  %v14570_v0 = vld [vmem:[#allocation12 + $0xdd4] sm:$0xf0]  ;;  %v14567_v14 = vld [vmem:[#allocation12 + $0xdc4] sm:$0xf] }
 0x436   :  { %12494 = vmatmul.msk.bf16.vlgmr.msrb.gmra.mxu3 %vm2150_vm4, %v16469_v13  ;;  %13035 = vmatmul.msk.bf16.vlgmr.msra.gmra.mxu0 %vm2150_vm4, %v16653_v28  ;;  %v12667_v30 = vld [vmem:[#allocation12 + $0xdd0] sm:$0xf0]  ;;  %v12674_v37 = vor.u32 %v14570_v0, %v12673_v60  ;;  %v12659_v52 = vld [vmem:[#allocation12 + $0xdb8] sm:$0xf0]  ;;  %v14587_v60 = vld [vmem:[#allocation12 + $0xe64] sm:$0xf] }
 0x437   :  { %6616 = vmatpush.bf16.msrb.mxu2 %v12622_v12  ;;  %6603 = vmatpush.bf16.msrb.mxu1 %v12618_v50  ;;  %v7660_v4 = vunpack.c.l.b16 %v7640_v1  ;;  %v12578_v12 = vor.u32 %v14544_v26, %v12575_v46  ;;  %v14697_v1 = vld [vmem:[#allocation12 + $0x11cc] sm:$0xf0]  ;;  %v12670_v32 = vor.u32 %v14567_v14, %v12667_v30  ;;  %v13193_v26 = vld [vmem:[#allocation12 + $0x11a0] sm:$0xf]  ;;  %v12751_v0 = vld [vmem:[#allocation12 + $0xe70] sm:$0xf0] }
 0x438   :  { %v4961_v31 = vpop.f32.mrf.mxu2  ;;  %6629 = vmatpush.bf16.msrb.mxu3 %v12626_v35  ;;  %7918 = vmatpush.bf16.msra.mxu0 %v13158_v11  ;;  %v14572_v35 = vld [vmem:[#allocation12 + $0xdec] sm:$0xf]  ;;  %v12759_v14 = vld [vmem:[#allocation12 + $0xe78] sm:$0xf0]  ;;  %v13293_v30 = vld [vmem:[#allocation12 + $0x1260] sm:$0xf] }
 0x439   :  { %v16670_v13 = vadd.f32 %v4961_v31, %v16647_v16  ;;  %v4974_v24 = vpop.f32.mrf.mxu3  ;;  %v12594_v16 = vor.u32 %v14548_v15, %v12591_v53  ;;  %v7663_v19 = vsel %vm2212_vm5, %v7662_v34, %v7660_v4  ;;  %v14568_v15 = vld [vmem:[#allocation12 + $0xdcc] sm:$0xf]  ;;  %v7827_v53 = vunpack.c.l.b16 %v7807_v2  ;;  %v14693_v4 = vld [vmem:[#allocation12 + $0x11ac] sm:$0xf0]  ;;  %v7971_v2 = vld [vmem:[#allocation3 + $0x68] sm:$0x1] }
 0x43a   :  { %v16673_v10 = vadd.f32 %v4974_v24, %v16650_v58  ;;  %v4950_v61 = vpop.f32.mrf.mxu1  ;;  %v13109_v58 = vld [vmem:[#allocation12 + $0x1100] sm:$0xf]  ;;  %v16676_v21 = vpack.c.b16 %v7663_v19, %v7663_v19  ;;  %v13194_v41 = vor.u32 %v14693_v4, %v13193_v26 }
 0x43b   :  { %v6265_v42 = vpop.f32.mrf.mxu0  ;;  %6617 = vmatpush.bf16.msrb.mxu2 %v12606_v63  ;;  %6604 = vmatpush.bf16.msrb.mxu1 %v12602_v40  ;;  %v13110_v50 = vor.u32 %v14673_v20, %v13109_v58  ;;  %v12690_v63 = vor.u32 %v14574_v17, %v12689_v22  ;;  %v12686_v40 = vor.u32 %v14571_v3, %v12683_v23  ;;  %v13209_v24 = vld [vmem:[#allocation12 + $0x11c0] sm:$0xf]  ;;  %v12657_v61 = vld [vmem:[#allocation12 + $0xda8] sm:$0xf]  ;;  %v7828_v19 = vrot.slane %v7827_v53, 7 }
 0x43c   :  { %6630 = vmatpush.bf16.msrb.mxu3 %v12610_v56  ;;  %7919 = vmatpush.bf16.msra.mxu0 %v13142_v44  ;;  %v12694_v56 = vor.u32 %v14572_v35, %v12691_v5  ;;  %v13226_v44 = vor.u32 %v14701_v38, %v13225_v54  ;;  %v14566_v42 = vld [vmem:[#allocation12 + $0xdb4] sm:$0xf0]  ;;  %v12641_v22 = vld [vmem:[#allocation12 + $0xd88] sm:$0xf]  ;;  %v12643_v23 = vld [vmem:[#allocation12 + $0xd98] sm:$0xf0] }
 0x43d   :  { %v14562_v17 = vld [vmem:[#allocation12 + $0xd94] sm:$0xf0]  ;;  %v14689_v35 = vld [vmem:[#allocation12 + $0x118c] sm:$0xf0]  ;;  %v12757_v38 = vld [vmem:[#allocation12 + $0xe68] sm:$0xf] }
 0x43e   :  { %v12642_v5 = vor.u32 %v14562_v17, %v12641_v22  ;;  %v14579_v22 = vld [vmem:[#allocation12 + $0xe24] sm:$0xf]  ;;  %v12719_v17 = vld [vmem:[#allocation12 + $0xe30] sm:$0xf0] }
 0x43f   :  { %6618 = vmatpush.bf16.msrb.mxu2 %v12590_v7  ;;  %6605 = vmatpush.bf16.msrb.mxu1 %v12586_v27  ;;  %v13210_v27 = vor.u32 %v14697_v1, %v13209_v24  ;;  %v7973_v1 = vpack.c.bf16 %v7971_v2, %v7971_v2 }
 0x440   :  { %v4963_v45 = vpop.f32.mrf.mxu2  ;;  %6631 = vmatpush.bf16.msrb.mxu3 %v12594_v16  ;;  %7920 = vmatpush.bf16.msra.mxu0 %v13126_v47  ;;  %v14564_v16 = vld [vmem:[#allocation12 + $0xdac] sm:$0xf] }
 0x441   :  { %v4976_v11 = vpop.f32.mrf.mxu3  ;;  %v14559_v45 = vld [vmem:[#allocation12 + $0xd84] sm:$0xf] }
 0x442   :  { %v5114_v57 = vpop.f32.mrf.mxu1 }
 0x443   :  { %v16679_v55 = vadd.f32 %v5114_v57, %v16656_v6  ;;  %v6429_v29 = vpop.f32.mrf.mxu0  ;;  %6619 = vmatpush.bf16.msrb.mxu2 %v12574_v48  ;;  %6606 = vmatpush.bf16.msrb.mxu1 %v12570_v43  ;;  %v12675_v6 = vld [vmem:[#allocation12 + $0xdd8] sm:$0xf0]  ;;  %v12658_v48 = vor.u32 %v14566_v42, %v12657_v61  ;;  %v12654_v43 = vor.u32 %v14563_v9, %v12651_v49  ;;  %v14590_v57 = vld [vmem:[#allocation12 + $0xe74] sm:$0xf0]  ;;  %v12741_v61 = vld [vmem:[#allocation12 + $0xe48] sm:$0xf] }
 0x444   :  { %v16682_v31 = vadd.f32 %v6429_v29, %v16659_v59  ;;  %6632 = vmatpush.bf16.msrb.mxu3 %v12578_v12  ;;  %7921 = vmatpush.bf16.msra.mxu0 %v13110_v50  ;;  %v7804_v59 = vld [vmem:[#allocation3 + $0x26] sm:$0x1]  ;;  %v12678_v7 = vor.u32 %v14568_v15, %v12675_v6  ;;  %v12635_v12 = vld [vmem:[#allocation12 + $0xd90] sm:$0xf0]  ;;  %v14560_v50 = vld [vmem:[#allocation12 + $0xd8c] sm:$0xf] }
 0x445   :  { %12560 = vmatmul.msk.bf16.vlgmr.msra.gmra.mxu1 %vm2150_vm4, %v16492_v25  ;;  %12561 = vmatmul.msk.bf16.vlgmr.msra.gmra.mxu2 %vm2150_vm4, %v16492_v25  ;;  %v7806_v33 = vpack.c.bf16 %v7804_v59, %v7804_v59  ;;  %v12638_v54 = vor.u32 %v14559_v45, %v12635_v12  ;;  %v14717_v15 = vld [vmem:[#allocation12 + $0x126c] sm:$0xf0]  ;;  %v14586_v42 = vld [vmem:[#allocation12 + $0xe54] sm:$0xf0]  ;;  %v14583_v9 = vld [vmem:[#allocation12 + $0xe44] sm:$0xf] }
 0x446   :  { %12562 = vmatmul.msk.bf16.vlgmr.msra.gmra.mxu3 %vm2150_vm4, %v16492_v25  ;;  %13103 = vmatmul.msk.bf16.vlgmr.msrb.gmra.mxu0 %vm2150_vm4, %v16676_v21  ;;  %v12735_v49 = vld [vmem:[#allocation12 + $0xe50] sm:$0xf0]  ;;  %v12742_v26 = vor.u32 %v14586_v42, %v12741_v61  ;;  %v12727_v12 = vld [vmem:[#allocation12 + $0xe38] sm:$0xf0]  ;;  %v14603_v61 = vld [vmem:[#allocation12 + $0xee4] sm:$0xf] }
 0x447   :  { %6782 = vmatpush.bf16.msra.mxu2 %v12690_v63  ;;  %6769 = vmatpush.bf16.msra.mxu1 %v12686_v40  ;;  %v7826_v3 = vunpack.c.l.b16 %v7806_v33  ;;  %v12646_v63 = vor.u32 %v14560_v50, %v12643_v23  ;;  %v14713_v33 = vld [vmem:[#allocation12 + $0x124c] sm:$0xf0]  ;;  %v12738_v4 = vor.u32 %v14583_v9, %v12735_v49  ;;  %v13261_v50 = vld [vmem:[#allocation12 + $0x1220] sm:$0xf]  ;;  %v12819_v42 = vld [vmem:[#allocation12 + $0xef0] sm:$0xf0] }
 0x448   :  { %v5127_v34 = vpop.f32.mrf.mxu2  ;;  %6795 = vmatpush.bf16.msra.mxu3 %v12694_v56  ;;  %8084 = vmatpush.bf16.msrb.mxu0 %v13226_v44  ;;  %v14588_v56 = vld [vmem:[#allocation12 + $0xe6c] sm:$0xf]  ;;  %v12827_v9 = vld [vmem:[#allocation12 + $0xef8] sm:$0xf0]  ;;  %v13361_v49 = vld [vmem:[#allocation12 + $0x12e0] sm:$0xf] }
 0x449   :  { %v16693_v25 = vadd.f32 %v5127_v34, %v16670_v13  ;;  %v5140_v47 = vpop.f32.mrf.mxu3  ;;  %v12662_v13 = vor.u32 %v14564_v16, %v12659_v52  ;;  %v7829_v11 = vsel %vm2212_vm5, %v7828_v19, %v7826_v3  ;;  %v14584_v16 = vld [vmem:[#allocation12 + $0xe4c] sm:$0xf]  ;;  %v7993_v52 = vunpack.c.l.b16 %v7973_v1  ;;  %v14709_v3 = vld [vmem:[#allocation12 + $0x122c] sm:$0xf0]  ;;  %v8137_v1 = vld [vmem:[#allocation3 + $0x69] sm:$0x1] }
 0x44a   :  { %v16696_v46 = vadd.f32 %v5140_v47, %v16673_v10  ;;  %v5116_v58 = vpop.f32.mrf.mxu1  ;;  %v13177_v10 = vld [vmem:[#allocation12 + $0x1180] sm:$0xf]  ;;  %v16699_v24 = vpack.c.b16 %v7829_v11, %v7829_v11  ;;  %v13262_v2 = vor.u32 %v14709_v3, %v13261_v50 }
 0x44b   :  { %v6431_v20 = vpop.f32.mrf.mxu0  ;;  %6783 = vmatpush.bf16.msra.mxu2 %v12674_v37  ;;  %6770 = vmatpush.bf16.msra.mxu1 %v12670_v32  ;;  %v13178_v40 = vor.u32 %v14689_v35, %v13177_v10  ;;  %v12758_v37 = vor.u32 %v14590_v57, %v12757_v38  ;;  %v12754_v32 = vor.u32 %v14587_v60, %v12751_v0  ;;  %v13277_v47 = vld [vmem:[#allocation12 + $0x1240] sm:$0xf]  ;;  %v12725_v58 = vld [vmem:[#allocation12 + $0xe28] sm:$0xf]  ;;  %v7994_v11 = vrot.slane %v7993_v52, 7 }
 0x44c   :  { %6796 = vmatpush.bf16.msra.mxu3 %v12678_v7  ;;  %8085 = vmatpush.bf16.msrb.mxu0 %v13210_v27  ;;  %v12762_v7 = vor.u32 %v14588_v56, %v12759_v14  ;;  %v13294_v27 = vor.u32 %v14717_v15, %v13293_v30  ;;  %v14582_v20 = vld [vmem:[#allocation12 + $0xe34] sm:$0xf0]  ;;  %v12709_v38 = vld [vmem:[#allocation12 + $0xe08] sm:$0xf]  ;;  %v12711_v0 = vld [vmem:[#allocation12 + $0xe18] sm:$0xf0] }
 0x44d   :  { %v14578_v57 = vld [vmem:[#allocation12 + $0xe14] sm:$0xf0]  ;;  %v14705_v56 = vld [vmem:[#allocation12 + $0x120c] sm:$0xf0]  ;;  %v12825_v15 = vld [vmem:[#allocation12 + $0xee8] sm:$0xf] }
 0x44e   :  { %v12710_v14 = vor.u32 %v14578_v57, %v12709_v38  ;;  %v14595_v38 = vld [vmem:[#allocation12 + $0xea4] sm:$0xf]  ;;  %v12787_v57 = vld [vmem:[#allocation12 + $0xeb0] sm:$0xf0] }
 0x44f   :  { %6784 = vmatpush.bf16.msra.mxu2 %v12658_v48  ;;  %6771 = vmatpush.bf16.msra.mxu1 %v12654_v43  ;;  %v13278_v43 = vor.u32 %v14713_v33, %v13277_v47  ;;  %v8139_v33 = vpack.c.bf16 %v8137_v1, %v8137_v1 }
 0x450   :  { %v5129_v29 = vpop.f32.mrf.mxu2  ;;  %6797 = vmatpush.bf16.msra.mxu3 %v12662_v13  ;;  %8086 = vmatpush.bf16.msrb.mxu0 %v13194_v41  ;;  %v14580_v13 = vld [vmem:[#allocation12 + $0xe2c] sm:$0xf] }
 0x451   :  { %v5142_v44 = vpop.f32.mrf.mxu3  ;;  %v14575_v29 = vld [vmem:[#allocation12 + $0xe04] sm:$0xf] }
 0x452   :  { %v5280_v6 = vpop.f32.mrf.mxu1 }
 0x453   :  { %v16702_v59 = vadd.f32 %v5280_v6, %v16679_v55  ;;  %v6595_v53 = vpop.f32.mrf.mxu0  ;;  %6785 = vmatpush.bf16.msra.mxu2 %v12642_v5  ;;  %6772 = vmatpush.bf16.msra.mxu1 %v12638_v54  ;;  %v12743_v55 = vld [vmem:[#allocation12 + $0xe58] sm:$0xf0]  ;;  %v12726_v5 = vor.u32 %v14582_v20, %v12725_v58  ;;  %v12722_v54 = vor.u32 %v14579_v22, %v12719_v17  ;;  %v14606_v6 = vld [vmem:[#allocation12 + $0xef4] sm:$0xf0]  ;;  %v12809_v58 = vld [vmem:[#allocation12 + $0xec8] sm:$0xf] }
 0x454   :  { %v16705_v34 = vadd.f32 %v6595_v53, %v16682_v31  ;;  %6798 = vmatpush.bf16.msra.mxu3 %v12646_v63  ;;  %8087 = vmatpush.bf16.msrb.mxu0 %v13178_v40  ;;  %v7970_v31 = vld [vmem:[#allocation3 + $0x28] sm:$0x1]  ;;  %v12746_v48 = vor.u32 %v14584_v16, %v12743_v55  ;;  %v12703_v63 = vld [vmem:[#allocation12 + $0xe10] sm:$0xf0]  ;;  %v14576_v40 = vld [vmem:[#allocation12 + $0xe0c] sm:$0xf] }
 0x455   :  { %12628 = vmatmul.msk.bf16.vlgmr.msrb.gmra.mxu1 %vm2150_vm4, %v16515_v18  ;;  %12629 = vmatmul.msk.bf16.vlgmr.msrb.gmra.mxu2 %vm2150_vm4, %v16515_v18  ;;  %v7972_v45 = vpack.c.bf16 %v7970_v31, %v7970_v31  ;;  %v12706_v30 = vor.u32 %v14575_v29, %v12703_v63  ;;  %v14733_v16 = vld [vmem:[#allocation12 + $0x12ec] sm:$0xf0]  ;;  %v14602_v20 = vld [vmem:[#allocation12 + $0xed4] sm:$0xf0]  ;;  %v14599_v22 = vld [vmem:[#allocation12 + $0xec4] sm:$0xf] }
 0x456   :  { %12630 = vmatmul.msk.bf16.vlgmr.msrb.gmra.mxu3 %vm2150_vm4, %v16515_v18  ;;  %13171 = vmatmul.msk.bf16.vlgmr.msra.gmra.mxu0 %vm2150_vm4, %v16699_v24  ;;  %v12803_v17 = vld [vmem:[#allocation12 + $0xed0] sm:$0xf0]  ;;  %v12810_v50 = vor.u32 %v14602_v20, %v12809_v58  ;;  %v12795_v63 = vld [vmem:[#allocation12 + $0xeb8] sm:$0xf0]  ;;  %v14619_v58 = vld [vmem:[#allocation12 + $0xf64] sm:$0xf] }
 0x457   :  { %6948 = vmatpush.bf16.msrb.mxu2 %v12758_v37  ;;  %6935 = vmatpush.bf16.msrb.mxu1 %v12754_v32  ;;  %v7992_v60 = vunpack.c.l.b16 %v7972_v45  ;;  %v12714_v37 = vor.u32 %v14576_v40, %v12711_v0  ;;  %v14729_v45 = vld [vmem:[#allocation12 + $0x12cc] sm:$0xf0]  ;;  %v12806_v3 = vor.u32 %v14599_v22, %v12803_v17  ;;  %v13329_v40 = vld [vmem:[#allocation12 + $0x12a0] sm:$0xf]  ;;  %v12887_v20 = vld [vmem:[#allocation12 + $0xf70] sm:$0xf0] }
 0x458   :  { %v5293_v19 = vpop.f32.mrf.mxu2  ;;  %6961 = vmatpush.bf16.msrb.mxu3 %v12762_v7  ;;  %8250 = vmatpush.bf16.msra.mxu0 %v13294_v27  ;;  %v14604_v7 = vld [vmem:[#allocation12 + $0xeec] sm:$0xf]  ;;  %v12895_v22 = vld [vmem:[#allocation12 + $0xf78] sm:$0xf0]  ;;  %v13429_v17 = vld [vmem:[#allocation12 + $0x1360] sm:$0xf] }
 0x459   :  { %v16716_v18 = vadd.f32 %v5293_v19, %v16693_v25  ;;  %v5306_v41 = vpop.f32.mrf.mxu3  ;;  %v12730_v25 = vor.u32 %v14580_v13, %v12727_v12  ;;  %v7995_v44 = vsel %vm2212_vm5, %v7994_v11, %v7992_v60  ;;  %v14600_v13 = vld [vmem:[#allocation12 + $0xecc] sm:$0xf]  ;;  %v8159_v12 = vunpack.c.l.b16 %v8139_v33  ;;  %v14725_v60 = vld [vmem:[#allocation12 + $0x12ac] sm:$0xf0]  ;;  %v8303_v33 = vld [vmem:[#allocation3 + $0x6a] sm:$0x1] }
 0x45a   :  { %v16719_v23 = vadd.f32 %v5306_v41, %v16696_v46  ;;  %v5282_v10 = vpop.f32.mrf.mxu1  ;;  %v13245_v46 = vld [vmem:[#allocation12 + $0x1200] sm:$0xf]  ;;  %v16722_v47 = vpack.c.b16 %v7995_v44, %v7995_v44  ;;  %v13330_v1 = vor.u32 %v14725_v60, %v13329_v40 }
 0x45b   :  { %v6597_v35 = vpop.f32.mrf.mxu0  ;;  %6949 = vmatpush.bf16.msrb.mxu2 %v12742_v26  ;;  %6936 = vmatpush.bf16.msrb.mxu1 %v12738_v4  ;;  %v13246_v32 = vor.u32 %v14705_v56, %v13245_v46  ;;  %v12826_v26 = vor.u32 %v14606_v6, %v12825_v15  ;;  %v12822_v4 = vor.u32 %v14603_v61, %v12819_v42  ;;  %v13345_v41 = vld [vmem:[#allocation12 + $0x12c0] sm:$0xf]  ;;  %v12793_v10 = vld [vmem:[#allocation12 + $0xea8] sm:$0xf]  ;;  %v8160_v44 = vrot.slane %v8159_v12, 7 }
 0x45c   :  { %6962 = vmatpush.bf16.msrb.mxu3 %v12746_v48  ;;  %8251 = vmatpush.bf16.msra.mxu0 %v13278_v43  ;;  %v12830_v48 = vor.u32 %v14604_v7, %v12827_v9  ;;  %v13362_v43 = vor.u32 %v14733_v16, %v13361_v49  ;;  %v14598_v35 = vld [vmem:[#allocation12 + $0xeb4] sm:$0xf0]  ;;  %v12777_v15 = vld [vmem:[#allocation12 + $0xe88] sm:$0xf]  ;;  %v12779_v42 = vld [vmem:[#allocation12 + $0xe98] sm:$0xf0] }
 0x45d   :  { %v14594_v6 = vld [vmem:[#allocation12 + $0xe94] sm:$0xf0]  ;;  %v14721_v7 = vld [vmem:[#allocation12 + $0x128c] sm:$0xf0]  ;;  %v12893_v16 = vld [vmem:[#allocation12 + $0xf68] sm:$0xf] }
 0x45e   :  { %v12778_v9 = vor.u32 %v14594_v6, %v12777_v15  ;;  %v14611_v15 = vld [vmem:[#allocation12 + $0xf24] sm:$0xf]  ;;  %v12855_v6 = vld [vmem:[#allocation12 + $0xf30] sm:$0xf0] }
 0x45f   :  { %6950 = vmatpush.bf16.msrb.mxu2 %v12726_v5  ;;  %6937 = vmatpush.bf16.msrb.mxu1 %v12722_v54  ;;  %v13346_v54 = vor.u32 %v14729_v45, %v13345_v41  ;;  %v8305_v45 = vpack.c.bf16 %v8303_v33, %v8303_v33 }
 0x460   :  { %v5295_v53 = vpop.f32.mrf.mxu2  ;;  %6963 = vmatpush.bf16.msrb.mxu3 %v12730_v25  ;;  %8252 = vmatpush.bf16.msra.mxu0 %v13262_v2  ;;  %v14596_v25 = vld [vmem:[#allocation12 + $0xeac] sm:$0xf] }
 0x461   :  { %v5308_v27 = vpop.f32.mrf.mxu3  ;;  %v14591_v53 = vld [vmem:[#allocation12 + $0xe84] sm:$0xf] }
 0x462   :  { %v5446_v55 = vpop.f32.mrf.mxu1 }
 0x463   :  { %v16725_v31 = vadd.f32 %v5446_v55, %v16702_v59  ;;  %v6761_v52 = vpop.f32.mrf.mxu0  ;;  %6951 = vmatpush.bf16.msrb.mxu2 %v12710_v14  ;;  %6938 = vmatpush.bf16.msrb.mxu1 %v12706_v30  ;;  %v12811_v59 = vld [vmem:[#allocation12 + $0xed8] sm:$0xf0]  ;;  %v12794_v14 = vor.u32 %v14598_v35, %v12793_v10  ;;  %v12790_v30 = vor.u32 %v14595_v38, %v12787_v57  ;;  %v14622_v55 = vld [vmem:[#allocation12 + $0xf74] sm:$0xf0]  ;;  %v12877_v10 = vld [vmem:[#allocation12 + $0xf48] sm:$0xf] }
 0x464   :  { %v16728_v19 = vadd.f32 %v6761_v52, %v16705_v34  ;;  %6964 = vmatpush.bf16.msrb.mxu3 %v12714_v37  ;;  %8253 = vmatpush.bf16.msra.mxu0 %v13246_v32  ;;  %v8136_v34 = vld [vmem:[#allocation3 + $0x29] sm:$0x1]  ;;  %v12814_v5 = vor.u32 %v14600_v13, %v12811_v59  ;;  %v12771_v37 = vld [vmem:[#allocation12 + $0xe90] sm:$0xf0]  ;;  %v14592_v32 = vld [vmem:[#allocation12 + $0xe8c] sm:$0xf] }
 0x465   :  { %12696 = vmatmul.msk.bf16.vlgmr.msra.gmra.mxu1 %vm2150_vm4, %v16538_v8  ;;  %12697 = vmatmul.msk.bf16.vlgmr.msra.gmra.mxu2 %vm2150_vm4, %v16538_v8  ;;  %v8138_v29 = vpack.c.bf16 %v8136_v34, %v8136_v34  ;;  %v12774_v49 = vor.u32 %v14591_v53, %v12771_v37  ;;  %v14749_v13 = vld [vmem:[#allocation12 + $0x136c] sm:$0xf0]  ;;  %v14618_v35 = vld [vmem:[#allocation12 + $0xf54] sm:$0xf0]  ;;  %v14615_v38 = vld [vmem:[#allocation12 + $0xf44] sm:$0xf] }
 0x466   :  { %12698 = vmatmul.msk.bf16.vlgmr.msra.gmra.mxu3 %vm2150_vm4, %v16538_v8  ;;  %13239 = vmatmul.msk.bf16.vlgmr.msrb.gmra.mxu0 %vm2150_vm4, %v16722_v47  ;;  %v12871_v57 = vld [vmem:[#allocation12 + $0xf50] sm:$0xf0]  ;;  %v12878_v40 = vor.u32 %v14618_v35, %v12877_v10  ;;  %v12863_v37 = vld [vmem:[#allocation12 + $0xf38] sm:$0xf0]  ;;  %v14635_v10 = vld [vmem:[#allocation12 + $0xfe4] sm:$0xf] }
 0x467   :  { %7114 = vmatpush.bf16.msra.mxu2 %v12826_v26  ;;  %7101 = vmatpush.bf16.msra.mxu1 %v12822_v4  ;;  %v8158_v61 = vunpack.c.l.b16 %v8138_v29  ;;  %v12782_v26 = vor.u32 %v14592_v32, %v12779_v42  ;;  %v14745_v29 = vld [vmem:[#allocation12 + $0x134c] sm:$0xf0]  ;;  %v12874_v60 = vor.u32 %v14615_v38, %v12871_v57  ;;  %v13397_v32 = vld [vmem:[#allocation12 + $0x1320] sm:$0xf]  ;;  %v12955_v35 = vld [vmem:[#allocation12 + $0xff0] sm:$0xf0] }
 0x468   :  { %v5459_v11 = vpop.f32.mrf.mxu2  ;;  %7127 = vmatpush.bf16.msra.mxu3 %v12830_v48  ;;  %8416 = vmatpush.bf16.msrb.mxu0 %v13362_v43  ;;  %v14620_v48 = vld [vmem:[#allocation12 + $0xf6c] sm:$0xf]  ;;  %v12963_v38 = vld [vmem:[#allocation12 + $0xff8] sm:$0xf0]  ;;  %v13497_v57 = vld [vmem:[#allocation12 + $0x13e0] sm:$0xf] }
 0x469   :  { %v16739_v8 = vadd.f32 %v5459_v11, %v16716_v18  ;;  %v5472_v2 = vpop.f32.mrf.mxu3  ;;  %v12798_v18 = vor.u32 %v14596_v25, %v12795_v63  ;;  %v8161_v27 = vsel %vm2212_vm5, %v8160_v44, %v8158_v61  ;;  %v14616_v25 = vld [vmem:[#allocation12 + $0xf4c] sm:$0xf]  ;;  %v8325_v63 = vunpack.c.l.b16 %v8305_v45  ;;  %v14741_v61 = vld [vmem:[#allocation12 + $0x132c] sm:$0xf0]  ;;  %v8469_v45 = vld [vmem:[#allocation3 + $0x6b] sm:$0x1] }
 0x46a   :  { %v16742_v0 = vadd.f32 %v5472_v2, %v16719_v23  ;;  %v5448_v46 = vpop.f32.mrf.mxu1  ;;  %v13313_v23 = vld [vmem:[#allocation12 + $0x1280] sm:$0xf]  ;;  %v16745_v41 = vpack.c.b16 %v8161_v27, %v8161_v27  ;;  %v13398_v33 = vor.u32 %v14741_v61, %v13397_v32 }
 0x46b   :  { %v6763_v56 = vpop.f32.mrf.mxu0  ;;  %7115 = vmatpush.bf16.msra.mxu2 %v12810_v50  ;;  %7102 = vmatpush.bf16.msra.mxu1 %v12806_v3  ;;  %v13314_v4 = vor.u32 %v14721_v7, %v13313_v23  ;;  %v12894_v50 = vor.u32 %v14622_v55, %v12893_v16  ;;  %v12890_v3 = vor.u32 %v14619_v58, %v12887_v20  ;;  %v13413_v2 = vld [vmem:[#allocation12 + $0x1340] sm:$0xf]  ;;  %v12861_v46 = vld [vmem:[#allocation12 + $0xf28] sm:$0xf]  ;;  %v8326_v27 = vrot.slane %v8325_v63, 7 }
 0x46c   :  { %7128 = vmatpush.bf16.msra.mxu3 %v12814_v5  ;;  %8417 = vmatpush.bf16.msrb.mxu0 %v13346_v54  ;;  %v12898_v5 = vor.u32 %v14620_v48, %v12895_v22  ;;  %v13430_v54 = vor.u32 %v14749_v13, %v13429_v17  ;;  %v14614_v56 = vld [vmem:[#allocation12 + $0xf34] sm:$0xf0]  ;;  %v12845_v16 = vld [vmem:[#allocation12 + $0xf08] sm:$0xf]  ;;  %v12847_v20 = vld [vmem:[#allocation12 + $0xf18] sm:$0xf0] }
 0x46d   :  { %v14610_v55 = vld [vmem:[#allocation12 + $0xf14] sm:$0xf0]  ;;  %v14737_v48 = vld [vmem:[#allocation12 + $0x130c] sm:$0xf0]  ;;  %v12961_v13 = vld [vmem:[#allocation12 + $0xfe8] sm:$0xf] }
 0x46e   :  { %v12846_v22 = vor.u32 %v14610_v55, %v12845_v16  ;;  %v14627_v16 = vld [vmem:[#allocation12 + $0xfa4] sm:$0xf]  ;;  %v12923_v55 = vld [vmem:[#allocation12 + $0xfb0] sm:$0xf0] }
 0x46f   :  { %7116 = vmatpush.bf16.msra.mxu2 %v12794_v14  ;;  %7103 = vmatpush.bf16.msra.mxu1 %v12790_v30  ;;  %v13414_v30 = vor.u32 %v14745_v29, %v13413_v2  ;;  %v8471_v29 = vpack.c.bf16 %v8469_v45, %v8469_v45 }
 0x470   :  { %v5461_v52 = vpop.f32.mrf.mxu2  ;;  %7129 = vmatpush.bf16.msra.mxu3 %v12798_v18  ;;  %8418 = vmatpush.bf16.msrb.mxu0 %v13330_v1  ;;  %v14612_v18 = vld [vmem:[#allocation12 + $0xf2c] sm:$0xf] }
 0x471   :  { %v5474_v43 = vpop.f32.mrf.mxu3  ;;  %v14607_v52 = vld [vmem:[#allocation12 + $0xf04] sm:$0xf] }
 0x472   :  { %v5612_v59 = vpop.f32.mrf.mxu1 }
 0x473   :  { %v16748_v34 = vadd.f32 %v5612_v59, %v16725_v31  ;;  %v6927_v12 = vpop.f32.mrf.mxu0  ;;  %7117 = vmatpush.bf16.msra.mxu2 %v12778_v9  ;;  %7104 = vmatpush.bf16.msra.mxu1 %v12774_v49  ;;  %v12879_v31 = vld [vmem:[#allocation12 + $0xf58] sm:$0xf0]  ;;  %v12862_v9 = vor.u32 %v14614_v56, %v12861_v46  ;;  %v12858_v49 = vor.u32 %v14611_v15, %v12855_v6  ;;  %v14638_v59 = vld [vmem:[#allocation12 + $0xff4] sm:$0xf0]  ;;  %v12945_v46 = vld [vmem:[#allocation12 + $0xfc8] sm:$0xf] }
 0x474   :  { %v16751_v11 = vadd.f32 %v6927_v12, %v16728_v19  ;;  %7130 = vmatpush.bf16.msra.mxu3 %v12782_v26  ;;  %8419 = vmatpush.bf16.msrb.mxu0 %v13314_v4  ;;  %v8302_v19 = vld [vmem:[#allocation3 + $0x2a] sm:$0x1]  ;;  %v12882_v14 = vor.u32 %v14616_v25, %v12879_v31  ;;  %v12839_v26 = vld [vmem:[#allocation12 + $0xf10] sm:$0xf0]  ;;  %v14608_v4 = vld [vmem:[#allocation12 + $0xf0c] sm:$0xf] }
 0x475   :  { %12764 = vmatmul.msk.bf16.vlgmr.msrb.gmra.mxu1 %vm2150_vm4, %v16561_v62  ;;  %12765 = vmatmul.msk.bf16.vlgmr.msrb.gmra.mxu2 %vm2150_vm4, %v16561_v62  ;;  %v8304_v53 = vpack.c.bf16 %v8302_v19, %v8302_v19  ;;  %v12842_v17 = vor.u32 %v14607_v52, %v12839_v26  ;;  %v14765_v25 = vld [vmem:[#allocation12 + $0x13ec] sm:$0xf0]  ;;  %v14634_v56 = vld [vmem:[#allocation12 + $0xfd4] sm:$0xf0]  ;;  %v14631_v15 = vld [vmem:[#allocation12 + $0xfc4] sm:$0xf] }
 0x476   :  { %12766 = vmatmul.msk.bf16.vlgmr.msrb.gmra.mxu3 %vm2150_vm4, %v16561_v62  ;;  %13307 = vmatmul.msk.bf16.vlgmr.msra.gmra.mxu0 %vm2150_vm4, %v16745_v41  ;;  %v12939_v6 = vld [vmem:[#allocation12 + $0xfd0] sm:$0xf0]  ;;  %v12946_v32 = vor.u32 %v14634_v56, %v12945_v46  ;;  %v12931_v26 = vld [vmem:[#allocation12 + $0xfb8] sm:$0xf0]  ;;  %v14651_v46 = vld [vmem:[#allocation12 + $0x1064] sm:$0xf] }
 0x477   :  { %7280 = vmatpush.bf16.msrb.mxu2 %v12894_v50  ;;  %7267 = vmatpush.bf16.msrb.mxu1 %v12890_v3  ;;  %v8324_v58 = vunpack.c.l.b16 %v8304_v53  ;;  %v12850_v50 = vor.u32 %v14608_v4, %v12847_v20  ;;  %v14761_v53 = vld [vmem:[#allocation12 + $0x13cc] sm:$0xf0]  ;;  %v12942_v61 = vor.u32 %v14631_v15, %v12939_v6  ;;  %v13465_v4 = vld [vmem:[#allocation12 + $0x13a0] sm:$0xf]  ;;  %v13023_v56 = vld [vmem:[#allocation12 + $0x1070] sm:$0xf0] }
 0x478   :  { %v5625_v44 = vpop.f32.mrf.mxu2  ;;  %7293 = vmatpush.bf16.msrb.mxu3 %v12898_v5  ;;  %8582 = vmatpush.bf16.msra.mxu0 %v13430_v54  ;;  %v14636_v5 = vld [vmem:[#allocation12 + $0xfec] sm:$0xf]  ;;  %v13031_v15 = vld [vmem:[#allocation12 + $0x1078] sm:$0xf0]  ;;  %v13565_v6 = vld [vmem:[#allocation12 + $0x1460] sm:$0xf] }
 0x479   :  { %v16762_v62 = vadd.f32 %v5625_v44, %v16739_v8  ;;  %v5638_v1 = vpop.f32.mrf.mxu3  ;;  %v12866_v8 = vor.u32 %v14612_v18, %v12863_v37  ;;  %v8327_v43 = vsel %vm2212_vm5, %v8326_v27, %v8324_v58  ;;  %v14632_v18 = vld [vmem:[#allocation12 + $0xfcc] sm:$0xf]  ;;  %v8491_v37 = vunpack.c.l.b16 %v8471_v29  ;;  %v14757_v58 = vld [vmem:[#allocation12 + $0x13ac] sm:$0xf0]  ;;  %v8635_v29 = vld [vmem:[#allocation3 + $0x6c] sm:$0x1] }
 0x47a   :  { %v16765_v42 = vadd.f32 %v5638_v1, %v16742_v0  ;;  %v5614_v23 = vpop.f32.mrf.mxu1  ;;  %v13381_v0 = vld [vmem:[#allocation12 + $0x1300] sm:$0xf]  ;;  %v16768_v2 = vpack.c.b16 %v8327_v43, %v8327_v43  ;;  %v13466_v45 = vor.u32 %v14757_v58, %v13465_v4 }
 0x47b   :  { %v6929_v7 = vpop.f32.mrf.mxu0  ;;  %7281 = vmatpush.bf16.msrb.mxu2 %v12878_v40  ;;  %7268 = vmatpush.bf16.msrb.mxu1 %v12874_v60  ;;  %v13382_v3 = vor.u32 %v14737_v48, %v13381_v0  ;;  %v12962_v40 = vor.u32 %v14638_v59, %v12961_v13  ;;  %v12958_v60 = vor.u32 %v14635_v10, %v12955_v35  ;;  %v13481_v1 = vld [vmem:[#allocation12 + $0x13c0] sm:$0xf]  ;;  %v12929_v23 = vld [vmem:[#allocation12 + $0xfa8] sm:$0xf]  ;;  %v8492_v43 = vrot.slane %v8491_v37, 7 }
 0x47c   :  { %7294 = vmatpush.bf16.msrb.mxu3 %v12882_v14  ;;  %8583 = vmatpush.bf16.msra.mxu0 %v13414_v30  ;;  %v12966_v14 = vor.u32 %v14636_v5, %v12963_v38  ;;  %v13498_v30 = vor.u32 %v14765_v25, %v13497_v57  ;;  %v14630_v7 = vld [vmem:[#allocation12 + $0xfb4] sm:$0xf0]  ;;  %v12913_v13 = vld [vmem:[#allocation12 + $0xf88] sm:$0xf]  ;;  %v12915_v35 = vld [vmem:[#allocation12 + $0xf98] sm:$0xf0] }
 0x47d   :  { %v14626_v59 = vld [vmem:[#allocation12 + $0xf94] sm:$0xf0]  ;;  %v14753_v5 = vld [vmem:[#allocation12 + $0x138c] sm:$0xf0]  ;;  %v13029_v25 = vld [vmem:[#allocation12 + $0x1068] sm:$0xf] }
 0x47e   :  { %v12914_v38 = vor.u32 %v14626_v59, %v12913_v13  ;;  %v14643_v13 = vld [vmem:[#allocation12 + $0x1024] sm:$0xf]  ;;  %v12991_v59 = vld [vmem:[#allocation12 + $0x1030] sm:$0xf0] }
 0x47f   :  { %7282 = vmatpush.bf16.msrb.mxu2 %v12862_v9  ;;  %7269 = vmatpush.bf16.msrb.mxu1 %v12858_v49  ;;  %v13482_v49 = vor.u32 %v14761_v53, %v13481_v1  ;;  %v8637_v53 = vpack.c.bf16 %v8635_v29, %v8635_v29 }
 0x480   :  { %v5627_v12 = vpop.f32.mrf.mxu2  ;;  %7295 = vmatpush.bf16.msrb.mxu3 %v12866_v8  ;;  %8584 = vmatpush.bf16.msra.mxu0 %v13398_v33  ;;  %v14628_v8 = vld [vmem:[#allocation12 + $0xfac] sm:$0xf] }
 0x481   :  { %v5640_v54 = vpop.f32.mrf.mxu3  ;;  %v14623_v12 = vld [vmem:[#allocation12 + $0xf84] sm:$0xf] }
 0x482   :  { %v5778_v31 = vpop.f32.mrf.mxu1 }
 0x483   :  { %v16771_v19 = vadd.f32 %v5778_v31, %v16748_v34  ;;  %v7093_v63 = vpop.f32.mrf.mxu0  ;;  %7283 = vmatpush.bf16.msrb.mxu2 %v12846_v22  ;;  %7270 = vmatpush.bf16.msrb.mxu1 %v12842_v17  ;;  %v12947_v34 = vld [vmem:[#allocation12 + $0xfd8] sm:$0xf0]  ;;  %v12930_v22 = vor.u32 %v14630_v7, %v12929_v23  ;;  %v12926_v17 = vor.u32 %v14627_v16, %v12923_v55  ;;  %v14654_v31 = vld [vmem:[#allocation12 + $0x1074] sm:$0xf0]  ;;  %v13013_v23 = vld [vmem:[#allocation12 + $0x1048] sm:$0xf] }
 0x484   :  { %v16774_v44 = vadd.f32 %v7093_v63, %v16751_v11  ;;  %7296 = vmatpush.bf16.msrb.mxu3 %v12850_v50  ;;  %8585 = vmatpush.bf16.msra.mxu0 %v13382_v3  ;;  %v8468_v11 = vld [vmem:[#allocation3 + $0x2b] sm:$0x1]  ;;  %v12950_v9 = vor.u32 %v14632_v18, %v12947_v34  ;;  %v12907_v50 = vld [vmem:[#allocation12 + $0xf90] sm:$0xf0]  ;;  %v14624_v3 = vld [vmem:[#allocation12 + $0xf8c] sm:$0xf] }
 0x485   :  { %12832 = vmatmul.msk.bf16.vlgmr.msra.gmra.mxu1 %vm2150_vm4, %v16584_v39  ;;  %12833 = vmatmul.msk.bf16.vlgmr.msra.gmra.mxu2 %vm2150_vm4, %v16584_v39  ;;  %v8470_v52 = vpack.c.bf16 %v8468_v11, %v8468_v11  ;;  %v12910_v57 = vor.u32 %v14623_v12, %v12907_v50  ;;  %v14781_v18 = vld [vmem:[#allocation12 + $0x146c] sm:$0xf0]  ;;  %v14650_v7 = vld [vmem:[#allocation12 + $0x1054] sm:$0xf0]  ;;  %v14647_v16 = vld [vmem:[#allocation12 + $0x1044] sm:$0xf] }
 0x486   :  { %12834 = vmatmul.msk.bf16.vlgmr.msra.gmra.mxu3 %vm2150_vm4, %v16584_v39  ;;  %13375 = vmatmul.msk.bf16.vlgmr.msrb.gmra.mxu0 %vm2150_vm4, %v16768_v2  ;;  %v13007_v55 = vld [vmem:[#allocation12 + $0x1050] sm:$0xf0]  ;;  %v13014_v4 = vor.u32 %v14650_v7, %v13013_v23  ;;  %v12999_v50 = vld [vmem:[#allocation12 + $0x1038] sm:$0xf0]  ;;  %v14667_v23 = vld [vmem:[#allocation12 + $0x10e4] sm:$0xf] }
 0x487   :  { %7446 = vmatpush.bf16.msra.mxu2 %v12962_v40  ;;  %7433 = vmatpush.bf16.msra.mxu1 %v12958_v60  ;;  %v8490_v10 = vunpack.c.l.b16 %v8470_v52  ;;  %v12918_v40 = vor.u32 %v14624_v3, %v12915_v35  ;;  %v14777_v52 = vld [vmem:[#allocation12 + $0x144c] sm:$0xf0]  ;;  %v13010_v58 = vor.u32 %v14647_v16, %v13007_v55  ;;  %v13533_v3 = vld [vmem:[#allocation12 + $0x1420] sm:$0xf]  ;;  %v13091_v7 = vld [vmem:[#allocation12 + $0x10f0] sm:$0xf0] }
 0x488   :  { %v5791_v27 = vpop.f32.mrf.mxu2  ;;  %7459 = vmatpush.bf16.msra.mxu3 %v12966_v14  ;;  %8748 = vmatpush.bf16.msrb.mxu0 %v13498_v30  ;;  %v14652_v14 = vld [vmem:[#allocation12 + $0x106c] sm:$0xf]  ;;  %v13099_v16 = vld [vmem:[#allocation12 + $0x10f8] sm:$0xf0]  ;;  %v13633_v55 = vld [vmem:[#allocation12 + $0x14e0] sm:$0xf] }
 0x489   :  { %v16785_v39 = vadd.f32 %v5791_v27, %v16762_v62  ;;  %v5804_v33 = vpop.f32.mrf.mxu3  ;;  %v12934_v62 = vor.u32 %v14628_v8, %v12931_v26  ;;  %v8493_v54 = vsel %vm2212_vm5, %v8492_v43, %v8490_v10  ;;  %v14648_v8 = vld [vmem:[#allocation12 + $0x104c] sm:$0xf]  ;;  %v8657_v26 = vunpack.c.l.b16 %v8637_v53  ;;  %v14773_v10 = vld [vmem:[#allocation12 + $0x142c] sm:$0xf0]  ;;  %v8801_v53 = vld [vmem:[#allocation3 + $0x6d] sm:$0x1] }
 0x48a   :  { %v16788_v20 = vadd.f32 %v5804_v33, %v16765_v42  ;;  %v5780_v0 = vpop.f32.mrf.mxu1  ;;  %v13449_v42 = vld [vmem:[#allocation12 + $0x1380] sm:$0xf]  ;;  %v16791_v1 = vpack.c.b16 %v8493_v54, %v8493_v54  ;;  %v13534_v29 = vor.u32 %v14773_v10, %v13533_v3 }
 0x48b   :  { %v7095_v48 = vpop.f32.mrf.mxu0  ;;  %7447 = vmatpush.bf16.msra.mxu2 %v12946_v32  ;;  %7434 = vmatpush.bf16.msra.mxu1 %v12942_v61  ;;  %v13450_v60 = vor.u32 %v14753_v5, %v13449_v42  ;;  %v13030_v32 = vor.u32 %v14654_v31, %v13029_v25  ;;  %v13026_v61 = vor.u32 %v14651_v46, %v13023_v56  ;;  %v13549_v33 = vld [vmem:[#allocation12 + $0x1440] sm:$0xf]  ;;  %v12997_v0 = vld [vmem:[#allocation12 + $0x1028] sm:$0xf]  ;;  %v8658_v54 = vrot.slane %v8657_v26, 7 }
 0x48c   :  { %7460 = vmatpush.bf16.msra.mxu3 %v12950_v9  ;;  %8749 = vmatpush.bf16.msrb.mxu0 %v13482_v49  ;;  %v13034_v9 = vor.u32 %v14652_v14, %v13031_v15  ;;  %v13566_v49 = vor.u32 %v14781_v18, %v13565_v6  ;;  %v14646_v48 = vld [vmem:[#allocation12 + $0x1034] sm:$0xf0]  ;;  %v12981_v25 = vld [vmem:[#allocation12 + $0x1008] sm:$0xf]  ;;  %v12983_v56 = vld [vmem:[#allocation12 + $0x1018] sm:$0xf0] }
 0x48d   :  { %v14642_v31 = vld [vmem:[#allocation12 + $0x1014] sm:$0xf0]  ;;  %v14769_v14 = vld [vmem:[#allocation12 + $0x140c] sm:$0xf0]  ;;  %v13097_v18 = vld [vmem:[#allocation12 + $0x10e8] sm:$0xf] }
 0x48e   :  { %v12982_v15 = vor.u32 %v14642_v31, %v12981_v25  ;;  %v14659_v25 = vld [vmem:[#allocation12 + $0x10a4] sm:$0xf]  ;;  %v13059_v31 = vld [vmem:[#allocation12 + $0x10b0] sm:$0xf0] }
 0x48f   :  { %7448 = vmatpush.bf16.msra.mxu2 %v12930_v22  ;;  %7435 = vmatpush.bf16.msra.mxu1 %v12926_v17  ;;  %v13550_v17 = vor.u32 %v14777_v52, %v13549_v33  ;;  %v8803_v52 = vpack.c.bf16 %v8801_v53, %v8801_v53 }
 0x490   :  { %v5793_v63 = vpop.f32.mrf.mxu2  ;;  %7461 = vmatpush.bf16.msra.mxu3 %v12934_v62  ;;  %8750 = vmatpush.bf16.msrb.mxu0 %v13466_v45  ;;  %v14644_v62 = vld [vmem:[#allocation12 + $0x102c] sm:$0xf] }
 0x491   :  { %v5806_v30 = vpop.f32.mrf.mxu3  ;;  %v14639_v63 = vld [vmem:[#allocation12 + $0x1004] sm:$0xf] }
 0x492   :  { %v5944_v34 = vpop.f32.mrf.mxu1 }
 0x493   :  { %v16794_v11 = vadd.f32 %v5944_v34, %v16771_v19  ;;  %v7259_v37 = vpop.f32.mrf.mxu0  ;;  %7449 = vmatpush.bf16.msra.mxu2 %v12914_v38  ;;  %7436 = vmatpush.bf16.msra.mxu1 %v12910_v57  ;;  %v13015_v19 = vld [vmem:[#allocation12 + $0x1058] sm:$0xf0]  ;;  %v12998_v38 = vor.u32 %v14646_v48, %v12997_v0  ;;  %v12994_v57 = vor.u32 %v14643_v13, %v12991_v59  ;;  %v14670_v34 = vld [vmem:[#allocation12 + $0x10f4] sm:$0xf0]  ;;  %v13081_v0 = vld [vmem:[#allocation12 + $0x10c8] sm:$0xf] }
 0x494   :  { %v16797_v27 = vadd.f32 %v7259_v37, %v16774_v44  ;;  %7462 = vmatpush.bf16.msra.mxu3 %v12918_v40  ;;  %8751 = vmatpush.bf16.msrb.mxu0 %v13450_v60  ;;  %v8634_v44 = vld [vmem:[#allocation3 + $0x2c] sm:$0x1]  ;;  %v13018_v22 = vor.u32 %v14648_v8, %v13015_v19  ;;  %v12975_v40 = vld [vmem:[#allocation12 + $0x1010] sm:$0xf0]  ;;  %v14640_v60 = vld [vmem:[#allocation12 + $0x100c] sm:$0xf] }
 0x495   :  { %12900 = vmatmul.msk.bf16.vlgmr.msrb.gmra.mxu1 %vm2150_vm4, %v16607_v51  ;;  %12901 = vmatmul.msk.bf16.vlgmr.msrb.gmra.mxu2 %vm2150_vm4, %v16607_v51  ;;  %v8636_v12 = vpack.c.bf16 %v8634_v44, %v8634_v44  ;;  %v12978_v6 = vor.u32 %v14639_v63, %v12975_v40  ;;  %v14797_v8 = vld [vmem:[#allocation12 + $0x14ec] sm:$0xf0]  ;;  %v14666_v48 = vld [vmem:[#allocation12 + $0x10d4] sm:$0xf0]  ;;  %v14663_v13 = vld [vmem:[#allocation12 + $0x10c4] sm:$0xf] }
 0x496   :  { %12902 = vmatmul.msk.bf16.vlgmr.msrb.gmra.mxu3 %vm2150_vm4, %v16607_v51  ;;  %13443 = vmatmul.msk.bf16.vlgmr.msra.gmra.mxu0 %vm2150_vm4, %v16791_v1  ;;  %v13075_v59 = vld [vmem:[#allocation12 + $0x10d0] sm:$0xf0]  ;;  %v13082_v3 = vor.u32 %v14666_v48, %v13081_v0  ;;  %v13067_v40 = vld [vmem:[#allocation12 + $0x10b8] sm:$0xf0]  ;;  %v14683_v0 = vld [vmem:[#allocation12 + $0x1164] sm:$0xf] }
 0x497   :  { %7612 = vmatpush.bf16.msrb.mxu2 %v13030_v32  ;;  %7599 = vmatpush.bf16.msrb.mxu1 %v13026_v61  ;;  %v8656_v46 = vunpack.c.l.b16 %v8636_v12  ;;  %v12986_v32 = vor.u32 %v14640_v60, %v12983_v56  ;;  %v14793_v12 = vld [vmem:[#allocation12 + $0x14cc] sm:$0xf0]  ;;  %v13078_v10 = vor.u32 %v14663_v13, %v13075_v59  ;;  %v13601_v60 = vld [vmem:[#allocation12 + $0x14a0] sm:$0xf]  ;;  %v13159_v48 = vld [vmem:[#allocation12 + $0x1170] sm:$0xf0] }
 0x498   :  { %v5957_v43 = vpop.f32.mrf.mxu2  ;;  %7625 = vmatpush.bf16.msrb.mxu3 %v13034_v9  ;;  %8914 = vmatpush.bf16.msra.mxu0 %v13566_v49  ;;  %v14668_v9 = vld [vmem:[#allocation12 + $0x10ec] sm:$0xf]  ;;  %v13167_v13 = vld [vmem:[#allocation12 + $0x1178] sm:$0xf0]  ;;  %v13701_v59 = vld [vmem:[#allocation12 + $0x1560] sm:$0xf] }
 0x499   :  { %v16808_v51 = vadd.f32 %v5957_v43, %v16785_v39  ;;  %v5970_v45 = vpop.f32.mrf.mxu3  ;;  %v13002_v39 = vor.u32 %v14644_v62, %v12999_v50  ;;  %v8659_v30 = vsel %vm2212_vm5, %v8658_v54, %v8656_v46  ;;  %v14664_v62 = vld [vmem:[#allocation12 + $0x10cc] sm:$0xf]  ;;  %v8823_v50 = vunpack.c.l.b16 %v8803_v52  ;;  %v14789_v46 = vld [vmem:[#allocation12 + $0x14ac] sm:$0xf0]  ;;  %v8967_v52 = vld [vmem:[#allocation3 + $0x6e] sm:$0x1] }
 0x49a   :  { %v16811_v35 = vadd.f32 %v5970_v45, %v16788_v20  ;;  %v5946_v42 = vpop.f32.mrf.mxu1  ;;  %v13517_v20 = vld [vmem:[#allocation12 + $0x1400] sm:$0xf]  ;;  %v16814_v33 = vpack.c.b16 %v8659_v30, %v8659_v30  ;;  %v13602_v53 = vor.u32 %v14789_v46, %v13601_v60 }
 0x49b   :  { %v7261_v5 = vpop.f32.mrf.mxu0  ;;  %7613 = vmatpush.bf16.msrb.mxu2 %v13014_v4  ;;  %7600 = vmatpush.bf16.msrb.mxu1 %v13010_v58  ;;  %v13518_v61 = vor.u32 %v14769_v14, %v13517_v20  ;;  %v13098_v4 = vor.u32 %v14670_v34, %v13097_v18  ;;  %v13094_v58 = vor.u32 %v14667_v23, %v13091_v7  ;;  %v13617_v45 = vld [vmem:[#allocation12 + $0x14c0] sm:$0xf]  ;;  %v13065_v42 = vld [vmem:[#allocation12 + $0x10a8] sm:$0xf]  ;;  %v8824_v30 = vrot.slane %v8823_v50, 7 }
 0x49c   :  { %7626 = vmatpush.bf16.msrb.mxu3 %v13018_v22  ;;  %8915 = vmatpush.bf16.msra.mxu0 %v13550_v17  ;;  %v13102_v22 = vor.u32 %v14668_v9, %v13099_v16  ;;  %v13634_v17 = vor.u32 %v14797_v8, %v13633_v55  ;;  %v14662_v5 = vld [vmem:[#allocation12 + $0x10b4] sm:$0xf0]  ;;  %v13049_v18 = vld [vmem:[#allocation12 + $0x1088] sm:$0xf]  ;;  %v13051_v7 = vld [vmem:[#allocation12 + $0x1098] sm:$0xf0] }
 0x49d   :  { %v14658_v34 = vld [vmem:[#allocation12 + $0x1094] sm:$0xf0]  ;;  %v14785_v9 = vld [vmem:[#allocation12 + $0x148c] sm:$0xf0]  ;;  %v13165_v8 = vld [vmem:[#allocation12 + $0x1168] sm:$0xf] }
 0x49e   :  { %v13050_v16 = vor.u32 %v14658_v34, %v13049_v18  ;;  %v14675_v18 = vld [vmem:[#allocation12 + $0x1124] sm:$0xf]  ;;  %v13127_v34 = vld [vmem:[#allocation12 + $0x1130] sm:$0xf0] }
 0x49f   :  { %7614 = vmatpush.bf16.msrb.mxu2 %v12998_v38  ;;  %7601 = vmatpush.bf16.msrb.mxu1 %v12994_v57  ;;  %v13618_v57 = vor.u32 %v14793_v12, %v13617_v45  ;;  %v8969_v12 = vpack.c.bf16 %v8967_v52, %v8967_v52 }
 0x4a0   :  { %v5959_v37 = vpop.f32.mrf.mxu2  ;;  %7627 = vmatpush.bf16.msrb.mxu3 %v13002_v39  ;;  %8916 = vmatpush.bf16.msra.mxu0 %v13534_v29  ;;  %v14660_v39 = vld [vmem:[#allocation12 + $0x10ac] sm:$0xf] }
 0x4a1   :  { %v5972_v49 = vpop.f32.mrf.mxu3  ;;  %v14655_v37 = vld [vmem:[#allocation12 + $0x1084] sm:$0xf] }
 0x4a2   :  { %v6110_v19 = vpop.f32.mrf.mxu1 }
 0x4a3   :  { %v16817_v44 = vadd.f32 %v6110_v19, %v16794_v11  ;;  %v7425_v26 = vpop.f32.mrf.mxu0  ;;  %7615 = vmatpush.bf16.msrb.mxu2 %v12982_v15  ;;  %7602 = vmatpush.bf16.msrb.mxu1 %v12978_v6  ;;  %v13083_v11 = vld [vmem:[#allocation12 + $0x10d8] sm:$0xf0]  ;;  %v13066_v15 = vor.u32 %v14662_v5, %v13065_v42  ;;  %v13062_v6 = vor.u32 %v14659_v25, %v13059_v31  ;;  %v14686_v19 = vld [vmem:[#allocation12 + $0x1174] sm:$0xf0]  ;;  %v13149_v42 = vld [vmem:[#allocation12 + $0x1148] sm:$0xf] }
 0x4a4   :  { %v16820_v43 = vadd.f32 %v7425_v26, %v16797_v27  ;;  %7628 = vmatpush.bf16.msrb.mxu3 %v12986_v32  ;;  %8917 = vmatpush.bf16.msra.mxu0 %v13518_v61  ;;  %v8800_v27 = vld [vmem:[#allocation3 + $0x2d] sm:$0x1]  ;;  %v13086_v38 = vor.u32 %v14664_v62, %v13083_v11  ;;  %v13043_v32 = vld [vmem:[#allocation12 + $0x1090] sm:$0xf0]  ;;  %v14656_v61 = vld [vmem:[#allocation12 + $0x108c] sm:$0xf] }
 0x4a5   :  { %12968 = vmatmul.msk.bf16.vlgmr.msra.gmra.mxu1 %vm2150_vm4, %v16630_v36  ;;  %12969 = vmatmul.msk.bf16.vlgmr.msra.gmra.mxu2 %vm2150_vm4, %v16630_v36  ;;  %v8802_v63 = vpack.c.bf16 %v8800_v27, %v8800_v27  ;;  %v13046_v55 = vor.u32 %v14655_v37, %v13043_v32  ;;  %v14813_v62 = vld [vmem:[#allocation12 + $0x156c] sm:$0xf0]  ;;  %v14682_v5 = vld [vmem:[#allocation12 + $0x1154] sm:$0xf0]  ;;  %v14679_v25 = vld [vmem:[#allocation12 + $0x1144] sm:$0xf] }
 0x4a6   :  { %12970 = vmatmul.msk.bf16.vlgmr.msra.gmra.mxu3 %vm2150_vm4, %v16630_v36  ;;  %13511 = vmatmul.msk.bf16.vlgmr.msrb.gmra.mxu0 %vm2150_vm4, %v16814_v33  ;;  %v13143_v31 = vld [vmem:[#allocation12 + $0x1150] sm:$0xf0]  ;;  %v13150_v60 = vor.u32 %v14682_v5, %v13149_v42  ;;  %v13135_v32 = vld [vmem:[#allocation12 + $0x1138] sm:$0xf0]  ;;  %v14699_v42 = vld [vmem:[#allocation12 + $0x11e4] sm:$0xf] }
 0x4a7   :  { %7778 = vmatpush.bf16.msra.mxu2 %v13098_v4  ;;  %7765 = vmatpush.bf16.msra.mxu1 %v13094_v58  ;;  %v8822_v23 = vunpack.c.l.b16 %v8802_v63  ;;  %v13054_v4 = vor.u32 %v14656_v61, %v13051_v7  ;;  %v14809_v63 = vld [vmem:[#allocation12 + $0x154c] sm:$0xf0]  ;;  %v13146_v46 = vor.u32 %v14679_v25, %v13143_v31  ;;  %v13669_v61 = vld [vmem:[#allocation12 + $0x1520] sm:$0xf]  ;;  %v13227_v5 = vld [vmem:[#allocation12 + $0x11f0] sm:$0xf0] }
 0x4a8   :  { %v6123_v54 = vpop.f32.mrf.mxu2  ;;  %7791 = vmatpush.bf16.msra.mxu3 %v13102_v22  ;;  %9080 = vmatpush.bf16.msrb.mxu0 %v13634_v17  ;;  %v14684_v22 = vld [vmem:[#allocation12 + $0x116c] sm:$0xf]  ;;  %v13235_v25 = vld [vmem:[#allocation12 + $0x11f8] sm:$0xf0]  ;;  %v13769_v31 = vld [vmem:[#allocation12 + $0x15e0] sm:$0xf] }
 0x4a9   :  { %v16831_v36 = vadd.f32 %v6123_v54, %v16808_v51  ;;  %v6136_v29 = vpop.f32.mrf.mxu3  ;;  %v13070_v51 = vor.u32 %v14660_v39, %v13067_v40  ;;  %v8825_v49 = vsel %vm2212_vm5, %v8824_v30, %v8822_v23  ;;  %v14680_v39 = vld [vmem:[#allocation12 + $0x114c] sm:$0xf]  ;;  %v8989_v40 = vunpack.c.l.b16 %v8969_v12  ;;  %v14805_v23 = vld [vmem:[#allocation12 + $0x152c] sm:$0xf0]  ;;  %v9133_v12 = vld [vmem:[#allocation3 + $0x70] sm:$0x1] }
 0x4aa   :  { %v16834_v56 = vadd.f32 %v6136_v29, %v16811_v35  ;;  %v6112_v20 = vpop.f32.mrf.mxu1  ;;  %v13585_v35 = vld [vmem:[#allocation12 + $0x1480] sm:$0xf]  ;;  %v16837_v45 = vpack.c.b16 %v8825_v49, %v8825_v49  ;;  %v13670_v52 = vor.u32 %v14805_v23, %v13669_v61 }
 0x4ab   :  { %v7427_v14 = vpop.f32.mrf.mxu0  ;;  %7779 = vmatpush.bf16.msra.mxu2 %v13082_v3  ;;  %7766 = vmatpush.bf16.msra.mxu1 %v13078_v10  ;;  %v13586_v58 = vor.u32 %v14785_v9, %v13585_v35  ;;  %v13166_v3 = vor.u32 %v14686_v19, %v13165_v8  ;;  %v13162_v10 = vor.u32 %v14683_v0, %v13159_v48  ;;  %v13685_v29 = vld [vmem:[#allocation12 + $0x1540] sm:$0xf]  ;;  %v13133_v20 = vld [vmem:[#allocation12 + $0x1128] sm:$0xf]  ;;  %v8990_v49 = vrot.slane %v8989_v40, 7 }
 0x4ac   :  { %7792 = vmatpush.bf16.msra.mxu3 %v13086_v38  ;;  %9081 = vmatpush.bf16.msrb.mxu0 %v13618_v57  ;;  %v13170_v38 = vor.u32 %v14684_v22, %v13167_v13  ;;  %v13702_v57 = vor.u32 %v14813_v62, %v13701_v59  ;;  %v14678_v14 = vld [vmem:[#allocation12 + $0x1134] sm:$0xf0]  ;;  %v13117_v8 = vld [vmem:[#allocation12 + $0x1108] sm:$0xf]  ;;  %v13119_v48 = vld [vmem:[#allocation12 + $0x1118] sm:$0xf0] }
 0x4ad   :  { %v14674_v19 = vld [vmem:[#allocation12 + $0x1114] sm:$0xf0]  ;;  %v14801_v22 = vld [vmem:[#allocation12 + $0x150c] sm:$0xf0]  ;;  %v13233_v62 = vld [vmem:[#allocation12 + $0x11e8] sm:$0xf] }
 0x4ae   :  { %v13118_v13 = vor.u32 %v14674_v19, %v13117_v8  ;;  %v14691_v8 = vld [vmem:[#allocation12 + $0x11a4] sm:$0xf]  ;;  %v13195_v19 = vld [vmem:[#allocation12 + $0x11b0] sm:$0xf0] }
 0x4af   :  { %7780 = vmatpush.bf16.msra.mxu2 %v13066_v15  ;;  %7767 = vmatpush.bf16.msra.mxu1 %v13062_v6  ;;  %v13686_v6 = vor.u32 %v14809_v63, %v13685_v29  ;;  %v9135_v63 = vpack.c.bf16 %v9133_v12, %v9133_v12 }
 0x4b0   :  { %v6125_v26 = vpop.f32.mrf.mxu2  ;;  %7793 = vmatpush.bf16.msra.mxu3 %v13070_v51  ;;  %9082 = vmatpush.bf16.msrb.mxu0 %v13602_v53  ;;  %v14676_v51 = vld [vmem:[#allocation12 + $0x112c] sm:$0xf] }
 0x4b1   :  { %v6138_v17 = vpop.f32.mrf.mxu3  ;;  %v14671_v26 = vld [vmem:[#allocation12 + $0x1104] sm:$0xf] }
 0x4b2   :  { %v6276_v11 = vpop.f32.mrf.mxu1 }
 0x4b3   :  { %v16840_v27 = vadd.f32 %v6276_v11, %v16817_v44  ;;  %v7591_v50 = vpop.f32.mrf.mxu0  ;;  %7781 = vmatpush.bf16.msra.mxu2 %v13050_v16  ;;  %7768 = vmatpush.bf16.msra.mxu1 %v13046_v55  ;;  %v13151_v44 = vld [vmem:[#allocation12 + $0x1158] sm:$0xf0]  ;;  %v13134_v16 = vor.u32 %v14678_v14, %v13133_v20  ;;  %v13130_v55 = vor.u32 %v14675_v18, %v13127_v34  ;;  %v14702_v11 = vld [vmem:[#allocation12 + $0x11f4] sm:$0xf0]  ;;  %v13217_v20 = vld [vmem:[#allocation12 + $0x11c8] sm:$0xf] }
 0x4b4   :  { %v16843_v54 = vadd.f32 %v7591_v50, %v16820_v43  ;;  %7794 = vmatpush.bf16.msra.mxu3 %v13054_v4  ;;  %9083 = vmatpush.bf16.msrb.mxu0 %v13586_v58  ;;  %v8966_v43 = vld [vmem:[#allocation3 + $0x2e] sm:$0x1]  ;;  %v13154_v15 = vor.u32 %v14680_v39, %v13151_v44  ;;  %v13111_v4 = vld [vmem:[#allocation12 + $0x1110] sm:$0xf0]  ;;  %v14672_v58 = vld [vmem:[#allocation12 + $0x110c] sm:$0xf] }
 0x4b5   :  { %13036 = vmatmul.msk.bf16.vlgmr.msrb.gmra.mxu1 %vm2150_vm4, %v16653_v28  ;;  %13037 = vmatmul.msk.bf16.vlgmr.msrb.gmra.mxu2 %vm2150_vm4, %v16653_v28  ;;  %v8968_v37 = vpack.c.bf16 %v8966_v43, %v8966_v43  ;;  %v13114_v59 = vor.u32 %v14671_v26, %v13111_v4  ;;  %v14829_v39 = vld [vmem:[#allocation12 + $0x15ec] sm:$0xf0]  ;;  %v14698_v14 = vld [vmem:[#allocation12 + $0x11d4] sm:$0xf0]  ;;  %v14695_v18 = vld [vmem:[#allocation12 + $0x11c4] sm:$0xf] }
 0x4b6   :  { %13038 = vmatmul.msk.bf16.vlgmr.msrb.gmra.mxu3 %vm2150_vm4, %v16653_v28  ;;  %13579 = vmatmul.msk.bf16.vlgmr.msra.gmra.mxu0 %vm2150_vm4, %v16837_v45  ;;  %v13211_v34 = vld [vmem:[#allocation12 + $0x11d0] sm:$0xf0]  ;;  %v13218_v61 = vor.u32 %v14698_v14, %v13217_v20  ;;  %v13203_v4 = vld [vmem:[#allocation12 + $0x11b8] sm:$0xf0]  ;;  %v14715_v20 = vld [vmem:[#allocation12 + $0x1264] sm:$0xf] }
 0x4b7   :  { %7944 = vmatpush.bf16.msrb.mxu2 %v13166_v3  ;;  %7931 = vmatpush.bf16.msrb.mxu1 %v13162_v10  ;;  %v8988_v0 = vunpack.c.l.b16 %v8968_v37  ;;  %v13122_v3 = vor.u32 %v14672_v58, %v13119_v48  ;;  %v14825_v37 = vld [vmem:[#allocation12 + $0x15cc] sm:$0xf0]  ;;  %v13214_v23 = vor.u32 %v14695_v18, %v13211_v34  ;;  %v13737_v58 = vld [vmem:[#allocation12 + $0x15a0] sm:$0xf]  ;;  %v13295_v14 = vld [vmem:[#allocation12 + $0x1270] sm:$0xf0] }
 0x4b8   :  { %v6289_v30 = vpop.f32.mrf.mxu2  ;;  %7957 = vmatpush.bf16.msrb.mxu3 %v13170_v38  ;;  %9246 = vmatpush.bf16.msra.mxu0 %v13702_v57  ;;  %v14700_v38 = vld [vmem:[#allocation12 + $0x11ec] sm:$0xf]  ;;  %v13303_v18 = vld [vmem:[#allocation12 + $0x1278] sm:$0xf0]  ;;  %v13837_v34 = vld [vmem:[#allocation12 + $0x1660] sm:$0xf] }
 0x4b9   :  { %v16854_v28 = vadd.f32 %v6289_v30, %v16831_v36  ;;  %v6302_v53 = vpop.f32.mrf.mxu3  ;;  %v13138_v36 = vor.u32 %v14676_v51, %v13135_v32  ;;  %v8991_v17 = vsel %vm2212_vm5, %v8990_v49, %v8988_v0  ;;  %v14696_v51 = vld [vmem:[#allocation12 + $0x11cc] sm:$0xf]  ;;  %v9155_v32 = vunpack.c.l.b16 %v9135_v63  ;;  %v14821_v0 = vld [vmem:[#allocation12 + $0x15ac] sm:$0xf0]  ;;  %v9299_v63 = vld [vmem:[#allocation3 + $0x71] sm:$0x1] }
 0x4ba   :  { %v16857_v7 = vadd.f32 %v6302_v53, %v16834_v56  ;;  %v6278_v35 = vpop.f32.mrf.mxu1  ;;  %v13653_v56 = vld [vmem:[#allocation12 + $0x1500] sm:$0xf]  ;;  %v16860_v29 = vpack.c.b16 %v8991_v17, %v8991_v17  ;;  %v13738_v12 = vor.u32 %v14821_v0, %v13737_v58 }
 0x4bb   :  { %v7593_v9 = vpop.f32.mrf.mxu0  ;;  %7945 = vmatpush.bf16.msrb.mxu2 %v13150_v60  ;;  %7932 = vmatpush.bf16.msrb.mxu1 %v13146_v46  ;;  %v13654_v10 = vor.u32 %v14801_v22, %v13653_v56  ;;  %v13234_v60 = vor.u32 %v14702_v11, %v13233_v62  ;;  %v13230_v46 = vor.u32 %v14699_v42, %v13227_v5  ;;  %v13753_v53 = vld [vmem:[#allocation12 + $0x15c0] sm:$0xf]  ;;  %v13201_v35 = vld [vmem:[#allocation12 + $0x11a8] sm:$0xf]  ;;  %v9156_v17 = vrot.slane %v9155_v32, 7 }
 0x4bc   :  { %7958 = vmatpush.bf16.msrb.mxu3 %v13154_v15  ;;  %9247 = vmatpush.bf16.msra.mxu0 %v13686_v6  ;;  %v13238_v15 = vor.u32 %v14700_v38, %v13235_v25  ;;  %v13770_v6 = vor.u32 %v14829_v39, %v13769_v31  ;;  %v14694_v9 = vld [vmem:[#allocation12 + $0x11b4] sm:$0xf0]  ;;  %v13185_v62 = vld [vmem:[#allocation12 + $0x1188] sm:$0xf]  ;;  %v13187_v5 = vld [vmem:[#allocation12 + $0x1198] sm:$0xf0] }
 0x4bd   :  { %v14690_v11 = vld [vmem:[#allocation12 + $0x1194] sm:$0xf0]  ;;  %v14817_v38 = vld [vmem:[#allocation12 + $0x158c] sm:$0xf0]  ;;  %v13301_v39 = vld [vmem:[#allocation12 + $0x1268] sm:$0xf] }
 0x4be   :  { %v13186_v25 = vor.u32 %v14690_v11, %v13185_v62  ;;  %v14707_v62 = vld [vmem:[#allocation12 + $0x1224] sm:$0xf]  ;;  %v13263_v11 = vld [vmem:[#allocation12 + $0x1230] sm:$0xf0] }
 0x4bf   :  { %7946 = vmatpush.bf16.msrb.mxu2 %v13134_v16  ;;  %7933 = vmatpush.bf16.msrb.mxu1 %v13130_v55  ;;  %v13754_v55 = vor.u32 %v14825_v37, %v13753_v53  ;;  %v9301_v37 = vpack.c.bf16 %v9299_v63, %v9299_v63 }
 0x4c0   :  { %v6291_v50 = vpop.f32.mrf.mxu2  ;;  %7959 = vmatpush.bf16.msrb.mxu3 %v13138_v36  ;;  %9248 = vmatpush.bf16.msra.mxu0 %v13670_v52  ;;  %v14692_v36 = vld [vmem:[#allocation12 + $0x11ac] sm:$0xf] }
 0x4c1   :  { %v6304_v57 = vpop.f32.mrf.mxu3  ;;  %v14687_v50 = vld [vmem:[#allocation12 + $0x1184] sm:$0xf] }
 0x4c2   :  { %v6442_v44 = vpop.f32.mrf.mxu1 }
 0x4c3   :  { %v16863_v43 = vadd.f32 %v6442_v44, %v16840_v27  ;;  %v7757_v40 = vpop.f32.mrf.mxu0  ;;  %7947 = vmatpush.bf16.msrb.mxu2 %v13118_v13  ;;  %7934 = vmatpush.bf16.msrb.mxu1 %v13114_v59  ;;  %v13219_v27 = vld [vmem:[#allocation12 + $0x11d8] sm:$0xf0]  ;;  %v13202_v13 = vor.u32 %v14694_v9, %v13201_v35  ;;  %v13198_v59 = vor.u32 %v14691_v8, %v13195_v19  ;;  %v14718_v44 = vld [vmem:[#allocation12 + $0x1274] sm:$0xf0]  ;;  %v13285_v35 = vld [vmem:[#allocation12 + $0x1248] sm:$0xf] }
 0x4c4   :  { %v16866_v30 = vadd.f32 %v7757_v40, %v16843_v54  ;;  %7960 = vmatpush.bf16.msrb.mxu3 %v13122_v3  ;;  %9249 = vmatpush.bf16.msra.mxu0 %v13654_v10  ;;  %v9132_v54 = vld [vmem:[#allocation3 + $0x30] sm:$0x1]  ;;  %v13222_v16 = vor.u32 %v14696_v51, %v13219_v27  ;;  %v13179_v3 = vld [vmem:[#allocation12 + $0x1190] sm:$0xf0]  ;;  %v14688_v10 = vld [vmem:[#allocation12 + $0x118c] sm:$0xf] }
 0x4c5   :  { %13104 = vmatmul.msk.bf16.vlgmr.msra.gmra.mxu1 %vm2150_vm4, %v16676_v21  ;;  %13105 = vmatmul.msk.bf16.vlgmr.msra.gmra.mxu2 %vm2150_vm4, %v16676_v21  ;;  %v9134_v26 = vpack.c.bf16 %v9132_v54, %v9132_v54  ;;  %v13182_v31 = vor.u32 %v14687_v50, %v13179_v3  ;;  %v14845_v51 = vld [vmem:[#allocation12 + $0x166c] sm:$0xf0]  ;;  %v14714_v9 = vld [vmem:[#allocation12 + $0x1254] sm:$0xf0]  ;;  %v14711_v8 = vld [vmem:[#allocation12 + $0x1244] sm:$0xf] }
 0x4c6   :  { %13106 = vmatmul.msk.bf16.vlgmr.msra.gmra.mxu3 %vm2150_vm4, %v16676_v21  ;;  %13647 = vmatmul.msk.bf16.vlgmr.msrb.gmra.mxu0 %vm2150_vm4, %v16860_v29  ;;  %v13279_v19 = vld [vmem:[#allocation12 + $0x1250] sm:$0xf0]  ;;  %v13286_v58 = vor.u32 %v14714_v9, %v13285_v35  ;;  %v13271_v3 = vld [vmem:[#allocation12 + $0x1238] sm:$0xf0]  ;;  %v14731_v35 = vld [vmem:[#allocation12 + $0x12e4] sm:$0xf] }
 0x4c7   :  { %8110 = vmatpush.bf16.msra.mxu2 %v13234_v60  ;;  %8097 = vmatpush.bf16.msra.mxu1 %v13230_v46  ;;  %v9154_v42 = vunpack.c.l.b16 %v9134_v26  ;;  %v13190_v60 = vor.u32 %v14688_v10, %v13187_v5  ;;  %v14841_v26 = vld [vmem:[#allocation12 + $0x164c] sm:$0xf0]  ;;  %v13282_v0 = vor.u32 %v14711_v8, %v13279_v19  ;;  %v13805_v10 = vld [vmem:[#allocation12 + $0x1620] sm:$0xf]  ;;  %v13363_v9 = vld [vmem:[#allocation12 + $0x12f0] sm:$0xf0] }
 0x4c8   :  { %v6455_v49 = vpop.f32.mrf.mxu2  ;;  %8123 = vmatpush.bf16.msra.mxu3 %v13238_v15  ;;  %9412 = vmatpush.bf16.msrb.mxu0 %v13770_v6  ;;  %v14716_v15 = vld [vmem:[#allocation12 + $0x126c] sm:$0xf]  ;;  %v13371_v8 = vld [vmem:[#allocation12 + $0x12f8] sm:$0xf0]  ;;  %v13905_v19 = vld [vmem:[#allocation12 + $0x16e0] sm:$0xf] }
 0x4c9   :  { %v16877_v21 = vadd.f32 %v6455_v49, %v16854_v28  ;;  %v6468_v52 = vpop.f32.mrf.mxu3  ;;  %v13206_v28 = vor.u32 %v14692_v36, %v13203_v4  ;;  %v9157_v57 = vsel %vm2212_vm5, %v9156_v17, %v9154_v42  ;;  %v14712_v36 = vld [vmem:[#allocation12 + $0x124c] sm:$0xf]  ;;  %v9321_v4 = vunpack.c.l.b16 %v9301_v37  ;;  %v14837_v42 = vld [vmem:[#allocation12 + $0x162c] sm:$0xf0]  ;;  %v9465_v37 = vld [vmem:[#allocation3 + $0x72] sm:$0x1] }
 0x4ca   :  { %v16880_v48 = vadd.f32 %v6468_v52, %v16857_v7  ;;  %v6444_v56 = vpop.f32.mrf.mxu1  ;;  %v13721_v7 = vld [vmem:[#allocation12 + $0x1580] sm:$0xf]  ;;  %v16883_v53 = vpack.c.b16 %v9157_v57, %v9157_v57  ;;  %v13806_v63 = vor.u32 %v14837_v42, %v13805_v10 }
 0x4cb   :  { %v7759_v22 = vpop.f32.mrf.mxu0  ;;  %8111 = vmatpush.bf16.msra.mxu2 %v13218_v61  ;;  %8098 = vmatpush.bf16.msra.mxu1 %v13214_v23  ;;  %v13722_v46 = vor.u32 %v14817_v38, %v13721_v7  ;;  %v13302_v61 = vor.u32 %v14718_v44, %v13301_v39  ;;  %v13298_v23 = vor.u32 %v14715_v20, %v13295_v14  ;;  %v13821_v52 = vld [vmem:[#allocation12 + $0x1640] sm:$0xf]  ;;  %v13269_v56 = vld [vmem:[#allocation12 + $0x1228] sm:$0xf]  ;;  %v9322_v57 = vrot.slane %v9321_v4, 7 }
 0x4cc   :  { %8124 = vmatpush.bf16.msra.mxu3 %v13222_v16  ;;  %9413 = vmatpush.bf16.msrb.mxu0 %v13754_v55  ;;  %v13306_v16 = vor.u32 %v14716_v15, %v13303_v18  ;;  %v13838_v55 = vor.u32 %v14845_v51, %v13837_v34  ;;  %v14710_v22 = vld [vmem:[#allocation12 + $0x1234] sm:$0xf0]  ;;  %v13253_v39 = vld [vmem:[#allocation12 + $0x1208] sm:$0xf]  ;;  %v13255_v14 = vld [vmem:[#allocation12 + $0x1218] sm:$0xf0] }
 0x4cd   :  { %v14706_v44 = vld [vmem:[#allocation12 + $0x1214] sm:$0xf0]  ;;  %v14833_v15 = vld [vmem:[#allocation12 + $0x160c] sm:$0xf0]  ;;  %v13369_v51 = vld [vmem:[#allocation12 + $0x12e8] sm:$0xf] }
 0x4ce   :  { %v13254_v18 = vor.u32 %v14706_v44, %v13253_v39  ;;  %v14723_v39 = vld [vmem:[#allocation12 + $0x12a4] sm:$0xf]  ;;  %v13331_v44 = vld [vmem:[#allocation12 + $0x12b0] sm:$0xf0] }
 0x4cf   :  { %8112 = vmatpush.bf16.msra.mxu2 %v13202_v13  ;;  %8099 = vmatpush.bf16.msra.mxu1 %v13198_v59  ;;  %v13822_v59 = vor.u32 %v14841_v26, %v13821_v52  ;;  %v9467_v26 = vpack.c.bf16 %v9465_v37, %v9465_v37 }
 0x4d0   :  { %v6457_v40 = vpop.f32.mrf.mxu2  ;;  %8125 = vmatpush.bf16.msra.mxu3 %v13206_v28  ;;  %9414 = vmatpush.bf16.msrb.mxu0 %v13738_v12  ;;  %v14708_v28 = vld [vmem:[#allocation12 + $0x122c] sm:$0xf] }
 0x4d1   :  { %v6470_v6 = vpop.f32.mrf.mxu3  ;;  %v14703_v40 = vld [vmem:[#allocation12 + $0x1204] sm:$0xf] }
 0x4d2   :  { %v6608_v27 = vpop.f32.mrf.mxu1 }
 0x4d3   :  { %v16886_v54 = vadd.f32 %v6608_v27, %v16863_v43  ;;  %v7923_v32 = vpop.f32.mrf.mxu0  ;;  %8113 = vmatpush.bf16.msra.mxu2 %v13186_v25  ;;  %8100 = vmatpush.bf16.msra.mxu1 %v13182_v31  ;;  %v13287_v43 = vld [vmem:[#allocation12 + $0x1258] sm:$0xf0]  ;;  %v13270_v25 = vor.u32 %v14710_v22, %v13269_v56  ;;  %v13266_v31 = vor.u32 %v14707_v62, %v13263_v11  ;;  %v14734_v27 = vld [vmem:[#allocation12 + $0x12f4] sm:$0xf0]  ;;  %v13353_v56 = vld [vmem:[#allocation12 + $0x12c8] sm:$0xf] }
 0x4d4   :  { %v16889_v49 = vadd.f32 %v7923_v32, %v16866_v30  ;;  %8126 = vmatpush.bf16.msra.mxu3 %v13190_v60  ;;  %9415 = vmatpush.bf16.msrb.mxu0 %v13722_v46  ;;  %v9298_v30 = vld [vmem:[#allocation3 + $0x31] sm:$0x1]  ;;  %v13290_v13 = vor.u32 %v14712_v36, %v13287_v43  ;;  %v13247_v60 = vld [vmem:[#allocation12 + $0x1210] sm:$0xf0]  ;;  %v14704_v46 = vld [vmem:[#allocation12 + $0x120c] sm:$0xf] }
 0x4d5   :  { %13172 = vmatmul.msk.bf16.vlgmr.msrb.gmra.mxu1 %vm2150_vm4, %v16699_v24  ;;  %13173 = vmatmul.msk.bf16.vlgmr.msrb.gmra.mxu2 %vm2150_vm4, %v16699_v24  ;;  %v9300_v50 = vpack.c.bf16 %v9298_v30, %v9298_v30  ;;  %v13250_v34 = vor.u32 %v14703_v40, %v13247_v60  ;;  %v14861_v36 = vld [vmem:[#allocation12 + $0x16ec] sm:$0xf0]  ;;  %v14730_v22 = vld [vmem:[#allocation12 + $0x12d4] sm:$0xf0]  ;;  %v14727_v62 = vld [vmem:[#allocation12 + $0x12c4] sm:$0xf] }
 0x4d6   :  { %13174 = vmatmul.msk.bf16.vlgmr.msrb.gmra.mxu3 %vm2150_vm4, %v16699_v24  ;;  %13715 = vmatmul.msk.bf16.vlgmr.msra.gmra.mxu0 %vm2150_vm4, %v16883_v53  ;;  %v13347_v11 = vld [vmem:[#allocation12 + $0x12d0] sm:$0xf0]  ;;  %v13354_v10 = vor.u32 %v14730_v22, %v13353_v56  ;;  %v13339_v60 = vld [vmem:[#allocation12 + $0x12b8] sm:$0xf0]  ;;  %v14747_v56 = vld [vmem:[#allocation12 + $0x1364] sm:$0xf] }
 0x4d7   :  { %8276 = vmatpush.bf16.msrb.mxu2 %v13302_v61  ;;  %8263 = vmatpush.bf16.msrb.mxu1 %v13298_v23  ;;  %v9320_v20 = vunpack.c.l.b16 %v9300_v50  ;;  %v13258_v61 = vor.u32 %v14704_v46, %v13255_v14  ;;  %v14857_v50 = vld [vmem:[#allocation12 + $0x16cc] sm:$0xf0]  ;;  %v13350_v42 = vor.u32 %v14727_v62, %v13347_v11  ;;  %v13873_v46 = vld [vmem:[#allocation12 + $0x16a0] sm:$0xf]  ;;  %v13431_v22 = vld [vmem:[#allocation12 + $0x1370] sm:$0xf0] }
 0x4d8   :  { %v6621_v17 = vpop.f32.mrf.mxu2  ;;  %8289 = vmatpush.bf16.msrb.mxu3 %v13306_v16  ;;  %9578 = vmatpush.bf16.msra.mxu0 %v13838_v55  ;;  %v14732_v16 = vld [vmem:[#allocation12 + $0x12ec] sm:$0xf]  ;;  %v13439_v62 = vld [vmem:[#allocation12 + $0x1378] sm:$0xf0]  ;;  %v13973_v11 = vld [vmem:[#allocation12 + $0x1760] sm:$0xf] }
 0x4d9   :  { %v16900_v24 = vadd.f32 %v6621_v17, %v16877_v21  ;;  %v6634_v12 = vpop.f32.mrf.mxu3  ;;  %v13274_v21 = vor.u32 %v14708_v28, %v13271_v3  ;;  %v9323_v6 = vsel %vm2212_vm5, %v9322_v57, %v9320_v20  ;;  %v14728_v28 = vld [vmem:[#allocation12 + $0x12cc] sm:$0xf]  ;;  %v9487_v3 = vunpack.c.l.b16 %v9467_v26  ;;  %v14853_v20 = vld [vmem:[#allocation12 + $0x16ac] sm:$0xf0]  ;;  %v9631_v26 = vld [vmem:[#allocation3 + $0x73] sm:$0x1] }
 0x4da   :  { %v16903_v5 = vadd.f32 %v6634_v12, %v16880_v48  ;;  %v6610_v7 = vpop.f32.mrf.mxu1  ;;  %v13789_v48 = vld [vmem:[#allocation12 + $0x1600] sm:$0xf]  ;;  %v16906_v52 = vpack.c.b16 %v9323_v6, %v9323_v6  ;;  %v13874_v37 = vor.u32 %v14853_v20, %v13873_v46 }
 0x4db   :  { %v7925_v38 = vpop.f32.mrf.mxu0  ;;  %8277 = vmatpush.bf16.msrb.mxu2 %v13286_v58  ;;  %8264 = vmatpush.bf16.msrb.mxu1 %v13282_v0  ;;  %v13790_v23 = vor.u32 %v14833_v15, %v13789_v48  ;;  %v13370_v58 = vor.u32 %v14734_v27, %v13369_v51  ;;  %v13366_v0 = vor.u32 %v14731_v35, %v13363_v9  ;;  %v13889_v12 = vld [vmem:[#allocation12 + $0x16c0] sm:$0xf]  ;;  %v13337_v7 = vld [vmem:[#allocation12 + $0x12a8] sm:$0xf]  ;;  %v9488_v6 = vrot.slane %v9487_v3, 7 }
 0x4dc   :  { %8290 = vmatpush.bf16.msrb.mxu3 %v13290_v13  ;;  %9579 = vmatpush.bf16.msra.mxu0 %v13822_v59  ;;  %v13374_v13 = vor.u32 %v14732_v16, %v13371_v8  ;;  %v13906_v59 = vor.u32 %v14861_v36, %v13905_v19  ;;  %v14726_v38 = vld [vmem:[#allocation12 + $0x12b4] sm:$0xf0]  ;;  %v13321_v51 = vld [vmem:[#allocation12 + $0x1288] sm:$0xf]  ;;  %v13323_v9 = vld [vmem:[#allocation12 + $0x1298] sm:$0xf0] }
 0x4dd   :  { %v14722_v27 = vld [vmem:[#allocation12 + $0x1294] sm:$0xf0]  ;;  %v14849_v16 = vld [vmem:[#allocation12 + $0x168c] sm:$0xf0]  ;;  %v13437_v36 = vld [vmem:[#allocation12 + $0x1368] sm:$0xf] }
 0x4de   :  { %v13322_v8 = vor.u32 %v14722_v27, %v13321_v51  ;;  %v14739_v51 = vld [vmem:[#allocation12 + $0x1324] sm:$0xf]  ;;  %v13399_v27 = vld [vmem:[#allocation12 + $0x1330] sm:$0xf0] }
 0x4df   :  { %8278 = vmatpush.bf16.msrb.mxu2 %v13270_v25  ;;  %8265 = vmatpush.bf16.msrb.mxu1 %v13266_v31  ;;  %v13890_v31 = vor.u32 %v14857_v50, %v13889_v12  ;;  %v9633_v50 = vpack.c.bf16 %v9631_v26, %v9631_v26 }
 0x4e0   :  { %v6623_v32 = vpop.f32.mrf.mxu2  ;;  %8291 = vmatpush.bf16.msrb.mxu3 %v13274_v21  ;;  %9580 = vmatpush.bf16.msra.mxu0 %v13806_v63  ;;  %v14724_v21 = vld [vmem:[#allocation12 + $0x12ac] sm:$0xf] }
 0x4e1   :  { %v6636_v55 = vpop.f32.mrf.mxu3  ;;  %v14719_v32 = vld [vmem:[#allocation12 + $0x1284] sm:$0xf] }
 0x4e2   :  { %v6774_v43 = vpop.f32.mrf.mxu1 }
 0x4e3   :  { %v16909_v30 = vadd.f32 %v6774_v43, %v16886_v54  ;;  %v8089_v4 = vpop.f32.mrf.mxu0  ;;  %8279 = vmatpush.bf16.msrb.mxu2 %v13254_v18  ;;  %8266 = vmatpush.bf16.msrb.mxu1 %v13250_v34  ;;  %v13355_v54 = vld [vmem:[#allocation12 + $0x12d8] sm:$0xf0]  ;;  %v13338_v18 = vor.u32 %v14726_v38, %v13337_v7  ;;  %v13334_v34 = vor.u32 %v14723_v39, %v13331_v44  ;;  %v14750_v43 = vld [vmem:[#allocation12 + $0x1374] sm:$0xf0]  ;;  %v13421_v7 = vld [vmem:[#allocation12 + $0x1348] sm:$0xf] }
 0x4e4   :  { %v16912_v17 = vadd.f32 %v8089_v4, %v16889_v49  ;;  %8292 = vmatpush.bf16.msrb.mxu3 %v13258_v61  ;;  %9581 = vmatpush.bf16.msra.mxu0 %v13790_v23  ;;  %v9464_v49 = vld [vmem:[#allocation3 + $0x32] sm:$0x1]  ;;  %v13358_v25 = vor.u32 %v14728_v28, %v13355_v54  ;;  %v13315_v61 = vld [vmem:[#allocation12 + $0x1290] sm:$0xf0]  ;;  %v14720_v23 = vld [vmem:[#allocation12 + $0x128c] sm:$0xf] }
 0x4e5   :  { %13240 = vmatmul.msk.bf16.vlgmr.msra.gmra.mxu1 %vm2150_vm4, %v16722_v47  ;;  %13241 = vmatmul.msk.bf16.vlgmr.msra.gmra.mxu2 %vm2150_vm4, %v16722_v47  ;;  %v9466_v40 = vpack.c.bf16 %v9464_v49, %v9464_v49  ;;  %v13318_v19 = vor.u32 %v14719_v32, %v13315_v61  ;;  %v14877_v28 = vld [vmem:[#allocation12 + $0x176c] sm:$0xf0]  ;;  %v14746_v38 = vld [vmem:[#allocation12 + $0x1354] sm:$0xf0]  ;;  %v14743_v39 = vld [vmem:[#allocation12 + $0x1344] sm:$0xf] }
 0x4e6   :  { %13242 = vmatmul.msk.bf16.vlgmr.msra.gmra.mxu3 %vm2150_vm4, %v16722_v47  ;;  %13783 = vmatmul.msk.bf16.vlgmr.msrb.gmra.mxu0 %vm2150_vm4, %v16906_v52  ;;  %v13415_v44 = vld [vmem:[#allocation12 + $0x1350] sm:$0xf0]  ;;  %v13422_v46 = vor.u32 %v14746_v38, %v13421_v7  ;;  %v13407_v32 = vld [vmem:[#allocation12 + $0x1338] sm:$0xf0]  ;;  %v13941_v61 = vld [vmem:[#allocation12 + $0x1720] sm:$0xf] }
 0x4e7   :  { %8442 = vmatpush.bf16.msra.mxu2 %v13370_v58  ;;  %8429 = vmatpush.bf16.msra.mxu1 %v13366_v0  ;;  %v9486_v35 = vunpack.c.l.b16 %v9466_v40  ;;  %v13326_v58 = vor.u32 %v14720_v23, %v13323_v9  ;;  %v14873_v40 = vld [vmem:[#allocation12 + $0x174c] sm:$0xf0]  ;;  %v13418_v20 = vor.u32 %v14743_v39, %v13415_v44  ;;  %v13499_v7 = vld [vmem:[#allocation12 + $0x13f0] sm:$0xf0]  ;;  %v14764_v38 = vld [vmem:[#allocation12 + $0x13ec] sm:$0xf] }
 0x4e8   :  { %v6787_v57 = vpop.f32.mrf.mxu2  ;;  %8455 = vmatpush.bf16.msra.mxu3 %v13374_v13  ;;  %9744 = vmatpush.bf16.msrb.mxu0 %v13906_v59  ;;  %v14748_v13 = vld [vmem:[#allocation12 + $0x136c] sm:$0xf]  ;;  %v14869_v23 = vld [vmem:[#allocation12 + $0x172c] sm:$0xf0]  ;;  %v13507_v39 = vld [vmem:[#allocation12 + $0x13f8] sm:$0xf0] }
 0x4e9   :  { %v16923_v47 = vadd.f32 %v6787_v57, %v16900_v24  ;;  %v6800_v63 = vpop.f32.mrf.mxu3  ;;  %v13342_v24 = vor.u32 %v14724_v21, %v13339_v60  ;;  %v9489_v55 = vsel %vm2212_vm5, %v9488_v6, %v9486_v35  ;;  %v14744_v21 = vld [vmem:[#allocation12 + $0x134c] sm:$0xf]  ;;  %v9653_v60 = vunpack.c.l.b16 %v9633_v50  ;;  %v14041_v44 = vld [vmem:[#allocation12 + $0x17e0] sm:$0xf] }
 0x4ea   :  { %v16926_v14 = vadd.f32 %v6800_v63, %v16903_v5  ;;  %v6776_v48 = vpop.f32.mrf.mxu1  ;;  %v13857_v5 = vld [vmem:[#allocation12 + $0x1680] sm:$0xf]  ;;  %v16929_v12 = vpack.c.b16 %v9489_v55, %v9489_v55  ;;  %v13942_v26 = vor.u32 %v14869_v23, %v13941_v61 }
 0x4eb   :  { %v8091_v15 = vpop.f32.mrf.mxu0  ;;  %8443 = vmatpush.bf16.msra.mxu2 %v13354_v10  ;;  %8430 = vmatpush.bf16.msra.mxu1 %v13350_v42  ;;  %v13858_v0 = vor.u32 %v14849_v16, %v13857_v5  ;;  %v13438_v10 = vor.u32 %v14750_v43, %v13437_v36  ;;  %v13434_v42 = vor.u32 %v14747_v56, %v13431_v22  ;;  %v13957_v63 = vld [vmem:[#allocation12 + $0x1740] sm:$0xf]  ;;  %v13405_v48 = vld [vmem:[#allocation12 + $0x1328] sm:$0xf]  ;;  %v9654_v55 = vrot.slane %v9653_v60, 7 }
 0x4ec   :  { %8456 = vmatpush.bf16.msra.mxu3 %v13358_v25  ;;  %9745 = vmatpush.bf16.msrb.mxu0 %v13890_v31  ;;  %v13442_v25 = vor.u32 %v14748_v13, %v13439_v62  ;;  %v13974_v31 = vor.u32 %v14877_v28, %v13973_v11  ;;  %v14742_v15 = vld [vmem:[#allocation12 + $0x1334] sm:$0xf0]  ;;  %v13389_v36 = vld [vmem:[#allocation12 + $0x1308] sm:$0xf]  ;;  %v13391_v56 = vld [vmem:[#allocation12 + $0x1318] sm:$0xf0] }
 0x4ed   :  { %v14738_v43 = vld [vmem:[#allocation12 + $0x1314] sm:$0xf0]  ;;  %v14865_v22 = vld [vmem:[#allocation12 + $0x170c] sm:$0xf0]  ;;  %v13505_v11 = vld [vmem:[#allocation12 + $0x13e8] sm:$0xf] }
 0x4ee   :  { %v14766_v28 = vld [vmem:[#allocation12 + $0x13f4] sm:$0xf0] }
 0x4ef   :  { %8444 = vmatpush.bf16.msra.mxu2 %v13338_v18  ;;  %8431 = vmatpush.bf16.msra.mxu1 %v13334_v34  ;;  %v13958_v34 = vor.u32 %v14873_v40, %v13957_v63  ;;  %v13506_v60 = vor.u32 %v14766_v28, %v13505_v11  ;;  %v13457_v28 = vld [vmem:[#allocation12 + $0x1388] sm:$0xf] }
 0x4f0   :  { %v6789_v4 = vpop.f32.mrf.mxu2  ;;  %8457 = vmatpush.bf16.msra.mxu3 %v13342_v24  ;;  %9746 = vmatpush.bf16.msrb.mxu0 %v13874_v37  ;;  %v14740_v24 = vld [vmem:[#allocation12 + $0x132c] sm:$0xf] }
 0x4f1   :  { %v6802_v59 = vpop.f32.mrf.mxu3  ;;  %v14735_v4 = vld [vmem:[#allocation12 + $0x1304] sm:$0xf] }
 0x4f2   :  { %v6940_v54 = vpop.f32.mrf.mxu1  ;;  %v13390_v59 = vor.u32 %v14738_v43, %v13389_v36  ;;  %v14755_v36 = vld [vmem:[#allocation12 + $0x13a4] sm:$0xf]  ;;  %v13467_v43 = vld [vmem:[#allocation12 + $0x13b0] sm:$0xf0] }
 0x4f3   :  { %v16932_v49 = vadd.f32 %v6940_v54, %v16909_v30  ;;  %v8255_v3 = vpop.f32.mrf.mxu0  ;;  %8445 = vmatpush.bf16.msra.mxu2 %v13322_v8  ;;  %8432 = vmatpush.bf16.msra.mxu1 %v13318_v19  ;;  %v13423_v30 = vld [vmem:[#allocation12 + $0x1358] sm:$0xf0]  ;;  %v13406_v8 = vor.u32 %v14742_v15, %v13405_v48  ;;  %v13402_v19 = vor.u32 %v14739_v51, %v13399_v27  ;;  %v9797_v54 = vld [vmem:[#allocation3 + $0x74] sm:$0x1]  ;;  %v14762_v48 = vld [vmem:[#allocation12 + $0x13d4] sm:$0xf0] }
 0x4f4   :  { %v16935_v57 = vadd.f32 %v8255_v3, %v16912_v17  ;;  %8458 = vmatpush.bf16.msra.mxu3 %v13326_v58  ;;  %9747 = vmatpush.bf16.msrb.mxu0 %v13858_v0  ;;  %v9630_v17 = vld [vmem:[#allocation3 + $0x33] sm:$0x1]  ;;  %v13426_v18 = vor.u32 %v14744_v21, %v13423_v30  ;;  %v13383_v58 = vld [vmem:[#allocation12 + $0x1310] sm:$0xf0]  ;;  %v14736_v0 = vld [vmem:[#allocation12 + $0x130c] sm:$0xf]  ;;  %v9799_v63 = vpack.c.bf16 %v9797_v54, %v9797_v54 }
 0x4f5   :  { %13308 = vmatmul.msk.bf16.vlgmr.msrb.gmra.mxu1 %vm2150_vm4, %v16745_v41  ;;  %13309 = vmatmul.msk.bf16.vlgmr.msrb.gmra.mxu2 %vm2150_vm4, %v16745_v41  ;;  %v9632_v16 = vpack.c.bf16 %v9630_v17, %v9630_v17  ;;  %v13386_v62 = vor.u32 %v14735_v4, %v13383_v58  ;;  %v13394_v3 = vor.u32 %v14736_v0, %v13391_v56  ;;  %v14893_v21 = vld [vmem:[#allocation12 + $0x17ec] sm:$0xf0]  ;;  %v13483_v51 = vld [vmem:[#allocation12 + $0x13d0] sm:$0xf0]  ;;  %v14760_v27 = vld [vmem:[#allocation12 + $0x13cc] sm:$0xf] }
 0x4f6   :  { %13310 = vmatmul.msk.bf16.vlgmr.msrb.gmra.mxu3 %vm2150_vm4, %v16745_v41  ;;  %13851 = vmatmul.msk.bf16.vlgmr.msra.gmra.mxu0 %vm2150_vm4, %v16929_v12  ;;  %v9819_v61 = vunpack.c.l.b16 %v9799_v63  ;;  %v13475_v58 = vld [vmem:[#allocation12 + $0x13b8] sm:$0xf0]  ;;  %v14009_v0 = vld [vmem:[#allocation12 + $0x17a0] sm:$0xf]  ;;  %v14885_v56 = vld [vmem:[#allocation12 + $0x17ac] sm:$0xf0]  ;;  %v13470_v11 = vor.u32 %v14755_v36, %v13467_v43 }
 0x4f7   :  { %8608 = vmatpush.bf16.msrb.mxu2 %v13438_v10  ;;  %8595 = vmatpush.bf16.msrb.mxu1 %v13434_v42  ;;  %v9652_v13 = vunpack.c.l.b16 %v9632_v16  ;;  %v14763_v42 = vld [vmem:[#allocation12 + $0x13e4] sm:$0xf]  ;;  %v14758_v16 = vld [vmem:[#allocation12 + $0x13b4] sm:$0xf0]  ;;  %v9963_v63 = vld [vmem:[#allocation3 + $0x75] sm:$0x1] }
 0x4f8   :  { %v6953_v6 = vpop.f32.mrf.mxu2  ;;  %8621 = vmatpush.bf16.msrb.mxu3 %v13442_v25  ;;  %9910 = vmatpush.bf16.msra.mxu0 %v13974_v31  ;;  %v14754_v54 = vld [vmem:[#allocation12 + $0x1394] sm:$0xf0]  ;;  %v13551_v43 = vld [vmem:[#allocation12 + $0x1450] sm:$0xf0] }
 0x4f9   :  { %v16946_v41 = vadd.f32 %v6953_v6, %v16923_v47  ;;  %v6966_v37 = vpop.f32.mrf.mxu3  ;;  %v13410_v47 = vor.u32 %v14740_v24, %v13407_v32  ;;  %v9655_v31 = vsel %vm2212_vm5, %v9654_v55, %v9652_v13  ;;  %v13510_v6 = vor.u32 %v14764_v38, %v13507_v39  ;;  %v14025_v24 = vld [vmem:[#allocation12 + $0x17c0] sm:$0xf]  ;;  %v9796_v32 = vld [vmem:[#allocation3 + $0x34] sm:$0x1]  ;;  %v13459_v38 = vld [vmem:[#allocation12 + $0x1398] sm:$0xf0] }
 0x4fa   :  { %v16949_v35 = vadd.f32 %v6966_v37, %v16926_v14  ;;  %v6942_v9 = vpop.f32.mrf.mxu1  ;;  %v13925_v14 = vld [vmem:[#allocation12 + $0x1700] sm:$0xf]  ;;  %v16957_v15 = vpack.c.b16 %v9655_v31, %v9655_v31  ;;  %v14889_v37 = vld [vmem:[#allocation12 + $0x17cc] sm:$0xf0]  ;;  %v9798_v4 = vpack.c.bf16 %v9796_v32, %v9796_v32  ;;  %v13458_v39 = vor.u32 %v14754_v54, %v13457_v28  ;;  %v14771_v54 = vld [vmem:[#allocation12 + $0x1424] sm:$0xf] }
 0x4fb   :  { %v8257_v5 = vpop.f32.mrf.mxu0  ;;  %8609 = vmatpush.bf16.msrb.mxu2 %v13422_v46  ;;  %8596 = vmatpush.bf16.msrb.mxu1 %v13418_v20  ;;  %v13926_v10 = vor.u32 %v14865_v22, %v13925_v14  ;;  %v13502_v46 = vor.u32 %v14763_v42, %v13499_v7  ;;  %v13489_v20 = vld [vmem:[#allocation12 + $0x13c8] sm:$0xf]  ;;  %v14752_v42 = vld [vmem:[#allocation12 + $0x138c] sm:$0xf] }
 0x4fc   :  { %8622 = vmatpush.bf16.msrb.mxu3 %v13426_v18  ;;  %9911 = vmatpush.bf16.msra.mxu0 %v13958_v34  ;;  %v14042_v18 = vor.u32 %v14893_v21, %v14041_v44  ;;  %v14759_v34 = vld [vmem:[#allocation12 + $0x13c4] sm:$0xf]  ;;  %v13490_v23 = vor.u32 %v14762_v48, %v13489_v20  ;;  %v13473_v5 = vld [vmem:[#allocation12 + $0x13a8] sm:$0xf]  ;;  %v9818_v7 = vunpack.c.l.b16 %v9798_v4  ;;  %v14905_v4 = vld [vmem:[#allocation12 + $0x184c] sm:$0xf0] }
 0x4fd   :  { %v13486_v9 = vor.u32 %v14759_v34, %v13483_v51  ;;  %v13573_v21 = vld [vmem:[#allocation12 + $0x1468] sm:$0xf]  ;;  %v14779_v48 = vld [vmem:[#allocation12 + $0x1464] sm:$0xf]  ;;  %v13575_v51 = vld [vmem:[#allocation12 + $0x1478] sm:$0xf0] }
 0x4ff   :  { %8610 = vmatpush.bf16.msrb.mxu2 %v13406_v8  ;;  %8597 = vmatpush.bf16.msrb.mxu1 %v13402_v19  ;;  %v14026_v19 = vor.u32 %v14889_v37, %v14025_v24 }
 0x500   :  { %v6955_v50 = vpop.f32.mrf.mxu2  ;;  %8623 = vmatpush.bf16.msrb.mxu3 %v13410_v47  ;;  %9912 = vmatpush.bf16.msra.mxu0 %v13942_v26  ;;  %v14756_v47 = vld [vmem:[#allocation12 + $0x13ac] sm:$0xf] }
 0x501   :  { %v6968_v25 = vpop.f32.mrf.mxu3  ;;  %v14010_v50 = vor.u32 %v14885_v56, %v14009_v0 }
 0x502   :  { %v7106_v30 = vpop.f32.mrf.mxu1  ;;  %v14881_v25 = vld [vmem:[#allocation12 + $0x178c] sm:$0xf0] }
 0x503   :  { %v16953_v40 = vadd.f32 %v7106_v30, %v16932_v49  ;;  %v16955_v17 = vpop.f32.mrf.mxu0  ;;  %8611 = vmatpush.bf16.msrb.mxu2 %v13390_v59  ;;  %8598 = vmatpush.bf16.msrb.mxu1 %v13386_v62  ;;  %v13491_v49 = vld [vmem:[#allocation12 + $0x13d8] sm:$0xf0]  ;;  %v9820_v59 = vrot.slane %v9819_v61, 7  ;;  %v13474_v62 = vor.u32 %v14758_v16, %v13473_v5  ;;  %v14782_v30 = vld [vmem:[#allocation12 + $0x1474] sm:$0xf0]  ;;  %v9965_v61 = vpack.c.bf16 %v9963_v63, %v9963_v63 }
 0x504   :  { %8624 = vmatpush.bf16.msrb.mxu3 %v13394_v3  ;;  %9913 = vmatpush.bf16.msra.mxu0 %v13926_v10  ;;  %v13494_v8 = vor.u32 %v14760_v27, %v13491_v49  ;;  %v14751_v3 = vld [vmem:[#allocation12 + $0x1384] sm:$0xf]  ;;  %v13451_v10 = vld [vmem:[#allocation12 + $0x1390] sm:$0xf0]  ;;  %v14109_v27 = vld [vmem:[#allocation12 + $0x1860] sm:$0xf]  ;;  %v8464_v24 = vadd.f32 %v16955_v17, %v16935_v57  ;;  %v13574_v5 = vor.u32 %v14782_v30, %v13573_v21 }
 0x505   :  { %13376 = vmatmul.msk.bf16.vlgmr.msra.gmra.mxu1 %vm2150_vm4, %v16768_v2  ;;  %13377 = vmatmul.msk.bf16.vlgmr.msra.gmra.mxu2 %vm2150_vm4, %v16768_v2  ;;  %v9821_v31 = vsel %vm2212_vm5, %v9820_v59, %v9818_v7  ;;  %v13454_v44 = vor.u32 %v14751_v3, %v13451_v10  ;;  %v14909_v49 = vld [vmem:[#allocation12 + $0x186c] sm:$0xf0]  ;;  %v14775_v17 = vld [vmem:[#allocation12 + $0x1444] sm:$0xf]  ;;  %v9985_v0 = vunpack.c.l.b16 %v9965_v61  ;;  %v14774_v59 = vld [vmem:[#allocation12 + $0x1434] sm:$0xf0] }
 0x506   :  { %13378 = vmatmul.msk.bf16.vlgmr.msra.gmra.mxu3 %vm2150_vm4, %v16768_v2  ;;  %13919 = vmatmul.msk.bf16.vlgmr.msrb.gmra.mxu0 %vm2150_vm4, %v16957_v15  ;;  %v16976_v32 = vpack.c.b16 %v9821_v31, %v9821_v31  ;;  %v14110_v57 = vor.u32 %v14909_v49, %v14109_v27  ;;  %v13543_v10 = vld [vmem:[#allocation12 + $0x1438] sm:$0xf0]  ;;  %v14901_v7 = vld [vmem:[#allocation12 + $0x182c] sm:$0xf0]  ;;  %v13525_v30 = vld [vmem:[#allocation12 + $0x1408] sm:$0xf] }
 0x507   :  { %8774 = vmatpush.bf16.msra.mxu2 %v13506_v60  ;;  %8761 = vmatpush.bf16.msra.mxu1 %v13502_v46  ;;  %v13462_v46 = vor.u32 %v14752_v42, %v13459_v38  ;;  %v14077_v42 = vld [vmem:[#allocation12 + $0x1820] sm:$0xf]  ;;  %v14770_v63 = vld [vmem:[#allocation12 + $0x1414] sm:$0xf0]  ;;  %v13641_v49 = vld [vmem:[#allocation12 + $0x14e8] sm:$0xf] }
 0x508   :  { %v7119_v55 = vpop.f32.mrf.mxu2  ;;  %8787 = vmatpush.bf16.msra.mxu3 %v13510_v6  ;;  %10076 = vmatpush.bf16.msrb.mxu0 %v14042_v18  ;;  %v13567_v6 = vld [vmem:[#allocation12 + $0x1470] sm:$0xf0]  ;;  %v14780_v18 = vld [vmem:[#allocation12 + $0x146c] sm:$0xf] }
 0x509   :  { %v16968_v2 = vadd.f32 %v7119_v55, %v16946_v41  ;;  %v7132_v26 = vpop.f32.mrf.mxu3  ;;  %v13478_v41 = vor.u32 %v14756_v47, %v13475_v58  ;;  %v13570_v16 = vor.u32 %v14779_v48, %v13567_v6  ;;  %v13557_v55 = vld [vmem:[#allocation12 + $0x1448] sm:$0xf]  ;;  %v13578_v36 = vor.u32 %v14780_v18, %v13575_v51  ;;  %v14776_v47 = vld [vmem:[#allocation12 + $0x144c] sm:$0xf]  ;;  %v13527_v6 = vld [vmem:[#allocation12 + $0x1418] sm:$0xf0] }
 0x50a   :  { %v16971_v14 = vadd.f32 %v7132_v26, %v16949_v35  ;;  %v7108_v22 = vpop.f32.mrf.mxu1  ;;  %v13993_v35 = vld [vmem:[#allocation12 + $0x1780] sm:$0xf]  ;;  %v9962_v58 = vld [vmem:[#allocation3 + $0x35] sm:$0x1]  ;;  %v14897_v18 = vld [vmem:[#allocation12 + $0x180c] sm:$0xf0]  ;;  %v13526_v51 = vor.u32 %v14770_v63, %v13525_v30 }
 0x50b   :  { %v8423_v13 = vpop.f32.mrf.mxu0  ;;  %8775 = vmatpush.bf16.msra.mxu2 %v13490_v23  ;;  %8762 = vmatpush.bf16.msra.mxu1 %v13486_v9  ;;  %v13994_v20 = vor.u32 %v14881_v25, %v13993_v35  ;;  %v14093_v26 = vld [vmem:[#allocation12 + $0x1840] sm:$0xf]  ;;  %v13554_v22 = vor.u32 %v14775_v17, %v13551_v43  ;;  %v9964_v31 = vpack.c.bf16 %v9962_v58, %v9962_v58  ;;  %v14768_v48 = vld [vmem:[#allocation12 + $0x140c] sm:$0xf]  ;;  %v13625_v58 = vld [vmem:[#allocation12 + $0x14c8] sm:$0xf] }
 0x50c   :  { %8788 = vmatpush.bf16.msra.mxu3 %v13494_v8  ;;  %10077 = vmatpush.bf16.msrb.mxu0 %v14026_v19  ;;  %v14778_v8 = vld [vmem:[#allocation12 + $0x1454] sm:$0xf0]  ;;  %v13541_v13 = vld [vmem:[#allocation12 + $0x1428] sm:$0xf]  ;;  %v14094_v28 = vor.u32 %v14905_v4, %v14093_v26  ;;  %v10129_v43 = vld [vmem:[#allocation3 + $0x76] sm:$0x1] }
 0x50d   :  { %v13558_v56 = vor.u32 %v14778_v8, %v13557_v55 }
 0x50f   :  { %8776 = vmatpush.bf16.msra.mxu2 %v13474_v62  ;;  %8763 = vmatpush.bf16.msra.mxu1 %v13470_v11 }
 0x510   :  { %v7121_v60 = vpop.f32.mrf.mxu2  ;;  %8789 = vmatpush.bf16.msra.mxu3 %v13478_v41  ;;  %10078 = vmatpush.bf16.msrb.mxu0 %v14010_v50  ;;  %v13535_v41 = vld [vmem:[#allocation12 + $0x1430] sm:$0xf0]  ;;  %v14772_v50 = vld [vmem:[#allocation12 + $0x142c] sm:$0xf] }
 0x511   :  { %v7134_v34 = vpop.f32.mrf.mxu3  ;;  %v13538_v21 = vor.u32 %v14771_v54, %v13535_v41  ;;  %v14078_v60 = vor.u32 %v14901_v7, %v14077_v42  ;;  %v14790_v42 = vld [vmem:[#allocation12 + $0x14b4] sm:$0xf0]  ;;  %v14787_v7 = vld [vmem:[#allocation12 + $0x14a4] sm:$0xf] }
 0x512   :  { %v7272_v37 = vpop.f32.mrf.mxu1  ;;  %v9984_v34 = vunpack.c.l.b16 %v9964_v31 }
 0x513   :  { %v16979_v23 = vadd.f32 %v7272_v37, %v16953_v40  ;;  %v8587_v9 = vpop.f32.mrf.mxu0  ;;  %8777 = vmatpush.bf16.msra.mxu2 %v13458_v39  ;;  %8764 = vmatpush.bf16.msra.mxu1 %v13454_v44  ;;  %v13559_v40 = vld [vmem:[#allocation12 + $0x1458] sm:$0xf0]  ;;  %v9986_v39 = vrot.slane %v9985_v0, 7  ;;  %v13542_v44 = vor.u32 %v14774_v59, %v13541_v13  ;;  %v13530_v37 = vor.u32 %v14768_v48, %v13527_v6  ;;  %v14794_v13 = vld [vmem:[#allocation12 + $0x14d4] sm:$0xf0] }
 0x514   :  { %v16981_v19 = vadd.f32 %v8587_v9, %v8464_v24  ;;  %8790 = vmatpush.bf16.msra.mxu3 %v13462_v46  ;;  %10079 = vmatpush.bf16.msrb.mxu0 %v13994_v20  ;;  %v13562_v11 = vor.u32 %v14776_v47, %v13559_v40  ;;  %v14767_v46 = vld [vmem:[#allocation12 + $0x1404] sm:$0xf]  ;;  %v13519_v20 = vld [vmem:[#allocation12 + $0x1410] sm:$0xf0]  ;;  %v14798_v9 = vld [vmem:[#allocation12 + $0x14f4] sm:$0xf0]  ;;  %v13626_v54 = vor.u32 %v14794_v13, %v13625_v58 }
 0x515   :  { %13444 = vmatmul.msk.bf16.vlgmr.msrb.gmra.mxu1 %vm2150_vm4, %v16791_v1  ;;  %13445 = vmatmul.msk.bf16.vlgmr.msrb.gmra.mxu2 %vm2150_vm4, %v16791_v1  ;;  %v13522_v27 = vor.u32 %v14767_v46, %v13519_v20  ;;  %v9987_v8 = vsel %vm2212_vm5, %v9986_v39, %v9984_v34  ;;  %v13642_v26 = vor.u32 %v14798_v9, %v13641_v49  ;;  %v14791_v59 = vld [vmem:[#allocation12 + $0x14c4] sm:$0xf]  ;;  %v14788_v39 = vld [vmem:[#allocation12 + $0x14ac] sm:$0xf]  ;;  %v13593_v20 = vld [vmem:[#allocation12 + $0x1488] sm:$0xf] }
 0x516   :  { %13446 = vmatmul.msk.bf16.vlgmr.msrb.gmra.mxu3 %vm2150_vm4, %v16791_v1  ;;  %13987 = vmatmul.msk.bf16.vlgmr.msra.gmra.mxu0 %vm2150_vm4, %v16976_v32  ;;  %v14786_v6 = vld [vmem:[#allocation12 + $0x1494] sm:$0xf0]  ;;  %v14784_v34 = vld [vmem:[#allocation12 + $0x148c] sm:$0xf]  ;;  %v13693_v58 = vld [vmem:[#allocation12 + $0x1548] sm:$0xf] }
 0x517   :  { %8940 = vmatpush.bf16.msrb.mxu2 %v13574_v5  ;;  %8927 = vmatpush.bf16.msrb.mxu1 %v13570_v16  ;;  %v14795_v5 = vld [vmem:[#allocation12 + $0x14e4] sm:$0xf]  ;;  %v13635_v16 = vld [vmem:[#allocation12 + $0x14f0] sm:$0xf0]  ;;  %v14814_v9 = vld [vmem:[#allocation12 + $0x1574] sm:$0xf0] }
 0x518   :  { %v7285_v62 = vpop.f32.mrf.mxu2  ;;  %8953 = vmatpush.bf16.msrb.mxu3 %v13578_v36  ;;  %10242 = vmatpush.bf16.msra.mxu0 %v14110_v57  ;;  %v14796_v36 = vld [vmem:[#allocation12 + $0x14ec] sm:$0xf]  ;;  %v13643_v57 = vld [vmem:[#allocation12 + $0x14f8] sm:$0xf0]  ;;  %v13638_v4 = vor.u32 %v14795_v5, %v13635_v16  ;;  %v14811_v5 = vld [vmem:[#allocation12 + $0x1564] sm:$0xf] }
 0x519   :  { %v16992_v1 = vadd.f32 %v7285_v62, %v16968_v2  ;;  %v7298_v3 = vpop.f32.mrf.mxu3  ;;  %v13546_v2 = vor.u32 %v14772_v50, %v13543_v10  ;;  %v13619_v62 = vld [vmem:[#allocation12 + $0x14d0] sm:$0xf0]  ;;  %v13609_v50 = vld [vmem:[#allocation12 + $0x14a8] sm:$0xf] }
 0x51a   :  { %v16995_v38 = vadd.f32 %v7298_v3, %v16971_v14  ;;  %v7274_v35 = vpop.f32.mrf.mxu1  ;;  %v14061_v14 = vld [vmem:[#allocation12 + $0x1800] sm:$0xf]  ;;  %v13622_v41 = vor.u32 %v14791_v59, %v13619_v62  ;;  %v13703_v16 = vld [vmem:[#allocation12 + $0x1570] sm:$0xf0]  ;;  %v14810_v62 = vld [vmem:[#allocation12 + $0x1554] sm:$0xf0] }
 0x51b   :  { %v8589_v25 = vpop.f32.mrf.mxu0  ;;  %8941 = vmatpush.bf16.msrb.mxu2 %v13558_v56  ;;  %8928 = vmatpush.bf16.msrb.mxu1 %v13554_v22  ;;  %v14062_v61 = vor.u32 %v14897_v18, %v14061_v14  ;;  %v17004_v56 = vpack.c.b16 %v9987_v8, %v9987_v8  ;;  %v13646_v22 = vor.u32 %v14796_v36, %v13643_v57  ;;  %v13603_v35 = vld [vmem:[#allocation12 + $0x14b0] sm:$0xf0]  ;;  %v14812_v36 = vld [vmem:[#allocation12 + $0x156c] sm:$0xf]  ;;  %v13711_v57 = vld [vmem:[#allocation12 + $0x1578] sm:$0xf0] }
 0x51c   :  { %8954 = vmatpush.bf16.msrb.mxu3 %v13562_v11  ;;  %10243 = vmatpush.bf16.msra.mxu0 %v14094_v28  ;;  %v14792_v11 = vld [vmem:[#allocation12 + $0x14cc] sm:$0xf]  ;;  %v13627_v28 = vld [vmem:[#allocation12 + $0x14d8] sm:$0xf0]  ;;  %v13606_v46 = vor.u32 %v14787_v7, %v13603_v35  ;;  %v13587_v14 = vld [vmem:[#allocation12 + $0x1490] sm:$0xf0]  ;;  %v13714_v59 = vor.u32 %v14812_v36, %v13711_v57 }
 0x51d   :  { %v13630_v10 = vor.u32 %v14792_v11, %v13627_v28  ;;  %v13687_v11 = vld [vmem:[#allocation12 + $0x1550] sm:$0xf0]  ;;  %v13695_v28 = vld [vmem:[#allocation12 + $0x1558] sm:$0xf0]  ;;  %v13761_v36 = vld [vmem:[#allocation12 + $0x15c8] sm:$0xf] }
 0x51e   :  { %v14826_v57 = vld [vmem:[#allocation12 + $0x15d4] sm:$0xf0] }
 0x51f   :  { %8942 = vmatpush.bf16.msrb.mxu2 %v13542_v44  ;;  %8929 = vmatpush.bf16.msrb.mxu1 %v13538_v21  ;;  %v13611_v44 = vld [vmem:[#allocation12 + $0x14b8] sm:$0xf0] }
 0x520   :  { %v7287_v24 = vpop.f32.mrf.mxu2  ;;  %8955 = vmatpush.bf16.msrb.mxu3 %v13546_v2  ;;  %10244 = vmatpush.bf16.msra.mxu0 %v14078_v60  ;;  %v13610_v60 = vor.u32 %v14790_v42, %v13609_v50  ;;  %v13614_v48 = vor.u32 %v14788_v39, %v13611_v44  ;;  %v13671_v42 = vld [vmem:[#allocation12 + $0x1530] sm:$0xf0] }
 0x521   :  { %v7300_v55 = vpop.f32.mrf.mxu3  ;;  %v13709_v24 = vld [vmem:[#allocation12 + $0x1568] sm:$0xf] }
 0x522   :  { %v7438_v17 = vpop.f32.mrf.mxu1 }
 0x523   :  { %v16999_v47 = vadd.f32 %v7438_v17, %v16979_v23  ;;  %v8753_v40 = vpop.f32.mrf.mxu0  ;;  %8943 = vmatpush.bf16.msrb.mxu2 %v13526_v51  ;;  %8930 = vmatpush.bf16.msrb.mxu1 %v13522_v27  ;;  %v10131_v23 = vpack.c.bf16 %v10129_v43, %v10129_v43  ;;  %v13595_v51 = vld [vmem:[#allocation12 + $0x1498] sm:$0xf0] }
 0x524   :  { %v17002_v0 = vadd.f32 %v8753_v40, %v16981_v19  ;;  %8956 = vmatpush.bf16.msrb.mxu3 %v13530_v37  ;;  %10245 = vmatpush.bf16.msra.mxu0 %v14062_v61  ;;  %v10128_v19 = vld [vmem:[#allocation3 + $0x36] sm:$0x1]  ;;  %v13598_v61 = vor.u32 %v14784_v34, %v13595_v51  ;;  %v14827_v34 = vld [vmem:[#allocation12 + $0x15e4] sm:$0xf] }
 0x525   :  { %13512 = vmatmul.msk.bf16.vlgmr.msra.gmra.mxu1 %vm2150_vm4, %v16814_v33  ;;  %13513 = vmatmul.msk.bf16.vlgmr.msra.gmra.mxu2 %vm2150_vm4, %v16814_v33  ;;  %v10130_v2 = vpack.c.bf16 %v10128_v19, %v10128_v19 }
 0x526   :  { %13514 = vmatmul.msk.bf16.vlgmr.msra.gmra.mxu3 %vm2150_vm4, %v16814_v33  ;;  %14055 = vmatmul.msk.bf16.vlgmr.msrb.gmra.mxu0 %vm2150_vm4, %v17004_v56  ;;  %v10151_v33 = vunpack.c.l.b16 %v10131_v23  ;;  %v14807_v23 = vld [vmem:[#allocation12 + $0x1544] sm:$0xf] }
 0x527   :  { %9106 = vmatpush.bf16.msra.mxu2 %v13642_v26  ;;  %9093 = vmatpush.bf16.msra.mxu1 %v13638_v4  ;;  %v10150_v27 = vunpack.c.l.b16 %v10130_v2  ;;  %v13710_v26 = vor.u32 %v14814_v9, %v13709_v24  ;;  %v13706_v4 = vor.u32 %v14811_v5, %v13703_v16  ;;  %v13690_v19 = vor.u32 %v14807_v23, %v13687_v11  ;;  %v13661_v2 = vld [vmem:[#allocation12 + $0x1508] sm:$0xf]  ;;  %v13779_v24 = vld [vmem:[#allocation12 + $0x15f8] sm:$0xf0]  ;;  %v14822_v23 = vld [vmem:[#allocation12 + $0x15b4] sm:$0xf0] }
 0x528   :  { %v7451_v3 = vpop.f32.mrf.mxu2  ;;  %9119 = vmatpush.bf16.msra.mxu3 %v13646_v22  ;;  %v10152_v18 = vrot.slane %v10151_v33, 7  ;;  %v14819_v11 = vld [vmem:[#allocation12 + $0x15a4] sm:$0xf] }
 0x529   :  { %v17015_v25 = vadd.f32 %v7451_v3, %v16992_v1  ;;  %v7464_v31 = vpop.f32.mrf.mxu3  ;;  %v14783_v1 = vld [vmem:[#allocation12 + $0x1484] sm:$0xf]  ;;  %v14806_v3 = vld [vmem:[#allocation12 + $0x1534] sm:$0xf0] }
 0x52a   :  { %v17018_v21 = vadd.f32 %v7464_v31, %v16995_v38  ;;  %v7440_v30 = vpop.f32.mrf.mxu1  ;;  %v13594_v38 = vor.u32 %v14786_v6, %v13593_v20  ;;  %v13590_v49 = vor.u32 %v14783_v1, %v13587_v14  ;;  %v10153_v8 = vsel %vm2212_vm5, %v10152_v18, %v10150_v27  ;;  %v14804_v31 = vld [vmem:[#allocation12 + $0x152c] sm:$0xf]  ;;  %v14799_v20 = vld [vmem:[#allocation12 + $0x1504] sm:$0xf]  ;;  %v13663_v6 = vld [vmem:[#allocation12 + $0x1518] sm:$0xf0] }
 0x52b   :  { %v8755_v63 = vpop.f32.mrf.mxu0  ;;  %9107 = vmatpush.bf16.msra.mxu2 %v13626_v54  ;;  %9094 = vmatpush.bf16.msra.mxu1 %v13622_v41  ;;  %v17027_v13 = vpack.c.b16 %v10153_v8, %v10153_v8  ;;  %v13677_v54 = vld [vmem:[#allocation12 + $0x1528] sm:$0xf]  ;;  %v14830_v18 = vld [vmem:[#allocation12 + $0x15f4] sm:$0xf0] }
 0x52c   :  { %9120 = vmatpush.bf16.msra.mxu3 %v13630_v10  ;;  %v14803_v10 = vld [vmem:[#allocation12 + $0x1524] sm:$0xf]  ;;  %v13678_v30 = vor.u32 %v14806_v3, %v13677_v54 }
 0x52d   :  { %v13674_v63 = vor.u32 %v14803_v10, %v13671_v42 }
 0x52f   :  { %9108 = vmatpush.bf16.msra.mxu2 %v13610_v60  ;;  %9095 = vmatpush.bf16.msra.mxu1 %v13606_v46  ;;  %v14802_v46 = vld [vmem:[#allocation12 + $0x1514] sm:$0xf0] }
 0x530   :  { %v7453_v37 = vpop.f32.mrf.mxu2  ;;  %9121 = vmatpush.bf16.msra.mxu3 %v13614_v48  ;;  %v13655_v48 = vld [vmem:[#allocation12 + $0x1510] sm:$0xf0]  ;;  %v13662_v1 = vor.u32 %v14802_v46, %v13661_v2  ;;  %v14846_v46 = vld [vmem:[#allocation12 + $0x1674] sm:$0xf0] }
 0x531   :  { %v7466_v55 = vpop.f32.mrf.mxu3  ;;  %v13658_v14 = vor.u32 %v14799_v20, %v13655_v48  ;;  %v14843_v20 = vld [vmem:[#allocation12 + $0x1664] sm:$0xf] }
 0x532   :  { %v7604_v17 = vpop.f32.mrf.mxu1 }
 0x533   :  { %v17022_v43 = vadd.f32 %v7604_v17, %v16999_v47  ;;  %v8919_v40 = vpop.f32.mrf.mxu0  ;;  %9109 = vmatpush.bf16.msra.mxu2 %v13594_v38  ;;  %9096 = vmatpush.bf16.msra.mxu1 %v13590_v49  ;;  %v14808_v47 = vld [vmem:[#allocation12 + $0x154c] sm:$0xf]  ;;  %v13771_v38 = vld [vmem:[#allocation12 + $0x15f0] sm:$0xf0]  ;;  %v14823_v17 = vld [vmem:[#allocation12 + $0x15c4] sm:$0xf] }
 0x534   :  { %v17025_v22 = vadd.f32 %v8919_v40, %v17002_v0  ;;  %9122 = vmatpush.bf16.msra.mxu3 %v13598_v61  ;;  %v13694_v0 = vor.u32 %v14810_v62, %v13693_v58  ;;  %v13698_v50 = vor.u32 %v14808_v47, %v13695_v28  ;;  %v14828_v49 = vld [vmem:[#allocation12 + $0x15ec] sm:$0xf]  ;;  %v13774_v55 = vor.u32 %v14827_v34, %v13771_v38  ;;  %v13763_v58 = vld [vmem:[#allocation12 + $0x15d8] sm:$0xf0]  ;;  %v13745_v62 = vld [vmem:[#allocation12 + $0x15a8] sm:$0xf] }
 0x535   :  { %13580 = vmatmul.msk.bf16.vlgmr.msrb.gmra.mxu1 %vm2150_vm4, %v16837_v45  ;;  %13581 = vmatmul.msk.bf16.vlgmr.msrb.gmra.mxu2 %vm2150_vm4, %v16837_v45  ;;  %v13782_v8 = vor.u32 %v14828_v49, %v13779_v24  ;;  %v13739_v28 = vld [vmem:[#allocation12 + $0x15b0] sm:$0xf0]  ;;  %v13746_v3 = vor.u32 %v14822_v23, %v13745_v62  ;;  %v13829_v49 = vld [vmem:[#allocation12 + $0x1648] sm:$0xf]  ;;  %v14842_v24 = vld [vmem:[#allocation12 + $0x1654] sm:$0xf0] }
 0x536   :  { %13582 = vmatmul.msk.bf16.vlgmr.msrb.gmra.mxu3 %vm2150_vm4, %v16837_v45  ;;  %14123 = vmatmul.msk.bf16.vlgmr.msra.gmra.mxu0 %vm2150_vm4, %v17027_v13  ;;  %v13679_v45 = vld [vmem:[#allocation12 + $0x1538] sm:$0xf0]  ;;  %v13742_v42 = vor.u32 %v14819_v11, %v13739_v28 }
 0x537   :  { %9272 = vmatpush.bf16.msrb.mxu2 %v13710_v26  ;;  %9259 = vmatpush.bf16.msrb.mxu1 %v13706_v4  ;;  %v13682_v60 = vor.u32 %v14804_v31, %v13679_v45  ;;  %v13755_v26 = vld [vmem:[#allocation12 + $0x15d0] sm:$0xf0]  ;;  %v14824_v4 = vld [vmem:[#allocation12 + $0x15cc] sm:$0xf]  ;;  %v13729_v31 = vld [vmem:[#allocation12 + $0x1588] sm:$0xf] }
 0x538   :  { %v7617_v41 = vpop.f32.mrf.mxu2  ;;  %9285 = vmatpush.bf16.msrb.mxu3 %v13714_v59  ;;  %v13758_v59 = vor.u32 %v14823_v17, %v13755_v26  ;;  %v14818_v45 = vld [vmem:[#allocation12 + $0x1594] sm:$0xf0] }
 0x539   :  { %v17038_v7 = vadd.f32 %v7617_v41, %v17015_v25  ;;  %v7630_v35 = vpop.f32.mrf.mxu3  ;;  %v14800_v25 = vld [vmem:[#allocation12 + $0x150c] sm:$0xf]  ;;  %v14838_v17 = vld [vmem:[#allocation12 + $0x1634] sm:$0xf0] }
 0x53a   :  { %v17041_v33 = vadd.f32 %v7630_v35, %v17018_v21  ;;  %v7606_v39 = vpop.f32.mrf.mxu1  ;;  %v13777_v21 = vld [vmem:[#allocation12 + $0x15e8] sm:$0xf]  ;;  %v13666_v27 = vor.u32 %v14800_v25, %v13663_v6  ;;  %v13839_v25 = vld [vmem:[#allocation12 + $0x1670] sm:$0xf0]  ;;  %v14844_v6 = vld [vmem:[#allocation12 + $0x166c] sm:$0xf] }
 0x53b   :  { %v8921_v44 = vpop.f32.mrf.mxu0  ;;  %9273 = vmatpush.bf16.msrb.mxu2 %v13694_v0  ;;  %9260 = vmatpush.bf16.msrb.mxu1 %v13690_v19  ;;  %v13778_v9 = vor.u32 %v14830_v18, %v13777_v21  ;;  %v14820_v0 = vld [vmem:[#allocation12 + $0x15ac] sm:$0xf]  ;;  %v13747_v19 = vld [vmem:[#allocation12 + $0x15b8] sm:$0xf0]  ;;  %v14815_v39 = vld [vmem:[#allocation12 + $0x1584] sm:$0xf] }
 0x53c   :  { %9286 = vmatpush.bf16.msrb.mxu3 %v13698_v50  ;;  %v13750_v35 = vor.u32 %v14820_v0, %v13747_v19  ;;  %v13723_v44 = vld [vmem:[#allocation12 + $0x1590] sm:$0xf0]  ;;  %v13797_v0 = vld [vmem:[#allocation12 + $0x1608] sm:$0xf]  ;;  %v14834_v19 = vld [vmem:[#allocation12 + $0x1614] sm:$0xf0] }
 0x53f   :  { %9274 = vmatpush.bf16.msrb.mxu2 %v13678_v30  ;;  %9261 = vmatpush.bf16.msrb.mxu1 %v13674_v63  ;;  %v14816_v30 = vld [vmem:[#allocation12 + $0x158c] sm:$0xf]  ;;  %v13731_v63 = vld [vmem:[#allocation12 + $0x1598] sm:$0xf0] }
 0x540   :  { %v7619_v51 = vpop.f32.mrf.mxu2  ;;  %9287 = vmatpush.bf16.msrb.mxu3 %v13682_v60  ;;  %v13734_v2 = vor.u32 %v14816_v30, %v13731_v63  ;;  %v13845_v60 = vld [vmem:[#allocation12 + $0x1668] sm:$0xf]  ;;  %v14860_v30 = vld [vmem:[#allocation12 + $0x16ec] sm:$0xf]  ;;  %v13915_v63 = vld [vmem:[#allocation12 + $0x16f8] sm:$0xf0] }
 0x541   :  { %v7632_v37 = vpop.f32.mrf.mxu3  ;;  %v13846_v18 = vor.u32 %v14846_v46, %v13845_v60 }
 0x542   :  { %v7770_v61 = vpop.f32.mrf.mxu1  ;;  %v14839_v37 = vld [vmem:[#allocation12 + $0x1644] sm:$0xf] }
 0x543   :  { %v17044_v5 = vadd.f32 %v7770_v61, %v17022_v43  ;;  %v9085_v16 = vpop.f32.mrf.mxu0  ;;  %9275 = vmatpush.bf16.msrb.mxu2 %v13662_v1  ;;  %9262 = vmatpush.bf16.msrb.mxu1 %v13658_v14  ;;  %v13762_v43 = vor.u32 %v14826_v57, %v13761_v36  ;;  %v13847_v1 = vld [vmem:[#allocation12 + $0x1678] sm:$0xf0]  ;;  %v13813_v57 = vld [vmem:[#allocation12 + $0x1628] sm:$0xf] }
 0x544   :  { %v17047_v40 = vadd.f32 %v9085_v16, %v17025_v22  ;;  %9288 = vmatpush.bf16.msrb.mxu3 %v13666_v27  ;;  %v13766_v22 = vor.u32 %v14824_v4, %v13763_v58  ;;  %v13842_v27 = vor.u32 %v14843_v20, %v13839_v25  ;;  %v13850_v38 = vor.u32 %v14844_v6, %v13847_v1  ;;  %v14840_v16 = vld [vmem:[#allocation12 + $0x164c] sm:$0xf]  ;;  %v13807_v4 = vld [vmem:[#allocation12 + $0x1630] sm:$0xf0]  ;;  %v13897_v25 = vld [vmem:[#allocation12 + $0x16c8] sm:$0xf] }
 0x545   :  { %13648 = vmatmul.msk.bf16.vlgmr.msra.gmra.mxu1 %vm2150_vm4, %v16860_v29  ;;  %13649 = vmatmul.msk.bf16.vlgmr.msra.gmra.mxu2 %vm2150_vm4, %v16860_v29  ;;  %v14836_v58 = vld [vmem:[#allocation12 + $0x162c] sm:$0xf]  ;;  %v13814_v23 = vor.u32 %v14838_v17, %v13813_v57  ;;  %v14858_v6 = vld [vmem:[#allocation12 + $0x16d4] sm:$0xf0]  ;;  %v14855_v1 = vld [vmem:[#allocation12 + $0x16c4] sm:$0xf] }
 0x546   :  { %13650 = vmatmul.msk.bf16.vlgmr.msra.gmra.mxu3 %vm2150_vm4, %v16860_v29 }
 0x547   :  { %9438 = vmatpush.bf16.msra.mxu2 %v13778_v9  ;;  %9425 = vmatpush.bf16.msra.mxu1 %v13774_v55  ;;  %v13823_v9 = vld [vmem:[#allocation12 + $0x1650] sm:$0xf0]  ;;  %v13831_v55 = vld [vmem:[#allocation12 + $0x1658] sm:$0xf0] }
 0x548   :  { %9451 = vmatpush.bf16.msra.mxu3 %v13782_v8  ;;  %v7783_v47 = vpop.f32.mrf.mxu2  ;;  %v13826_v8 = vor.u32 %v14839_v37, %v13823_v9  ;;  %v13834_v36 = vor.u32 %v14840_v16, %v13831_v55  ;;  %v14851_v37 = vld [vmem:[#allocation12 + $0x16a4] sm:$0xf]  ;;  %v13875_v9 = vld [vmem:[#allocation12 + $0x16b0] sm:$0xf0]  ;;  %v14852_v16 = vld [vmem:[#allocation12 + $0x16ac] sm:$0xf] }
 0x549   :  { %v17056_v54 = vadd.f32 %v7783_v47, %v17038_v7  ;;  %v7796_v41 = vpop.f32.mrf.mxu3  ;;  %v13730_v7 = vor.u32 %v14818_v45, %v13729_v31  ;;  %v14862_v31 = vld [vmem:[#allocation12 + $0x16f4] sm:$0xf0]  ;;  %v14859_v45 = vld [vmem:[#allocation12 + $0x16e4] sm:$0xf]  ;;  %v13883_v55 = vld [vmem:[#allocation12 + $0x16b8] sm:$0xf0] }
 0x54a   :  { %v17059_v50 = vadd.f32 %v7796_v41, %v17041_v33  ;;  %v7772_v29 = vpop.f32.mrf.mxu1  ;;  %v13726_v33 = vor.u32 %v14815_v39, %v13723_v44  ;;  %v14831_v41 = vld [vmem:[#allocation12 + $0x1604] sm:$0xf]  ;;  %v13907_v44 = vld [vmem:[#allocation12 + $0x16f0] sm:$0xf0] }
 0x54b   :  { %9439 = vmatpush.bf16.msra.mxu2 %v13762_v43  ;;  %v9087_v10 = vpop.f32.mrf.mxu0  ;;  %9426 = vmatpush.bf16.msra.mxu1 %v13758_v59  ;;  %v13815_v43 = vld [vmem:[#allocation12 + $0x1638] sm:$0xf0]  ;;  %v13791_v29 = vld [vmem:[#allocation12 + $0x1610] sm:$0xf0]  ;;  %v13910_v20 = vor.u32 %v14859_v45, %v13907_v44  ;;  %v14874_v44 = vld [vmem:[#allocation12 + $0x1754] sm:$0xf0] }
 0x54c   :  { %9452 = vmatpush.bf16.msra.mxu3 %v13766_v22  ;;  %v13818_v28 = vor.u32 %v14836_v58, %v13815_v43  ;;  %v13799_v10 = vld [vmem:[#allocation12 + $0x1618] sm:$0xf0]  ;;  %v14850_v58 = vld [vmem:[#allocation12 + $0x1694] sm:$0xf0]  ;;  %v14847_v43 = vld [vmem:[#allocation12 + $0x1684] sm:$0xf] }
 0x54f   :  { %9440 = vmatpush.bf16.msra.mxu2 %v13746_v3  ;;  %9427 = vmatpush.bf16.msra.mxu1 %v13742_v42  ;;  %v14832_v3 = vld [vmem:[#allocation12 + $0x160c] sm:$0xf] }
 0x550   :  { %9453 = vmatpush.bf16.msra.mxu3 %v13750_v35  ;;  %v7785_v48 = vpop.f32.mrf.mxu2  ;;  %v13802_v42 = vor.u32 %v14832_v3, %v13799_v10  ;;  %v13913_v35 = vld [vmem:[#allocation12 + $0x16e8] sm:$0xf]  ;;  %v13983_v3 = vld [vmem:[#allocation12 + $0x1778] sm:$0xf0] }
 0x551   :  { %v7798_v14 = vpop.f32.mrf.mxu3  ;;  %v13918_v48 = vor.u32 %v14860_v30, %v13915_v63  ;;  %v14871_v30 = vld [vmem:[#allocation12 + $0x1744] sm:$0xf]  ;;  %v13959_v63 = vld [vmem:[#allocation12 + $0x1750] sm:$0xf0] }
 0x552   :  { %v7936_v21 = vpop.f32.mrf.mxu1 }
 0x553   :  { %9441 = vmatpush.bf16.msra.mxu2 %v13730_v7  ;;  %v17062_v34 = vadd.f32 %v7936_v21, %v17044_v5  ;;  %v9251_v51 = vpop.f32.mrf.mxu0  ;;  %9428 = vmatpush.bf16.msra.mxu1 %v13726_v33  ;;  %v13830_v5 = vor.u32 %v14842_v24, %v13829_v49  ;;  %v13891_v21 = vld [vmem:[#allocation12 + $0x16d0] sm:$0xf0]  ;;  %v13881_v49 = vld [vmem:[#allocation12 + $0x16a8] sm:$0xf]  ;;  %v14854_v24 = vld [vmem:[#allocation12 + $0x16b4] sm:$0xf0] }
 0x554   :  { %9454 = vmatpush.bf16.msra.mxu3 %v13734_v2  ;;  %v17065_v61 = vadd.f32 %v9251_v51, %v17047_v40  ;;  %v14835_v40 = vld [vmem:[#allocation12 + $0x1624] sm:$0xf]  ;;  %v13914_v2 = vor.u32 %v14862_v31, %v13913_v35  ;;  %v13899_v51 = vld [vmem:[#allocation12 + $0x16d8] sm:$0xf0] }
 0x555   :  { %13716 = vmatmul.msk.bf16.vlgmr.msrb.gmra.mxu1 %vm2150_vm4, %v16883_v53  ;;  %13717 = vmatmul.msk.bf16.vlgmr.msrb.gmra.mxu2 %vm2150_vm4, %v16883_v53  ;;  %v13810_v47 = vor.u32 %v14835_v40, %v13807_v4  ;;  %v13878_v40 = vor.u32 %v14851_v37, %v13875_v9  ;;  %v13865_v4 = vld [vmem:[#allocation12 + $0x1688] sm:$0xf]  ;;  %v14866_v9 = vld [vmem:[#allocation12 + $0x1714] sm:$0xf0] }
 0x556   :  { %13718 = vmatmul.msk.bf16.vlgmr.msrb.gmra.mxu3 %vm2150_vm4, %v16883_v53 }
 0x557   :  { %9604 = vmatpush.bf16.msrb.mxu2 %v13846_v18  ;;  %9591 = vmatpush.bf16.msrb.mxu1 %v13842_v27  ;;  %v14856_v18 = vld [vmem:[#allocation12 + $0x16cc] sm:$0xf]  ;;  %v13894_v27 = vor.u32 %v14855_v1, %v13891_v21  ;;  %v13943_v1 = vld [vmem:[#allocation12 + $0x1730] sm:$0xf0] }
 0x558   :  { %9617 = vmatpush.bf16.msrb.mxu3 %v13850_v38  ;;  %v7949_v26 = vpop.f32.mrf.mxu2  ;;  %v13902_v38 = vor.u32 %v14856_v18, %v13899_v51  ;;  %v14868_v21 = vld [vmem:[#allocation12 + $0x172c] sm:$0xf]  ;;  %v13951_v18 = vld [vmem:[#allocation12 + $0x1738] sm:$0xf0] }
 0x559   :  { %v17074_v59 = vadd.f32 %v7949_v26, %v17056_v54  ;;  %v7962_v22 = vpop.f32.mrf.mxu3  ;;  %v13798_v54 = vor.u32 %v14834_v19, %v13797_v0  ;;  %v13886_v26 = vor.u32 %v14852_v16, %v13883_v55  ;;  %v14875_v0 = vld [vmem:[#allocation12 + $0x1764] sm:$0xf]  ;;  %v13927_v55 = vld [vmem:[#allocation12 + $0x1710] sm:$0xf0] }
 0x55a   :  { %v17077_v62 = vadd.f32 %v7962_v22, %v17059_v50  ;;  %v7938_v53 = vpop.f32.mrf.mxu1  ;;  %v13794_v50 = vor.u32 %v14831_v41, %v13791_v29  ;;  %v13859_v22 = vld [vmem:[#allocation12 + $0x1690] sm:$0xf0]  ;;  %v14876_v29 = vld [vmem:[#allocation12 + $0x176c] sm:$0xf]  ;;  %v14863_v16 = vld [vmem:[#allocation12 + $0x1704] sm:$0xf] }
 0x55b   :  { %9605 = vmatpush.bf16.msrb.mxu2 %v13830_v5  ;;  %v9253_v11 = vpop.f32.mrf.mxu0  ;;  %9592 = vmatpush.bf16.msrb.mxu1 %v13826_v8  ;;  %v14848_v53 = vld [vmem:[#allocation12 + $0x168c] sm:$0xf]  ;;  %v13975_v41 = vld [vmem:[#allocation12 + $0x1770] sm:$0xf0]  ;;  %v13986_v45 = vor.u32 %v14876_v29, %v13983_v3  ;;  %v14033_v29 = vld [vmem:[#allocation12 + $0x17c8] sm:$0xf] }
 0x55c   :  { %9618 = vmatpush.bf16.msrb.mxu3 %v13834_v36  ;;  %v13866_v11 = vor.u32 %v14850_v58, %v13865_v4  ;;  %v13978_v31 = vor.u32 %v14875_v0, %v13975_v41  ;;  %v14894_v4 = vld [vmem:[#allocation12 + $0x17f4] sm:$0xf0]  ;;  %v14891_v58 = vld [vmem:[#allocation12 + $0x17e4] sm:$0xf] }
 0x55d   :  { %v14890_v3 = vld [vmem:[#allocation12 + $0x17d4] sm:$0xf0] }
 0x55f   :  { %9606 = vmatpush.bf16.msrb.mxu2 %v13814_v23  ;;  %9593 = vmatpush.bf16.msrb.mxu1 %v13810_v47  ;;  %v13867_v23 = vld [vmem:[#allocation12 + $0x1698] sm:$0xf0]  ;;  %v13981_v47 = vld [vmem:[#allocation12 + $0x1768] sm:$0xf] }
 0x560   :  { %9619 = vmatpush.bf16.msrb.mxu3 %v13818_v28  ;;  %v7951_v39 = vpop.f32.mrf.mxu2  ;;  %v14878_v28 = vld [vmem:[#allocation12 + $0x1774] sm:$0xf0] }
 0x561   :  { %v7964_v7 = vpop.f32.mrf.mxu3  ;;  %v13965_v39 = vld [vmem:[#allocation12 + $0x1748] sm:$0xf] }
 0x562   :  { %v8102_v33 = vpop.f32.mrf.mxu1  ;;  %v14872_v7 = vld [vmem:[#allocation12 + $0x174c] sm:$0xf] }
 0x563   :  { %9607 = vmatpush.bf16.msrb.mxu2 %v13798_v54  ;;  %v17080_v60 = vadd.f32 %v8102_v33, %v17062_v34  ;;  %v9417_v46 = vpop.f32.mrf.mxu0  ;;  %9594 = vmatpush.bf16.msrb.mxu1 %v13794_v50  ;;  %v13898_v34 = vor.u32 %v14858_v6, %v13897_v25  ;;  %v13982_v50 = vor.u32 %v14878_v28, %v13981_v47  ;;  %v13967_v33 = vld [vmem:[#allocation12 + $0x1758] sm:$0xf0]  ;;  %v14867_v25 = vld [vmem:[#allocation12 + $0x1724] sm:$0xf] }
 0x564   :  { %9620 = vmatpush.bf16.msrb.mxu3 %v13802_v42  ;;  %v17083_v14 = vadd.f32 %v9417_v46, %v17065_v61  ;;  %v13970_v46 = vor.u32 %v14872_v7, %v13967_v33  ;;  %v13946_v37 = vor.u32 %v14867_v25, %v13943_v1  ;;  %v14886_v7 = vld [vmem:[#allocation12 + $0x17b4] sm:$0xf0]  ;;  %v14883_v33 = vld [vmem:[#allocation12 + $0x17a4] sm:$0xf] }
 0x565   :  { %13784 = vmatmul.msk.bf16.vlgmr.msra.gmra.mxu1 %vm2150_vm4, %v16906_v52  ;;  %13785 = vmatmul.msk.bf16.vlgmr.msra.gmra.mxu2 %vm2150_vm4, %v16906_v52  ;;  %v10321_v25 = vld [vmem:[%s17390_s7 + $0x48] sm:$0xff] }
 0x566   :  { %13786 = vmatmul.msk.bf16.vlgmr.msra.gmra.mxu3 %vm2150_vm4, %v16906_v52  ;;  %v13882_v52 = vor.u32 %v14854_v24, %v13881_v49  ;;  %v13933_v49 = vld [vmem:[#allocation12 + $0x1708] sm:$0xf] }
 0x567   :  { %9770 = vmatpush.bf16.msra.mxu2 %v13914_v2  ;;  %9757 = vmatpush.bf16.msra.mxu1 %v13910_v20  ;;  %v13966_v2 = vor.u32 %v14874_v44, %v13965_v39  ;;  %v13949_v20 = vld [vmem:[#allocation12 + $0x1728] sm:$0xf]  ;;  %v14034_v39 = vor.u32 %v14890_v3, %v14033_v29  ;;  %v14906_v29 = vld [vmem:[#allocation12 + $0x1854] sm:$0xf0]  ;;  %v14904_v3 = vld [vmem:[#allocation12 + $0x184c] sm:$0xf] }
 0x568   :  { %9783 = vmatpush.bf16.msra.mxu3 %v13918_v48  ;;  %v8115_v61 = vpop.f32.mrf.mxu2  ;;  %v14870_v48 = vld [vmem:[#allocation12 + $0x1734] sm:$0xf0]  ;;  %v14017_v44 = vld [vmem:[#allocation12 + $0x17a8] sm:$0xf] }
 0x569   :  { %v8134_v5 = vadd.f32 %v8115_v61, %v17074_v59  ;;  %v8128_v8 = vpop.f32.mrf.mxu3  ;;  %v13862_v59 = vor.u32 %v14847_v43, %v13859_v22  ;;  %v13954_v61 = vor.u32 %v14868_v21, %v13951_v18  ;;  %v10325_v43 = vld [vmem:[%s17390_s7 + $0x68] sm:$0xff]  ;;  %v14018_v1 = vor.u32 %v14886_v7, %v14017_v44  ;;  %v14001_v21 = vld [vmem:[#allocation12 + $0x1788] sm:$0xf] }
 0x56a   :  { %v8135_v36 = vadd.f32 %v8128_v8, %v17077_v62  ;;  %v8104_v57 = vpop.f32.mrf.mxu1  ;;  %v13870_v62 = vor.u32 %v14848_v53, %v13867_v23  ;;  %v14864_v8 = vld [vmem:[#allocation12 + $0x170c] sm:$0xf]  ;;  %v14043_v53 = vld [vmem:[#allocation12 + $0x17f0] sm:$0xf0]  ;;  %v14085_v44 = vld [vmem:[#allocation12 + $0x1828] sm:$0xf] }
 0x56b   :  { %9771 = vmatpush.bf16.msra.mxu2 %v13898_v34  ;;  %v9419_v17 = vpop.f32.mrf.mxu0  ;;  %9758 = vmatpush.bf16.msra.mxu1 %v13894_v27  ;;  %v13935_v57 = vld [vmem:[#allocation12 + $0x1718] sm:$0xf0]  ;;  %v14892_v23 = vld [vmem:[#allocation12 + $0x17ec] sm:$0xf] }
 0x56c   :  { %9784 = vmatpush.bf16.msra.mxu3 %v13902_v38  ;;  %v14049_v17 = vld [vmem:[#allocation12 + $0x17e8] sm:$0xf] }
 0x56d   :  { %v14050_v28 = vor.u32 %v14894_v4, %v14049_v17  ;;  %v10318_v17 = vld [vmem:[%s17390_s7 + $0x30] sm:$0xff] }
 0x56e   :  { %v14908_v4 = vld [vmem:[#allocation12 + $0x186c] sm:$0xf] }
 0x56f   :  { %9772 = vmatpush.bf16.msra.mxu2 %v13882_v52  ;;  %9759 = vmatpush.bf16.msra.mxu1 %v13878_v40  ;;  %v13934_v52 = vor.u32 %v14866_v9, %v13933_v49  ;;  %v13930_v40 = vor.u32 %v14863_v16, %v13927_v55  ;;  %v14879_v49 = vld [vmem:[#allocation12 + $0x1784] sm:$0xf]  ;;  %v14003_v9 = vld [vmem:[#allocation12 + $0x1798] sm:$0xf0]  ;;  %v10319_v16 = vld [vmem:[%s17390_s7 + $0x38] sm:$0xff] }
 0x570   :  { %9785 = vmatpush.bf16.msra.mxu3 %v13886_v26  ;;  %v8117_v19 = vpop.f32.mrf.mxu2  ;;  %v13938_v26 = vor.u32 %v14864_v8, %v13935_v57  ;;  %v14117_v8 = vld [vmem:[#allocation12 + $0x1868] sm:$0xf] }
 0x571   :  { %v8130_v10 = vpop.f32.mrf.mxu3  ;;  %v14046_v19 = vor.u32 %v14891_v58, %v14043_v53  ;;  %v14119_v58 = vld [vmem:[#allocation12 + $0x1878] sm:$0xf0]  ;;  %v10317_v53 = vld [vmem:[%s17390_s7 + $0x28] sm:$0xff] }
 0x572   :  { %v8268_v54 = vpop.f32.mrf.mxu1  ;;  %v14887_v10 = vld [vmem:[#allocation12 + $0x17c4] sm:$0xf] }
 0x573   :  { %9773 = vmatpush.bf16.msra.mxu2 %v13866_v11  ;;  %v17094_v42 = vadd.f32 %v8268_v54, %v17080_v60  ;;  %v17096_v35 = vpop.f32.mrf.mxu0  ;;  %9760 = vmatpush.bf16.msra.mxu1 %v13862_v59  ;;  %v13962_v60 = vor.u32 %v14871_v30, %v13959_v63  ;;  %v14051_v11 = vld [vmem:[#allocation12 + $0x17f8] sm:$0xf0]  ;;  %v14027_v54 = vld [vmem:[#allocation12 + $0x17d0] sm:$0xf0] }
 0x574   :  { %9786 = vmatpush.bf16.msra.mxu3 %v13870_v62  ;;  %v10324_v62 = vld [vmem:[%s17390_s7 + $0x60] sm:$0xff]  ;;  %v14054_v41 = vor.u32 %v14892_v23, %v14051_v11  ;;  %v14030_v30 = vor.u32 %v14887_v10, %v14027_v54 }
 0x575   :  { %13852 = vmatmul.msk.bf16.vlgmr.msrb.gmra.mxu1 %vm2150_vm4, %v16929_v12  ;;  %13853 = vmatmul.msk.bf16.vlgmr.msrb.gmra.mxu2 %vm2150_vm4, %v16929_v12  ;;  %v14103_v10 = vld [vmem:[#allocation12 + $0x1858] sm:$0xf0] }
 0x576   :  { %13854 = vmatmul.msk.bf16.vlgmr.msrb.gmra.mxu3 %vm2150_vm4, %v16929_v12  ;;  %v13950_v12 = vor.u32 %v14870_v48, %v13949_v20  ;;  %v14884_v20 = vld [vmem:[#allocation12 + $0x17ac] sm:$0xf]  ;;  %v14019_v48 = vld [vmem:[#allocation12 + $0x17b8] sm:$0xf0] }
 0x577   :  { %9936 = vmatpush.bf16.msrb.mxu2 %v13982_v50  ;;  %9923 = vmatpush.bf16.msrb.mxu1 %v13978_v31  ;;  %v14888_v50 = vld [vmem:[#allocation12 + $0x17cc] sm:$0xf]  ;;  %v14035_v31 = vld [vmem:[#allocation12 + $0x17d8] sm:$0xf0] }
 0x578   :  { %9949 = vmatpush.bf16.msrb.mxu3 %v13986_v45  ;;  %v8281_v6 = vpop.f32.mrf.mxu2  ;;  %v10323_v45 = vld [vmem:[%s17390_s7 + $0x58] sm:$0xff]  ;;  %v14038_v63 = vor.u32 %v14888_v50, %v14035_v31  ;;  %v10316_v54 = vld [vmem:[%s17390_s7 + $0x20] sm:$0xff] }
 0x579   :  { %v17104_v51 = vadd.f32 %v8281_v6, %v8134_v5  ;;  %v8294_v34 = vpop.f32.mrf.mxu3  ;;  %v10327_v5 = vld [vmem:[%s17390_s7 + $0x78] sm:$0xff] }
 0x57a   :  { %v17106_v27 = vadd.f32 %v8294_v34, %v8135_v36  ;;  %v8270_v38 = vpop.f32.mrf.mxu1  ;;  %10380 = vmatpush.msrb.mxu0 %v10327_v5  ;;  %v10326_v36 = vld [vmem:[%s17390_s7 + $0x70] sm:$0xff] }
 0x57b   :  { %9937 = vmatpush.bf16.msrb.mxu2 %v13966_v2  ;;  %v9585_v24 = vpop.f32.mrf.mxu0  ;;  %9924 = vmatpush.bf16.msrb.mxu1 %v13962_v60  ;;  %v10322_v2 = vld [vmem:[%s17390_s7 + $0x50] sm:$0xff]  ;;  %v14022_v38 = vor.u32 %v14884_v20, %v14019_v48  ;;  %v14087_v20 = vld [vmem:[#allocation12 + $0x1838] sm:$0xf0] }
 0x57c   :  { %9950 = vmatpush.bf16.msrb.mxu3 %v13970_v46  ;;  %10381 = vmatpush.msrb.mxu0 %v10326_v36  ;;  %v14011_v46 = vld [vmem:[#allocation12 + $0x17b0] sm:$0xf0]  ;;  %v10320_v24 = vld [vmem:[%s17390_s7 + $0x40] sm:$0xff] }
 0x57d   :  { %v14014_v34 = vor.u32 %v14883_v33, %v14011_v46  ;;  %v14910_v36 = vld [vmem:[#allocation12 + $0x1874] sm:$0xf0]  ;;  %v14900_v46 = vld [vmem:[#allocation12 + $0x182c] sm:$0xf] }
 0x57e   :  { %10382 = vmatpush.msrb.mxu0 %v10325_v43  ;;  %v14118_v11 = vor.u32 %v14910_v36, %v14117_v8 }
 0x57f   :  { %9938 = vmatpush.bf16.msrb.mxu2 %v13950_v12  ;;  %9925 = vmatpush.bf16.msrb.mxu1 %v13946_v37  ;;  %v14882_v12 = vld [vmem:[#allocation12 + $0x1794] sm:$0xf0]  ;;  %v13995_v37 = vld [vmem:[#allocation12 + $0x1790] sm:$0xf0] }
 0x580   :  { %9951 = vmatpush.bf16.msrb.mxu3 %v13954_v61  ;;  %v8283_v22 = vpop.f32.mrf.mxu2  ;;  %10383 = vmatpush.msrb.mxu0 %v10324_v62  ;;  %v14880_v61 = vld [vmem:[#allocation12 + $0x178c] sm:$0xf]  ;;  %v14002_v55 = vor.u32 %v14882_v12, %v14001_v21  ;;  %v13998_v57 = vor.u32 %v14879_v49, %v13995_v37  ;;  %v10313_v12 = vld [vmem:[%s17390_s7 + $0x8] sm:$0xff]  ;;  %v14063_v49 = vld [vmem:[#allocation12 + $0x1810] sm:$0xf0] }
 0x581   :  { %v8296_v59 = vpop.f32.mrf.mxu3  ;;  %v14006_v5 = vor.u32 %v14880_v61, %v14003_v9  ;;  %v14071_v37 = vld [vmem:[#allocation12 + $0x1818] sm:$0xf0] }
 0x582   :  { %v17120_v47 = vpop.f32.mrf.mxu1  ;;  %10384 = vmatpush.msrb.mxu0 %v10323_v45  ;;  %v10312_v61 = vld [vmem:[%s17390_s7] sm:$0xff] }
 0x583   :  { %9939 = vmatpush.bf16.msrb.mxu2 %v13934_v52  ;;  %v17122_v0 = vpop.f32.mrf.mxu0  ;;  %9926 = vmatpush.bf16.msrb.mxu1 %v13930_v40  ;;  %v14907_v52 = vld [vmem:[#allocation12 + $0x1864] sm:$0xf]  ;;  %v8465_v43 = vadd.f32 %v17120_v47, %v17094_v42  ;;  %v14095_v47 = vld [vmem:[#allocation12 + $0x1850] sm:$0xf0] }
 0x584   :  { %9952 = vmatpush.bf16.msrb.mxu3 %v13938_v26  ;;  %10385 = vmatpush.msrb.mxu0 %v10322_v2  ;;  %v14111_v26 = vld [vmem:[#allocation12 + $0x1870] sm:$0xf0]  ;;  %v14903_v42 = vld [vmem:[#allocation12 + $0x1844] sm:$0xf] }
 0x585   :  { %13920 = vmatmul.msk.bf16.vlgmr.msra.gmra.mxu1 %vm2150_vm4, %v16957_v15  ;;  %13921 = vmatmul.msk.bf16.vlgmr.msra.gmra.mxu2 %vm2150_vm4, %v16957_v15  ;;  %v14098_v45 = vor.u32 %v14903_v42, %v14095_v47  ;;  %v14079_v2 = vld [vmem:[#allocation12 + $0x1830] sm:$0xf0] }
 0x586   :  { %13922 = vmatmul.msk.bf16.vlgmr.msra.gmra.mxu3 %vm2150_vm4, %v16957_v15  ;;  %10386 = vmatpush.msrb.mxu0 %v10321_v25 }
 0x587   :  { %10102 = vmatpush.bf16.msra.mxu2 %v14050_v28  ;;  %10089 = vmatpush.bf16.msra.mxu1 %v14046_v19  ;;  %v14114_v28 = vor.u32 %v14907_v52, %v14111_v26  ;;  %v14122_v19 = vor.u32 %v14908_v4, %v14119_v58 }
 0x588   :  { %10115 = vmatpush.bf16.msra.mxu3 %v14054_v41  ;;  %v17136_v60 = vpop.f32.mrf.mxu2  ;;  %10387 = vmatpush.msrb.mxu0 %v10320_v24  ;;  %v14101_v41 = vld [vmem:[#allocation12 + $0x1848] sm:$0xf]  ;;  %v14896_v24 = vld [vmem:[#allocation12 + $0x180c] sm:$0xf] }
 0x589   :  { %v17138_v15 = vpop.f32.mrf.mxu3  ;;  %v14102_v50 = vor.u32 %v14906_v29, %v14101_v41  ;;  %v8466_v31 = vadd.f32 %v17136_v60, %v17104_v51  ;;  %v10315_v51 = vld [vmem:[%s17390_s7 + $0x18] sm:$0xff]  ;;  %v10314_v60 = vld [vmem:[%s17390_s7 + $0x10] sm:$0xff] }
 0x58a   :  { %v8436_v6 = vpop.f32.mrf.mxu1  ;;  %10388 = vmatpush.msrb.mxu0 %v10319_v16  ;;  %v8467_v7 = vadd.f32 %v17138_v15, %v17106_v27  ;;  %v14069_v27 = vld [vmem:[#allocation12 + $0x1808] sm:$0xf] }
 0x58b   :  { %10103 = vmatpush.bf16.msra.mxu2 %v14034_v39  ;;  %v9751_v18 = vpop.f32.mrf.mxu0  ;;  %10090 = vmatpush.bf16.msra.mxu1 %v14030_v30  ;;  %v14106_v39 = vor.u32 %v14904_v3, %v14103_v10  ;;  %v14902_v30 = vld [vmem:[#allocation12 + $0x1834] sm:$0xf0] }
 0x58c   :  { %10116 = vmatpush.bf16.msra.mxu3 %v14038_v63  ;;  %10389 = vmatpush.msrb.mxu0 %v10318_v17  ;;  %v14899_v63 = vld [vmem:[#allocation12 + $0x1824] sm:$0xf]  ;;  %v14090_v18 = vor.u32 %v14900_v46, %v14087_v20 }
 0x58d   :  { %v14082_v21 = vor.u32 %v14899_v63, %v14079_v2 }
 0x58e   :  { %10390 = vmatpush.msrb.mxu0 %v10317_v53 }
 0x58f   :  { %10104 = vmatpush.bf16.msra.mxu2 %v14018_v1  ;;  %10091 = vmatpush.bf16.msra.mxu1 %v14014_v34  ;;  %v14086_v1 = vor.u32 %v14902_v30, %v14085_v44  ;;  %v14898_v34 = vld [vmem:[#allocation12 + $0x1814] sm:$0xf0] }
 0x590   :  { %10117 = vmatpush.bf16.msra.mxu3 %v14022_v38  ;;  %v8449_v40 = vpop.f32.mrf.mxu2  ;;  %10391 = vmatpush.msrb.mxu0 %v10316_v54  ;;  %v14895_v38 = vld [vmem:[#allocation12 + $0x1804] sm:$0xf]  ;;  %v14070_v9 = vor.u32 %v14898_v34, %v14069_v27 }
 0x591   :  { %v8462_v22 = vpop.f32.mrf.mxu3  ;;  %v14066_v16 = vor.u32 %v14895_v38, %v14063_v49 }
 0x592   :  { %v8600_v23 = vpop.f32.mrf.mxu1  ;;  %10392 = vmatpush.msrb.mxu0 %v10315_v51  ;;  %v9626_v22 = vadd.f32 %v17096_v35, %v17083_v14 }
 0x593   :  { %10105 = vmatpush.bf16.msra.mxu2 %v14002_v55  ;;  %v17157_v59 = vadd.f32 %v8600_v23, %v8465_v43  ;;  %v17159_v62 = vpop.f32.mrf.mxu0  ;;  %10092 = vmatpush.bf16.msra.mxu1 %v13998_v57  ;;  %v14074_v55 = vor.u32 %v14896_v24, %v14071_v37  ;;  %v17196_v23 = vld [vmem:[#allocation13] sm:$0xf] }
 0x594   :  { %10118 = vmatpush.bf16.msra.mxu3 %v14006_v5  ;;  %10393 = vmatpush.msrb.mxu0 %v10314_v60  ;;  %v9792_v53 = vadd.f32 %v17122_v0, %v9626_v22  ;;  %v10374_v22 = vld [vmem:[%s17390_s7 + $0x1f0] sm:$0xff] }
 0x595   :  { %13988 = vmatmul.msk.bf16.vlgmr.msrb.gmra.mxu1 %vm2150_vm4, %v16976_v32  ;;  %13989 = vmatmul.msk.bf16.vlgmr.msrb.gmra.mxu2 %vm2150_vm4, %v16976_v32 }
 0x596   :  { %13990 = vmatmul.msk.bf16.vlgmr.msrb.gmra.mxu3 %vm2150_vm4, %v16976_v32  ;;  %10394 = vmatpush.msrb.mxu0 %v10313_v12 }
 0x597   :  { %10268 = vmatpush.bf16.msrb.mxu2 %v14118_v11  ;;  %10255 = vmatpush.bf16.msrb.mxu1 %v14114_v28  ;;  %v9958_v11 = vadd.f32 %v17159_v62, %v9792_v53  ;;  %v10338_v53 = vld [vmem:[%s17390_s7 + $0xd0] sm:$0xff] }
 0x598   :  { %10281 = vmatpush.bf16.msrb.mxu3 %v14122_v19  ;;  %v8613_v33 = vpop.f32.mrf.mxu2  ;;  %10395 = vmatpush.msrb.mxu0 %v10312_v61 }
 0x599   :  { %v8632_v32 = vadd.f32 %v8613_v33, %v8466_v31  ;;  %v8626_v48 = vpop.f32.mrf.mxu3 }
 0x59a   :  { %v8633_v25 = vadd.f32 %v8626_v48, %v8467_v7  ;;  %v8602_v6 = vpop.f32.mrf.mxu1 }
 0x59b   :  { %10269 = vmatpush.bf16.msrb.mxu2 %v14102_v50  ;;  %v9917_v15 = vpop.f32.mrf.mxu0  ;;  %10256 = vmatpush.bf16.msrb.mxu1 %v14098_v45 }
 0x59c   :  { %10282 = vmatpush.bf16.msrb.mxu3 %v14106_v39 }
 0x59f   :  { %10270 = vmatpush.bf16.msrb.mxu2 %v14086_v1  ;;  %10257 = vmatpush.bf16.msrb.mxu1 %v14082_v21 }
 0x5a0   :  { %10283 = vmatpush.bf16.msrb.mxu3 %v14090_v18  ;;  %v8615_v8 = vpop.f32.mrf.mxu2 }
 0x5a1   :  { %v8628_v57 = vpop.f32.mrf.mxu3  ;;  %v10343_v8 = vld [vmem:[%s17390_s7 + $0xf8] sm:$0xff] }
 0x5a2   :  { %v8766_v5 = vpop.f32.mrf.mxu1  ;;  %v10342_v57 = vld [vmem:[%s17390_s7 + $0xf0] sm:$0xff] }
 0x5a3   :  { %10271 = vmatpush.bf16.msrb.mxu2 %v14070_v9  ;;  %v8797_v36 = vadd.f32 %v8766_v5, %v17157_v59  ;;  %v10081_v52 = vpop.f32.mrf.mxu0  ;;  %10258 = vmatpush.bf16.msrb.mxu1 %v14066_v16  ;;  %v10341_v5 = vld [vmem:[%s17390_s7 + $0xe8] sm:$0xff] }
 0x5a4   :  { %10284 = vmatpush.bf16.msrb.mxu3 %v14074_v55  ;;  %v10124_v19 = vadd.f32 %v10081_v52, %v9958_v11  ;;  %v10357_v11 = vld [vmem:[%s17390_s7 + $0x168] sm:$0xff] }
 0x5a5   :  { %14056 = vmatmul.msk.bf16.vlgmr.msra.gmra.mxu1 %vm2150_vm4, %v17004_v56  ;;  %14057 = vmatmul.msk.bf16.vlgmr.msra.gmra.mxu2 %vm2150_vm4, %v17004_v56 }
 0x5a6   :  { %14058 = vmatmul.msk.bf16.vlgmr.msra.gmra.mxu3 %vm2150_vm4, %v17004_v56  ;;  %v10296_v56 = vperm.slane %v17196_v23, 0 }
 0x5a7   :  { %10400 = vmatpush.msra.mxu1 %v10343_v8  ;;  %v10345_v8 = vld [vmem:[%s17390_s7 + $0x108] sm:$0xff] }
 0x5a8   :  { %v8779_v17 = vpop.f32.mrf.mxu2 }
 0x5a9   :  { %v8798_v40 = vadd.f32 %v8779_v17, %v8632_v32  ;;  %v8792_v26 = vpop.f32.mrf.mxu3  ;;  %10401 = vmatpush.msra.mxu1 %v10342_v57  ;;  %v10340_v17 = vld [vmem:[%s17390_s7 + $0xe0] sm:$0xff] }
 0x5aa   :  { %v8799_v4 = vadd.f32 %v8792_v26, %v8633_v25  ;;  %v8768_v58 = vpop.f32.mrf.mxu1  ;;  %v10375_v26 = vld [vmem:[%s17390_s7 + $0x1f8] sm:$0xff] }
 0x5ab   :  { %v10083_v43 = vpop.f32.mrf.mxu0  ;;  %10402 = vmatpush.msra.mxu1 %v10341_v5  ;;  %10440 = vmatpush.msra.mxu3 %v10375_v26  ;;  %v10339_v58 = vld [vmem:[%s17390_s7 + $0xd8] sm:$0xff]  ;;  %v10361_v5 = vld [vmem:[%s17390_s7 + $0x188] sm:$0xff] }
 0x5ac   :  { %v10358_v43 = vld [vmem:[%s17390_s7 + $0x170] sm:$0xff] }
 0x5ad   :  { %10403 = vmatpush.msra.mxu1 %v10340_v17  ;;  %10441 = vmatpush.msra.mxu3 %v10374_v22  ;;  %v10360_v17 = vld [vmem:[%s17390_s7 + $0x180] sm:$0xff] }
 0x5af   :  { %10404 = vmatpush.msra.mxu1 %v10339_v58 }
 0x5b0   :  { %v8781_v59 = vpop.f32.mrf.mxu2 }
 0x5b1   :  { %v8794_v28 = vpop.f32.mrf.mxu3  ;;  %v10373_v59 = vld [vmem:[%s17390_s7 + $0x1e8] sm:$0xff]  ;;  %10405 = vmatpush.msra.mxu1 %v10338_v53 }
 0x5b2   :  { %v8932_v41 = vpop.f32.mrf.mxu1  ;;  %v10337_v28 = vld [vmem:[%s17390_s7 + $0xc8] sm:$0xff]  ;;  %10442 = vmatpush.msra.mxu3 %v10373_v59 }
 0x5b3   :  { %v8963_v29 = vadd.f32 %v8932_v41, %v8797_v36  ;;  %v10247_v42 = vpop.f32.mrf.mxu0  ;;  %v10372_v41 = vld [vmem:[%s17390_s7 + $0x1e0] sm:$0xff]  ;;  %10406 = vmatpush.msra.mxu1 %v10337_v28 }
 0x5b4   :  { %v10290_v47 = vadd.f32 %v10247_v42, %v10124_v19  ;;  %v10356_v19 = vld [vmem:[%s17390_s7 + $0x160] sm:$0xff]  ;;  %10443 = vmatpush.msra.mxu3 %v10372_v41  ;;  %v10297_v41 = vperm.slane %v17196_v23, 1 }
 0x5b5   :  { %14124 = vmatmul.msk.bf16.vlgmr.msrb.gmra.mxu1 %vm2150_vm4, %v17027_v13  ;;  %14125 = vmatmul.msk.bf16.vlgmr.msrb.gmra.mxu2 %vm2150_vm4, %v17027_v13 }
 0x5b6   :  { %v10304_v14 = vadd.f32 %v10296_v56, %v10290_v47  ;;  %14126 = vmatmul.msk.bf16.vlgmr.msrb.gmra.mxu3 %vm2150_vm4, %v17027_v13  ;;  %v10336_v47 = vld [vmem:[%s17390_s7 + $0xc0] sm:$0xff] }
 0x5b7   :  { %10407 = vmatpush.msra.mxu1 %v10336_v47 }
 0x5b8   :  { %v10308_v35 = vmax.f32 %v10304_v14, 0.0  ;;  %v8945_v0 = vpop.f32.mrf.mxu2  ;;  %v10355_v14 = vld [vmem:[%s17390_s7 + $0x158] sm:$0xff] }
 0x5b9   :  { %v8964_v62 = vadd.f32 %v8945_v0, %v8798_v40  ;;  %v8958_v3 = vpop.f32.mrf.mxu3  ;;  %v10359_v40 = vld [vmem:[%s17390_s7 + $0x178] sm:$0xff] }
 0x5ba   :  { %v8965_v10 = vadd.f32 %v8958_v3, %v8799_v4  ;;  %10396 = vmatmul.f32.vlgmr.msrb.gmra.mxu0 %v10308_v35  ;;  %v8934_v54 = vpop.f32.mrf.mxu1  ;;  %10420 = vmatpush.msra.mxu2 %v10359_v40  ;;  %v10371_v35 = vld [vmem:[%s17390_s7 + $0x1d8] sm:$0xff]  ;;  %v10370_v3 = vld [vmem:[%s17390_s7 + $0x1d0] sm:$0xff] }
 0x5bb   :  { %v10249_v50 = vpop.f32.mrf.mxu0  ;;  %v10335_v0 = vld [vmem:[%s17390_s7 + $0xb8] sm:$0xff]  ;;  %10444 = vmatpush.msra.mxu3 %v10371_v35  ;;  %v10353_v54 = vld [vmem:[%s17390_s7 + $0x148] sm:$0xff] }
 0x5bc   :  { %10421 = vmatpush.msra.mxu2 %v10358_v43  ;;  %10408 = vmatpush.msra.mxu1 %v10335_v0  ;;  %v10369_v50 = vld [vmem:[%s17390_s7 + $0x1c8] sm:$0xff] }
 0x5bd   :  { %10445 = vmatpush.msra.mxu3 %v10370_v3 }
 0x5be   :  { %10422 = vmatpush.msra.mxu2 %v10357_v11 }
 0x5bf   :  { %10446 = vmatpush.msra.mxu3 %v10369_v50 }
 0x5c0   :  { %v8947_v31 = vpop.f32.mrf.mxu2  ;;  %10423 = vmatpush.msra.mxu2 %v10356_v19 }
 0x5c1   :  { %v8960_v45 = vpop.f32.mrf.mxu3  ;;  %v10333_v31 = vld [vmem:[%s17390_s7 + $0xa8] sm:$0xff] }
 0x5c2   :  { %v9098_v39 = vpop.f32.mrf.mxu1  ;;  %10424 = vmatpush.msra.mxu2 %v10355_v14  ;;  %v10352_v45 = vld [vmem:[%s17390_s7 + $0x140] sm:$0xff] }
 0x5c3   :  { %v9129_v44 = vadd.f32 %v9098_v39, %v8963_v29  ;;  %v10368_v39 = vld [vmem:[%s17390_s7 + $0x1c0] sm:$0xff] }
 0x5c4   :  { %10447 = vmatpush.msra.mxu3 %v10368_v39 }
 0x5c8   :  { %v9111_v30 = vpop.f32.mrf.mxu2 }
 0x5c9   :  { %v9130_v63 = vadd.f32 %v9111_v30, %v8964_v62  ;;  %v9124_v7 = vpop.f32.mrf.mxu3  ;;  %v10354_v62 = vld [vmem:[%s17390_s7 + $0x150] sm:$0xff] }
 0x5ca   :  { %v9131_v33 = vadd.f32 %v9124_v7, %v8965_v10  ;;  %v9100_v2 = vpop.f32.mrf.mxu1  ;;  %v10334_v10 = vld [vmem:[%s17390_s7 + $0xb0] sm:$0xff]  ;;  %10425 = vmatpush.msra.mxu2 %v10354_v62  ;;  %v10351_v7 = vld [vmem:[%s17390_s7 + $0x138] sm:$0xff] }
 0x5cb   :  { %10409 = vmatpush.msra.mxu1 %v10334_v10 }
 0x5cc   :  { %10426 = vmatpush.msra.mxu2 %v10353_v54  ;;  %v10299_v54 = vperm.slane %v17196_v23, 3 }
 0x5cd   :  { %10410 = vmatpush.msra.mxu1 %v10333_v31 }
 0x5ce   :  { %10427 = vmatpush.msra.mxu2 %v10352_v45 }
 0x5d0   :  { %v9113_v46 = vpop.f32.mrf.mxu2  ;;  %10428 = vmatpush.msra.mxu2 %v10351_v7 }
 0x5d1   :  { %v9126_v20 = vpop.f32.mrf.mxu3  ;;  %v10331_v46 = vld [vmem:[%s17390_s7 + $0x98] sm:$0xff] }
 0x5d2   :  { %v9264_v13 = vpop.f32.mrf.mxu1  ;;  %v10350_v20 = vld [vmem:[%s17390_s7 + $0x130] sm:$0xff] }
 0x5d3   :  { %v9295_v32 = vadd.f32 %v9264_v13, %v9129_v44  ;;  %v10366_v13 = vld [vmem:[%s17390_s7 + $0x1b0] sm:$0xff]  ;;  %10429 = vmatpush.msra.mxu2 %v10350_v20 }
 0x5d8   :  { %v9277_v48 = vpop.f32.mrf.mxu2 }
 0x5d9   :  { %v9296_v51 = vadd.f32 %v9277_v48, %v9130_v63  ;;  %v9290_v60 = vpop.f32.mrf.mxu3  ;;  %v10332_v63 = vld [vmem:[%s17390_s7 + $0xa0] sm:$0xff]  ;;  %v10330_v48 = vld [vmem:[%s17390_s7 + $0x90] sm:$0xff] }
 0x5da   :  { %v9297_v25 = vadd.f32 %v9290_v60, %v9131_v33  ;;  %v9266_v6 = vpop.f32.mrf.mxu1  ;;  %v10367_v33 = vld [vmem:[%s17390_s7 + $0x1b8] sm:$0xff]  ;;  %10411 = vmatpush.msra.mxu1 %v10332_v63  ;;  %v10365_v60 = vld [vmem:[%s17390_s7 + $0x1a8] sm:$0xff] }
 0x5db   :  { %10448 = vmatpush.msra.mxu3 %v10367_v33  ;;  %v10329_v6 = vld [vmem:[%s17390_s7 + $0x88] sm:$0xff] }
 0x5dc   :  { %10412 = vmatpush.msra.mxu1 %v10331_v46  ;;  %v14928_v63 = vld [vmem:[#allocation15] ss:$0 sm:$0xff] }
 0x5dd   :  { %10449 = vmatpush.msra.mxu3 %v10366_v13 }
 0x5de   :  { %10413 = vmatpush.msra.mxu1 %v10330_v48 }
 0x5df   :  { %10450 = vmatpush.msra.mxu3 %v10365_v60 }
 0x5e0   :  { %v9279_v1 = vpop.f32.mrf.mxu2  ;;  %10414 = vmatpush.msra.mxu1 %v10329_v6 }
 0x5e1   :  { %v9292_v27 = vpop.f32.mrf.mxu3  ;;  %v10348_v1 = vld [vmem:[%s17390_s7 + $0x120] sm:$0xff] }
 0x5e2   :  { %v9430_v15 = vpop.f32.mrf.mxu1 }
 0x5e3   :  { %v17206_v21 = vadd.f32 %v9430_v15, %v9295_v32  ;;  %v10364_v15 = vld [vmem:[%s17390_s7 + $0x1a0] sm:$0xff] }
 0x5e4   :  { %10451 = vmatpush.msra.mxu3 %v10364_v15 }
 0x5e8   :  { %v9443_v18 = vpop.f32.mrf.mxu2 }
 0x5e9   :  { %v17208_v34 = vadd.f32 %v9443_v18, %v9296_v51  ;;  %v9456_v38 = vpop.f32.mrf.mxu3  ;;  %v10349_v51 = vld [vmem:[%s17390_s7 + $0x128] sm:$0xff]  ;;  %v10328_v18 = vld [vmem:[%s17390_s7 + $0x80] sm:$0xff] }
 0x5ea   :  { %v17210_v12 = vadd.f32 %v9456_v38, %v9297_v25  ;;  %v9432_v49 = vpop.f32.mrf.mxu1  ;;  %10430 = vmatpush.msra.mxu2 %v10349_v51  ;;  %v10347_v38 = vld [vmem:[%s17390_s7 + $0x118] sm:$0xff]  ;;  %10415 = vmatpush.msra.mxu1 %v10328_v18 }
 0x5eb   :  { %v10363_v49 = vld [vmem:[%s17390_s7 + $0x198] sm:$0xff] }
 0x5ec   :  { %10431 = vmatpush.msra.mxu2 %v10348_v1  ;;  %10452 = vmatpush.msra.mxu3 %v10363_v49 }
 0x5ee   :  { %10432 = vmatpush.msra.mxu2 %v10347_v38 }
 0x5f0   :  { %v9445_v24 = vpop.f32.mrf.mxu2 }
 0x5f1   :  { %v9458_v37 = vpop.f32.mrf.mxu3  ;;  %v10346_v24 = vld [vmem:[%s17390_s7 + $0x110] sm:$0xff] }
 0x5f2   :  { %v17212_v61 = vpop.f32.mrf.mxu1  ;;  %v10362_v37 = vld [vmem:[%s17390_s7 + $0x190] sm:$0xff]  ;;  %10433 = vmatpush.msra.mxu2 %v10346_v24 }
 0x5f3   :  { %10453 = vmatpush.msra.mxu3 %v10362_v37  ;;  %v9627_v43 = vadd.f32 %v17212_v61, %v17206_v21 }
 0x5f4   :  { %10434 = vmatpush.msra.mxu2 %v10345_v8 }
 0x5f5   :  { %10454 = vmatpush.msra.mxu3 %v10361_v5 }
 0x5f7   :  { %10455 = vmatpush.msra.mxu3 %v10360_v17 }
 0x5f8   :  { %v17214_v9 = vpop.f32.mrf.mxu2 }
 0x5f9   :  { %v17216_v16 = vpop.f32.mrf.mxu3  ;;  %v9628_v59 = vadd.f32 %v17214_v9, %v17208_v34  ;;  %v10298_v34 = vperm.slane %v17196_v23, 2 }
 0x5fa   :  { %v9598_v55 = vpop.f32.mrf.mxu1 }
 0x600   :  { %v9611_v36 = vpop.f32.mrf.mxu2 }
 0x601   :  { %v9624_v52 = vpop.f32.mrf.mxu3 }
 0x602   :  { %v17236_v4 = vpop.f32.mrf.mxu1  ;;  %v10344_v52 = vld [vmem:[%s17390_s7 + $0x100] sm:$0xff]  ;;  %s15145_s7 = smov [#allocation16]  }
 0x603   :  { %10435 = vmatpush.msra.mxu2 %v10344_v52  ;;  %v9793_v22 = vadd.f32 %v17236_v4, %v9627_v43  ;;  %s10467_s16 = sshll.u32 %s15145_s7, 4  ;;  %s10468_s16 = int_to_ptr.vmem [resolvable:$true] %s10467_s16 }
 0x608   :  { %v17265_v56 = vpop.f32.mrf.mxu2 }
 0x609   :  { %v17267_v29 = vpop.f32.mrf.mxu3  ;;  %v9794_v14 = vadd.f32 %v17265_v56, %v9628_v59 }
 0x60a   :  { %v9764_v42 = vpop.f32.mrf.mxu1 }
 0x60b   :  { %v9629_v42 = vadd.f32 %v17216_v16, %v17210_v12 }
 0x60d   :  { %v9795_v21 = vadd.f32 %v17267_v29, %v9629_v42 }
 0x610   :  { %v9777_v44 = vpop.f32.mrf.mxu2 }
 0x611   :  { %v9790_v30 = vpop.f32.mrf.mxu3 }
 0x612   :  { %v9928_v2 = vpop.f32.mrf.mxu1 }
 0x613   :  { %v9959_v53 = vadd.f32 %v9928_v2, %v9793_v22 }
 0x618   :  { %v9941_v32 = vpop.f32.mrf.mxu2 }
 0x619   :  { %v9954_v25 = vpop.f32.mrf.mxu3  ;;  %v9960_v61 = vadd.f32 %v9941_v32, %v9794_v14 }
 0x61a   :  { %v9930_v27 = vpop.f32.mrf.mxu1  ;;  %v9961_v0 = vadd.f32 %v9954_v25, %v9795_v21 }
 0x620   :  { %v9943_v55 = vpop.f32.mrf.mxu2 }
 0x621   :  { %v9956_v57 = vpop.f32.mrf.mxu3 }
 0x622   :  { %v10094_v36 = vpop.f32.mrf.mxu1 }
 0x623   :  { %v10125_v28 = vadd.f32 %v10094_v36, %v9959_v53 }
 0x628   :  { %v10107_v40 = vpop.f32.mrf.mxu2 }
 0x629   :  { %v10120_v26 = vpop.f32.mrf.mxu3  ;;  %v10126_v62 = vadd.f32 %v10107_v40, %v9960_v61 }
 0x62a   :  { %v10096_v58 = vpop.f32.mrf.mxu1  ;;  %v10127_v9 = vadd.f32 %v10120_v26, %v9961_v0 }
 0x630   :  { %v10109_v11 = vpop.f32.mrf.mxu2 }
 0x631   :  { %v10122_v19 = vpop.f32.mrf.mxu3 }
 0x632   :  { %v10260_v47 = vpop.f32.mrf.mxu1 }
 0x633   :  { %v10291_v35 = vadd.f32 %v10260_v47, %v10125_v28 }
 0x635   :  { %v10305_v4 = vadd.f32 %v10297_v41, %v10291_v35 }
 0x637   :  { %v10309_v3 = vmax.f32 %v10305_v4, 0.0  ;;  %v10397_v7 = vpop.f32.mrf.mxu0 }
 0x638   :  { %v10273_v10 = vpop.f32.mrf.mxu2  ;;  %v10398_v2 = vadd.f32 %v14928_v63, %v10397_v7 }
 0x639   :  { %v10292_v50 = vadd.f32 %v10273_v10, %v10126_v62  ;;  %v10286_v31 = vpop.f32.mrf.mxu3  ;;  %10416 = vmatmul.f32.vlgmr.msra.gmra.mxu1 %v10309_v3 }
 0x63a   :  { %v10293_v12 = vadd.f32 %v10286_v31, %v10127_v9  ;;  %v10262_v16 = vpop.f32.mrf.mxu1 }
 0x63b   :  { %v10306_v56 = vadd.f32 %v10298_v34, %v10292_v50 }
 0x63c   :  { %v10307_v45 = vadd.f32 %v10299_v54, %v10293_v12 }
 0x63d   :  { %v10310_v39 = vmax.f32 %v10306_v56, 0.0 }
 0x63e   :  { %v10311_v29 = vmax.f32 %v10307_v45, 0.0 }
 0x63f   :  { %10436 = vmatmul.f32.vlgmr.msra.gmra.mxu2 %v10310_v39 }
 0x640   :  { %10456 = vmatmul.f32.vlgmr.msra.gmra.mxu3 %v10311_v29  ;;  %v10275_v44 = vpop.f32.mrf.mxu2 }
 0x641   :  { %v10288_v30 = vpop.f32.mrf.mxu3 }
 0x6b6   :  { %v10417_v33 = vpop.f32.mrf.mxu1 }
 0x6b7   :  { %v10418_v46 = vadd.f32 %v10417_v33, %v10398_v2 }
 0x6c2   :  { %v10437_v20 = vpop.f32.mrf.mxu2 }
 0x6c3   :  { %v10438_v23 = vadd.f32 %v10437_v20, %v10418_v46  ;;  %v10457_v13 = vpop.f32.mrf.mxu3 }
 0x6c5   :  { %v10458_v32 = vadd.f32 %v10457_v13, %v10438_v23 }
 0x6c7   :  { %10461 = vst.msk [vmem:[#allocation16] sm:$0x3] %vm10460_vm6, %v10458_v32 }
 0x6c8   :  { %10472 = dma.vmem_to_hbm [thread:$0]  %s10468_s16, 32, %s10470_s19, [#allocation6]  }
 0x6c9   :  { %15129 = dma.done.wait [#allocation6], 32  }
 0x6ca   :  { %15130 = vsyncadd [#allocation6], 4294967264 }
 0x6cb   :  { %10477 = vsyncpa [#allocation5], 1 }
 0x6cc   :  { %10478 = vsyncpa [#allocation8], 1 }
 0x6cd   :  { %10479 = vsyncpa [#allocation11], 1 }
 0x6ce   :  { %10480 = vsyncpa [#allocation14], 1 }
 0x6cf   :  { %10481 = vsyncpa [#allocation6], 1 }

</bundles_post_ra>
